<compile_context>
chip_gen: v7x
topology: tpu7x:2x2x1
jax: 0.10.0
libtpu: 0.0.40
codegen_flags: <defaults>
</compile_context>

<pallas_src>
import functools

import numpy as np
import jax
import jax.numpy as jnp
from jax import lax
from jax.experimental import pallas as pl
from jax.experimental.pallas import tpu as pltpu

BEV_FEAT_DIM = 256   # Config.bev_feat_dim
_LEFT = 8            # first data column inside the zero-haloed conv-input buffers
_MARGIN = 8          # 8-aligned halo strip width (covers the single halo column)


# ------------------------------ kernel helpers ------------------------------ #

def _im2col_3x3(col_ref, read_tap, ho, wo, cin):
    """Build the 9-tap im2col (ho*wo, 9*cin) bf16 LHS once in VMEM.

    read_tap(ky, kx) must return the zero-haloed (ho, wo, cin) f32 window for
    kernel tap (ky, kx).  One bf16 cast per column block (== one full cast of
    the im2col per layer, no repeated full-activation casts)."""
    for t in range(9):
        ky, kx = divmod(t, 3)
        tap = read_tap(ky, kx)                                   # (ho, wo, cin) f32
        col_ref[:, t * cin:(t + 1) * cin] = (
            tap.reshape(ho * wo, cin).astype(jnp.bfloat16))


def _bn_relu_pool(y, scale, bias, wbuf, ho, wo):
    """Fused conv epilogue: folded BN + ReLU + 2x2/stride-2 max pool.

    y:     (2*ho * 2*wo, c) f32 conv output, rows in (h, w) row-major order.
    wbuf:  (ho, 2*wo, c) f32 staging scratch for the column-pair step.
    Returns the pooled (ho, wo, c) f32 value."""
    c = y.shape[-1]
    y = jnp.maximum(y * scale + bias, 0.0)
    # Row pairs: leading-dim reshape + max (layout-preserving, stays in vregs).
    wbuf[...] = jnp.max(y.reshape(ho, 2, 2 * wo, c), axis=1)     # (ho, 2*wo, c)
    # Column pairs: stride-2 sublane reads of the half-size staging buffer.
    return jnp.maximum(wbuf[:, pl.ds(0, wo, 2), :],
                       wbuf[:, pl.ds(1, wo, 2), :])              # (ho, wo, c)


def _zero_halo(pad_ref, h, w):
    """Zero only the halo strips the 3x3 taps actually read (every grid step)."""
    wp, c = pad_ref.shape[1], pad_ref.shape[2]
    z_row = jnp.zeros((1, wp, c), jnp.float32)
    pad_ref[0:1, :, :] = z_row                                   # top halo row
    pad_ref[h + 1:h + 2, :, :] = z_row                           # bottom halo row
    z_col = jnp.zeros((h, _MARGIN, c), jnp.float32)
    pad_ref[1:h + 1, 0:_MARGIN, :] = z_col                       # covers col _LEFT-1
    pad_ref[1:h + 1, _LEFT + w:_LEFT + w + _MARGIN, :] = z_col   # covers col _LEFT+w


# ------------------------------- fused kernel ------------------------------- #

def _bevnet_fused_kernel(x_ref, w1_ref, s1_ref, b1_ref,
                         w2_ref, s2_ref, b2_ref,
                         w3_ref, s3_ref, b3_ref,
                         o_ref,
                         col1, wb1, pad2, col2, wb2, pad3, col3,
                         *, H, W):
    H2, W2, H3, W3 = H // 2, W // 2, H // 4, W // 4
    CP = x_ref.shape[-1]                       # channel-padded Cin (8)
    C1 = w1_ref.shape[-1]
    C2 = w2_ref.shape[-1]
    C3 = w3_ref.shape[-1]
    f32 = jnp.float32

    # ---- layer 1: conv3x3(Cin->64) + BN + ReLU + maxpool2 (single K=9*CP dot)
    _im2col_3x3(col1, lambda ky, kx: x_ref[0, ky:ky + H, kx:kx + W, :], H, W, CP)
    y1 = jnp.dot(col1[...], w1_ref[...], preferred_element_type=f32)   # (H*W, C1)
    pooled1 = _bn_relu_pool(y1, s1_ref[...], b1_ref[...], wb1, H2, W2)
    _zero_halo(pad2, H2, W2)
    pad2[1:H2 + 1, _LEFT:_LEFT + W2, :] = pooled1                      # aligned store

    # ---- layer 2: conv3x3(64->128) + BN + ReLU + maxpool2 (single K=9*C1 dot)
    _im2col_3x3(
        col2,
        lambda ky, kx: pad2[ky:ky + H2, _LEFT - 1 + kx:_LEFT - 1 + kx + W2, :],
        H2, W2, C1)
    y2 = jnp.dot(col2[...], w2_ref[...], preferred_element_type=f32)   # (H2*W2, C2)
    pooled2 = _bn_relu_pool(y2, s2_ref[...], b2_ref[...], wb2, H3, W3)
    _zero_halo(pad3, H3, W3)
    pad3[1:H3 + 1, _LEFT:_LEFT + W3, :] = pooled2

    # ---- layer 3: conv3x3(128->256) + BN + ReLU + global average pool -------
    _im2col_3x3(
        col3,
        lambda ky, kx: pad3[ky:ky + H3, _LEFT - 1 + kx:_LEFT - 1 + kx + W3, :],
        H3, W3, C2)
    y3 = jnp.dot(col3[...], w3_ref[...], preferred_element_type=f32)   # (H3*W3, C3)
    y3 = jnp.maximum(y3 * s3_ref[...] + b3_ref[...], 0.0)
    o_ref[0, :, :] = (jnp.sum(y3, axis=0, keepdims=True)
                      * (1.0 / (H3 * W3))).astype(o_ref.dtype)


# --------------------------------- wrapper ---------------------------------- #

@jax.jit
def bevnet_forward(x_nchw, params):
    x = jnp.transpose(x_nchw, (0, 2, 3, 1)).astype(jnp.float32)   # NCHW -> NHWC
    B, H, W, Cin = x.shape
    # Two 2x2 pools + layout-preserving in-kernel reshapes need these at the
    # toy whole-image-per-step sizes (row tiling for bev_size=256 is a TODO).
    assert H % 4 == 0 and W % 32 == 0, "need H % 4 == 0 and W % 32 == 0"
    H2, W2, H3, W3 = H // 2, W // 2, H // 4, W // 4

    # Raw input with a 1-pixel spatial halo; channels zero-padded 3 -> 8 so the
    # contraction/lane extents are sublane-tile friendly.  No wrapper im2col.
    CP = ((Cin + 7) // 8) * 8
    xpad = jnp.pad(x, ((0, 0), (1, 1), (1, 1), (0, CP - Cin)))    # (B, H+2, W+2, CP)

    p1, p2, p3 = params
    C1 = p1["w_hwio"].shape[-1]
    C2 = p2["w_hwio"].shape[-1]
    C3 = p3["w_hwio"].shape[-1]
    # (ky, kx, cin)-major weight reshapes matching the im2col column order.
    w1 = jnp.pad(p1["w_hwio"], ((0, 0), (0, 0), (0, CP - Cin), (0, 0)))
    w1 = w1.reshape(9 * CP, C1).astype(jnp.bfloat16)              # (72,  64)
    w2 = p2["w_hwio"].reshape(9 * C1, C2).astype(jnp.bfloat16)    # (576, 128)
    w3 = p3["w_hwio"].reshape(9 * C2, C3).astype(jnp.bfloat16)    # (1152,256)
    s1, b1 = p1["scale"].reshape(1, C1), p1["bias"].reshape(1, C1)
    s2, b2 = p2["scale"].reshape(1, C2), p2["bias"].reshape(1, C2)
    s3, b3 = p3["scale"].reshape(1, C3), p3["bias"].reshape(1, C3)

    W2P = _LEFT + W2 + _MARGIN    # haloed layer-2 input width (8-aligned)
    W3P = _LEFT + W3 + _MARGIN    # haloed layer-3 input width (8-aligned)

    kernel = functools.partial(_bevnet_fused_kernel, H=H, W=W)
    out = pl.pallas_call(
        kernel,
        out_shape=jax.ShapeDtypeStruct((B, 1, C3), jnp.float32),
        grid=(B,),
        in_specs=[
            pl.BlockSpec((1, H + 2, W + 2, CP), lambda b: (b, 0, 0, 0)),
            pl.BlockSpec((9 * CP, C1), lambda b: (0, 0)),
            pl.BlockSpec((1, C1), lambda b: (0, 0)),
            pl.BlockSpec((1, C1), lambda b: (0, 0)),
            pl.BlockSpec((9 * C1, C2), lambda b: (0, 0)),
            pl.BlockSpec((1, C2), lambda b: (0, 0)),
            pl.BlockSpec((1, C2), lambda b: (0, 0)),
            pl.BlockSpec((9 * C2, C3), lambda b: (0, 0)),
            pl.BlockSpec((1, C3), lambda b: (0, 0)),
            pl.BlockSpec((1, C3), lambda b: (0, 0)),
        ],
        out_specs=pl.BlockSpec((1, 1, C3), lambda b: (b, 0, 0)),
        scratch_shapes=[
            pltpu.VMEM((H * W, 9 * CP), jnp.bfloat16),       # col1: layer-1 im2col
            pltpu.VMEM((H2, W, C1), jnp.float32),            # wb1: pool staging
            pltpu.VMEM((H2 + 2, W2P, C1), jnp.float32),      # pad2: haloed L2 input
            pltpu.VMEM((H2 * W2, 9 * C1), jnp.bfloat16),     # col2: layer-2 im2col
            pltpu.VMEM((H3, W2, C2), jnp.float32),           # wb2: pool staging
            pltpu.VMEM((H3 + 2, W3P, C2), jnp.float32),      # pad3: haloed L3 input
            pltpu.VMEM((H3 * W3, 9 * C2), jnp.bfloat16),     # col3: layer-3 im2col
        ],
        # ~4.5 MiB total VMEM at the test size -> default scoped limit is fine;
        # raise vmem_limit_bytes only when row-tiling real bev_size inputs.
        compiler_params=pltpu.CompilerParams(
            dimension_semantics=("parallel",)),
    )(xpad, w1, s1, b1, w2, s2, b2, w3, s3, b3)
    return out[:, 0, :]                                           # (B, 256)


# ------------------------------- parameters --------------------------------- #

def init_params(key):
    layer_dims = [(3, 64), (64, 128), (128, BEV_FEAT_DIM)]
    eps = 1e-5
    params = []
    for i, (cin, cout) in enumerate(layer_dims):
        kw, kb = jax.random.split(jax.random.fold_in(key, i))
        w_hwio = 0.1 * jax.random.normal(kw, (3, 3, cin, cout), jnp.float32)
        conv_b = 0.01 * jax.random.normal(kb, (cout,), jnp.float32)
        gamma = jnp.ones((cout,), jnp.float32)      # PyTorch BN default init
        beta = jnp.zeros((cout,), jnp.float32)
        r_mean = jnp.zeros((cout,), jnp.float32)
        r_var = jnp.ones((cout,), jnp.float32)
        bn_scale = gamma / jnp.sqrt(r_var + eps)
        scale = bn_scale                             # folded BN scale
        bias = beta + bn_scale * (conv_b - r_mean)   # folded BN bias (+ conv bias)
        params.append(dict(w_hwio=w_hwio, scale=scale, bias=bias))
    return params


# -------------------------------- reference --------------------------------- #

def bevnet_reference(x_nchw, params, operand_dtype=jnp.bfloat16):
    """Pure-XLA reference.  operand_dtype controls the conv operand precision;
    the Pallas kernel feeds bf16 operands to the MXU with f32 accumulation."""
    x = jnp.transpose(x_nchw, (0, 2, 3, 1)).astype(jnp.float32)
    for i, p in enumerate(params):
        y = lax.conv_general_dilated(
            x.astype(operand_dtype), p["w_hwio"].astype(operand_dtype),
            window_strides=(1, 1), padding="SAME",
            dimension_numbers=("NHWC", "HWIO", "NHWC"),
            preferred_element_type=jnp.float32)
        y = jnp.maximum(y * p["scale"] + p["bias"], 0.0)
        if i < 2:
            B, H, W, C = y.shape
            x = y.reshape(B, H // 2, 2, W // 2, 2, C).max(axis=(2, 4))
        else:
            x = y.mean(axis=(1, 2))
    return x


# ----------------------------------- main ------------------------------------ #

if __name__ == "__main__":
    # Small shapes: batch=2, 3 input channels, 32x32 BEV grid (divisible by 4).
    key = jax.random.PRNGKey(0)
    x = jax.random.normal(key, (2, 3, 32, 32), jnp.float32)   # NCHW like PyTorch
    params = init_params(jax.random.PRNGKey(1))

    out = jax.block_until_ready(bevnet_forward(x, params))
    assert out.shape == (2, BEV_FEAT_DIM), out.shape

    # Primary check: matched-precision reference (bf16 MXU operands, f32 acc).
    ref = bevnet_reference(x, params, operand_dtype=jnp.bfloat16)
    np.testing.assert_allclose(np.asarray(out), np.asarray(ref),
                               rtol=2e-3, atol=2e-3)

    # Looser sanity check against the full-f32 reference (bf16 rounding only).
    ref32 = bevnet_reference(x, params, operand_dtype=jnp.float32)
    np.testing.assert_allclose(np.asarray(out), np.asarray(ref32),
                               rtol=5e-2, atol=5e-2)

    print("KERNEL_OK")
</pallas_src>

<mosaic_0001>
module attributes {stable_mosaic.version = 11 : i64} {
  func.func @_bevnet_fused_kernel(%arg0: i32, %arg1: memref<1x34x34x8xf32, #tpu.memory_space<vmem>>, %arg2: memref<72x64xbf16, #tpu.memory_space<vmem>>, %arg3: memref<1x64xf32, #tpu.memory_space<vmem>>, %arg4: memref<1x64xf32, #tpu.memory_space<vmem>>, %arg5: memref<576x128xbf16, #tpu.memory_space<vmem>>, %arg6: memref<1x128xf32, #tpu.memory_space<vmem>>, %arg7: memref<1x128xf32, #tpu.memory_space<vmem>>, %arg8: memref<1152x256xbf16, #tpu.memory_space<vmem>>, %arg9: memref<1x256xf32, #tpu.memory_space<vmem>>, %arg10: memref<1x256xf32, #tpu.memory_space<vmem>>, %arg11: memref<1x1x256xf32, #tpu.memory_space<vmem>>, %arg12: memref<1024x72xbf16, #tpu.memory_space<vmem>>, %arg13: memref<16x32x64xf32, #tpu.memory_space<vmem>>, %arg14: memref<18x32x64xf32, #tpu.memory_space<vmem>>, %arg15: memref<256x576xbf16, #tpu.memory_space<vmem>>, %arg16: memref<8x16x128xf32, #tpu.memory_space<vmem>>, %arg17: memref<10x24x128xf32, #tpu.memory_space<vmem>>, %arg18: memref<64x1152xbf16, #tpu.memory_space<vmem>>) attributes {dimension_semantics = [#tpu.dimension_semantics<parallel>], iteration_bounds = array<i64: 2>, scalar_prefetch = 0 : i64, scratch_operands = 7 : i64, tpu.core_type = #tpu.core_type<tc>, window_params = [{transform_indices = @transform_0, window_bounds = array<i64: 1, 34, 34, 8>}, {pipeline_mode = #tpu.pipeline_mode<synchronous>, transform_indices = @transform_1, window_bounds = array<i64: 72, 64>}, {pipeline_mode = #tpu.pipeline_mode<synchronous>, transform_indices = @transform_2, window_bounds = array<i64: 1, 64>}, {pipeline_mode = #tpu.pipeline_mode<synchronous>, transform_indices = @transform_3, window_bounds = array<i64: 1, 64>}, {pipeline_mode = #tpu.pipeline_mode<synchronous>, transform_indices = @transform_4, window_bounds = array<i64: 576, 128>}, {pipeline_mode = #tpu.pipeline_mode<synchronous>, transform_indices = @transform_5, window_bounds = array<i64: 1, 128>}, {pipeline_mode = #tpu.pipeline_mode<synchronous>, transform_indices = @transform_6, window_bounds = array<i64: 1, 128>}, {pipeline_mode = #tpu.pipeline_mode<synchronous>, transform_indices = @transform_7, window_bounds = array<i64: 1152, 256>}, {pipeline_mode = #tpu.pipeline_mode<synchronous>, transform_indices = @transform_8, window_bounds = array<i64: 1, 256>}, {pipeline_mode = #tpu.pipeline_mode<synchronous>, transform_indices = @transform_9, window_bounds = array<i64: 1, 256>}, {transform_indices = @transform_10, window_bounds = array<i64: 1, 1, 256>}]} {
    %c0 = arith.constant 0 : index
    %c0_0 = arith.constant 0 : index
    %c0_1 = arith.constant 0 : index
    %c0_2 = arith.constant 0 : index
    %0 = vector.load %arg1[%c0, %c0_0, %c0_1, %c0_2] : memref<1x34x34x8xf32, #tpu.memory_space<vmem>>, vector<1x32x32x8xf32>
    %1 = vector.shape_cast %0 : vector<1x32x32x8xf32> to vector<32x32x8xf32>
    %2 = vector.shape_cast %1 : vector<32x32x8xf32> to vector<1024x8xf32>
    %3 = arith.truncf %2 : vector<1024x8xf32> to vector<1024x8xbf16>
    %c0_3 = arith.constant 0 : index
    %c0_4 = arith.constant 0 : index
    %4 = vector.load %arg12[%c0_3, %c0_4] : memref<1024x72xbf16, #tpu.memory_space<vmem>>, vector<1024x8xbf16>
    tpu.vector_store %arg12[%c0_3, %c0_4], %3 {strides = array<i32>} : memref<1024x72xbf16, #tpu.memory_space<vmem>>, vector<1024x8xbf16>,
    %c0_5 = arith.constant 0 : index
    %c0_6 = arith.constant 0 : index
    %c1 = arith.constant 1 : index
    %c0_7 = arith.constant 0 : index
    %5 = vector.load %arg1[%c0_5, %c0_6, %c1, %c0_7] : memref<1x34x34x8xf32, #tpu.memory_space<vmem>>, vector<1x32x32x8xf32>
    %6 = vector.shape_cast %5 : vector<1x32x32x8xf32> to vector<32x32x8xf32>
    %7 = vector.shape_cast %6 : vector<32x32x8xf32> to vector<1024x8xf32>
    %8 = arith.truncf %7 : vector<1024x8xf32> to vector<1024x8xbf16>
    %c0_8 = arith.constant 0 : index
    %c8 = arith.constant 8 : index
    %9 = vector.load %arg12[%c0_8, %c8] : memref<1024x72xbf16, #tpu.memory_space<vmem>>, vector<1024x8xbf16>
    tpu.vector_store %arg12[%c0_8, %c8], %8 {strides = array<i32>} : memref<1024x72xbf16, #tpu.memory_space<vmem>>, vector<1024x8xbf16>,
    %c0_9 = arith.constant 0 : index
    %c0_10 = arith.constant 0 : index
    %c2 = arith.constant 2 : index
    %c0_11 = arith.constant 0 : index
    %10 = vector.load %arg1[%c0_9, %c0_10, %c2, %c0_11] : memref<1x34x34x8xf32, #tpu.memory_space<vmem>>, vector<1x32x32x8xf32>
    %11 = vector.shape_cast %10 : vector<1x32x32x8xf32> to vector<32x32x8xf32>
    %12 = vector.shape_cast %11 : vector<32x32x8xf32> to vector<1024x8xf32>
    %13 = arith.truncf %12 : vector<1024x8xf32> to vector<1024x8xbf16>
    %c0_12 = arith.constant 0 : index
    %c16 = arith.constant 16 : index
    %14 = vector.load %arg12[%c0_12, %c16] : memref<1024x72xbf16, #tpu.memory_space<vmem>>, vector<1024x8xbf16>
    tpu.vector_store %arg12[%c0_12, %c16], %13 {strides = array<i32>} : memref<1024x72xbf16, #tpu.memory_space<vmem>>, vector<1024x8xbf16>,
    %c0_13 = arith.constant 0 : index
    %c1_14 = arith.constant 1 : index
    %c0_15 = arith.constant 0 : index
    %c0_16 = arith.constant 0 : index
    %15 = vector.load %arg1[%c0_13, %c1_14, %c0_15, %c0_16] : memref<1x34x34x8xf32, #tpu.memory_space<vmem>>, vector<1x32x32x8xf32>
    %16 = vector.shape_cast %15 : vector<1x32x32x8xf32> to vector<32x32x8xf32>
    %17 = vector.shape_cast %16 : vector<32x32x8xf32> to vector<1024x8xf32>
    %18 = arith.truncf %17 : vector<1024x8xf32> to vector<1024x8xbf16>
    %c0_17 = arith.constant 0 : index
    %c24 = arith.constant 24 : index
    %19 = vector.load %arg12[%c0_17, %c24] : memref<1024x72xbf16, #tpu.memory_space<vmem>>, vector<1024x8xbf16>
    tpu.vector_store %arg12[%c0_17, %c24], %18 {strides = array<i32>} : memref<1024x72xbf16, #tpu.memory_space<vmem>>, vector<1024x8xbf16>,
    %c0_18 = arith.constant 0 : index
    %c1_19 = arith.constant 1 : index
    %c1_20 = arith.constant 1 : index
    %c0_21 = arith.constant 0 : index
    %20 = vector.load %arg1[%c0_18, %c1_19, %c1_20, %c0_21] : memref<1x34x34x8xf32, #tpu.memory_space<vmem>>, vector<1x32x32x8xf32>
    %21 = vector.shape_cast %20 : vector<1x32x32x8xf32> to vector<32x32x8xf32>
    %22 = vector.shape_cast %21 : vector<32x32x8xf32> to vector<1024x8xf32>
    %23 = arith.truncf %22 : vector<1024x8xf32> to vector<1024x8xbf16>
    %c0_22 = arith.constant 0 : index
    %c32 = arith.constant 32 : index
    %24 = vector.load %arg12[%c0_22, %c32] : memref<1024x72xbf16, #tpu.memory_space<vmem>>, vector<1024x8xbf16>
    tpu.vector_store %arg12[%c0_22, %c32], %23 {strides = array<i32>} : memref<1024x72xbf16, #tpu.memory_space<vmem>>, vector<1024x8xbf16>,
    %c0_23 = arith.constant 0 : index
    %c1_24 = arith.constant 1 : index
    %c2_25 = arith.constant 2 : index
    %c0_26 = arith.constant 0 : index
    %25 = vector.load %arg1[%c0_23, %c1_24, %c2_25, %c0_26] : memref<1x34x34x8xf32, #tpu.memory_space<vmem>>, vector<1x32x32x8xf32>
    %26 = vector.shape_cast %25 : vector<1x32x32x8xf32> to vector<32x32x8xf32>
    %27 = vector.shape_cast %26 : vector<32x32x8xf32> to vector<1024x8xf32>
    %28 = arith.truncf %27 : vector<1024x8xf32> to vector<1024x8xbf16>
    %c0_27 = arith.constant 0 : index
    %c40 = arith.constant 40 : index
    %29 = vector.load %arg12[%c0_27, %c40] : memref<1024x72xbf16, #tpu.memory_space<vmem>>, vector<1024x8xbf16>
    tpu.vector_store %arg12[%c0_27, %c40], %28 {strides = array<i32>} : memref<1024x72xbf16, #tpu.memory_space<vmem>>, vector<1024x8xbf16>,
    %c0_28 = arith.constant 0 : index
    %c2_29 = arith.constant 2 : index
    %c0_30 = arith.constant 0 : index
    %c0_31 = arith.constant 0 : index
    %30 = vector.load %arg1[%c0_28, %c2_29, %c0_30, %c0_31] : memref<1x34x34x8xf32, #tpu.memory_space<vmem>>, vector<1x32x32x8xf32>
    %31 = vector.shape_cast %30 : vector<1x32x32x8xf32> to vector<32x32x8xf32>
    %32 = vector.shape_cast %31 : vector<32x32x8xf32> to vector<1024x8xf32>
    %33 = arith.truncf %32 : vector<1024x8xf32> to vector<1024x8xbf16>
    %c0_32 = arith.constant 0 : index
    %c48 = arith.constant 48 : index
    %34 = vector.load %arg12[%c0_32, %c48] : memref<1024x72xbf16, #tpu.memory_space<vmem>>, vector<1024x8xbf16>
    tpu.vector_store %arg12[%c0_32, %c48], %33 {strides = array<i32>} : memref<1024x72xbf16, #tpu.memory_space<vmem>>, vector<1024x8xbf16>,
    %c0_33 = arith.constant 0 : index
    %c2_34 = arith.constant 2 : index
    %c1_35 = arith.constant 1 : index
    %c0_36 = arith.constant 0 : index
    %35 = vector.load %arg1[%c0_33, %c2_34, %c1_35, %c0_36] : memref<1x34x34x8xf32, #tpu.memory_space<vmem>>, vector<1x32x32x8xf32>
    %36 = vector.shape_cast %35 : vector<1x32x32x8xf32> to vector<32x32x8xf32>
    %37 = vector.shape_cast %36 : vector<32x32x8xf32> to vector<1024x8xf32>
    %38 = arith.truncf %37 : vector<1024x8xf32> to vector<1024x8xbf16>
    %c0_37 = arith.constant 0 : index
    %c56 = arith.constant 56 : index
    %39 = vector.load %arg12[%c0_37, %c56] : memref<1024x72xbf16, #tpu.memory_space<vmem>>, vector<1024x8xbf16>
    tpu.vector_store %arg12[%c0_37, %c56], %38 {strides = array<i32>} : memref<1024x72xbf16, #tpu.memory_space<vmem>>, vector<1024x8xbf16>,
    %c0_38 = arith.constant 0 : index
    %c2_39 = arith.constant 2 : index
    %c2_40 = arith.constant 2 : index
    %c0_41 = arith.constant 0 : index
    %40 = vector.load %arg1[%c0_38, %c2_39, %c2_40, %c0_41] : memref<1x34x34x8xf32, #tpu.memory_space<vmem>>, vector<1x32x32x8xf32>
    %41 = vector.shape_cast %40 : vector<1x32x32x8xf32> to vector<32x32x8xf32>
    %42 = vector.shape_cast %41 : vector<32x32x8xf32> to vector<1024x8xf32>
    %43 = arith.truncf %42 : vector<1024x8xf32> to vector<1024x8xbf16>
    %c0_42 = arith.constant 0 : index
    %c64 = arith.constant 64 : index
    %44 = vector.load %arg12[%c0_42, %c64] : memref<1024x72xbf16, #tpu.memory_space<vmem>>, vector<1024x8xbf16>
    tpu.vector_store %arg12[%c0_42, %c64], %43 {strides = array<i32>} : memref<1024x72xbf16, #tpu.memory_space<vmem>>, vector<1024x8xbf16>,
    %c0_43 = arith.constant 0 : index
    %c0_44 = arith.constant 0 : index
    %45 = vector.load %arg12[%c0_43, %c0_44] : memref<1024x72xbf16, #tpu.memory_space<vmem>>, vector<1024x72xbf16>
    %c0_45 = arith.constant 0 : index
    %c0_46 = arith.constant 0 : index
    %46 = vector.load %arg2[%c0_45, %c0_46] : memref<72x64xbf16, #tpu.memory_space<vmem>>, vector<72x64xbf16>
    %cst = arith.constant dense<0.000000e+00> : vector<1024x64xf32>
    %47 = tpu.matmul %45, %46, %cst {dimension_numbers = #tpu.dot_dimension_numbers<[1], [0], [0], [1], [0, 0, 1, 1], [], []>} : vector<1024x72xbf16>, vector<72x64xbf16>, vector<1024x64xf32> -> vector<1024x64xf32>
    %c0_47 = arith.constant 0 : index
    %c0_48 = arith.constant 0 : index
    %48 = vector.load %arg3[%c0_47, %c0_48] : memref<1x64xf32, #tpu.memory_space<vmem>>, vector<1x64xf32>
    %c0_49 = arith.constant 0 : index
    %c0_50 = arith.constant 0 : index
    %49 = vector.load %arg4[%c0_49, %c0_50] : memref<1x64xf32, #tpu.memory_space<vmem>>, vector<1x64xf32>
    %50 = vector.broadcast %48 : vector<1x64xf32> to vector<1024x64xf32>
    %51 = arith.mulf %47, %50 : vector<1024x64xf32>
    %52 = vector.broadcast %49 : vector<1x64xf32> to vector<1024x64xf32>
    %53 = arith.addf %51, %52 : vector<1024x64xf32>
    %cst_51 = arith.constant 0.000000e+00 : f32
    %54 = vector.broadcast %cst_51 : f32 to vector<1024x64xf32>
    %55 = arith.maximumf %53, %54 : vector<1024x64xf32>
    %56 = vector.shape_cast %55 : vector<1024x64xf32> to vector<16x2x32x64xf32>
    %cst_52 = arith.constant dense<0xFF800000> : vector<16x32x64xf32>
    %57 = vector.multi_reduction <maximumf>, %56, %cst_52 [1] : vector<16x2x32x64xf32> to vector<16x32x64xf32>
    %c0_53 = arith.constant 0 : index
    %c0_54 = arith.constant 0 : index
    %c0_55 = arith.constant 0 : index
    %58 = vector.load %arg13[%c0_53, %c0_54, %c0_55] : memref<16x32x64xf32, #tpu.memory_space<vmem>>, vector<16x32x64xf32>
    tpu.vector_store %arg13[%c0_53, %c0_54, %c0_55], %57 {strides = array<i32>} : memref<16x32x64xf32, #tpu.memory_space<vmem>>, vector<16x32x64xf32>,
    %c0_56 = arith.constant 0 : index
    %c0_57 = arith.constant 0 : index
    %c0_58 = arith.constant 0 : index
    %59 = tpu.strided_load %arg13[%c0_56, %c0_57, %c0_58] {strides = array<i32: 1, 2, 1>} : memref<16x32x64xf32, #tpu.memory_space<vmem>>, vector<16x16x64xf32>
    %c0_59 = arith.constant 0 : index
    %c1_60 = arith.constant 1 : index
    %c0_61 = arith.constant 0 : index
    %60 = tpu.strided_load %arg13[%c0_59, %c1_60, %c0_61] {strides = array<i32: 1, 2, 1>} : memref<16x32x64xf32, #tpu.memory_space<vmem>>, vector<16x16x64xf32>
    %61 = arith.maximumf %59, %60 : vector<16x16x64xf32>
    %cst_62 = arith.constant 0.000000e+00 : f32
    %62 = vector.broadcast %cst_62 : f32 to vector<1x32x64xf32>
    %c0_63 = arith.constant 0 : index
    %c0_64 = arith.constant 0 : index
    %c0_65 = arith.constant 0 : index
    %63 = vector.load %arg14[%c0_63, %c0_64, %c0_65] : memref<18x32x64xf32, #tpu.memory_space<vmem>>, vector<1x32x64xf32>
    tpu.vector_store %arg14[%c0_63, %c0_64, %c0_65], %62 {strides = array<i32>} : memref<18x32x64xf32, #tpu.memory_space<vmem>>, vector<1x32x64xf32>,
    %c17 = arith.constant 17 : index
    %c0_66 = arith.constant 0 : index
    %c0_67 = arith.constant 0 : index
    %64 = vector.load %arg14[%c17, %c0_66, %c0_67] : memref<18x32x64xf32, #tpu.memory_space<vmem>>, vector<1x32x64xf32>
    tpu.vector_store %arg14[%c17, %c0_66, %c0_67], %62 {strides = array<i32>} : memref<18x32x64xf32, #tpu.memory_space<vmem>>, vector<1x32x64xf32>,
    %cst_68 = arith.constant 0.000000e+00 : f32
    %65 = vector.broadcast %cst_68 : f32 to vector<16x8x64xf32>
    %c1_69 = arith.constant 1 : index
    %c0_70 = arith.constant 0 : index
    %c0_71 = arith.constant 0 : index
    %66 = vector.load %arg14[%c1_69, %c0_70, %c0_71] : memref<18x32x64xf32, #tpu.memory_space<vmem>>, vector<16x8x64xf32>
    tpu.vector_store %arg14[%c1_69, %c0_70, %c0_71], %65 {strides = array<i32>} : memref<18x32x64xf32, #tpu.memory_space<vmem>>, vector<16x8x64xf32>,
    %c1_72 = arith.constant 1 : index
    %c24_73 = arith.constant 24 : index
    %c0_74 = arith.constant 0 : index
    %67 = vector.load %arg14[%c1_72, %c24_73, %c0_74] : memref<18x32x64xf32, #tpu.memory_space<vmem>>, vector<16x8x64xf32>
    tpu.vector_store %arg14[%c1_72, %c24_73, %c0_74], %65 {strides = array<i32>} : memref<18x32x64xf32, #tpu.memory_space<vmem>>, vector<16x8x64xf32>,
    %c1_75 = arith.constant 1 : index
    %c8_76 = arith.constant 8 : index
    %c0_77 = arith.constant 0 : index
    %68 = vector.load %arg14[%c1_75, %c8_76, %c0_77] : memref<18x32x64xf32, #tpu.memory_space<vmem>>, vector<16x16x64xf32>
    tpu.vector_store %arg14[%c1_75, %c8_76, %c0_77], %61 {strides = array<i32>} : memref<18x32x64xf32, #tpu.memory_space<vmem>>, vector<16x16x64xf32>,
    %c0_78 = arith.constant 0 : index
    %c7 = arith.constant 7 : index
    %c0_79 = arith.constant 0 : index
    %69 = vector.load %arg14[%c0_78, %c7, %c0_79] : memref<18x32x64xf32, #tpu.memory_space<vmem>>, vector<16x16x64xf32>
    %70 = vector.shape_cast %69 : vector<16x16x64xf32> to vector<256x64xf32>
    %71 = arith.truncf %70 : vector<256x64xf32> to vector<256x64xbf16>
    %c0_80 = arith.constant 0 : index
    %c0_81 = arith.constant 0 : index
    %72 = vector.load %arg15[%c0_80, %c0_81] : memref<256x576xbf16, #tpu.memory_space<vmem>>, vector<256x64xbf16>
    tpu.vector_store %arg15[%c0_80, %c0_81], %71 {strides = array<i32>} : memref<256x576xbf16, #tpu.memory_space<vmem>>, vector<256x64xbf16>,
    %c0_82 = arith.constant 0 : index
    %c8_83 = arith.constant 8 : index
    %c0_84 = arith.constant 0 : index
    %73 = vector.load %arg14[%c0_82, %c8_83, %c0_84] : memref<18x32x64xf32, #tpu.memory_space<vmem>>, vector<16x16x64xf32>
    %74 = vector.shape_cast %73 : vector<16x16x64xf32> to vector<256x64xf32>
    %75 = arith.truncf %74 : vector<256x64xf32> to vector<256x64xbf16>
    %c0_85 = arith.constant 0 : index
    %c64_86 = arith.constant 64 : index
    %76 = vector.load %arg15[%c0_85, %c64_86] : memref<256x576xbf16, #tpu.memory_space<vmem>>, vector<256x64xbf16>
    tpu.vector_store %arg15[%c0_85, %c64_86], %75 {strides = array<i32>} : memref<256x576xbf16, #tpu.memory_space<vmem>>, vector<256x64xbf16>,
    %c0_87 = arith.constant 0 : index
    %c9 = arith.constant 9 : index
    %c0_88 = arith.constant 0 : index
    %77 = vector.load %arg14[%c0_87, %c9, %c0_88] : memref<18x32x64xf32, #tpu.memory_space<vmem>>, vector<16x16x64xf32>
    %78 = vector.shape_cast %77 : vector<16x16x64xf32> to vector<256x64xf32>
    %79 = arith.truncf %78 : vector<256x64xf32> to vector<256x64xbf16>
    %c0_89 = arith.constant 0 : index
    %c128 = arith.constant 128 : index
    %80 = vector.load %arg15[%c0_89, %c128] : memref<256x576xbf16, #tpu.memory_space<vmem>>, vector<256x64xbf16>
    tpu.vector_store %arg15[%c0_89, %c128], %79 {strides = array<i32>} : memref<256x576xbf16, #tpu.memory_space<vmem>>, vector<256x64xbf16>,
    %c1_90 = arith.constant 1 : index
    %c7_91 = arith.constant 7 : index
    %c0_92 = arith.constant 0 : index
    %81 = vector.load %arg14[%c1_90, %c7_91, %c0_92] : memref<18x32x64xf32, #tpu.memory_space<vmem>>, vector<16x16x64xf32>
    %82 = vector.shape_cast %81 : vector<16x16x64xf32> to vector<256x64xf32>
    %83 = arith.truncf %82 : vector<256x64xf32> to vector<256x64xbf16>
    %c0_93 = arith.constant 0 : index
    %c192 = arith.constant 192 : index
    %84 = vector.load %arg15[%c0_93, %c192] : memref<256x576xbf16, #tpu.memory_space<vmem>>, vector<256x64xbf16>
    tpu.vector_store %arg15[%c0_93, %c192], %83 {strides = array<i32>} : memref<256x576xbf16, #tpu.memory_space<vmem>>, vector<256x64xbf16>,
    %c1_94 = arith.constant 1 : index
    %c8_95 = arith.constant 8 : index
    %c0_96 = arith.constant 0 : index
    %85 = vector.load %arg14[%c1_94, %c8_95, %c0_96] : memref<18x32x64xf32, #tpu.memory_space<vmem>>, vector<16x16x64xf32>
    %86 = vector.shape_cast %85 : vector<16x16x64xf32> to vector<256x64xf32>
    %87 = arith.truncf %86 : vector<256x64xf32> to vector<256x64xbf16>
    %c0_97 = arith.constant 0 : index
    %c256 = arith.constant 256 : index
    %88 = vector.load %arg15[%c0_97, %c256] : memref<256x576xbf16, #tpu.memory_space<vmem>>, vector<256x64xbf16>
    tpu.vector_store %arg15[%c0_97, %c256], %87 {strides = array<i32>} : memref<256x576xbf16, #tpu.memory_space<vmem>>, vector<256x64xbf16>,
    %c1_98 = arith.constant 1 : index
    %c9_99 = arith.constant 9 : index
    %c0_100 = arith.constant 0 : index
    %89 = vector.load %arg14[%c1_98, %c9_99, %c0_100] : memref<18x32x64xf32, #tpu.memory_space<vmem>>, vector<16x16x64xf32>
    %90 = vector.shape_cast %89 : vector<16x16x64xf32> to vector<256x64xf32>
    %91 = arith.truncf %90 : vector<256x64xf32> to vector<256x64xbf16>
    %c0_101 = arith.constant 0 : index
    %c320 = arith.constant 320 : index
    %92 = vector.load %arg15[%c0_101, %c320] : memref<256x576xbf16, #tpu.memory_space<vmem>>, vector<256x64xbf16>
    tpu.vector_store %arg15[%c0_101, %c320], %91 {strides = array<i32>} : memref<256x576xbf16, #tpu.memory_space<vmem>>, vector<256x64xbf16>,
    %c2_102 = arith.constant 2 : index
    %c7_103 = arith.constant 7 : index
    %c0_104 = arith.constant 0 : index
    %93 = vector.load %arg14[%c2_102, %c7_103, %c0_104] : memref<18x32x64xf32, #tpu.memory_space<vmem>>, vector<16x16x64xf32>
    %94 = vector.shape_cast %93 : vector<16x16x64xf32> to vector<256x64xf32>
    %95 = arith.truncf %94 : vector<256x64xf32> to vector<256x64xbf16>
    %c0_105 = arith.constant 0 : index
    %c384 = arith.constant 384 : index
    %96 = vector.load %arg15[%c0_105, %c384] : memref<256x576xbf16, #tpu.memory_space<vmem>>, vector<256x64xbf16>
    tpu.vector_store %arg15[%c0_105, %c384], %95 {strides = array<i32>} : memref<256x576xbf16, #tpu.memory_space<vmem>>, vector<256x64xbf16>,
    %c2_106 = arith.constant 2 : index
    %c8_107 = arith.constant 8 : index
    %c0_108 = arith.constant 0 : index
    %97 = vector.load %arg14[%c2_106, %c8_107, %c0_108] : memref<18x32x64xf32, #tpu.memory_space<vmem>>, vector<16x16x64xf32>
    %98 = vector.shape_cast %97 : vector<16x16x64xf32> to vector<256x64xf32>
    %99 = arith.truncf %98 : vector<256x64xf32> to vector<256x64xbf16>
    %c0_109 = arith.constant 0 : index
    %c448 = arith.constant 448 : index
    %100 = vector.load %arg15[%c0_109, %c448] : memref<256x576xbf16, #tpu.memory_space<vmem>>, vector<256x64xbf16>
    tpu.vector_store %arg15[%c0_109, %c448], %99 {strides = array<i32>} : memref<256x576xbf16, #tpu.memory_space<vmem>>, vector<256x64xbf16>,
    %c2_110 = arith.constant 2 : index
    %c9_111 = arith.constant 9 : index
    %c0_112 = arith.constant 0 : index
    %101 = vector.load %arg14[%c2_110, %c9_111, %c0_112] : memref<18x32x64xf32, #tpu.memory_space<vmem>>, vector<16x16x64xf32>
    %102 = vector.shape_cast %101 : vector<16x16x64xf32> to vector<256x64xf32>
    %103 = arith.truncf %102 : vector<256x64xf32> to vector<256x64xbf16>
    %c0_113 = arith.constant 0 : index
    %c512 = arith.constant 512 : index
    %104 = vector.load %arg15[%c0_113, %c512] : memref<256x576xbf16, #tpu.memory_space<vmem>>, vector<256x64xbf16>
    tpu.vector_store %arg15[%c0_113, %c512], %103 {strides = array<i32>} : memref<256x576xbf16, #tpu.memory_space<vmem>>, vector<256x64xbf16>,
    %c0_114 = arith.constant 0 : index
    %c0_115 = arith.constant 0 : index
    %105 = vector.load %arg15[%c0_114, %c0_115] : memref<256x576xbf16, #tpu.memory_space<vmem>>, vector<256x576xbf16>
    %c0_116 = arith.constant 0 : index
    %c0_117 = arith.constant 0 : index
    %106 = vector.load %arg5[%c0_116, %c0_117] : memref<576x128xbf16, #tpu.memory_space<vmem>>, vector<576x128xbf16>
    %cst_118 = arith.constant dense<0.000000e+00> : vector<256x128xf32>
    %107 = tpu.matmul %105, %106, %cst_118 {dimension_numbers = #tpu.dot_dimension_numbers<[1], [0], [0], [1], [0, 0, 1, 1], [], []>} : vector<256x576xbf16>, vector<576x128xbf16>, vector<256x128xf32> -> vector<256x128xf32>
    %c0_119 = arith.constant 0 : index
    %c0_120 = arith.constant 0 : index
    %108 = vector.load %arg6[%c0_119, %c0_120] : memref<1x128xf32, #tpu.memory_space<vmem>>, vector<1x128xf32>
    %c0_121 = arith.constant 0 : index
    %c0_122 = arith.constant 0 : index
    %109 = vector.load %arg7[%c0_121, %c0_122] : memref<1x128xf32, #tpu.memory_space<vmem>>, vector<1x128xf32>
    %110 = vector.broadcast %108 : vector<1x128xf32> to vector<256x128xf32>
    %111 = arith.mulf %107, %110 : vector<256x128xf32>
    %112 = vector.broadcast %109 : vector<1x128xf32> to vector<256x128xf32>
    %113 = arith.addf %111, %112 : vector<256x128xf32>
    %cst_123 = arith.constant 0.000000e+00 : f32
    %114 = vector.broadcast %cst_123 : f32 to vector<256x128xf32>
    %115 = arith.maximumf %113, %114 : vector<256x128xf32>
    %116 = vector.shape_cast %115 : vector<256x128xf32> to vector<8x2x16x128xf32>
    %cst_124 = arith.constant dense<0xFF800000> : vector<8x16x128xf32>
    %117 = vector.multi_reduction <maximumf>, %116, %cst_124 [1] : vector<8x2x16x128xf32> to vector<8x16x128xf32>
    %c0_125 = arith.constant 0 : index
    %c0_126 = arith.constant 0 : index
    %c0_127 = arith.constant 0 : index
    %118 = vector.load %arg16[%c0_125, %c0_126, %c0_127] : memref<8x16x128xf32, #tpu.memory_space<vmem>>, vector<8x16x128xf32>
    tpu.vector_store %arg16[%c0_125, %c0_126, %c0_127], %117 {strides = array<i32>} : memref<8x16x128xf32, #tpu.memory_space<vmem>>, vector<8x16x128xf32>,
    %c0_128 = arith.constant 0 : index
    %c0_129 = arith.constant 0 : index
    %c0_130 = arith.constant 0 : index
    %119 = tpu.strided_load %arg16[%c0_128, %c0_129, %c0_130] {strides = array<i32: 1, 2, 1>} : memref<8x16x128xf32, #tpu.memory_space<vmem>>, vector<8x8x128xf32>
    %c0_131 = arith.constant 0 : index
    %c1_132 = arith.constant 1 : index
    %c0_133 = arith.constant 0 : index
    %120 = tpu.strided_load %arg16[%c0_131, %c1_132, %c0_133] {strides = array<i32: 1, 2, 1>} : memref<8x16x128xf32, #tpu.memory_space<vmem>>, vector<8x8x128xf32>
    %121 = arith.maximumf %119, %120 : vector<8x8x128xf32>
    %cst_134 = arith.constant 0.000000e+00 : f32
    %122 = vector.broadcast %cst_134 : f32 to vector<1x24x128xf32>
    %c0_135 = arith.constant 0 : index
    %c0_136 = arith.constant 0 : index
    %c0_137 = arith.constant 0 : index
    %123 = vector.load %arg17[%c0_135, %c0_136, %c0_137] : memref<10x24x128xf32, #tpu.memory_space<vmem>>, vector<1x24x128xf32>
    tpu.vector_store %arg17[%c0_135, %c0_136, %c0_137], %122 {strides = array<i32>} : memref<10x24x128xf32, #tpu.memory_space<vmem>>, vector<1x24x128xf32>,
    %c9_138 = arith.constant 9 : index
    %c0_139 = arith.constant 0 : index
    %c0_140 = arith.constant 0 : index
    %124 = vector.load %arg17[%c9_138, %c0_139, %c0_140] : memref<10x24x128xf32, #tpu.memory_space<vmem>>, vector<1x24x128xf32>
    tpu.vector_store %arg17[%c9_138, %c0_139, %c0_140], %122 {strides = array<i32>} : memref<10x24x128xf32, #tpu.memory_space<vmem>>, vector<1x24x128xf32>,
    %cst_141 = arith.constant 0.000000e+00 : f32
    %125 = vector.broadcast %cst_141 : f32 to vector<8x8x128xf32>
    %c1_142 = arith.constant 1 : index
    %c0_143 = arith.constant 0 : index
    %c0_144 = arith.constant 0 : index
    %126 = vector.load %arg17[%c1_142, %c0_143, %c0_144] : memref<10x24x128xf32, #tpu.memory_space<vmem>>, vector<8x8x128xf32>
    tpu.vector_store %arg17[%c1_142, %c0_143, %c0_144], %125 {strides = array<i32>} : memref<10x24x128xf32, #tpu.memory_space<vmem>>, vector<8x8x128xf32>,
    %c1_145 = arith.constant 1 : index
    %c16_146 = arith.constant 16 : index
    %c0_147 = arith.constant 0 : index
    %127 = vector.load %arg17[%c1_145, %c16_146, %c0_147] : memref<10x24x128xf32, #tpu.memory_space<vmem>>, vector<8x8x128xf32>
    tpu.vector_store %arg17[%c1_145, %c16_146, %c0_147], %125 {strides = array<i32>} : memref<10x24x128xf32, #tpu.memory_space<vmem>>, vector<8x8x128xf32>,
    %c1_148 = arith.constant 1 : index
    %c8_149 = arith.constant 8 : index
    %c0_150 = arith.constant 0 : index
    %128 = vector.load %arg17[%c1_148, %c8_149, %c0_150] : memref<10x24x128xf32, #tpu.memory_space<vmem>>, vector<8x8x128xf32>
    tpu.vector_store %arg17[%c1_148, %c8_149, %c0_150], %121 {strides = array<i32>} : memref<10x24x128xf32, #tpu.memory_space<vmem>>, vector<8x8x128xf32>,
    %c0_151 = arith.constant 0 : index
    %c7_152 = arith.constant 7 : index
    %c0_153 = arith.constant 0 : index
    %129 = vector.load %arg17[%c0_151, %c7_152, %c0_153] : memref<10x24x128xf32, #tpu.memory_space<vmem>>, vector<8x8x128xf32>
    %130 = vector.shape_cast %129 : vector<8x8x128xf32> to vector<64x128xf32>
    %131 = arith.truncf %130 : vector<64x128xf32> to vector<64x128xbf16>
    %c0_154 = arith.constant 0 : index
    %c0_155 = arith.constant 0 : index
    %132 = vector.load %arg18[%c0_154, %c0_155] : memref<64x1152xbf16, #tpu.memory_space<vmem>>, vector<64x128xbf16>
    tpu.vector_store %arg18[%c0_154, %c0_155], %131 {strides = array<i32>} : memref<64x1152xbf16, #tpu.memory_space<vmem>>, vector<64x128xbf16>,
    %c0_156 = arith.constant 0 : index
    %c8_157 = arith.constant 8 : index
    %c0_158 = arith.constant 0 : index
    %133 = vector.load %arg17[%c0_156, %c8_157, %c0_158] : memref<10x24x128xf32, #tpu.memory_space<vmem>>, vector<8x8x128xf32>
    %134 = vector.shape_cast %133 : vector<8x8x128xf32> to vector<64x128xf32>
    %135 = arith.truncf %134 : vector<64x128xf32> to vector<64x128xbf16>
    %c0_159 = arith.constant 0 : index
    %c128_160 = arith.constant 128 : index
    %136 = vector.load %arg18[%c0_159, %c128_160] : memref<64x1152xbf16, #tpu.memory_space<vmem>>, vector<64x128xbf16>
    tpu.vector_store %arg18[%c0_159, %c128_160], %135 {strides = array<i32>} : memref<64x1152xbf16, #tpu.memory_space<vmem>>, vector<64x128xbf16>,
    %c0_161 = arith.constant 0 : index
    %c9_162 = arith.constant 9 : index
    %c0_163 = arith.constant 0 : index
    %137 = vector.load %arg17[%c0_161, %c9_162, %c0_163] : memref<10x24x128xf32, #tpu.memory_space<vmem>>, vector<8x8x128xf32>
    %138 = vector.shape_cast %137 : vector<8x8x128xf32> to vector<64x128xf32>
    %139 = arith.truncf %138 : vector<64x128xf32> to vector<64x128xbf16>
    %c0_164 = arith.constant 0 : index
    %c256_165 = arith.constant 256 : index
    %140 = vector.load %arg18[%c0_164, %c256_165] : memref<64x1152xbf16, #tpu.memory_space<vmem>>, vector<64x128xbf16>
    tpu.vector_store %arg18[%c0_164, %c256_165], %139 {strides = array<i32>} : memref<64x1152xbf16, #tpu.memory_space<vmem>>, vector<64x128xbf16>,
    %c1_166 = arith.constant 1 : index
    %c7_167 = arith.constant 7 : index
    %c0_168 = arith.constant 0 : index
    %141 = vector.load %arg17[%c1_166, %c7_167, %c0_168] : memref<10x24x128xf32, #tpu.memory_space<vmem>>, vector<8x8x128xf32>
    %142 = vector.shape_cast %141 : vector<8x8x128xf32> to vector<64x128xf32>
    %143 = arith.truncf %142 : vector<64x128xf32> to vector<64x128xbf16>
    %c0_169 = arith.constant 0 : index
    %c384_170 = arith.constant 384 : index
    %144 = vector.load %arg18[%c0_169, %c384_170] : memref<64x1152xbf16, #tpu.memory_space<vmem>>, vector<64x128xbf16>
    tpu.vector_store %arg18[%c0_169, %c384_170], %143 {strides = array<i32>} : memref<64x1152xbf16, #tpu.memory_space<vmem>>, vector<64x128xbf16>,
    %c1_171 = arith.constant 1 : index
    %c8_172 = arith.constant 8 : index
    %c0_173 = arith.constant 0 : index
    %145 = vector.load %arg17[%c1_171, %c8_172, %c0_173] : memref<10x24x128xf32, #tpu.memory_space<vmem>>, vector<8x8x128xf32>
    %146 = vector.shape_cast %145 : vector<8x8x128xf32> to vector<64x128xf32>
    %147 = arith.truncf %146 : vector<64x128xf32> to vector<64x128xbf16>
    %c0_174 = arith.constant 0 : index
    %c512_175 = arith.constant 512 : index
    %148 = vector.load %arg18[%c0_174, %c512_175] : memref<64x1152xbf16, #tpu.memory_space<vmem>>, vector<64x128xbf16>
    tpu.vector_store %arg18[%c0_174, %c512_175], %147 {strides = array<i32>} : memref<64x1152xbf16, #tpu.memory_space<vmem>>, vector<64x128xbf16>,
    %c1_176 = arith.constant 1 : index
    %c9_177 = arith.constant 9 : index
    %c0_178 = arith.constant 0 : index
    %149 = vector.load %arg17[%c1_176, %c9_177, %c0_178] : memref<10x24x128xf32, #tpu.memory_space<vmem>>, vector<8x8x128xf32>
    %150 = vector.shape_cast %149 : vector<8x8x128xf32> to vector<64x128xf32>
    %151 = arith.truncf %150 : vector<64x128xf32> to vector<64x128xbf16>
    %c0_179 = arith.constant 0 : index
    %c640 = arith.constant 640 : index
    %152 = vector.load %arg18[%c0_179, %c640] : memref<64x1152xbf16, #tpu.memory_space<vmem>>, vector<64x128xbf16>
    tpu.vector_store %arg18[%c0_179, %c640], %151 {strides = array<i32>} : memref<64x1152xbf16, #tpu.memory_space<vmem>>, vector<64x128xbf16>,
    %c2_180 = arith.constant 2 : index
    %c7_181 = arith.constant 7 : index
    %c0_182 = arith.constant 0 : index
    %153 = vector.load %arg17[%c2_180, %c7_181, %c0_182] : memref<10x24x128xf32, #tpu.memory_space<vmem>>, vector<8x8x128xf32>
    %154 = vector.shape_cast %153 : vector<8x8x128xf32> to vector<64x128xf32>
    %155 = arith.truncf %154 : vector<64x128xf32> to vector<64x128xbf16>
    %c0_183 = arith.constant 0 : index
    %c768 = arith.constant 768 : index
    %156 = vector.load %arg18[%c0_183, %c768] : memref<64x1152xbf16, #tpu.memory_space<vmem>>, vector<64x128xbf16>
    tpu.vector_store %arg18[%c0_183, %c768], %155 {strides = array<i32>} : memref<64x1152xbf16, #tpu.memory_space<vmem>>, vector<64x128xbf16>,
    %c2_184 = arith.constant 2 : index
    %c8_185 = arith.constant 8 : index
    %c0_186 = arith.constant 0 : index
    %157 = vector.load %arg17[%c2_184, %c8_185, %c0_186] : memref<10x24x128xf32, #tpu.memory_space<vmem>>, vector<8x8x128xf32>
    %158 = vector.shape_cast %157 : vector<8x8x128xf32> to vector<64x128xf32>
    %159 = arith.truncf %158 : vector<64x128xf32> to vector<64x128xbf16>
    %c0_187 = arith.constant 0 : index
    %c896 = arith.constant 896 : index
    %160 = vector.load %arg18[%c0_187, %c896] : memref<64x1152xbf16, #tpu.memory_space<vmem>>, vector<64x128xbf16>
    tpu.vector_store %arg18[%c0_187, %c896], %159 {strides = array<i32>} : memref<64x1152xbf16, #tpu.memory_space<vmem>>, vector<64x128xbf16>,
    %c2_188 = arith.constant 2 : index
    %c9_189 = arith.constant 9 : index
    %c0_190 = arith.constant 0 : index
    %161 = vector.load %arg17[%c2_188, %c9_189, %c0_190] : memref<10x24x128xf32, #tpu.memory_space<vmem>>, vector<8x8x128xf32>
    %162 = vector.shape_cast %161 : vector<8x8x128xf32> to vector<64x128xf32>
    %163 = arith.truncf %162 : vector<64x128xf32> to vector<64x128xbf16>
    %c0_191 = arith.constant 0 : index
    %c1024 = arith.constant 1024 : index
    %164 = vector.load %arg18[%c0_191, %c1024] : memref<64x1152xbf16, #tpu.memory_space<vmem>>, vector<64x128xbf16>
    tpu.vector_store %arg18[%c0_191, %c1024], %163 {strides = array<i32>} : memref<64x1152xbf16, #tpu.memory_space<vmem>>, vector<64x128xbf16>,
    %c0_192 = arith.constant 0 : index
    %c0_193 = arith.constant 0 : index
    %165 = vector.load %arg18[%c0_192, %c0_193] : memref<64x1152xbf16, #tpu.memory_space<vmem>>, vector<64x1152xbf16>
    %c0_194 = arith.constant 0 : index
    %c0_195 = arith.constant 0 : index
    %166 = vector.load %arg8[%c0_194, %c0_195] : memref<1152x256xbf16, #tpu.memory_space<vmem>>, vector<1152x256xbf16>
    %cst_196 = arith.constant dense<0.000000e+00> : vector<64x256xf32>
    %167 = tpu.matmul %165, %166, %cst_196 {dimension_numbers = #tpu.dot_dimension_numbers<[1], [0], [0], [1], [0, 0, 1, 1], [], []>} : vector<64x1152xbf16>, vector<1152x256xbf16>, vector<64x256xf32> -> vector<64x256xf32>
    %c0_197 = arith.constant 0 : index
    %c0_198 = arith.constant 0 : index
    %168 = vector.load %arg9[%c0_197, %c0_198] : memref<1x256xf32, #tpu.memory_space<vmem>>, vector<1x256xf32>
    %169 = vector.broadcast %168 : vector<1x256xf32> to vector<64x256xf32>
    %170 = arith.mulf %167, %169 : vector<64x256xf32>
    %c0_199 = arith.constant 0 : index
    %c0_200 = arith.constant 0 : index
    %171 = vector.load %arg10[%c0_199, %c0_200] : memref<1x256xf32, #tpu.memory_space<vmem>>, vector<1x256xf32>
    %172 = vector.broadcast %171 : vector<1x256xf32> to vector<64x256xf32>
    %173 = arith.addf %170, %172 : vector<64x256xf32>
    %cst_201 = arith.constant 0.000000e+00 : f32
    %174 = vector.broadcast %cst_201 : f32 to vector<64x256xf32>
    %175 = arith.maximumf %173, %174 : vector<64x256xf32>
    %cst_202 = arith.constant dense<0.000000e+00> : vector<256xf32>
    %176 = vector.multi_reduction <add>, %175, %cst_202 [0] : vector<64x256xf32> to vector<256xf32>
    %177 = vector.shape_cast %176 : vector<256xf32> to vector<1x256xf32>
    %cst_203 = arith.constant 1.562500e-02 : f32
    %178 = vector.broadcast %cst_203 : f32 to vector<1x256xf32>
    %179 = arith.mulf %177, %178 : vector<1x256xf32>
    %c0_204 = arith.constant 0 : index
    %c0_205 = arith.constant 0 : index
    %c0_206 = arith.constant 0 : index
    %180 = vector.load %arg11[%c0_204, %c0_205, %c0_206] : memref<1x1x256xf32, #tpu.memory_space<vmem>>, vector<1x1x256xf32>
    %181 = vector.shape_cast %180 : vector<1x1x256xf32> to vector<1x256xf32>
    %182 = vector.shape_cast %179 : vector<1x256xf32> to vector<1x1x256xf32>
    tpu.vector_store %arg11[%c0_204, %c0_205, %c0_206], %182 {strides = array<i32>} : memref<1x1x256xf32, #tpu.memory_space<vmem>>, vector<1x1x256xf32>,
    return
  }
  func.func @transform_0(%arg0: i32) -> (i32, i32, i32, i32) {
    %c0_i32 = arith.constant 0 : i32
    %c0_i32_0 = arith.constant 0 : i32
    %c0_i32_1 = arith.constant 0 : i32
    %c0_i32_2 = arith.constant 0 : i32
    return %arg0, %c0_i32, %c0_i32_0, %c0_i32_1 : i32, i32, i32, i32
  }
  func.func @transform_1(%arg0: i32) -> (i32, i32) {
    %c0_i32 = arith.constant 0 : i32
    %c0_i32_0 = arith.constant 0 : i32
    %c0_i32_1 = arith.constant 0 : i32
    return %c0_i32, %c0_i32_0 : i32, i32
  }
  func.func @transform_2(%arg0: i32) -> (i32, i32) {
    %c0_i32 = arith.constant 0 : i32
    %c0_i32_0 = arith.constant 0 : i32
    %c0_i32_1 = arith.constant 0 : i32
    return %c0_i32, %c0_i32_0 : i32, i32
  }
  func.func @transform_3(%arg0: i32) -> (i32, i32) {
    %c0_i32 = arith.constant 0 : i32
    %c0_i32_0 = arith.constant 0 : i32
    %c0_i32_1 = arith.constant 0 : i32
    return %c0_i32, %c0_i32_0 : i32, i32
  }
  func.func @transform_4(%arg0: i32) -> (i32, i32) {
    %c0_i32 = arith.constant 0 : i32
    %c0_i32_0 = arith.constant 0 : i32
    %c0_i32_1 = arith.constant 0 : i32
    return %c0_i32, %c0_i32_0 : i32, i32
  }
  func.func @transform_5(%arg0: i32) -> (i32, i32) {
    %c0_i32 = arith.constant 0 : i32
    %c0_i32_0 = arith.constant 0 : i32
    %c0_i32_1 = arith.constant 0 : i32
    return %c0_i32, %c0_i32_0 : i32, i32
  }
  func.func @transform_6(%arg0: i32) -> (i32, i32) {
    %c0_i32 = arith.constant 0 : i32
    %c0_i32_0 = arith.constant 0 : i32
    %c0_i32_1 = arith.constant 0 : i32
    return %c0_i32, %c0_i32_0 : i32, i32
  }
  func.func @transform_7(%arg0: i32) -> (i32, i32) {
    %c0_i32 = arith.constant 0 : i32
    %c0_i32_0 = arith.constant 0 : i32
    %c0_i32_1 = arith.constant 0 : i32
    return %c0_i32, %c0_i32_0 : i32, i32
  }
  func.func @transform_8(%arg0: i32) -> (i32, i32) {
    %c0_i32 = arith.constant 0 : i32
    %c0_i32_0 = arith.constant 0 : i32
    %c0_i32_1 = arith.constant 0 : i32
    return %c0_i32, %c0_i32_0 : i32, i32
  }
  func.func @transform_9(%arg0: i32) -> (i32, i32) {
    %c0_i32 = arith.constant 0 : i32
    %c0_i32_0 = arith.constant 0 : i32
    %c0_i32_1 = arith.constant 0 : i32
    return %c0_i32, %c0_i32_0 : i32, i32
  }
  func.func @transform_10(%arg0: i32) -> (i32, i32, i32) {
    %c0_i32 = arith.constant 0 : i32
    %c0_i32_0 = arith.constant 0 : i32
    %c0_i32_1 = arith.constant 0 : i32
    return %arg0, %c0_i32, %c0_i32_0 : i32, i32, i32
  }
}

</mosaic_0001>

<bundles_post_ra>
// kernel: bevnet_forward.1
= control target key start
LH: loop header
LB: loop body
LE: loop exit
PB: predicated region body
PF: predicated region fallthrough
CT: control target
= control target key end

     0   :  { %s11964_s13 = smov 0   ;;  %s16458_s0 = inlined_call_operand.vmem [shape: f32[2,34,34,8], index: 0, kind: input, shape index: {}]   ;;  %s16459_s1 = inlined_call_operand.vmem [shape: bf16[72,64], index: 1, kind: input, shape index: {}]   ;;  %s16460_s2 = inlined_call_operand.vmem [shape: f32[1,64], index: 2, kind: input, shape index: {}]   ;;  %s16461_s3 = inlined_call_operand.vmem [shape: f32[1,64], index: 3, kind: input, shape index: {}]   ;;  %s16462_s4 = inlined_call_operand.vmem [shape: bf16[576,128], index: 4, kind: input, shape index: {}]   ;;  %s16463_s5 = inlined_call_operand.vmem [shape: f32[1,128], index: 5, kind: input, shape index: {}]   ;;  %s16464_s6 = inlined_call_operand.vmem [shape: f32[1,128], index: 6, kind: input, shape index: {}]   ;;  %s16465_s7 = inlined_call_operand.vmem [shape: bf16[1152,256], index: 7, kind: input, shape index: {}]   ;;  %s16466_s8 = inlined_call_operand.vmem [shape: f32[1,256], index: 8, kind: input, shape index: {}]   ;;  %s16467_s9 = inlined_call_operand.vmem [shape: f32[1,256], index: 9, kind: input, shape index: {}]   ;;  %s16468_s10 = inlined_call_operand.vmem [shape: f32[2,1,256], index: 10, kind: output, shape index: {}]  }
   0x1 LB: > { %s9984_s14 = sadd.s32 4294967295, %s11896_s13   ;;  %p9988_p0 = scmp.ge.s32.totalorder %s11896_s13, 1  ;;  %s11896_s13 = sphi %s11964_s13, %s20_s13  }
   0x2   : > { %p312_p1 = scmp.lt.s32.totalorder %s11896_s13, 3 }
   0x4   : > { %p313_p2 = pnand %p9988_p0, %p312_p1 }
   0x5   : > { %p349_p3 = scmp.lt.s32.totalorder (!%p313_p2), %s9984_s14, 1  ;;  %s11898_s19 = smov (!%p313_p2), 16   ;;  %vm551_vm0 = vcmask (!%p313_p2), 64512   ;;  %v11622_v54 = vld [vmem:[%s16459_s1] sm:$0xff] (!%p313_p2)   ;;  %v11623_v55 = vld [vmem:[%s16459_s1 + $0x8] sm:$0xff] (!%p313_p2)   ;;  %v11624_v60 = vld [vmem:[%s16459_s1 + $0x10] sm:$0xff] (!%p313_p2)  }
   0x6   : > { %316 = sbr.rel (%p313_p2) target bundleno = 2333 (0x91d), region = 60  ;;  %s11899_s20 = smov (!%p313_p2), 8   ;;  %11343 = vmatprep.subr.bf16.mxu0 (!%p313_p2), %v11622_v54  ;;  %v11626_v62 = vld [vmem:[%s16459_s1 + $0x20] ss:$0 sps:$4 sm:$0xff] (!%p313_p2)   ;;  %vm5015_vm1 = vcmask (!%p313_p2), 1043456   ;;  %v11625_v63 = vld [vmem:[%s16459_s1 + $0x18] sm:$0xff] (!%p313_p2)  }
   0x7   : > { %s11900_s21 = smov (!%p313_p2), 24   ;;  %s11901_s22 = smov (!%p313_p2), 32   ;;  %11344 = vmatpush3.bf16.msra.mxu0 (!%p313_p2), %v11622_v54  ;;  %vm1064_vm2 = vcmask (!%p313_p2), 130112   ;;  %vm1577_vm3 = vcmask (!%p313_p2), 195712   ;;  %vm2091_vm4 = vcmask (!%p313_p2), 261312   ;;  %vm2604_vm5 = vcmask (!%p313_p2), 326912  }
   0x8   : > { %s11902_s23 = smov (!%p313_p2), 40   ;;  %s11903_s24 = smov (!%p313_p2), 48   ;;  %11345 = vmatprep.subr.bf16.mxu0 (!%p313_p2), %v11623_v55  ;;  %vm3117_vm6 = vcmask (!%p313_p2), 392512   ;;  %vm3631_vm7 = vcmask (!%p313_p2), 458112   ;;  %vm4144_vm8 = vcmask (!%p313_p2), 523712   ;;  %vm4657_vm9 = vcmask (!%p313_p2), 589312  }
   0x9   : > { %s11904_s29 = smov (!%p313_p2), 56   ;;  %s11905_s25 = smov (!%p313_p2), 64   ;;  %vm4822_vm10 = vcmask (!%p313_p2), 588800   ;;  %vm5962_vm11 = vcmask (!%p313_p2), 523264   ;;  %vm6628_vm12 = vcmask (!%p313_p2), 1048064  }
   0xb   : > { %11346 = vmatpush3.bf16.msra.mxu0 (!%p313_p2), %v11623_v55 }
   0xc   : > { %11347 = vmatprep.subr.bf16.mxu0 (!%p313_p2), %v11624_v60 }
   0xd   : > { %s16470_s14 = smov (!%p349_p3, %s9984_s14), 1 }
   0xe   : > { %s11602_s15 = smul.u32 1360, %s16470_s14  ;;  %s9990_s30 = sshll.u32 %s16470_s14, 1 }
   0xf   : > { %11348 = vmatpush3.bf16.msra.mxu0 %v11624_v60 }
  0x10   : > { %s11978_s18 = scalar_lea.vmem %s16458_s0, %s11602_s15  ;;  %11349 = vmatprep.subr.bf16.mxu0 %v11625_v63 }
  0x11   : > { %v1129_v0 = vld [vmem:[%s11978_s18 + $0x2] sm:$0xff]  ;;  %v1130_v1 = vld [vmem:[%s11978_s18 + $0xa] sm:$0xff]  ;;  %v1131_v5 = vld [vmem:[%s11978_s18 + $0x12] sm:$0xff] }
  0x12   : > { %v616_v2 = vld [vmem:[%s11978_s18 + $0x1] sm:$0xff]  ;;  %v1257_v3 = vpack.c.bf16 %v1130_v1, %v1129_v0  ;;  %v617_v4 = vld [vmem:[%s11978_s18 + $0x9] sm:$0xff]  ;;  %v618_v8 = vld [vmem:[%s11978_s18 + $0x11] sm:$0xff]  ;;  %v5017_v1 = vsel %vm5015_vm1, %v11626_v62, 0 }
  0x13   : > { %v1132_v6 = vld [vmem:[%s11978_s18 + $0x1a] sm:$0xff]  ;;  %v744_v7 = vpack.c.bf16 %v617_v4, %v616_v2  ;;  %v9991_v13 = vld [vmem:[%s11978_s18 + $0x28] sm:$0xff]  ;;  %v9992_v14 = vld [vmem:[%s11978_s18 + $0x30] sm:$0xff]  ;;  %11350 = vmatpush3.bf16.msra.mxu0 %v11625_v63 }
  0x14   : > { %v619_v9 = vld [vmem:[%s11978_s18 + $0x19] sm:$0xff]  ;;  %1385 = vrot.lane.b32.xlu1 %v1257_v3, %s11898_s19  ;;  %v1258_v11 = vpack.c.bf16 %v1132_v6, %v1131_v5  ;;  %v1771_v17 = vpack.c.bf16 %v9992_v14, %v9991_v13  ;;  %v10378_v19 = vld [vmem:[%s11978_s18 + $0x68] sm:$0xff]  ;;  %v10375_v20 = vld [vmem:[%s11978_s18 + $0x50] sm:$0xff]  ;;  %11601 = vmatprep.subr.msk.bf16.mxu0 %vm5015_vm1, %v11626_v62 }
  0x15   : > { %v9993_v10 = vld [vmem:[%s11978_s18 + $0x38] sm:$0xff]  ;;  %v9994_v12 = vld [vmem:[%s11978_s18 + $0x40] sm:$0xff]  ;;  %872 = vrot.lane.b32.xlu0 %v744_v7, %s11899_s20  ;;  %v745_v15 = vpack.c.bf16 %v619_v9, %v618_v8  ;;  %v10119_v26 = vld [vmem:[%s11978_s18 + $0x29] sm:$0xff] }
  0x16   : > { %v1772_v16 = vpack.c.bf16 %v9994_v12, %v9993_v10  ;;  %v10377_v18 = vld [vmem:[%s11978_s18 + $0x60] sm:$0xff]  ;;  %554 = vst.msk [vmem:[#allocation2 + $0x10] sm:$0xff] %vm551_vm0, %v1771_v17  ;;  %v10376_v21 = vld [vmem:[%s11978_s18 + $0x58] sm:$0xff]  ;;  %v10381_v28 = vld [vmem:[%s11978_s18 + $0x88] sm:$0xff] }
  0x17   : > { %v10121_v22 = vld [vmem:[%s11978_s18 + $0x39] sm:$0xff]  ;;  %v10122_v23 = vld [vmem:[%s11978_s18 + $0x41] sm:$0xff]  ;;  %v12004_v24 = vpack.c.bf16 %v10378_v19, %v10377_v18  ;;  %v12006_v25 = vpack.c.bf16 %v10376_v21, %v10375_v20  ;;  %v10120_v27 = vld [vmem:[%s11978_s18 + $0x31] sm:$0xff]  ;;  %11352 = vmatpush3.bf16.msra.mxu0 %v5017_v1 }
  0x18   : > { %555 = vst.msk [vmem:[#allocation2 + $0x18] sm:$0xff] %vm551_vm0, %v1772_v16  ;;  %1387 = vrot.lane.b32.xlu1 %v1258_v11, %s11898_s19  ;;  %v12016_v29 = vpack.c.bf16 %v10122_v23, %v10121_v22  ;;  %v10382_v30 = vld [vmem:[%s11978_s18 + $0x90] sm:$0xff]  ;;  %v10379_v31 = vld [vmem:[%s11978_s18 + $0x78] sm:$0xff]  ;;  %v10380_v32 = vld [vmem:[%s11978_s18 + $0x80] sm:$0xff]  ;;  %v2284_v33 = vpack.c.bf16 %v10120_v27, %v10119_v26 }
  0x19   : > { %874 = vrot.lane.b32.xlu0 %v745_v15, %s11899_s20  ;;  %556 = vst.msk [vmem:[#allocation2 + $0x20] sm:$0xff] %vm551_vm0, %v12006_v25  ;;  %557 = vst.msk [vmem:[#allocation2 + $0x28] sm:$0xff] %vm551_vm0, %v12004_v24  ;;  %v10249_v34 = vld [vmem:[%s11978_s18 + $0x3a] sm:$0xff]  ;;  %v10250_v35 = vld [vmem:[%s11978_s18 + $0x42] sm:$0xff]  ;;  %v12024_v36 = vpack.c.bf16 %v10382_v30, %v10381_v28  ;;  %v12026_v37 = vpack.c.bf16 %v10380_v32, %v10379_v31 }
  0x1a   : > { %v10247_v38 = vld [vmem:[%s11978_s18 + $0x2a] sm:$0xff]  ;;  %v10248_v39 = vld [vmem:[%s11978_s18 + $0x32] sm:$0xff]  ;;  %v2798_v40 = vpack.c.bf16 %v10250_v35, %v10249_v34  ;;  %v359_v42 = vld [vmem:[%s11978_s18] sm:$0xff] }
  0x1b   : > { %558 = vst.msk [vmem:[#allocation2 + $0x30] sm:$0xff] %vm551_vm0, %v12026_v37  ;;  %559 = vst.msk [vmem:[#allocation2 + $0x38] sm:$0xff] %vm551_vm0, %v12024_v36  ;;  %v2797_v41 = vpack.c.bf16 %v10248_v39, %v10247_v38  ;;  %v360_v43 = vld [vmem:[%s11978_s18 + $0x8] sm:$0xff]  ;;  %v361_v47 = vld [vmem:[%s11978_s18 + $0x10] sm:$0xff] }
  0x1c   : > { %1901 = vrot.lane.b32.xlu1 %v1772_v16, %s11900_s21  ;;  %v10505_v44 = vld [vmem:[%s11978_s18 + $0x61] sm:$0xff]  ;;  %v10506_v45 = vld [vmem:[%s11978_s18 + $0x69] sm:$0xff]  ;;  %v487_v46 = vpack.c.bf16 %v360_v43, %v359_v42  ;;  %v10503_v48 = vld [vmem:[%s11978_s18 + $0x51] sm:$0xff] }
  0x1d   : > { %1899 = vrot.lane.b32.xlu0 %v1771_v17, %s11900_s21  ;;  %v10504_v49 = vld [vmem:[%s11978_s18 + $0x59] sm:$0xff]  ;;  %v3825_v52 = vpack.c.bf16 %v10506_v45, %v10505_v44  ;;  %v10633_v58 = vld [vmem:[%s11978_s18 + $0x62] sm:$0xff]  ;;  %v10634_v61 = vld [vmem:[%s11978_s18 + $0x6a] sm:$0xff] }
  0x1e   : > { %v362_v50 = vld [vmem:[%s11978_s18 + $0x18] sm:$0xff]  ;;  %552 = vst.msk [vmem:[#allocation2] sm:$0xff] %vm551_vm0, %v487_v46  ;;  %v3824_v53 = vpack.c.bf16 %v10504_v49, %v10503_v48  ;;  %v4338_v0 = vpack.c.bf16 %v10634_v61, %v10633_v58  ;;  %v10509_v2 = vld [vmem:[%s11978_s18 + $0x89] sm:$0xff]  ;;  %v10508_v5 = vld [vmem:[%s11978_s18 + $0x81] sm:$0xff] }
  0x1f   : > { %v488_v51 = vpack.c.bf16 %v362_v50, %v361_v47  ;;  %v10631_v56 = vld [vmem:[%s11978_s18 + $0x52] sm:$0xff]  ;;  %v10632_v57 = vld [vmem:[%s11978_s18 + $0x5a] sm:$0xff]  ;;  %v10636_v9 = vld [vmem:[%s11978_s18 + $0x82] sm:$0xff] }
  0x20   : > { %2414 = vrot.lane.b32.xlu1 %v12016_v29, %s11901_s22  ;;  %v4337_v59 = vpack.c.bf16 %v10632_v57, %v10631_v56  ;;  %v10510_v3 = vld [vmem:[%s11978_s18 + $0x91] sm:$0xff]  ;;  %v10507_v4 = vld [vmem:[%s11978_s18 + $0x79] sm:$0xff]  ;;  %v10384_v17 = vld [vmem:[%s11978_s18 + $0xa8] sm:$0xff] }
  0x21   : > { %2412 = vrot.lane.b32.xlu0 %v2284_v33, %s11901_s22  ;;  %553 = vst.msk [vmem:[#allocation2 + $0x8] sm:$0xff] %vm551_vm0, %v488_v51  ;;  %v3827_v6 = vpack.c.bf16 %v10510_v3, %v10509_v2  ;;  %v3826_v7 = vpack.c.bf16 %v10508_v5, %v10507_v4  ;;  %v10635_v8 = vld [vmem:[%s11978_s18 + $0x7a] sm:$0xff]  ;;  %v10637_v11 = vld [vmem:[%s11978_s18 + $0x8a] sm:$0xff]  ;;  %v10638_v12 = vld [vmem:[%s11978_s18 + $0x92] sm:$0xff] }
  0x22   : > { %v4339_v10 = vpack.c.bf16 %v10636_v9, %v10635_v8  ;;  %v4340_v13 = vpack.c.bf16 %v10638_v12, %v10637_v11  ;;  %v10385_v14 = vld [vmem:[%s11978_s18 + $0xb0] sm:$0xff]  ;;  %v10386_v15 = vld [vmem:[%s11978_s18 + $0xb8] sm:$0xff]  ;;  %v10383_v16 = vld [vmem:[%s11978_s18 + $0xa0] sm:$0xff] }
  0x23   : > { %v10513_v18 = vld [vmem:[%s11978_s18 + $0xb1] sm:$0xff]  ;;  %v10514_v19 = vld [vmem:[%s11978_s18 + $0xb9] sm:$0xff]  ;;  %v3316_v20 = vpack.c.bf16 %v10386_v15, %v10385_v14  ;;  %v3315_v21 = vpack.c.bf16 %v10384_v17, %v10383_v16  ;;  %v10511_v22 = vld [vmem:[%s11978_s18 + $0xa1] sm:$0xff] }
  0x24   : > { %2927 = vrot.lane.b32.xlu1 %v2798_v40, %s11902_s23  ;;  %v10512_v23 = vld [vmem:[%s11978_s18 + $0xa9] sm:$0xff]  ;;  %v10642_v30 = vld [vmem:[%s11978_s18 + $0xba] sm:$0xff]  ;;  %v10516_v47 = vld [vmem:[%s11978_s18 + $0xd1] sm:$0xff] }
  0x25   : > { %2925 = vrot.lane.b32.xlu0 %v2797_v41, %s11902_s23  ;;  %v10639_v26 = vld [vmem:[%s11978_s18 + $0xa2] sm:$0xff]  ;;  %v10640_v27 = vld [vmem:[%s11978_s18 + $0xaa] sm:$0xff]  ;;  %v10389_v32 = vld [vmem:[%s11978_s18 + $0xd8] sm:$0xff] }
  0x26   : > { %v12139_v28 = vpack.c.bf16 %v10640_v27, %v10639_v26  ;;  %v375_v34 = vld [vmem:[%s11978_s18 + $0xa0] sm:$0xff]  ;;  %v376_v35 = vld [vmem:[%s11978_s18 + $0xa8] sm:$0xff]  ;;  %v377_v43 = vld [vmem:[%s11978_s18 + $0xb0] sm:$0xff] }
  0x27   : > { %v495_v38 = vpack.c.bf16 %v376_v35, %v375_v34  ;;  %v10518_v42 = vld [vmem:[%s11978_s18 + $0xe1] sm:$0xff]  ;;  %v378_v44 = vld [vmem:[%s11978_s18 + $0xb8] sm:$0xff]  ;;  %v10515_v46 = vld [vmem:[%s11978_s18 + $0xc9] sm:$0xff] }
  0x28   : > { %3441 = vrot.lane.b32.xlu1 %v12004_v24, %s11903_s24  ;;  %v496_v48 = vpack.c.bf16 %v378_v44, %v377_v43  ;;  %v12182_v51 = vpack.c.bf16 %v10516_v47, %v10515_v46  ;;  %v10644_v54 = vld [vmem:[%s11978_s18 + $0xd2] sm:$0xff]  ;;  %v10645_v58 = vld [vmem:[%s11978_s18 + $0xda] sm:$0xff]  ;;  %v379_v8 = vld [vmem:[%s11978_s18 + $0xc8] sm:$0xff] }
  0x29   : > { %3439 = vrot.lane.b32.xlu0 %v12006_v25, %s11903_s24  ;;  %560 = vst.msk [vmem:[#allocation2 + $0x40] sm:$0xff] %vm551_vm0, %v495_v38  ;;  %v380_v9 = vld [vmem:[%s11978_s18 + $0xd0] sm:$0xff]  ;;  %v10392_v12 = vld [vmem:[%s11978_s18 + $0xf8] sm:$0xff]  ;;  %v10521_v16 = vld [vmem:[%s11978_s18 + $0x101] sm:$0xff] }
  0x2a   : > { %561 = vst.msk [vmem:[#allocation2 + $0x48] sm:$0xff] %vm551_vm0, %v496_v48  ;;  %v10391_v11 = vld [vmem:[%s11978_s18 + $0xf0] sm:$0xff]  ;;  %v10649_v35 = vld [vmem:[%s11978_s18 + $0x102] sm:$0xff] }
  0x2b   : > { %v3319_v17 = vpack.c.bf16 %v10392_v12, %v10391_v11  ;;  %v10397_v48 = vld [vmem:[%s11978_s18 + $0x128] sm:$0xff] }
  0x2c   : > { %3954 = vrot.lane.b32.xlu1 %v3825_v52, %s11904_s29 }
  0x2d   : > { %3952 = vrot.lane.b32.xlu0 %v3824_v53, %s11904_s29 }
  0x30   : > { %876 = vrot.lane.b32.xlu1 %v2284_v33, %s11899_s20  ;;  %v10390_v33 = vld [vmem:[%s11978_s18 + $0xe0] sm:$0xff] }
  0x31   : > { %4465 = vrot.lane.b32.xlu0 %v4337_v59, %s11905_s25  ;;  %v3318_v39 = vpack.c.bf16 %v10390_v33, %v10389_v32 }
  0x34   : > { %878 = vrot.lane.b32.xlu1 %v12016_v29, %s11899_s20  ;;  %v10641_v29 = vld [vmem:[%s11978_s18 + $0xb2] sm:$0xff] }
  0x35   : > { %4467 = vrot.lane.b32.xlu0 %v4338_v0, %s11905_s25  ;;  %v12146_v31 = vpack.c.bf16 %v10642_v30, %v10641_v29  ;;  %v10647_v29 = vld [vmem:[%s11978_s18 + $0xf2] sm:$0xff]  ;;  %v10648_v30 = vld [vmem:[%s11978_s18 + $0xfa] sm:$0xff] }
  0x36   : > { %v12264_v33 = vpack.c.bf16 %v10648_v30, %v10647_v29  ;;  %v388_v29 = vld [vmem:[%s11978_s18 + $0x120] sm:$0xff] }
  0x38   : > { %1391 = vrot.lane.b32.xlu1 %v2798_v40, %s11898_s19  ;;  %v10517_v40 = vld [vmem:[%s11978_s18 + $0xd9] sm:$0xff] }
  0x39   : > { %1389 = vrot.lane.b32.xlu0 %v2797_v41, %s11898_s19  ;;  %v12178_v50 = vpack.c.bf16 %v10518_v42, %v10517_v40 }
  0x3c   : > { %1905 = vrot.lane.b32.xlu1 %v12004_v24, %s11900_s21  ;;  %v12128_v24 = vpack.c.bf16 %v10514_v19, %v10513_v18  ;;  %v10522_v18 = vld [vmem:[%s11978_s18 + $0x109] sm:$0xff]  ;;  %v381_v19 = vld [vmem:[%s11978_s18 + $0xd8] sm:$0xff] }
  0x3d   : > { %1903 = vrot.lane.b32.xlu0 %v12006_v25, %s11900_s21  ;;  %v12131_v25 = vpack.c.bf16 %v10512_v23, %v10511_v22  ;;  %v10519_v22 = vld [vmem:[%s11978_s18 + $0xf1] sm:$0xff]  ;;  %v10520_v23 = vld [vmem:[%s11978_s18 + $0xf9] sm:$0xff]  ;;  %v12249_v26 = vpack.c.bf16 %v10522_v18, %v10521_v16 }
  0x3e   : > { %v12253_v27 = vpack.c.bf16 %v10520_v23, %v10519_v22 }
  0x40   : > { %2418 = vrot.lane.b32.xlu1 %v3825_v52, %s11901_s22 }
  0x41   : > { %2416 = vrot.lane.b32.xlu0 %v3824_v53, %s11901_s22 }
  0x44   : > { %2931 = vrot.lane.b32.xlu1 %v4338_v0, %s11902_s23 }
  0x45   : > { %2929 = vrot.lane.b32.xlu0 %v4337_v59, %s11902_s23 }
  0x48   : > { %3445 = vrot.lane.b32.xlu1 %v12024_v36, %s11903_s24 }
  0x49   : > { %3443 = vrot.lane.b32.xlu0 %v12026_v37, %s11903_s24 }
  0x4c   : > { %3958 = vrot.lane.b32.xlu1 %v3827_v6, %s11904_s29 }
  0x4d   : > { %3956 = vrot.lane.b32.xlu0 %v3826_v7, %s11904_s29 }
  0x50   : > { %880 = vrot.lane.b32.xlu1 %v3824_v53, %s11899_s20  ;;  %v10643_v53 = vld [vmem:[%s11978_s18 + $0xca] sm:$0xff] }
  0x51   : > { %4469 = vrot.lane.b32.xlu0 %v4339_v10, %s11905_s25  ;;  %v12193_v56 = vpack.c.bf16 %v10644_v54, %v10643_v53  ;;  %v10395_v53 = vld [vmem:[%s11978_s18 + $0x118] sm:$0xff]  ;;  %v10396_v54 = vld [vmem:[%s11978_s18 + $0x120] sm:$0xff] }
  0x54   : > { %882 = vrot.lane.b32.xlu1 %v3825_v52, %s11899_s20 }
  0x55   : > { %4471 = vrot.lane.b32.xlu0 %v4340_v13, %s11905_s25 }
  0x58   : > { %1395 = vrot.lane.b32.xlu1 %v4338_v0, %s11898_s19 }
  0x59   : > { %1393 = vrot.lane.b32.xlu0 %v4337_v59, %s11898_s19  ;;  %v10646_v59 = vld [vmem:[%s11978_s18 + $0xe2] sm:$0xff] }
  0x5a   : > { %v12203_v61 = vpack.c.bf16 %v10646_v59, %v10645_v58  ;;  %v10525_v58 = vld [vmem:[%s11978_s18 + $0x129] sm:$0xff]  ;;  %v3321_v59 = vpack.c.bf16 %v10396_v54, %v10395_v53 }
  0x5c   : > { %1909 = vrot.lane.b32.xlu1 %v12024_v36, %s11900_s21  ;;  %v10387_v36 = vld [vmem:[%s11978_s18 + $0xc8] sm:$0xff] }
  0x5d   : > { %1907 = vrot.lane.b32.xlu0 %v12026_v37, %s11900_s21  ;;  %v10388_v37 = vld [vmem:[%s11978_s18 + $0xd0] sm:$0xff] }
  0x5e   : > { %v3317_v41 = vpack.c.bf16 %v10388_v37, %v10387_v36  ;;  %v10650_v36 = vld [vmem:[%s11978_s18 + $0x10a] sm:$0xff] }
  0x60   : > { %2422 = vrot.lane.b32.xlu1 %v3827_v6, %s11901_s22 }
  0x61   : > { %2420 = vrot.lane.b32.xlu0 %v3826_v7, %s11901_s22 }
  0x64   : > { %2935 = vrot.lane.b32.xlu1 %v4340_v13, %s11902_s23 }
  0x65   : > { %2933 = vrot.lane.b32.xlu0 %v4339_v10, %s11902_s23 }
  0x68   : > { %3449 = vrot.lane.b32.xlu1 %v3316_v20, %s11903_s24 }
  0x69   : > { %3447 = vrot.lane.b32.xlu0 %v3315_v21, %s11903_s24 }
  0x6c   : > { %3962 = vrot.lane.b32.xlu1 %v12128_v24, %s11904_s29 }
  0x6d   : > { %3960 = vrot.lane.b32.xlu0 %v12131_v25, %s11904_s29 }
  0x70   : > { %884 = vrot.lane.b32.xlu1 %v3826_v7, %s11899_s20  ;;  %v10394_v7 = vld [vmem:[%s11978_s18 + $0x108] sm:$0xff] }
  0x71   : > { %4473 = vrot.lane.b32.xlu0 %v12139_v28, %s11905_s25 }
  0x74   : > { %886 = vrot.lane.b32.xlu1 %v3827_v6, %s11899_s20  ;;  %v10393_v6 = vld [vmem:[%s11978_s18 + $0x100] sm:$0xff] }
  0x75   : > { %4475 = vrot.lane.b32.xlu0 %v12146_v31, %s11905_s25  ;;  %v3320_v15 = vpack.c.bf16 %v10394_v7, %v10393_v6  ;;  %v10651_v7 = vld [vmem:[%s11978_s18 + $0x11a] sm:$0xff] }
  0x78   : > { %1399 = vrot.lane.b32.xlu1 %v4340_v13, %s11898_s19  ;;  %v497_v13 = vpack.c.bf16 %v380_v9, %v379_v8  ;;  %v10652_v8 = vld [vmem:[%s11978_s18 + $0x122] sm:$0xff] }
  0x79   : > { %1397 = vrot.lane.b32.xlu0 %v4339_v10, %s11898_s19  ;;  %v12336_v11 = vpack.c.bf16 %v10652_v8, %v10651_v7  ;;  %v392_v7 = vld [vmem:[%s11978_s18 + $0x148] sm:$0xff] }
  0x7a   : > { %562 = vst.msk [vmem:[#allocation2 + $0x50] sm:$0xff] %vm551_vm0, %v497_v13  ;;  %v10653_v13 = vld [vmem:[%s11978_s18 + $0x12a] sm:$0xff] }
  0x7c   : > { %1913 = vrot.lane.b32.xlu1 %v3316_v20, %s11900_s21  ;;  %v382_v20 = vld [vmem:[%s11978_s18 + $0xe0] sm:$0xff] }
  0x7d   : > { %1911 = vrot.lane.b32.xlu0 %v3315_v21, %s11900_s21 }
  0x80   : > { %2426 = vrot.lane.b32.xlu1 %v12128_v24, %s11901_s22 }
  0x81   : > { %2424 = vrot.lane.b32.xlu0 %v12131_v25, %s11901_s22 }
  0x84   : > { %2939 = vrot.lane.b32.xlu1 %v12146_v31, %s11902_s23 }
  0x85   : > { %2937 = vrot.lane.b32.xlu0 %v12139_v28, %s11902_s23 }
  0x86   : > { %v1386_v45 = vpop.permute.xlu1 %1385 }
  0x87   : > { %v873_v49 = vpop.permute.xlu0 %872 }
  0x88   : > { %1065 = vst.msk [vmem:[#allocation2] sm:$0xff] %vm1064_vm2, %v873_v49  ;;  %3453 = vrot.lane.b32.xlu1 %v3318_v39, %s11903_s24  ;;  %v10398_v49 = vld [vmem:[%s11978_s18 + $0x130] sm:$0xff] }
  0x89   : > { %3451 = vrot.lane.b32.xlu0 %v3317_v41, %s11903_s24  ;;  %1578 = vst.msk [vmem:[#allocation2] sm:$0xff] %vm1577_vm3, %v1386_v45 }
  0x8a   : > { %v1388_v52 = vpop.permute.xlu1 %1387 }
  0x8b   : > { %v875_v55 = vpop.permute.xlu0 %874 }
  0x8c   : > { %1066 = vst.msk [vmem:[#allocation2 + $0x8] sm:$0xff] %vm1064_vm2, %v875_v55  ;;  %3966 = vrot.lane.b32.xlu1 %v12178_v50, %s11904_s29 }
  0x8d   : > { %3964 = vrot.lane.b32.xlu0 %v12182_v51, %s11904_s29  ;;  %1579 = vst.msk [vmem:[#allocation2 + $0x8] sm:$0xff] %vm1577_vm3, %v1388_v52 }
  0x8e   : > { %v1902_v57 = vpop.permute.xlu1 %1901 }
  0x8f   : > { %2093 = vst.msk [vmem:[#allocation2 + $0x8] sm:$0xff] %vm2091_vm4, %v1902_v57  ;;  %v1900_v60 = vpop.permute.xlu0 %1899  ;;  %v3322_v57 = vpack.c.bf16 %v10398_v49, %v10397_v48  ;;  %v10655_v49 = vld [vmem:[%s11978_s18 + $0x142] sm:$0xff] }
  0x90   : > { %2092 = vst.msk [vmem:[#allocation2] sm:$0xff] %vm2091_vm4, %v1900_v60  ;;  %888 = vrot.lane.b32.xlu1 %v12131_v25, %s11899_s20  ;;  %v10526_v60 = vld [vmem:[%s11978_s18 + $0x131] sm:$0xff] }
  0x91   : > { %4477 = vrot.lane.b32.xlu0 %v12193_v56, %s11905_s25 }
  0x92   : > { %v2415_v62 = vpop.permute.xlu1 %2414 }
  0x93   : > { %2606 = vst.msk [vmem:[#allocation2 + $0x8] sm:$0xff] %vm2604_vm5, %v2415_v62  ;;  %v2413_v63 = vpop.permute.xlu0 %2412  ;;  %v386_v62 = vld [vmem:[%s11978_s18 + $0x108] sm:$0xff] }
  0x94   : > { %2605 = vst.msk [vmem:[#allocation2] sm:$0xff] %vm2604_vm5, %v2413_v63  ;;  %890 = vrot.lane.b32.xlu1 %v12128_v24, %s11899_s20  ;;  %v498_v24 = vpack.c.bf16 %v382_v20, %v381_v19 }
  0x95   : > { %4479 = vrot.lane.b32.xlu0 %v12203_v61, %s11905_s25 }
  0x96   : > { %v2928_v0 = vpop.permute.xlu1 %2927  ;;  %563 = vst.msk [vmem:[#allocation2 + $0x58] sm:$0xff] %vm551_vm0, %v498_v24 }
  0x97   : > { %3119 = vst.msk [vmem:[#allocation2 + $0x8] sm:$0xff] %vm3117_vm6, %v2928_v0  ;;  %v2926_v1 = vpop.permute.xlu0 %2925  ;;  %v10523_v0 = vld [vmem:[%s11978_s18 + $0x119] sm:$0xff] }
  0x98   : > { %3118 = vst.msk [vmem:[#allocation2] sm:$0xff] %vm3117_vm6, %v2926_v1  ;;  %1403 = vrot.lane.b32.xlu1 %v12146_v31, %s11898_s19  ;;  %v10524_v1 = vld [vmem:[%s11978_s18 + $0x121] sm:$0xff] }
  0x99   : > { %1401 = vrot.lane.b32.xlu0 %v12139_v28, %s11898_s19 }
  0x9a   : > { %v3442_v2 = vpop.permute.xlu1 %3441 }
  0x9b   : > { %3633 = vst.msk [vmem:[#allocation2 + $0x8] sm:$0xff] %vm3631_vm7, %v3442_v2  ;;  %v3440_v3 = vpop.permute.xlu0 %3439 }
  0x9c   : > { %3632 = vst.msk [vmem:[#allocation2] sm:$0xff] %vm3631_vm7, %v3440_v3  ;;  %1917 = vrot.lane.b32.xlu1 %v3318_v39, %s11900_s21  ;;  %v12275_v39 = vpack.c.bf16 %v10650_v36, %v10649_v35  ;;  %v10529_v36 = vld [vmem:[%s11978_s18 + $0x151] sm:$0xff] }
  0x9d   : > { %1915 = vrot.lane.b32.xlu0 %v3317_v41, %s11900_s21 }
  0x9e   : > { %v3955_v4 = vpop.permute.xlu1 %3954 }
  0x9f   : > { %4146 = vst.msk [vmem:[#allocation2 + $0x8] sm:$0xff] %vm4144_vm8, %v3955_v4  ;;  %v3953_v5 = vpop.permute.xlu0 %3952  ;;  %v12321_v4 = vpack.c.bf16 %v10526_v60, %v10525_v58 }
  0xa0   : > { %4145 = vst.msk [vmem:[#allocation2] sm:$0xff] %vm4144_vm8, %v3953_v5  ;;  %2430 = vrot.lane.b32.xlu1 %v12178_v50, %s11901_s22  ;;  %v12325_v5 = vpack.c.bf16 %v10524_v1, %v10523_v0 }
  0xa1   : > { %2428 = vrot.lane.b32.xlu0 %v12182_v51, %s11901_s22 }
  0xa2   : > { %v877_v10 = vpop.permute.xlu1 %876 }
  0xa3   : > { %1067 = vst.msk [vmem:[#allocation2 + $0x10] sm:$0xff] %vm1064_vm2, %v877_v10  ;;  %v4466_v14 = vpop.permute.xlu0 %4465 }
  0xa4   : > { %4658 = vst.msk [vmem:[#allocation2] sm:$0xff] %vm4657_vm9, %v4466_v14  ;;  %2943 = vrot.lane.b32.xlu1 %v12203_v61, %s11902_s23  ;;  %v10654_v14 = vld [vmem:[%s11978_s18 + $0x132] sm:$0xff] }
  0xa5   : > { %2941 = vrot.lane.b32.xlu0 %v12193_v56, %s11902_s23 }
  0xa6   : > { %v879_v21 = vpop.permute.xlu1 %878 }
  0xa7   : > { %1068 = vst.msk [vmem:[#allocation2 + $0x18] sm:$0xff] %vm1064_vm2, %v879_v21  ;;  %v4468_v25 = vpop.permute.xlu0 %4467 }
  0xa8   : > { %4659 = vst.msk [vmem:[#allocation2 + $0x8] sm:$0xff] %vm4657_vm9, %v4468_v25  ;;  %3457 = vrot.lane.b32.xlu1 %v3320_v15, %s11903_s24 }
  0xa9   : > { %3455 = vrot.lane.b32.xlu0 %v3319_v17, %s11903_s24 }
  0xaa   : > { %v1392_v28 = vpop.permute.xlu1 %1391 }
  0xab   : > { %1581 = vst.msk [vmem:[#allocation2 + $0x18] sm:$0xff] %vm1577_vm3, %v1392_v28  ;;  %v1390_v31 = vpop.permute.xlu0 %1389  ;;  %v4722_v32 = vld [vmem:[#allocation2] sm:$0xff]  ;;  %v387_v28 = vld [vmem:[%s11978_s18 + $0x118] sm:$0xff] }
  0xac   : > { %1580 = vst.msk [vmem:[#allocation2 + $0x10] sm:$0xff] %vm1577_vm3, %v1390_v31  ;;  %11353 = vmatprep.mubr.msk.bf16.mxu0 %vm4822_vm10, %v4722_v32  ;;  %3970 = vrot.lane.b32.xlu1 %v12249_v26, %s11904_s29  ;;  %v10399_v31 = vld [vmem:[%s11978_s18 + $0x140] sm:$0xff]  ;;  %v10400_v32 = vld [vmem:[%s11978_s18 + $0x148] sm:$0xff] }
  0xad   : > { %3968 = vrot.lane.b32.xlu0 %v12253_v27, %s11904_s29 }
  0xae   : > { %v1906_v34 = vpop.permute.xlu1 %1905 }
  0xaf   : > { %2095 = vst.msk [vmem:[#allocation2 + $0x18] sm:$0xff] %vm2091_vm4, %v1906_v34  ;;  %v1904_v37 = vpop.permute.xlu0 %1903  ;;  %v4723_v38 = vld [vmem:[#allocation2 + $0x8] sm:$0xff] }
  0xb0   : > { %2094 = vst.msk [vmem:[#allocation2 + $0x10] sm:$0xff] %vm2091_vm4, %v1904_v37  ;;  %11354 = vmatmul.mubr.msk.bf16.vlgmr.msra.gmra.mrb[0].mxu0 %vm4822_vm10, %v4723_v38  ;;  %892 = vrot.lane.b32.xlu1 %v12182_v51, %s11899_s20  ;;  %v384_v51 = vld [vmem:[%s11978_s18 + $0xf8] sm:$0xff]  ;;  %v3323_v37 = vpack.c.bf16 %v10400_v32, %v10399_v31 }
  0xb1   : > { %4481 = vrot.lane.b32.xlu0 %v12264_v33, %s11905_s25  ;;  %v10530_v38 = vld [vmem:[%s11978_s18 + $0x159] sm:$0xff] }
  0xb2   : > { %v2419_v40 = vpop.permute.xlu1 %2418 }
  0xb3   : > { %2608 = vst.msk [vmem:[#allocation2 + $0x18] sm:$0xff] %vm2604_vm5, %v2419_v40  ;;  %v2417_v41 = vpop.permute.xlu0 %2416  ;;  %v390_v40 = vld [vmem:[%s11978_s18 + $0x130] sm:$0xff] }
  0xb4   : > { %2607 = vst.msk [vmem:[#allocation2 + $0x10] sm:$0xff] %vm2604_vm5, %v2417_v41  ;;  %894 = vrot.lane.b32.xlu1 %v12178_v50, %s11899_s20  ;;  %v383_v50 = vld [vmem:[%s11978_s18 + $0xf0] sm:$0xff] }
  0xb5   : > { %4483 = vrot.lane.b32.xlu0 %v12275_v39, %s11905_s25  ;;  %v499_v55 = vpack.c.bf16 %v384_v51, %v383_v50  ;;  %v10656_v50 = vld [vmem:[%s11978_s18 + $0x14a] sm:$0xff] }
  0xb6   : > { %v2932_v42 = vpop.permute.xlu1 %2931  ;;  %v12408_v53 = vpack.c.bf16 %v10656_v50, %v10655_v49  ;;  %v396_v49 = vld [vmem:[%s11978_s18 + $0x170] sm:$0xff] }
  0xb7   : > { %3121 = vst.msk [vmem:[#allocation2 + $0x18] sm:$0xff] %vm3117_vm6, %v2932_v42  ;;  %v2930_v43 = vpop.permute.xlu0 %2929  ;;  %v10527_v42 = vld [vmem:[%s11978_s18 + $0x141] sm:$0xff] }
  0xb8   : > { %3120 = vst.msk [vmem:[#allocation2 + $0x10] sm:$0xff] %vm3117_vm6, %v2930_v43  ;;  %1407 = vrot.lane.b32.xlu1 %v12203_v61, %s11898_s19  ;;  %v385_v61 = vld [vmem:[%s11978_s18 + $0x100] sm:$0xff]  ;;  %v10528_v43 = vld [vmem:[%s11978_s18 + $0x149] sm:$0xff] }
  0xb9   : > { %1405 = vrot.lane.b32.xlu0 %v12193_v56, %s11898_s19  ;;  %564 = vst.msk [vmem:[#allocation2 + $0x60] sm:$0xff] %vm551_vm0, %v499_v55  ;;  %v500_v2 = vpack.c.bf16 %v386_v62, %v385_v61  ;;  %v10657_v55 = vld [vmem:[%s11978_s18 + $0x152] sm:$0xff] }
  0xba   : > { %v3446_v44 = vpop.permute.xlu1 %3445 }
  0xbb   : > { %3635 = vst.msk [vmem:[#allocation2 + $0x18] sm:$0xff] %vm3631_vm7, %v3446_v44  ;;  %v3444_v45 = vpop.permute.xlu0 %3443 }
  0xbc   : > { %3634 = vst.msk [vmem:[#allocation2 + $0x10] sm:$0xff] %vm3631_vm7, %v3444_v45  ;;  %1921 = vrot.lane.b32.xlu1 %v3320_v15, %s11900_s21 }
  0xbd   : > { %1919 = vrot.lane.b32.xlu0 %v3319_v17, %s11900_s21  ;;  %565 = vst.msk [vmem:[#allocation2 + $0x68] sm:$0xff] %vm551_vm0, %v500_v2  ;;  %v12347_v17 = vpack.c.bf16 %v10654_v14, %v10653_v13  ;;  %v10533_v14 = vld [vmem:[%s11978_s18 + $0x179] sm:$0xff] }
  0xbe   : > { %v3959_v46 = vpop.permute.xlu1 %3958 }
  0xbf   : > { %4148 = vst.msk [vmem:[#allocation2 + $0x18] sm:$0xff] %vm4144_vm8, %v3959_v46  ;;  %v3957_v47 = vpop.permute.xlu0 %3956  ;;  %v12393_v46 = vpack.c.bf16 %v10530_v38, %v10529_v36 }
  0xc0   : > { %4147 = vst.msk [vmem:[#allocation2 + $0x10] sm:$0xff] %vm4144_vm8, %v3957_v47  ;;  %2434 = vrot.lane.b32.xlu1 %v12249_v26, %s11901_s22  ;;  %v12397_v47 = vpack.c.bf16 %v10528_v43, %v10527_v42 }
  0xc1   : > { %2432 = vrot.lane.b32.xlu0 %v12253_v27, %s11901_s22 }
  0xc2   : > { %v881_v52 = vpop.permute.xlu1 %880 }
  0xc3   : > { %1069 = vst.msk [vmem:[#allocation2 + $0x20] sm:$0xff] %vm1064_vm2, %v881_v52  ;;  %v4470_v56 = vpop.permute.xlu0 %4469 }
  0xc4   : > { %4660 = vst.msk [vmem:[#allocation2 + $0x10] sm:$0xff] %vm4657_vm9, %v4470_v56  ;;  %2947 = vrot.lane.b32.xlu1 %v12275_v39, %s11902_s23  ;;  %v10658_v56 = vld [vmem:[%s11978_s18 + $0x15a] sm:$0xff] }
  0xc5   : > { %2945 = vrot.lane.b32.xlu0 %v12264_v33, %s11902_s23 }
  0xc6   : > { %v883_v63 = vpop.permute.xlu1 %882 }
  0xc7   : > { %1070 = vst.msk [vmem:[#allocation2 + $0x28] sm:$0xff] %vm1064_vm2, %v883_v63  ;;  %v4472_v3 = vpop.permute.xlu0 %4471 }
  0xc8   : > { %4661 = vst.msk [vmem:[#allocation2 + $0x18] sm:$0xff] %vm4657_vm9, %v4472_v3  ;;  %3461 = vrot.lane.b32.xlu1 %v3322_v57, %s11903_s24 }
  0xc9   : > { %3459 = vrot.lane.b32.xlu0 %v3321_v59, %s11903_s24 }
  0xca   : > { %v1396_v6 = vpop.permute.xlu1 %1395 }
  0xcb   : > { %1583 = vst.msk [vmem:[#allocation2 + $0x28] sm:$0xff] %vm1577_vm3, %v1396_v6  ;;  %v1394_v9 = vpop.permute.xlu0 %1393  ;;  %v4724_v10 = vld [vmem:[#allocation2 + $0x10] sm:$0xff]  ;;  %v391_v6 = vld [vmem:[%s11978_s18 + $0x140] sm:$0xff] }
  0xcc   : > { %1582 = vst.msk [vmem:[#allocation2 + $0x20] sm:$0xff] %vm1577_vm3, %v1394_v9  ;;  %11357 = vmatprep.mubr.msk.bf16.mxu0 %vm4822_vm10, %v4724_v10  ;;  %3974 = vrot.lane.b32.xlu1 %v12321_v4, %s11904_s29  ;;  %v10403_v9 = vld [vmem:[%s11978_s18 + $0x168] sm:$0xff]  ;;  %v10404_v10 = vld [vmem:[%s11978_s18 + $0x170] sm:$0xff] }
  0xcd   : > { %3972 = vrot.lane.b32.xlu0 %v12325_v5, %s11904_s29 }
  0xce   : > { %v1910_v12 = vpop.permute.xlu1 %1909 }
  0xcf   : > { %2097 = vst.msk [vmem:[#allocation2 + $0x28] sm:$0xff] %vm2091_vm4, %v1910_v12  ;;  %v1908_v15 = vpop.permute.xlu0 %1907  ;;  %v4725_v16 = vld [vmem:[#allocation2 + $0x18] sm:$0xff] }
  0xd0   : > { %2096 = vst.msk [vmem:[#allocation2 + $0x20] sm:$0xff] %vm2091_vm4, %v1908_v15  ;;  %11358 = vmatmul.mubr.msk.bf16.gmra.mrb[4].mxu0 %vm4822_vm10, %v4725_v16  ;;  %896 = vrot.lane.b32.xlu1 %v12253_v27, %s11899_s20  ;;  %v10402_v27 = vld [vmem:[%s11978_s18 + $0x158] sm:$0xff]  ;;  %v3325_v15 = vpack.c.bf16 %v10404_v10, %v10403_v9  ;;  %v10534_v16 = vld [vmem:[%s11978_s18 + $0x181] sm:$0xff] }
  0xd1   : > { %4485 = vrot.lane.b32.xlu0 %v12336_v11, %s11905_s25 }
  0xd2   : > { %v2423_v18 = vpop.permute.xlu1 %2422 }
  0xd3   : > { %2610 = vst.msk [vmem:[#allocation2 + $0x28] sm:$0xff] %vm2604_vm5, %v2423_v18  ;;  %v2421_v19 = vpop.permute.xlu0 %2420  ;;  %v394_v18 = vld [vmem:[%s11978_s18 + $0x158] sm:$0xff] }
  0xd4   : > { %2609 = vst.msk [vmem:[#allocation2 + $0x20] sm:$0xff] %vm2604_vm5, %v2421_v19  ;;  %898 = vrot.lane.b32.xlu1 %v12249_v26, %s11899_s20  ;;  %v10401_v26 = vld [vmem:[%s11978_s18 + $0x150] sm:$0xff] }
  0xd5   : > { %4487 = vrot.lane.b32.xlu0 %v12347_v17, %s11905_s25  ;;  %v3324_v35 = vpack.c.bf16 %v10402_v27, %v10401_v26  ;;  %v10659_v27 = vld [vmem:[%s11978_s18 + $0x16a] sm:$0xff] }
  0xd6   : > { %v2936_v20 = vpop.permute.xlu1 %2935 }
  0xd7   : > { %3123 = vst.msk [vmem:[#allocation2 + $0x28] sm:$0xff] %vm3117_vm6, %v2936_v20  ;;  %v2934_v21 = vpop.permute.xlu0 %2933  ;;  %v10531_v20 = vld [vmem:[%s11978_s18 + $0x169] sm:$0xff] }
  0xd8   : > { %3122 = vst.msk [vmem:[#allocation2 + $0x20] sm:$0xff] %vm3117_vm6, %v2934_v21  ;;  %1411 = vrot.lane.b32.xlu1 %v12275_v39, %s11898_s19  ;;  %v389_v39 = vld [vmem:[%s11978_s18 + $0x128] sm:$0xff]  ;;  %v10532_v21 = vld [vmem:[%s11978_s18 + $0x171] sm:$0xff] }
  0xd9   : > { %1409 = vrot.lane.b32.xlu0 %v12264_v33, %s11898_s19  ;;  %v501_v33 = vpack.c.bf16 %v388_v29, %v387_v28  ;;  %v502_v44 = vpack.c.bf16 %v390_v40, %v389_v39  ;;  %v10660_v28 = vld [vmem:[%s11978_s18 + $0x172] sm:$0xff] }
  0xda   : > { %v3450_v22 = vpop.permute.xlu1 %3449  ;;  %v12480_v31 = vpack.c.bf16 %v10660_v28, %v10659_v27  ;;  %v399_v27 = vld [vmem:[%s11978_s18 + $0x190] sm:$0xff]  ;;  %v400_v28 = vld [vmem:[%s11978_s18 + $0x198] sm:$0xff] }
  0xdb   : > { %3637 = vst.msk [vmem:[#allocation2 + $0x28] sm:$0xff] %vm3631_vm7, %v3450_v22  ;;  %v3448_v23 = vpop.permute.xlu0 %3447 }
  0xdc   : > { %3636 = vst.msk [vmem:[#allocation2 + $0x20] sm:$0xff] %vm3631_vm7, %v3448_v23  ;;  %1925 = vrot.lane.b32.xlu1 %v3322_v57, %s11900_s21 }
  0xdd   : > { %1923 = vrot.lane.b32.xlu0 %v3321_v59, %s11900_s21  ;;  %566 = vst.msk [vmem:[#allocation2 + $0x70] sm:$0xff] %vm551_vm0, %v501_v33  ;;  %567 = vst.msk [vmem:[#allocation2 + $0x78] sm:$0xff] %vm551_vm0, %v502_v44  ;;  %v12419_v59 = vpack.c.bf16 %v10658_v56, %v10657_v55  ;;  %v10661_v33 = vld [vmem:[%s11978_s18 + $0x17a] sm:$0xff] }
  0xde   : > { %v3963_v24 = vpop.permute.xlu1 %3962  ;;  %v10537_v56 = vld [vmem:[%s11978_s18 + $0x1a1] sm:$0xff] }
  0xdf   : > { %4150 = vst.msk [vmem:[#allocation2 + $0x28] sm:$0xff] %vm4144_vm8, %v3963_v24  ;;  %v3961_v25 = vpop.permute.xlu0 %3960  ;;  %v12465_v24 = vpack.c.bf16 %v10534_v16, %v10533_v14 }
  0xe0   : > { %4149 = vst.msk [vmem:[#allocation2 + $0x20] sm:$0xff] %vm4144_vm8, %v3961_v25  ;;  %2438 = vrot.lane.b32.xlu1 %v12321_v4, %s11901_s22  ;;  %v12469_v25 = vpack.c.bf16 %v10532_v21, %v10531_v20  ;;  %v11906_v20 = vmov 0.0  }
  0xe1   : > { %2436 = vrot.lane.b32.xlu0 %v12325_v5, %s11901_s22  ;;  %6379 = vst.msk [vmem:[#allocation4 + $0x8] sm:$0xff] %vm5962_vm11, %v11906_v20  ;;  %6380 = vst.msk [vmem:[#allocation4 + $0x10] sm:$0xff] %vm5962_vm11, %v11906_v20 }
  0xe2   : > { %v885_v30 = vpop.permute.xlu1 %884  ;;  %6378 = vst.msk [vmem:[#allocation4] sm:$0xff] %vm5962_vm11, %v11906_v20  ;;  %6381 = vst.msk [vmem:[#allocation4 + $0x18] sm:$0xff] %vm5962_vm11, %v11906_v20 }
  0xe3   : > { %1071 = vst.msk [vmem:[#allocation2 + $0x30] sm:$0xff] %vm1064_vm2, %v885_v30  ;;  %v4474_v34 = vpop.permute.xlu0 %4473  ;;  %8366 = vst [vmem:[#allocation7] sm:$0xff] %v11906_v20 }
  0xe4   : > { %4662 = vst.msk [vmem:[#allocation2 + $0x20] sm:$0xff] %vm4657_vm9, %v4474_v34  ;;  %2951 = vrot.lane.b32.xlu1 %v12347_v17, %s11902_s23  ;;  %v10662_v34 = vld [vmem:[%s11978_s18 + $0x182] sm:$0xff]  ;;  %8367 = vst [vmem:[#allocation7 + $0x8] sm:$0xff] %v11906_v20 }
  0xe5   : > { %2949 = vrot.lane.b32.xlu0 %v12336_v11, %s11902_s23  ;;  %6383 = vst.msk [vmem:[#allocation4 + $0x220] sm:$0xff] %vm5962_vm11, %v11906_v20  ;;  %6384 = vst.msk [vmem:[#allocation4 + $0x228] sm:$0xff] %vm5962_vm11, %v11906_v20 }
  0xe6   : > { %v887_v41 = vpop.permute.xlu1 %886  ;;  %6385 = vst.msk [vmem:[#allocation4 + $0x230] sm:$0xff] %vm5962_vm11, %v11906_v20  ;;  %6386 = vst.msk [vmem:[#allocation4 + $0x238] sm:$0xff] %vm5962_vm11, %v11906_v20 }
  0xe7   : > { %1072 = vst.msk [vmem:[#allocation2 + $0x38] sm:$0xff] %vm1064_vm2, %v887_v41  ;;  %v4476_v45 = vpop.permute.xlu0 %4475  ;;  %8368 = vst [vmem:[#allocation7 + $0x10] sm:$0xff] %v11906_v20 }
  0xe8   : > { %4663 = vst.msk [vmem:[#allocation2 + $0x28] sm:$0xff] %vm4657_vm9, %v4476_v45  ;;  %3465 = vrot.lane.b32.xlu1 %v3324_v35, %s11903_s24  ;;  %8370 = vst [vmem:[#allocation7 + $0xd8] sm:$0xff] %v11906_v20 }
  0xe9   : > { %3463 = vrot.lane.b32.xlu0 %v3323_v37, %s11903_s24  ;;  %6388 = vst.msk [vmem:[#allocation4 + $0x20] sm:$0xff] %vm5962_vm11, %v11906_v20  ;;  %6389 = vst.msk [vmem:[#allocation4 + $0x40] sm:$0xff] %vm5962_vm11, %v11906_v20 }
  0xea   : > { %v1400_v48 = vpop.permute.xlu1 %1399  ;;  %6390 = vst.msk [vmem:[#allocation4 + $0x60] sm:$0xff] %vm5962_vm11, %v11906_v20  ;;  %6391 = vst.msk [vmem:[#allocation4 + $0x80] sm:$0xff] %vm5962_vm11, %v11906_v20 }
  0xeb   : > { %1585 = vst.msk [vmem:[#allocation2 + $0x38] sm:$0xff] %vm1577_vm3, %v1400_v48  ;;  %v1398_v51 = vpop.permute.xlu0 %1397  ;;  %v4726_v52 = vld [vmem:[#allocation2 + $0x20] sm:$0xff]  ;;  %v395_v48 = vld [vmem:[%s11978_s18 + $0x168] sm:$0xff]  ;;  %8371 = vst [vmem:[#allocation7 + $0xe0] sm:$0xff] %v11906_v20 }
  0xec   : > { %1584 = vst.msk [vmem:[#allocation2 + $0x30] sm:$0xff] %vm1577_vm3, %v1398_v51  ;;  %11361 = vmatprep.mubr.msk.bf16.mxu0 %vm4822_vm10, %v4726_v52  ;;  %3978 = vrot.lane.b32.xlu1 %v12393_v46, %s11904_s29  ;;  %v10407_v51 = vld [vmem:[%s11978_s18 + $0x190] sm:$0xff]  ;;  %v10408_v52 = vld [vmem:[%s11978_s18 + $0x198] sm:$0xff]  ;;  %8372 = vst [vmem:[#allocation7 + $0xe8] sm:$0xff] %v11906_v20 }
  0xed   : > { %3976 = vrot.lane.b32.xlu0 %v12397_v47, %s11904_s29  ;;  %6392 = vst.msk [vmem:[#allocation4 + $0xa0] sm:$0xff] %vm5962_vm11, %v11906_v20  ;;  %6393 = vst.msk [vmem:[#allocation4 + $0xc0] sm:$0xff] %vm5962_vm11, %v11906_v20 }
  0xee   : > { %v1914_v54 = vpop.permute.xlu1 %1913  ;;  %6394 = vst.msk [vmem:[#allocation4 + $0xe0] sm:$0xff] %vm5962_vm11, %v11906_v20  ;;  %6395 = vst.msk [vmem:[#allocation4 + $0x100] sm:$0xff] %vm5962_vm11, %v11906_v20 }
  0xef   : > { %2099 = vst.msk [vmem:[#allocation2 + $0x38] sm:$0xff] %vm2091_vm4, %v1914_v54  ;;  %v1912_v57 = vpop.permute.xlu0 %1911  ;;  %v4727_v58 = vld [vmem:[#allocation2 + $0x28] sm:$0xff]  ;;  %8374 = vst [vmem:[#allocation7 + $0x18] sm:$0xff] %v11906_v20 }
  0xf0   : > { %2098 = vst.msk [vmem:[#allocation2 + $0x30] sm:$0xff] %vm2091_vm4, %v1912_v57  ;;  %11362 = vmatmul.mubr.msk.bf16.gmra.mrb[8].mxu0 %vm4822_vm10, %v4727_v58  ;;  %900 = vrot.lane.b32.xlu1 %v12325_v5, %s11899_s20  ;;  %v10406_v5 = vld [vmem:[%s11978_s18 + $0x180] sm:$0xff]  ;;  %v12531_v57 = vpack.c.bf16 %v10408_v52, %v10407_v51  ;;  %v10538_v58 = vld [vmem:[%s11978_s18 + $0x1a9] sm:$0xff]  ;;  %8375 = vst [vmem:[#allocation7 + $0x30] sm:$0xff] %v11906_v20 }
  0xf1   : > { %4489 = vrot.lane.b32.xlu0 %v12408_v53, %s11905_s25  ;;  %6396 = vst.msk [vmem:[#allocation4 + $0x120] sm:$0xff] %vm5962_vm11, %v11906_v20  ;;  %6397 = vst.msk [vmem:[#allocation4 + $0x140] sm:$0xff] %vm5962_vm11, %v11906_v20 }
  0xf2   : > { %v2427_v60 = vpop.permute.xlu1 %2426  ;;  %6398 = vst.msk [vmem:[#allocation4 + $0x160] sm:$0xff] %vm5962_vm11, %v11906_v20  ;;  %6399 = vst.msk [vmem:[#allocation4 + $0x180] sm:$0xff] %vm5962_vm11, %v11906_v20 }
  0xf3   : > { %2612 = vst.msk [vmem:[#allocation2 + $0x38] sm:$0xff] %vm2604_vm5, %v2427_v60  ;;  %v2425_v61 = vpop.permute.xlu0 %2424  ;;  %v398_v60 = vld [vmem:[%s11978_s18 + $0x180] sm:$0xff]  ;;  %8376 = vst [vmem:[#allocation7 + $0x48] sm:$0xff] %v11906_v20 }
  0xf4   : > { %2611 = vst.msk [vmem:[#allocation2 + $0x30] sm:$0xff] %vm2604_vm5, %v2425_v61  ;;  %902 = vrot.lane.b32.xlu1 %v12321_v4, %s11899_s20  ;;  %v10405_v4 = vld [vmem:[%s11978_s18 + $0x178] sm:$0xff]  ;;  %8377 = vst [vmem:[#allocation7 + $0x60] sm:$0xff] %v11906_v20 }
  0xf5   : > { %4491 = vrot.lane.b32.xlu0 %v12419_v59, %s11905_s25  ;;  %v3326_v13 = vpack.c.bf16 %v10406_v5, %v10405_v4  ;;  %v10663_v5 = vld [vmem:[%s11978_s18 + $0x192] sm:$0xff]  ;;  %6400 = vst.msk [vmem:[#allocation4 + $0x1a0] sm:$0xff] %vm5962_vm11, %v11906_v20  ;;  %6401 = vst.msk [vmem:[#allocation4 + $0x1c0] sm:$0xff] %vm5962_vm11, %v11906_v20 }
  0xf6   : > { %v2940_v62 = vpop.permute.xlu1 %2939  ;;  %6402 = vst.msk [vmem:[#allocation4 + $0x1e0] sm:$0xff] %vm5962_vm11, %v11906_v20  ;;  %6403 = vst.msk [vmem:[#allocation4 + $0x200] sm:$0xff] %vm5962_vm11, %v11906_v20 }
  0xf7   : > { %3125 = vst.msk [vmem:[#allocation2 + $0x38] sm:$0xff] %vm3117_vm6, %v2940_v62  ;;  %v2938_v63 = vpop.permute.xlu0 %2937  ;;  %v10535_v62 = vld [vmem:[%s11978_s18 + $0x191] sm:$0xff]  ;;  %8378 = vst [vmem:[#allocation7 + $0x78] sm:$0xff] %v11906_v20 }
  0xf8   : > { %3124 = vst.msk [vmem:[#allocation2 + $0x30] sm:$0xff] %vm3117_vm6, %v2938_v63  ;;  %1415 = vrot.lane.b32.xlu1 %v12347_v17, %s11898_s19  ;;  %v393_v17 = vld [vmem:[%s11978_s18 + $0x150] sm:$0xff]  ;;  %v10536_v63 = vld [vmem:[%s11978_s18 + $0x199] sm:$0xff]  ;;  %8379 = vst [vmem:[#allocation7 + $0x90] sm:$0xff] %v11906_v20 }
  0xf9   : > { %1413 = vrot.lane.b32.xlu0 %v12336_v11, %s11898_s19  ;;  %v503_v11 = vpack.c.bf16 %v392_v7, %v391_v6  ;;  %v504_v22 = vpack.c.bf16 %v394_v18, %v393_v17  ;;  %v10664_v6 = vld [vmem:[%s11978_s18 + $0x19a] sm:$0xff]  ;;  %6404 = vst.msk [vmem:[#allocation4 + $0x38] sm:$0xff] %vm5962_vm11, %v11906_v20  ;;  %6405 = vst.msk [vmem:[#allocation4 + $0x58] sm:$0xff] %vm5962_vm11, %v11906_v20 }
  0xfa   : > { %v3454_v0 = vpop.permute.xlu1 %3453  ;;  %v12558_v9 = vpack.c.bf16 %v10664_v6, %v10663_v5  ;;  %6406 = vst.msk [vmem:[#allocation4 + $0x78] sm:$0xff] %vm5962_vm11, %v11906_v20  ;;  %6407 = vst.msk [vmem:[#allocation4 + $0x98] sm:$0xff] %vm5962_vm11, %v11906_v20  ;;  %v403_v5 = vld [vmem:[%s11978_s18 + $0x1b8] sm:$0xff]  ;;  %v404_v6 = vld [vmem:[%s11978_s18 + $0x1c0] sm:$0xff] }
  0xfb   : > { %3639 = vst.msk [vmem:[#allocation2 + $0x38] sm:$0xff] %vm3631_vm7, %v3454_v0  ;;  %v3452_v1 = vpop.permute.xlu0 %3451  ;;  %8380 = vst [vmem:[#allocation7 + $0xa8] sm:$0xff] %v11906_v20 }
  0xfc   : > { %3638 = vst.msk [vmem:[#allocation2 + $0x30] sm:$0xff] %vm3631_vm7, %v3452_v1  ;;  %1929 = vrot.lane.b32.xlu1 %v3324_v35, %s11900_s21  ;;  %8381 = vst [vmem:[#allocation7 + $0xc0] sm:$0xff] %v11906_v20 }
  0xfd   : > { %1927 = vrot.lane.b32.xlu0 %v3323_v37, %s11900_s21  ;;  %568 = vst.msk [vmem:[#allocation2 + $0x80] sm:$0xff] %vm551_vm0, %v503_v11  ;;  %569 = vst.msk [vmem:[#allocation2 + $0x88] sm:$0xff] %vm551_vm0, %v504_v22  ;;  %v12491_v37 = vpack.c.bf16 %v10662_v34, %v10661_v33  ;;  %v10665_v11 = vld [vmem:[%s11978_s18 + $0x1a2] sm:$0xff] }
  0xfe   : > { %v3967_v2 = vpop.permute.xlu1 %3966  ;;  %6408 = vst.msk [vmem:[#allocation4 + $0xb8] sm:$0xff] %vm5962_vm11, %v11906_v20  ;;  %6409 = vst.msk [vmem:[#allocation4 + $0xd8] sm:$0xff] %vm5962_vm11, %v11906_v20 }
  0xff   : > { %4152 = vst.msk [vmem:[#allocation2 + $0x38] sm:$0xff] %vm4144_vm8, %v3967_v2  ;;  %v3965_v3 = vpop.permute.xlu0 %3964  ;;  %v12542_v2 = vpack.c.bf16 %v10538_v58, %v10537_v56  ;;  %8382 = vst [vmem:[#allocation7 + $0x28] sm:$0xff] %v11906_v20 }
 0x100   : > { %4151 = vst.msk [vmem:[#allocation2 + $0x30] sm:$0xff] %vm4144_vm8, %v3965_v3  ;;  %2442 = vrot.lane.b32.xlu1 %v12393_v46, %s11901_s22  ;;  %v12547_v3 = vpack.c.bf16 %v10536_v63, %v10535_v62  ;;  %8383 = vst [vmem:[#allocation7 + $0x40] sm:$0xff] %v11906_v20 }
 0x101   : > { %2440 = vrot.lane.b32.xlu0 %v12397_v47, %s11901_s22  ;;  %6410 = vst.msk [vmem:[#allocation4 + $0xf8] sm:$0xff] %vm5962_vm11, %v11906_v20  ;;  %6411 = vst.msk [vmem:[#allocation4 + $0x118] sm:$0xff] %vm5962_vm11, %v11906_v20 }
 0x102   : > { %v889_v8 = vpop.permute.xlu1 %888  ;;  %6412 = vst.msk [vmem:[#allocation4 + $0x138] sm:$0xff] %vm5962_vm11, %v11906_v20  ;;  %6413 = vst.msk [vmem:[#allocation4 + $0x158] sm:$0xff] %vm5962_vm11, %v11906_v20 }
 0x103   : > { %1073 = vst.msk [vmem:[#allocation2 + $0x40] sm:$0xff] %vm1064_vm2, %v889_v8  ;;  %v4478_v12 = vpop.permute.xlu0 %4477  ;;  %8384 = vst [vmem:[#allocation7 + $0x58] sm:$0xff] %v11906_v20 }
 0x104   : > { %4664 = vst.msk [vmem:[#allocation2 + $0x30] sm:$0xff] %vm4657_vm9, %v4478_v12  ;;  %2955 = vrot.lane.b32.xlu1 %v12419_v59, %s11902_s23  ;;  %v10666_v12 = vld [vmem:[%s11978_s18 + $0x1aa] sm:$0xff]  ;;  %8385 = vst [vmem:[#allocation7 + $0x70] sm:$0xff] %v11906_v20 }
 0x105   : > { %2953 = vrot.lane.b32.xlu0 %v12408_v53, %s11902_s23  ;;  %6414 = vst.msk [vmem:[#allocation4 + $0x178] sm:$0xff] %vm5962_vm11, %v11906_v20  ;;  %6415 = vst.msk [vmem:[#allocation4 + $0x198] sm:$0xff] %vm5962_vm11, %v11906_v20 }
 0x106   : > { %v891_v19 = vpop.permute.xlu1 %890  ;;  %6416 = vst.msk [vmem:[#allocation4 + $0x1b8] sm:$0xff] %vm5962_vm11, %v11906_v20  ;;  %6417 = vst.msk [vmem:[#allocation4 + $0x1d8] sm:$0xff] %vm5962_vm11, %v11906_v20 }
 0x107   : > { %1074 = vst.msk [vmem:[#allocation2 + $0x48] sm:$0xff] %vm1064_vm2, %v891_v19  ;;  %v4480_v23 = vpop.permute.xlu0 %4479  ;;  %8386 = vst [vmem:[#allocation7 + $0x88] sm:$0xff] %v11906_v20 }
 0x108   : > { %4665 = vst.msk [vmem:[#allocation2 + $0x38] sm:$0xff] %vm4657_vm9, %v4480_v23  ;;  %3469 = vrot.lane.b32.xlu1 %v3326_v13, %s11903_s24  ;;  %8387 = vst [vmem:[#allocation7 + $0xa0] sm:$0xff] %v11906_v20 }
 0x109   : > { %3467 = vrot.lane.b32.xlu0 %v3325_v15, %s11903_s24  ;;  %6418 = vst.msk [vmem:[#allocation4 + $0x1f8] sm:$0xff] %vm5962_vm11, %v11906_v20  ;;  %6419 = vst.msk [vmem:[#allocation4 + $0x218] sm:$0xff] %vm5962_vm11, %v11906_v20 }
 0x10a   : > { %v1404_v26 = vpop.permute.xlu1 %1403  ;;  %8388 = vst [vmem:[#allocation7 + $0xb8] sm:$0xff] %v11906_v20  ;;  %8389 = vst [vmem:[#allocation7 + $0xd0] sm:$0xff] %v11906_v20  ;;  %v10544_v20 = vld [vmem:[%s11978_s18 + $0x1e9] sm:$0xff] }
 0x10b   : > { %1587 = vst.msk [vmem:[#allocation2 + $0x48] sm:$0xff] %vm1577_vm3, %v1404_v26  ;;  %v1402_v29 = vpop.permute.xlu0 %1401  ;;  %v4728_v30 = vld [vmem:[#allocation2 + $0x30] sm:$0xff] }
 0x10c   : > { %1586 = vst.msk [vmem:[#allocation2 + $0x40] sm:$0xff] %vm1577_vm3, %v1402_v29  ;;  %11365 = vmatprep.mubr.msk.bf16.mxu0 %vm4822_vm10, %v4728_v30  ;;  %3982 = vrot.lane.b32.xlu1 %v12465_v24, %s11904_s29  ;;  %v10414_v26 = vld [vmem:[%s11978_s18 + $0x1d0] sm:$0xff]  ;;  %v10411_v30 = vld [vmem:[%s11978_s18 + $0x1b8] sm:$0xff] }
 0x10d   : > { %3980 = vrot.lane.b32.xlu0 %v12469_v25, %s11904_s29 }
 0x10e   : > { %v1918_v32 = vpop.permute.xlu1 %1917 }
 0x10f   : > { %2101 = vst.msk [vmem:[#allocation2 + $0x48] sm:$0xff] %vm2091_vm4, %v1918_v32  ;;  %v1916_v35 = vpop.permute.xlu0 %1915  ;;  %v4729_v36 = vld [vmem:[#allocation2 + $0x38] sm:$0xff]  ;;  %v507_v32 = vpack.c.bf16 %v400_v28, %v399_v27  ;;  %v10672_v27 = vld [vmem:[%s11978_s18 + $0x1ea] sm:$0xff] }
 0x110   : > { %2100 = vst.msk [vmem:[#allocation2 + $0x40] sm:$0xff] %vm2091_vm4, %v1916_v35  ;;  %11366 = vmatmul.mubr.msk.bf16.gmra.mrb[12].mxu0 %vm4822_vm10, %v4729_v36  ;;  %904 = vrot.lane.b32.xlu1 %v12397_v47, %s11899_s20  ;;  %v10410_v47 = vld [vmem:[%s11978_s18 + $0x1a8] sm:$0xff] }
 0x111   : > { %4493 = vrot.lane.b32.xlu0 %v12480_v31, %s11905_s25  ;;  %v10541_v35 = vld [vmem:[%s11978_s18 + $0x1c9] sm:$0xff]  ;;  %572 = vst.msk [vmem:[#allocation2 + $0xa0] sm:$0xff] %vm551_vm0, %v507_v32  ;;  %v10673_v32 = vld [vmem:[%s11978_s18 + $0x1f2] sm:$0xff] }
 0x112   : > { %v2431_v38 = vpop.permute.xlu1 %2430 }
 0x113   : > { %2614 = vst.msk [vmem:[#allocation2 + $0x48] sm:$0xff] %vm2604_vm5, %v2431_v38  ;;  %v2429_v39 = vpop.permute.xlu0 %2428  ;;  %v401_v38 = vld [vmem:[%s11978_s18 + $0x1a0] sm:$0xff] }
 0x114   : > { %2613 = vst.msk [vmem:[#allocation2 + $0x40] sm:$0xff] %vm2604_vm5, %v2429_v39  ;;  %906 = vrot.lane.b32.xlu1 %v12393_v46, %s11899_s20  ;;  %v10409_v46 = vld [vmem:[%s11978_s18 + $0x1a0] sm:$0xff]  ;;  %v402_v39 = vld [vmem:[%s11978_s18 + $0x1a8] sm:$0xff] }
 0x115   : > { %4495 = vrot.lane.b32.xlu0 %v12491_v37, %s11905_s25  ;;  %v12525_v55 = vpack.c.bf16 %v10410_v47, %v10409_v46 }
 0x116   : > { %v2944_v40 = vpop.permute.xlu1 %2943 }
 0x117   : > { %3127 = vst.msk [vmem:[#allocation2 + $0x48] sm:$0xff] %vm3117_vm6, %v2944_v40  ;;  %v2942_v41 = vpop.permute.xlu0 %2941 }
 0x118   : > { %3126 = vst.msk [vmem:[#allocation2 + $0x40] sm:$0xff] %vm3117_vm6, %v2942_v41  ;;  %1419 = vrot.lane.b32.xlu1 %v12419_v59, %s11898_s19  ;;  %v397_v59 = vld [vmem:[%s11978_s18 + $0x178] sm:$0xff] }
 0x119   : > { %1417 = vrot.lane.b32.xlu0 %v12408_v53, %s11898_s19  ;;  %v505_v53 = vpack.c.bf16 %v396_v49, %v395_v48  ;;  %v506_v0 = vpack.c.bf16 %v398_v60, %v397_v59  ;;  %v10539_v41 = vld [vmem:[%s11978_s18 + $0x1b9] sm:$0xff]  ;;  %v10668_v49 = vld [vmem:[%s11978_s18 + $0x1c2] sm:$0xff] }
 0x11a   : > { %v3458_v42 = vpop.permute.xlu1 %3457  ;;  %v10667_v48 = vld [vmem:[%s11978_s18 + $0x1ba] sm:$0xff] }
 0x11b   : > { %3641 = vst.msk [vmem:[#allocation2 + $0x48] sm:$0xff] %vm3631_vm7, %v3458_v42  ;;  %v3456_v43 = vpop.permute.xlu0 %3455  ;;  %v10540_v42 = vld [vmem:[%s11978_s18 + $0x1c1] sm:$0xff]  ;;  %v12672_v52 = vpack.c.bf16 %v10668_v49, %v10667_v48 }
 0x11c   : > { %3640 = vst.msk [vmem:[#allocation2 + $0x40] sm:$0xff] %vm3631_vm7, %v3456_v43  ;;  %1933 = vrot.lane.b32.xlu1 %v3326_v13, %s11900_s21  ;;  %v508_v43 = vpack.c.bf16 %v402_v39, %v401_v38  ;;  %v12661_v46 = vpack.c.bf16 %v10540_v42, %v10539_v41  ;;  %v408_v48 = vld [vmem:[%s11978_s18 + $0x1e8] sm:$0xff] }
 0x11d   : > { %1931 = vrot.lane.b32.xlu0 %v3325_v15, %s11900_s21  ;;  %570 = vst.msk [vmem:[#allocation2 + $0x90] sm:$0xff] %vm551_vm0, %v505_v53  ;;  %571 = vst.msk [vmem:[#allocation2 + $0x98] sm:$0xff] %vm551_vm0, %v506_v0  ;;  %v12569_v15 = vpack.c.bf16 %v10666_v12, %v10665_v11 }
 0x11e   : > { %v3971_v44 = vpop.permute.xlu1 %3970  ;;  %573 = vst.msk [vmem:[#allocation2 + $0xa8] sm:$0xff] %vm551_vm0, %v508_v43 }
 0x11f   : > { %4154 = vst.msk [vmem:[#allocation2 + $0x48] sm:$0xff] %vm4144_vm8, %v3971_v44  ;;  %v3969_v45 = vpop.permute.xlu0 %3968 }
 0x120   : > { %4153 = vst.msk [vmem:[#allocation2 + $0x40] sm:$0xff] %vm4144_vm8, %v3969_v45  ;;  %2446 = vrot.lane.b32.xlu1 %v12465_v24, %s11901_s22 }
 0x121   : > { %2444 = vrot.lane.b32.xlu0 %v12469_v25, %s11901_s22 }
 0x122   : > { %v893_v50 = vpop.permute.xlu1 %892 }
 0x123   : > { %1075 = vst.msk [vmem:[#allocation2 + $0x50] sm:$0xff] %vm1064_vm2, %v893_v50  ;;  %v4482_v54 = vpop.permute.xlu0 %4481 }
 0x124   : > { %4666 = vst.msk [vmem:[#allocation2 + $0x40] sm:$0xff] %vm4657_vm9, %v4482_v54  ;;  %2959 = vrot.lane.b32.xlu1 %v12491_v37, %s11902_s23  ;;  %v10669_v54 = vld [vmem:[%s11978_s18 + $0x1ca] sm:$0xff] }
 0x125   : > { %2957 = vrot.lane.b32.xlu0 %v12480_v31, %s11902_s23 }
 0x126   : > { %v895_v61 = vpop.permute.xlu1 %894 }
 0x127   : > { %1076 = vst.msk [vmem:[#allocation2 + $0x58] sm:$0xff] %vm1064_vm2, %v895_v61  ;;  %v4484_v1 = vpop.permute.xlu0 %4483 }
 0x128   : > { %4667 = vst.msk [vmem:[#allocation2 + $0x48] sm:$0xff] %vm4657_vm9, %v4484_v1  ;;  %3473 = vrot.lane.b32.xlu1 %v12525_v55, %s11903_s24 }
 0x129   : > { %3471 = vrot.lane.b32.xlu0 %v12531_v57, %s11903_s24 }
 0x12a   : > { %v1408_v4 = vpop.permute.xlu1 %1407 }
 0x12b   : > { %1589 = vst.msk [vmem:[#allocation2 + $0x58] sm:$0xff] %vm1577_vm3, %v1408_v4  ;;  %v1406_v7 = vpop.permute.xlu0 %1405  ;;  %v4730_v8 = vld [vmem:[#allocation2 + $0x40] sm:$0xff]  ;;  %v10418_v4 = vld [vmem:[%s11978_s18 + $0x1f8] sm:$0xff] }
 0x12c   : > { %1588 = vst.msk [vmem:[#allocation2 + $0x50] sm:$0xff] %vm1577_vm3, %v1406_v7  ;;  %11369 = vmatprep.mubr.msk.bf16.mxu0 %vm4822_vm10, %v4730_v8  ;;  %3986 = vrot.lane.b32.xlu1 %v12542_v2, %s11904_s29  ;;  %v10415_v8 = vld [vmem:[%s11978_s18 + $0x1e0] sm:$0xff] }
 0x12d   : > { %3984 = vrot.lane.b32.xlu0 %v12547_v3, %s11904_s29 }
 0x12e   : > { %v1922_v10 = vpop.permute.xlu1 %1921 }
 0x12f   : > { %2103 = vst.msk [vmem:[#allocation2 + $0x58] sm:$0xff] %vm2091_vm4, %v1922_v10  ;;  %v1920_v13 = vpop.permute.xlu0 %1919  ;;  %v4731_v14 = vld [vmem:[#allocation2 + $0x48] sm:$0xff]  ;;  %v509_v10 = vpack.c.bf16 %v404_v6, %v403_v5 }
 0x130   : > { %2102 = vst.msk [vmem:[#allocation2 + $0x50] sm:$0xff] %vm2091_vm4, %v1920_v13  ;;  %11370 = vmatmul.mubr.msk.bf16.gmra.mrb[16].mxu0 %vm4822_vm10, %v4731_v14  ;;  %908 = vrot.lane.b32.xlu1 %v12469_v25, %s11899_s20  ;;  %v10413_v25 = vld [vmem:[%s11978_s18 + $0x1c8] sm:$0xff]  ;;  %v10545_v13 = vld [vmem:[%s11978_s18 + $0x1f1] sm:$0xff] }
 0x131   : > { %4497 = vrot.lane.b32.xlu0 %v12558_v9, %s11905_s25  ;;  %v3330_v34 = vpack.c.bf16 %v10414_v26, %v10413_v25  ;;  %574 = vst.msk [vmem:[#allocation2 + $0xb0] sm:$0xff] %vm551_vm0, %v509_v10  ;;  %v10671_v26 = vld [vmem:[%s11978_s18 + $0x1e2] sm:$0xff] }
 0x132   : > { %v2435_v16 = vpop.permute.xlu1 %2434 }
 0x133   : > { %2616 = vst.msk [vmem:[#allocation2 + $0x58] sm:$0xff] %vm2604_vm5, %v2435_v16  ;;  %v2433_v17 = vpop.permute.xlu0 %2432  ;;  %v405_v16 = vld [vmem:[%s11978_s18 + $0x1c8] sm:$0xff] }
 0x134   : > { %2615 = vst.msk [vmem:[#allocation2 + $0x50] sm:$0xff] %vm2604_vm5, %v2433_v17  ;;  %910 = vrot.lane.b32.xlu1 %v12465_v24, %s11899_s20  ;;  %v406_v17 = vld [vmem:[%s11978_s18 + $0x1d0] sm:$0xff] }
 0x135   : > { %4499 = vrot.lane.b32.xlu0 %v12569_v15, %s11905_s25 }
 0x136   : > { %v2948_v18 = vpop.permute.xlu1 %2947 }
 0x137   : > { %3129 = vst.msk [vmem:[#allocation2 + $0x58] sm:$0xff] %vm3117_vm6, %v2948_v18  ;;  %v2946_v19 = vpop.permute.xlu0 %2945 }
 0x138   : > { %3128 = vst.msk [vmem:[#allocation2 + $0x50] sm:$0xff] %vm3117_vm6, %v2946_v19  ;;  %1423 = vrot.lane.b32.xlu1 %v12491_v37, %s11898_s19  ;;  %v10542_v37 = vld [vmem:[%s11978_s18 + $0x1d1] sm:$0xff]  ;;  %v10543_v19 = vld [vmem:[%s11978_s18 + $0x1e1] sm:$0xff] }
 0x139   : > { %1421 = vrot.lane.b32.xlu0 %v12480_v31, %s11898_s19  ;;  %v10412_v31 = vld [vmem:[%s11978_s18 + $0x1c0] sm:$0xff]  ;;  %v12657_v45 = vpack.c.bf16 %v10542_v37, %v10541_v35 }
 0x13a   : > { %v3462_v21 = vpop.permute.xlu1 %3461  ;;  %v3329_v36 = vpack.c.bf16 %v10412_v31, %v10411_v30  ;;  %v12744_v30 = vpack.c.bf16 %v10672_v27, %v10671_v26 }
 0x13b   : > { %3643 = vst.msk [vmem:[#allocation2 + $0x58] sm:$0xff] %vm3631_vm7, %v3462_v21  ;;  %v3460_v22 = vpop.permute.xlu0 %3459  ;;  %v510_v21 = vpack.c.bf16 %v406_v17, %v405_v16 }
 0x13c   : > { %3642 = vst.msk [vmem:[#allocation2 + $0x50] sm:$0xff] %vm3631_vm7, %v3460_v22  ;;  %1937 = vrot.lane.b32.xlu1 %v12525_v55, %s11900_s21  ;;  %v10670_v55 = vld [vmem:[%s11978_s18 + $0x1d2] sm:$0xff] }
 0x13d   : > { %1935 = vrot.lane.b32.xlu0 %v12531_v57, %s11900_s21  ;;  %v12683_v58 = vpack.c.bf16 %v10670_v55, %v10669_v54  ;;  %575 = vst.msk [vmem:[#allocation2 + $0xb8] sm:$0xff] %vm551_vm0, %v510_v21 }
 0x13e   : > { %v3975_v23 = vpop.permute.xlu1 %3974 }
 0x13f   : > { %4156 = vst.msk [vmem:[#allocation2 + $0x58] sm:$0xff] %vm4144_vm8, %v3975_v23  ;;  %v3973_v24 = vpop.permute.xlu0 %3972 }
 0x140   : > { %4155 = vst.msk [vmem:[#allocation2 + $0x50] sm:$0xff] %vm4144_vm8, %v3973_v24  ;;  %2450 = vrot.lane.b32.xlu1 %v12542_v2, %s11901_s22  ;;  %v12733_v24 = vpack.c.bf16 %v10544_v20, %v10543_v19 }
 0x141   : > { %2448 = vrot.lane.b32.xlu0 %v12547_v3, %s11901_s22 }
 0x142   : > { %v897_v29 = vpop.permute.xlu1 %896 }
 0x143   : > { %1077 = vst.msk [vmem:[#allocation2 + $0x60] sm:$0xff] %vm1064_vm2, %v897_v29  ;;  %v4486_v33 = vpop.permute.xlu0 %4485 }
 0x144   : > { %4668 = vst.msk [vmem:[#allocation2 + $0x50] sm:$0xff] %vm4657_vm9, %v4486_v33  ;;  %2963 = vrot.lane.b32.xlu1 %v12569_v15, %s11902_s23  ;;  %v10674_v33 = vld [vmem:[%s11978_s18 + $0x1fa] sm:$0xff] }
 0x145   : > { %2961 = vrot.lane.b32.xlu0 %v12558_v9, %s11902_s23 }
 0x146   : > { %v899_v40 = vpop.permute.xlu1 %898 }
 0x147   : > { %1078 = vst.msk [vmem:[#allocation2 + $0x68] sm:$0xff] %vm1064_vm2, %v899_v40  ;;  %v4488_v44 = vpop.permute.xlu0 %4487 }
 0x148   : > { %4669 = vst.msk [vmem:[#allocation2 + $0x58] sm:$0xff] %vm4657_vm9, %v4488_v44  ;;  %3477 = vrot.lane.b32.xlu1 %v3330_v34, %s11903_s24 }
 0x149   : > { %3475 = vrot.lane.b32.xlu0 %v3329_v36, %s11903_s24 }
 0x14a   : > { %v1412_v47 = vpop.permute.xlu1 %1411 }
 0x14b   : > { %1591 = vst.msk [vmem:[#allocation2 + $0x68] sm:$0xff] %vm1577_vm3, %v1412_v47  ;;  %v1410_v50 = vpop.permute.xlu0 %1409  ;;  %v4732_v51 = vld [vmem:[#allocation2 + $0x50] sm:$0xff]  ;;  %v407_v47 = vld [vmem:[%s11978_s18 + $0x1e0] sm:$0xff] }
 0x14c   : > { %1590 = vst.msk [vmem:[#allocation2 + $0x60] sm:$0xff] %vm1577_vm3, %v1410_v50  ;;  %11373 = vmatprep.mubr.msk.bf16.mxu0 %vm4822_vm10, %v4732_v51  ;;  %3990 = vrot.lane.b32.xlu1 %v12657_v45, %s11904_s29  ;;  %v10419_v50 = vld [vmem:[%s11978_s18 + $0x208] sm:$0xff]  ;;  %v10420_v51 = vld [vmem:[%s11978_s18 + $0x210] sm:$0xff] }
 0x14d   : > { %3988 = vrot.lane.b32.xlu0 %v12661_v46, %s11904_s29 }
 0x14e   : > { %v1926_v53 = vpop.permute.xlu1 %1925 }
 0x14f   : > { %2105 = vst.msk [vmem:[#allocation2 + $0x68] sm:$0xff] %vm2091_vm4, %v1926_v53  ;;  %v1924_v56 = vpop.permute.xlu0 %1923  ;;  %v4733_v57 = vld [vmem:[#allocation2 + $0x58] sm:$0xff] }
 0x150   : > { %2104 = vst.msk [vmem:[#allocation2 + $0x60] sm:$0xff] %vm2091_vm4, %v1924_v56  ;;  %11374 = vmatmul.mubr.msk.bf16.gmra.mrb[20].mxu0 %vm4822_vm10, %v4733_v57  ;;  %912 = vrot.lane.b32.xlu1 %v12547_v3, %s11899_s20  ;;  %v10417_v3 = vld [vmem:[%s11978_s18 + $0x1f0] sm:$0xff]  ;;  %v10549_v57 = vld [vmem:[%s11978_s18 + $0x219] sm:$0xff] }
 0x151   : > { %4501 = vrot.lane.b32.xlu0 %v12672_v52, %s11905_s25  ;;  %v3332_v12 = vpack.c.bf16 %v10418_v4, %v10417_v3 }
 0x152   : > { %v2439_v59 = vpop.permute.xlu1 %2438 }
 0x153   : > { %2618 = vst.msk [vmem:[#allocation2 + $0x68] sm:$0xff] %vm2604_vm5, %v2439_v59  ;;  %v2437_v60 = vpop.permute.xlu0 %2436  ;;  %v3333_v59 = vpack.c.bf16 %v10420_v51, %v10419_v50 }
 0x154   : > { %2617 = vst.msk [vmem:[#allocation2 + $0x60] sm:$0xff] %vm2604_vm5, %v2437_v60  ;;  %914 = vrot.lane.b32.xlu1 %v12542_v2, %s11899_s20  ;;  %v10550_v60 = vld [vmem:[%s11978_s18 + $0x221] sm:$0xff] }
 0x155   : > { %4503 = vrot.lane.b32.xlu0 %v12683_v58, %s11905_s25  ;;  %v12809_v5 = vpack.c.bf16 %v10550_v60, %v10549_v57 }
 0x156   : > { %v2952_v61 = vpop.permute.xlu1 %2951 }
 0x157   : > { %3131 = vst.msk [vmem:[#allocation2 + $0x68] sm:$0xff] %vm3117_vm6, %v2952_v61  ;;  %v2950_v62 = vpop.permute.xlu0 %2949  ;;  %v409_v61 = vld [vmem:[%s11978_s18 + $0x1f0] sm:$0xff] }
 0x158   : > { %3130 = vst.msk [vmem:[#allocation2 + $0x60] sm:$0xff] %vm3117_vm6, %v2950_v62  ;;  %1427 = vrot.lane.b32.xlu1 %v12569_v15, %s11898_s19  ;;  %v10546_v15 = vld [vmem:[%s11978_s18 + $0x1f9] sm:$0xff] }
 0x159   : > { %1425 = vrot.lane.b32.xlu0 %v12558_v9, %s11898_s19  ;;  %v10416_v9 = vld [vmem:[%s11978_s18 + $0x1e8] sm:$0xff]  ;;  %v12729_v23 = vpack.c.bf16 %v10546_v15, %v10545_v13  ;;  %v410_v62 = vld [vmem:[%s11978_s18 + $0x1f8] sm:$0xff] }
 0x15a   : > { %v3466_v63 = vpop.permute.xlu1 %3465  ;;  %v3331_v14 = vpack.c.bf16 %v10416_v9, %v10415_v8  ;;  %v512_v3 = vpack.c.bf16 %v410_v62, %v409_v61  ;;  %v10675_v8 = vld [vmem:[%s11978_s18 + $0x20a] sm:$0xff]  ;;  %v10676_v9 = vld [vmem:[%s11978_s18 + $0x212] sm:$0xff]  ;;  %v10678_v15 = vld [vmem:[%s11978_s18 + $0x222] sm:$0xff] }
 0x15b   : > { %3645 = vst.msk [vmem:[#allocation2 + $0x68] sm:$0xff] %vm3631_vm7, %v3466_v63  ;;  %v3464_v0 = vpop.permute.xlu0 %3463  ;;  %v10551_v62 = vld [vmem:[%s11978_s18 + $0x231] sm:$0xff] }
 0x15c   : > { %3644 = vst.msk [vmem:[#allocation2 + $0x60] sm:$0xff] %vm3631_vm7, %v3464_v0  ;;  %1941 = vrot.lane.b32.xlu1 %v3330_v34, %s11900_s21 }
 0x15d   : > { %1939 = vrot.lane.b32.xlu0 %v3329_v36, %s11900_s21  ;;  %v12755_v36 = vpack.c.bf16 %v10674_v33, %v10673_v32  ;;  %577 = vst.msk [vmem:[#allocation2 + $0xc8] sm:$0xff] %vm551_vm0, %v512_v3  ;;  %v10425_v32 = vld [vmem:[%s11978_s18 + $0x240] sm:$0xff] }
 0x15e   : > { %v3979_v1 = vpop.permute.xlu1 %3978 }
 0x15f   : > { %4158 = vst.msk [vmem:[#allocation2 + $0x68] sm:$0xff] %vm4144_vm8, %v3979_v1  ;;  %v3977_v2 = vpop.permute.xlu0 %3976  ;;  %v10547_v1 = vld [vmem:[%s11978_s18 + $0x209] sm:$0xff] }
 0x160   : > { %4157 = vst.msk [vmem:[#allocation2 + $0x60] sm:$0xff] %vm4144_vm8, %v3977_v2  ;;  %2454 = vrot.lane.b32.xlu1 %v12657_v45, %s11901_s22  ;;  %v10548_v2 = vld [vmem:[%s11978_s18 + $0x211] sm:$0xff] }
 0x161   : > { %2452 = vrot.lane.b32.xlu0 %v12661_v46, %s11901_s22  ;;  %v12813_v6 = vpack.c.bf16 %v10548_v2, %v10547_v1 }
 0x162   : > { %v901_v7 = vpop.permute.xlu1 %900 }
 0x163   : > { %1079 = vst.msk [vmem:[#allocation2 + $0x70] sm:$0xff] %vm1064_vm2, %v901_v7  ;;  %v4490_v11 = vpop.permute.xlu0 %4489 }
 0x164   : > { %4670 = vst.msk [vmem:[#allocation2 + $0x60] sm:$0xff] %vm4657_vm9, %v4490_v11  ;;  %2967 = vrot.lane.b32.xlu1 %v12683_v58, %s11902_s23 }
 0x165   : > { %2965 = vrot.lane.b32.xlu0 %v12672_v52, %s11902_s23 }
 0x166   : > { %v903_v18 = vpop.permute.xlu1 %902 }
 0x167   : > { %1080 = vst.msk [vmem:[#allocation2 + $0x78] sm:$0xff] %vm1064_vm2, %v903_v18  ;;  %v4492_v22 = vpop.permute.xlu0 %4491 }
 0x168   : > { %4671 = vst.msk [vmem:[#allocation2 + $0x68] sm:$0xff] %vm4657_vm9, %v4492_v22  ;;  %3481 = vrot.lane.b32.xlu1 %v3332_v12, %s11903_s24 }
 0x169   : > { %3479 = vrot.lane.b32.xlu0 %v3331_v14, %s11903_s24 }
 0x16a   : > { %v1416_v25 = vpop.permute.xlu1 %1415 }
 0x16b   : > { %1593 = vst.msk [vmem:[#allocation2 + $0x78] sm:$0xff] %vm1577_vm3, %v1416_v25  ;;  %v1414_v28 = vpop.permute.xlu0 %1413  ;;  %v4734_v29 = vld [vmem:[#allocation2 + $0x60] sm:$0xff] }
 0x16c   : > { %1592 = vst.msk [vmem:[#allocation2 + $0x70] sm:$0xff] %vm1577_vm3, %v1414_v28  ;;  %11377 = vmatprep.mubr.msk.bf16.mxu0 %vm4822_vm10, %v4734_v29  ;;  %3994 = vrot.lane.b32.xlu1 %v12729_v23, %s11904_s29  ;;  %v12863_v28 = vld [vmem:[%s16461_s3] ss:$0 sm:$0xff] }
 0x16d   : > { %3992 = vrot.lane.b32.xlu0 %v12733_v24, %s11904_s29 }
 0x16e   : > { %v1930_v31 = vpop.permute.xlu1 %1929 }
 0x16f   : > { %2107 = vst.msk [vmem:[#allocation2 + $0x78] sm:$0xff] %vm2091_vm4, %v1930_v31  ;;  %v1928_v34 = vpop.permute.xlu0 %1927  ;;  %v4735_v35 = vld [vmem:[#allocation2 + $0x68] sm:$0xff] }
 0x170   : > { %2106 = vst.msk [vmem:[#allocation2 + $0x70] sm:$0xff] %vm2091_vm4, %v1928_v34  ;;  %11378 = vmatmul.mubr.msk.bf16.gmra.mrb[24].mxu0 %vm4822_vm10, %v4735_v35  ;;  %916 = vrot.lane.b32.xlu1 %v12661_v46, %s11899_s20  ;;  %v10422_v46 = vld [vmem:[%s11978_s18 + $0x220] sm:$0xff]  ;;  %v10426_v34 = vld [vmem:[%s11978_s18 + $0x248] sm:$0xff] }
 0x171   : > { %4505 = vrot.lane.b32.xlu0 %v12744_v30, %s11905_s25  ;;  %v411_v35 = vld [vmem:[%s11978_s18 + $0x208] sm:$0xff] }
 0x172   : > { %v2443_v37 = vpop.permute.xlu1 %2442 }
 0x173   : > { %2620 = vst.msk [vmem:[#allocation2 + $0x78] sm:$0xff] %vm2604_vm5, %v2443_v37  ;;  %v2441_v38 = vpop.permute.xlu0 %2440 }
 0x174   : > { %2619 = vst.msk [vmem:[#allocation2 + $0x70] sm:$0xff] %vm2604_vm5, %v2441_v38  ;;  %918 = vrot.lane.b32.xlu1 %v12657_v45, %s11899_s20  ;;  %v10421_v45 = vld [vmem:[%s11978_s18 + $0x218] sm:$0xff] }
 0x175   : > { %4507 = vrot.lane.b32.xlu0 %v12755_v36, %s11905_s25  ;;  %v3334_v56 = vpack.c.bf16 %v10422_v46, %v10421_v45 }
 0x176   : > { %v2956_v39 = vpop.permute.xlu1 %2955 }
 0x177   : > { %3133 = vst.msk [vmem:[#allocation2 + $0x78] sm:$0xff] %vm3117_vm6, %v2956_v39  ;;  %v2954_v40 = vpop.permute.xlu0 %2953  ;;  %v10423_v39 = vld [vmem:[%s11978_s18 + $0x230] sm:$0xff] }
 0x178   : > { %3132 = vst.msk [vmem:[#allocation2 + $0x70] sm:$0xff] %vm3117_vm6, %v2954_v40  ;;  %1431 = vrot.lane.b32.xlu1 %v12683_v58, %s11898_s19  ;;  %v10424_v40 = vld [vmem:[%s11978_s18 + $0x238] sm:$0xff] }
 0x179   : > { %1429 = vrot.lane.b32.xlu0 %v12672_v52, %s11898_s19  ;;  %v511_v52 = vpack.c.bf16 %v408_v48, %v407_v47  ;;  %v12891_v48 = vpack.c.bf16 %v10426_v34, %v10425_v32 }
 0x17a   : > { %v3470_v41 = vpop.permute.xlu1 %3469 }
 0x17b   : > { %3647 = vst.msk [vmem:[#allocation2 + $0x78] sm:$0xff] %vm3631_vm7, %v3470_v41  ;;  %v3468_v42 = vpop.permute.xlu0 %3467 }
 0x17c   : > { %3646 = vst.msk [vmem:[#allocation2 + $0x70] sm:$0xff] %vm3631_vm7, %v3468_v42  ;;  %1945 = vrot.lane.b32.xlu1 %v3332_v12, %s11900_s21  ;;  %v12824_v12 = vpack.c.bf16 %v10676_v9, %v10675_v8 }
 0x17d   : > { %1943 = vrot.lane.b32.xlu0 %v3331_v14, %s11900_s21  ;;  %576 = vst.msk [vmem:[#allocation2 + $0xc0] sm:$0xff] %vm551_vm0, %v511_v52  ;;  %v10677_v14 = vld [vmem:[%s11978_s18 + $0x21a] sm:$0xff] }
 0x17e   : > { %v3983_v43 = vpop.permute.xlu1 %3982  ;;  %v12835_v18 = vpack.c.bf16 %v10678_v15, %v10677_v14 }
 0x17f   : > { %4160 = vst.msk [vmem:[#allocation2 + $0x78] sm:$0xff] %vm4144_vm8, %v3983_v43  ;;  %v3981_v44 = vpop.permute.xlu0 %3980 }
 0x180   : > { %4159 = vst.msk [vmem:[#allocation2 + $0x70] sm:$0xff] %vm4144_vm8, %v3981_v44  ;;  %2458 = vrot.lane.b32.xlu1 %v12729_v23, %s11901_s22 }
 0x181   : > { %2456 = vrot.lane.b32.xlu0 %v12733_v24, %s11901_s22 }
 0x182   : > { %v905_v49 = vpop.permute.xlu1 %904 }
 0x183   : > { %1081 = vst.msk [vmem:[#allocation2 + $0x80] sm:$0xff] %vm1064_vm2, %v905_v49  ;;  %v4494_v53 = vpop.permute.xlu0 %4493  ;;  %v12786_v54 = vpop.f32.mrb[0].mxu0  ;;  %v10553_v49 = vld [vmem:[%s11978_s18 + $0x241] sm:$0xff] }
 0x184   : > { %4672 = vst.msk [vmem:[#allocation2 + $0x70] sm:$0xff] %vm4657_vm9, %v4494_v53  ;;  %v12789_v55 = vpop.f32.mrb[1].mxu0  ;;  %2971 = vrot.lane.b32.xlu1 %v12755_v36, %s11902_s23  ;;  %v12899_v53 = vpack.c.bf16 %v10424_v40, %v10423_v39  ;;  %v10681_v40 = vld [vmem:[%s11978_s18 + $0x242] sm:$0xff] }
 0x185   : > { %2969 = vrot.lane.b32.xlu0 %v12744_v30, %s11902_s23  ;;  %v12797_v58 = vpop.f32.mrb[2].mxu0 }
 0x186   : > { %v12802_v63 = vpop.f32.mrb[3].mxu0  ;;  %v907_v0 = vpop.permute.xlu1 %906 }
 0x187   : > { %1082 = vst.msk [vmem:[#allocation2 + $0x88] sm:$0xff] %vm1064_vm2, %v907_v0  ;;  %v4496_v4 = vpop.permute.xlu0 %4495 }
 0x188   : > { %4673 = vst.msk [vmem:[#allocation2 + $0x78] sm:$0xff] %vm4657_vm9, %v4496_v4  ;;  %3485 = vrot.lane.b32.xlu1 %v3334_v56, %s11903_s24 }
 0x189   : > { %3483 = vrot.lane.b32.xlu0 %v3333_v59, %s11903_s24 }
 0x18a   : > { %v1420_v7 = vpop.permute.xlu1 %1419 }
 0x18b   : > { %1595 = vst.msk [vmem:[#allocation2 + $0x88] sm:$0xff] %vm1577_vm3, %v1420_v7  ;;  %v1418_v10 = vpop.permute.xlu0 %1417  ;;  %v4736_v11 = vld [vmem:[#allocation2 + $0x70] sm:$0xff] }
 0x18c   : > { %1594 = vst.msk [vmem:[#allocation2 + $0x80] sm:$0xff] %vm1577_vm3, %v1418_v10  ;;  %11381 = vmatprep.mubr.msk.bf16.mxu0 %vm4822_vm10, %v4736_v11  ;;  %3998 = vrot.lane.b32.xlu1 %v12809_v5, %s11904_s29 }
 0x18d   : > { %3996 = vrot.lane.b32.xlu0 %v12813_v6, %s11904_s29 }
 0x18e   : > { %v1934_v13 = vpop.permute.xlu1 %1933 }
 0x18f   : > { %2109 = vst.msk [vmem:[#allocation2 + $0x88] sm:$0xff] %vm2091_vm4, %v1934_v13  ;;  %v1932_v16 = vpop.permute.xlu0 %1931  ;;  %v4737_v17 = vld [vmem:[#allocation2 + $0x78] sm:$0xff] }
 0x190   : > { %2108 = vst.msk [vmem:[#allocation2 + $0x80] sm:$0xff] %vm2091_vm4, %v1932_v16  ;;  %11382 = vmatmul.mubr.msk.bf16.gmra.mrb[28].mxu0 %vm4822_vm10, %v4737_v17  ;;  %920 = vrot.lane.b32.xlu1 %v12733_v24, %s11899_s20 }
 0x191   : > { %4509 = vrot.lane.b32.xlu0 %v12824_v12, %s11905_s25 }
 0x192   : > { %v2447_v19 = vpop.permute.xlu1 %2446 }
 0x193   : > { %2622 = vst.msk [vmem:[#allocation2 + $0x88] sm:$0xff] %vm2604_vm5, %v2447_v19  ;;  %v2445_v20 = vpop.permute.xlu0 %2444 }
 0x194   : > { %2621 = vst.msk [vmem:[#allocation2 + $0x80] sm:$0xff] %vm2604_vm5, %v2445_v20  ;;  %922 = vrot.lane.b32.xlu1 %v12729_v23, %s11899_s20  ;;  %v12852_v23 = vld [vmem:[%s16460_s2] ss:$0 sm:$0xff] }
 0x195   : > { %4511 = vrot.lane.b32.xlu0 %v12835_v18, %s11905_s25  ;;  %v5574_v26 = vmul.f32 %v12786_v54, %v12852_v23  ;;  %v5572_v29 = vmul.f32 %v12852_v23, %v12789_v55  ;;  %v5575_v31 = vmul.f32 %v12797_v58, %v12852_v23  ;;  %v5573_v33 = vmul.f32 %v12852_v23, %v12802_v63  ;;  %v10554_v54 = vld [vmem:[%s11978_s18 + $0x249] sm:$0xff]  ;;  %v413_v55 = vld [vmem:[%s11978_s18 + $0x218] sm:$0xff] }
 0x196   : > { %v2960_v21 = vpop.permute.xlu1 %2959  ;;  %v10552_v63 = vld [vmem:[%s11978_s18 + $0x239] sm:$0xff]  ;;  %v12915_v10 = vpack.c.bf16 %v10554_v54, %v10553_v49 }
 0x197   : > { %3135 = vst.msk [vmem:[#allocation2 + $0x88] sm:$0xff] %vm3117_vm6, %v2960_v21  ;;  %v2958_v22 = vpop.permute.xlu0 %2957  ;;  %v5708_v37 = vadd.f32 %v12863_v28, %v5574_v26  ;;  %v5706_v42 = vadd.f32 %v12863_v28, %v5572_v29  ;;  %v5709_v45 = vadd.f32 %v12863_v28, %v5575_v31  ;;  %v5707_v50 = vadd.f32 %v12863_v28, %v5573_v33  ;;  %v10679_v21 = vld [vmem:[%s11978_s18 + $0x232] sm:$0xff] }
 0x198   : > { %3134 = vst.msk [vmem:[#allocation2 + $0x80] sm:$0xff] %vm3117_vm6, %v2958_v22  ;;  %1435 = vrot.lane.b32.xlu1 %v12755_v36, %s11898_s19  ;;  %v412_v36 = vld [vmem:[%s11978_s18 + $0x210] sm:$0xff]  ;;  %v12921_v15 = vpack.c.bf16 %v10552_v63, %v10551_v62  ;;  %v10680_v22 = vld [vmem:[%s11978_s18 + $0x23a] sm:$0xff] }
 0x199   : > { %1433 = vrot.lane.b32.xlu0 %v12744_v30, %s11898_s19  ;;  %v513_v41 = vpack.c.bf16 %v412_v36, %v411_v35  ;;  %v5836_v57 = vmax.f32 %v5708_v37, 0.0  ;;  %v5834_v1 = vmax.f32 %v5706_v42, 0.0  ;;  %v5837_v7 = vmax.f32 %v5709_v45, 0.0 }
 0x19a   : > { %v3474_v24 = vpop.permute.xlu1 %3473  ;;  %v5835_v11 = vmax.f32 %v5707_v50, 0.0  ;;  %v12941_v37 = vpack.c.bf16 %v10680_v22, %v10679_v21  ;;  %v10558_v21 = vld [vmem:[%s11978_s18 + $0x271] sm:$0xff]  ;;  %v417_v22 = vld [vmem:[%s11978_s18 + $0x240] sm:$0xff] }
 0x19b   : > { %3649 = vst.msk [vmem:[#allocation2 + $0x88] sm:$0xff] %vm3631_vm7, %v3474_v24  ;;  %v3472_v25 = vpop.permute.xlu0 %3471  ;;  %v5969_v16 = vsel %vm5962_vm11, %v5836_v57, -inf  ;;  %v5963_v24 = vsel %vm5962_vm11, %v5834_v1, -inf  ;;  %v5972_v31 = vsel %vm5962_vm11, %v5837_v7, -inf  ;;  %v10429_v57 = vld [vmem:[%s11978_s18 + $0x268] sm:$0xff] }
 0x19c   : > { %3648 = vst.msk [vmem:[#allocation2 + $0x80] sm:$0xff] %vm3631_vm7, %v3472_v25  ;;  %1949 = vrot.lane.b32.xlu1 %v3334_v56, %s11900_s21  ;;  %v414_v56 = vld [vmem:[%s11978_s18 + $0x220] sm:$0xff]  ;;  %v5966_v34 = vsel %vm5962_vm11, %v5835_v11, -inf }
 0x19d   : > { %1947 = vrot.lane.b32.xlu0 %v3333_v59, %s11900_s21  ;;  %578 = vst.msk [vmem:[#allocation2 + $0xd0] sm:$0xff] %vm551_vm0, %v513_v41  ;;  %v514_v0 = vpack.c.bf16 %v414_v56, %v413_v55  ;;  %v10682_v41 = vld [vmem:[%s11978_s18 + $0x24a] sm:$0xff] }
 0x19e   : > { %v3987_v27 = vpop.permute.xlu1 %3986 }
 0x19f   : > { %4162 = vst.msk [vmem:[#allocation2 + $0x88] sm:$0xff] %vm4144_vm8, %v3987_v27  ;;  %v3985_v30 = vpop.permute.xlu0 %3984 }
 0x1a0   : > { %4161 = vst.msk [vmem:[#allocation2 + $0x80] sm:$0xff] %vm4144_vm8, %v3985_v30  ;;  %2462 = vrot.lane.b32.xlu1 %v12809_v5, %s11901_s22 }
 0x1a1   : > { %2460 = vrot.lane.b32.xlu0 %v12813_v6, %s11901_s22  ;;  %579 = vst.msk [vmem:[#allocation2 + $0xd8] sm:$0xff] %vm551_vm0, %v514_v0  ;;  %v10428_v0 = vld [vmem:[%s11978_s18 + $0x260] sm:$0xff] }
 0x1a2   : > { %v909_v38 = vpop.permute.xlu1 %908 }
 0x1a3   : > { %1083 = vst.msk [vmem:[#allocation2 + $0x90] sm:$0xff] %vm1064_vm2, %v909_v38  ;;  %v4498_v43 = vpop.permute.xlu0 %4497  ;;  %v11359_v44 = vpop.f32.mrb[4].mxu0 }
 0x1a4   : > { %4674 = vst.msk [vmem:[#allocation2 + $0x80] sm:$0xff] %vm4657_vm9, %v4498_v43  ;;  %v5578_v46 = vmul.f32 %v11359_v44, %v12852_v23  ;;  %v5069_v47 = vpop.f32.mrb[5].mxu0  ;;  %2975 = vrot.lane.b32.xlu1 %v12835_v18, %s11902_s23  ;;  %v12955_v44 = vpack.c.bf16 %v10682_v41, %v10681_v40 }
 0x1a5   : > { %v5576_v51 = vmul.f32 %v12852_v23, %v5069_v47  ;;  %2973 = vrot.lane.b32.xlu0 %v12824_v12, %s11902_s23  ;;  %v11360_v52 = vpop.f32.mrb[6].mxu0 }
 0x1a6   : > { %v5712_v58 = vadd.f32 %v12863_v28, %v5578_v46  ;;  %v5579_v59 = vmul.f32 %v11360_v52, %v12852_v23  ;;  %v5072_v60 = vpop.f32.mrb[7].mxu0  ;;  %v911_v61 = vpop.permute.xlu1 %910 }
 0x1a7   : > { %v5710_v2 = vadd.f32 %v12863_v28, %v5576_v51  ;;  %v5577_v3 = vmul.f32 %v12852_v23, %v5072_v60  ;;  %1084 = vst.msk [vmem:[#allocation2 + $0x98] sm:$0xff] %vm1064_vm2, %v911_v61  ;;  %v4500_v4 = vpop.permute.xlu0 %4499 }
 0x1a8   : > { %v5840_v8 = vmax.f32 %v5712_v58, 0.0  ;;  %v5713_v9 = vadd.f32 %v12863_v28, %v5579_v59  ;;  %4675 = vst.msk [vmem:[#allocation2 + $0x88] sm:$0xff] %vm4657_vm9, %v4500_v4  ;;  %3489 = vrot.lane.b32.xlu1 %v12891_v48, %s11903_s24  ;;  %v10430_v58 = vld [vmem:[%s11978_s18 + $0x270] sm:$0xff]  ;;  %v10427_v59 = vld [vmem:[%s11978_s18 + $0x258] sm:$0xff] }
 0x1a9   : > { %v5838_v13 = vmax.f32 %v5710_v2, 0.0  ;;  %v5711_v14 = vadd.f32 %v12863_v28, %v5577_v3  ;;  %3487 = vrot.lane.b32.xlu0 %v12899_v53, %s11903_s24 }
 0x1aa   : > { %v5970_v17 = vsel %vm5962_vm11, %v5840_v8, -inf  ;;  %v5841_v19 = vmax.f32 %v5713_v9, 0.0  ;;  %v1424_v20 = vpop.permute.xlu1 %1423 }
 0x1ab   : > { %v5971_v25 = vmax.f32 %v5969_v16, %v5970_v17  ;;  %v5964_v26 = vsel %vm5962_vm11, %v5838_v13, -inf  ;;  %v5839_v27 = vmax.f32 %v5711_v14, 0.0  ;;  %1597 = vst.msk [vmem:[#allocation2 + $0x98] sm:$0xff] %vm1577_vm3, %v1424_v20  ;;  %v1422_v29 = vpop.permute.xlu0 %1421  ;;  %v4738_v30 = vld [vmem:[#allocation2 + $0x80] sm:$0xff]  ;;  %v13001_v14 = vpack.c.bf16 %v10430_v58, %v10429_v57  ;;  %v10557_v16 = vld [vmem:[%s11978_s18 + $0x269] sm:$0xff] }
 0x1ac   : > { %v5965_v32 = vmax.f32 %v5963_v24, %v5964_v26  ;;  %v5973_v33 = vsel %vm5962_vm11, %v5841_v19, -inf  ;;  %1596 = vst.msk [vmem:[#allocation2 + $0x90] sm:$0xff] %vm1577_vm3, %v1422_v29  ;;  %11385 = vmatprep.mubr.msk.bf16.mxu0 %vm4822_vm10, %v4738_v30  ;;  %4002 = vrot.lane.b32.xlu1 %v12915_v10, %s11904_s29  ;;  %v3337_v20 = vpack.c.bf16 %v10428_v0, %v10427_v59  ;;  %v418_v24 = vld [vmem:[%s11978_s18 + $0x248] sm:$0xff]  ;;  %v420_v57 = vld [vmem:[%s11978_s18 + $0x260] sm:$0xff] }
 0x1ad   : > { %6157 = vst.msk [vmem:[#allocation3 + $0x10] sm:$0xff] %vm5962_vm11, %v5971_v25  ;;  %v5974_v35 = vmax.f32 %v5972_v31, %v5973_v33  ;;  %v5967_v36 = vsel %vm5962_vm11, %v5839_v27, -inf  ;;  %4000 = vrot.lane.b32.xlu0 %v12921_v15, %s11904_s29  ;;  %v10555_v27 = vld [vmem:[%s11978_s18 + $0x259] sm:$0xff]  ;;  %v10556_v29 = vld [vmem:[%s11978_s18 + $0x261] sm:$0xff]  ;;  %v516_v30 = vpack.c.bf16 %v418_v24, %v417_v22 }
 0x1ae   : > { %6155 = vst.msk [vmem:[#allocation3] sm:$0xff] %vm5962_vm11, %v5965_v32  ;;  %v5968_v38 = vmax.f32 %v5966_v34, %v5967_v36  ;;  %v1938_v39 = vpop.permute.xlu1 %1937  ;;  %v13025_v32 = vpack.c.bf16 %v10558_v21, %v10557_v16  ;;  %v13029_v33 = vpack.c.bf16 %v10556_v29, %v10555_v27  ;;  %v10684_v36 = vld [vmem:[%s11978_s18 + $0x262] sm:$0xff]  ;;  %v10562_v16 = vld [vmem:[%s11978_s18 + $0x299] sm:$0xff] }
 0x1af   : > { %6158 = vst.msk [vmem:[#allocation3 + $0x18] sm:$0xff] %vm5962_vm11, %v5974_v35  ;;  %v1936_v42 = vpop.permute.xlu0 %1935  ;;  %v4739_v43 = vld [vmem:[#allocation2 + $0x88] sm:$0xff]  ;;  %v10683_v35 = vld [vmem:[%s11978_s18 + $0x25a] sm:$0xff] }
 0x1b0   : > { %2111 = vst.msk [vmem:[#allocation2 + $0x98] sm:$0xff] %vm2091_vm4, %v1938_v39  ;;  %2110 = vst.msk [vmem:[#allocation2 + $0x90] sm:$0xff] %vm2091_vm4, %v1936_v42  ;;  %11386 = vmatmul.mubr.msk.bf16.gmra.mrb[32].mxu0 %vm4822_vm10, %v4739_v43  ;;  %924 = vrot.lane.b32.xlu1 %v12813_v6, %s11899_s20  ;;  %v13040_v40 = vpack.c.bf16 %v10684_v36, %v10683_v35  ;;  %v10685_v42 = vld [vmem:[%s11978_s18 + $0x26a] sm:$0xff]  ;;  %v10686_v43 = vld [vmem:[%s11978_s18 + $0x272] sm:$0xff] }
 0x1b1   : > { %6156 = vst.msk [vmem:[#allocation3 + $0x8] sm:$0xff] %vm5962_vm11, %v5968_v38  ;;  %4513 = vrot.lane.b32.xlu0 %v12941_v37, %s11905_s25  ;;  %v10560_v27 = vld [vmem:[%s11978_s18 + $0x289] sm:$0xff] }
 0x1b2   : > { %v2451_v45 = vpop.permute.xlu1 %2450  ;;  %581 = vst.msk [vmem:[#allocation2 + $0xe8] sm:$0xff] %vm551_vm0, %v516_v30 }
 0x1b3   : > { %2624 = vst.msk [vmem:[#allocation2 + $0x98] sm:$0xff] %vm2604_vm5, %v2451_v45  ;;  %v2449_v46 = vpop.permute.xlu0 %2448 }
 0x1b4   : > { %2623 = vst.msk [vmem:[#allocation2 + $0x90] sm:$0xff] %vm2604_vm5, %v2449_v46  ;;  %926 = vrot.lane.b32.xlu1 %v12809_v5, %s11899_s20 }
 0x1b5   : > { %4515 = vrot.lane.b32.xlu0 %v12955_v44, %s11905_s25 }
 0x1b6   : > { %v6221_v47 = vld [vmem:[#allocation3 + $0x10] ss:$2 sm:$0xff]  ;;  %v6285_v49 = vld [vmem:[#allocation3 + $0x11] ss:$2 sm:$0xff]  ;;  %v2964_v6 = vpop.permute.xlu1 %2963 }
 0x1b7   : > { %v6347_v50 = vmax.f32 %v6221_v47, %v6285_v49  ;;  %3137 = vst.msk [vmem:[#allocation2 + $0x98] sm:$0xff] %vm3117_vm6, %v2964_v6  ;;  %v2962_v54 = vpop.permute.xlu0 %2961  ;;  %v13051_v47 = vpack.c.bf16 %v10686_v43, %v10685_v42 }
 0x1b8   : > { %v6219_v51 = vld [vmem:[#allocation3] ss:$2 sm:$0xff]  ;;  %v6283_v52 = vld [vmem:[#allocation3 + $0x1] ss:$2 sm:$0xff]  ;;  %3136 = vst.msk [vmem:[#allocation2 + $0x90] sm:$0xff] %vm3117_vm6, %v2962_v54  ;;  %1439 = vrot.lane.b32.xlu1 %v12835_v18, %s11898_s19 }
 0x1b9   : > { %v6346_v55 = vmax.f32 %v6219_v51, %v6283_v52  ;;  %6421 = vst.msk [vmem:[#allocation4 + $0x30] sm:$0xff] %vm5962_vm11, %v6347_v50  ;;  %1437 = vrot.lane.b32.xlu0 %v12824_v12, %s11898_s19 }
 0x1ba   : > { %v3478_v5 = vpop.permute.xlu1 %3477 }
 0x1bb   : > { %6420 = vst.msk [vmem:[#allocation4 + $0x28] sm:$0xff] %vm5962_vm11, %v6346_v55  ;;  %v3476_v56 = vpop.permute.xlu0 %3475 }
 0x1bc   : > { %3651 = vst.msk [vmem:[#allocation2 + $0x98] sm:$0xff] %vm3631_vm7, %v3478_v5  ;;  %3650 = vst.msk [vmem:[#allocation2 + $0x90] sm:$0xff] %vm3631_vm7, %v3476_v56  ;;  %1953 = vrot.lane.b32.xlu1 %v12891_v48, %s11900_s21  ;;  %v415_v48 = vld [vmem:[%s11978_s18 + $0x230] sm:$0xff] }
 0x1bd   : > { %1951 = vrot.lane.b32.xlu0 %v12899_v53, %s11900_s21  ;;  %v416_v53 = vld [vmem:[%s11978_s18 + $0x238] sm:$0xff]  ;;  %v10433_v5 = vld [vmem:[%s11978_s18 + $0x290] sm:$0xff] }
 0x1be   : > { %v3991_v18 = vpop.permute.xlu1 %3990  ;;  %v515_v1 = vpack.c.bf16 %v416_v53, %v415_v48 }
 0x1bf   : > { %4164 = vst.msk [vmem:[#allocation2 + $0x98] sm:$0xff] %vm4144_vm8, %v3991_v18  ;;  %v3989_v12 = vpop.permute.xlu0 %3988  ;;  %v10434_v18 = vld [vmem:[%s11978_s18 + $0x298] sm:$0xff] }
 0x1c0   : > { %4163 = vst.msk [vmem:[#allocation2 + $0x90] sm:$0xff] %vm4144_vm8, %v3989_v12  ;;  %2466 = vrot.lane.b32.xlu1 %v12915_v10, %s11901_s22  ;;  %v6648_v60 = vld [vmem:[#allocation4 + $0x31] sm:$0xff] }
 0x1c1   : > { %v6838_v61 = vld [vmem:[#allocation4 + $0x30] sm:$0xff]  ;;  %2464 = vrot.lane.b32.xlu0 %v12921_v15, %s11901_s22  ;;  %580 = vst.msk [vmem:[#allocation2 + $0xe0] sm:$0xff] %vm551_vm0, %v515_v1  ;;  %v419_v12 = vld [vmem:[%s11978_s18 + $0x258] sm:$0xff] }
 0x1c2   : > { %v6709_v62 = vld [vmem:[#allocation4 + $0x27] sm:$0xff]  ;;  %v913_v63 = vpop.permute.xlu1 %912  ;;  %v6710_v2 = vld [vmem:[#allocation4 + $0x2f] sm:$0xff]  ;;  %v517_v48 = vpack.c.bf16 %v420_v57, %v419_v12 }
 0x1c3   : > { %v6647_v3 = vld [vmem:[#allocation4 + $0x29] sm:$0xff]  ;;  %1085 = vst.msk [vmem:[#allocation2 + $0xa0] sm:$0xff] %vm1064_vm2, %v913_v63  ;;  %v4502_v4 = vpop.permute.xlu0 %4501  ;;  %v12990_v7 = vpop.f32.mrb[8].mxu0  ;;  %v12992_v8 = vpack.c.bf16 %v6710_v2, %v6709_v62 }
 0x1c4   : > { %v12994_v9 = vpack.c.bf16 %v6648_v60, %v6647_v3  ;;  %v6837_v11 = vld [vmem:[#allocation4 + $0x28] sm:$0xff]  ;;  %4676 = vst.msk [vmem:[#allocation2 + $0x90] sm:$0xff] %vm4657_vm9, %v4502_v4  ;;  %v12997_v13 = vpop.f32.mrb[9].mxu0  ;;  %2979 = vrot.lane.b32.xlu1 %v12955_v44, %s11902_s23  ;;  %v10431_v60 = vld [vmem:[%s11978_s18 + $0x280] sm:$0xff]  ;;  %v13098_v3 = vpack.c.bf16 %v10434_v18, %v10433_v5  ;;  %v10561_v4 = vld [vmem:[%s11978_s18 + $0x291] sm:$0xff] }
 0x1c5   : > { %v6869_v17 = vpack.c.bf16 %v6838_v61, %v6837_v11  ;;  %2977 = vrot.lane.b32.xlu0 %v12941_v37, %s11902_s23  ;;  %v13007_v19 = vpop.f32.mrb[10].mxu0  ;;  %6501 = vst.msk [vmem:[#allocation5 + $0x28] sm:$0xff] %vm5962_vm11, %v12992_v8  ;;  %v10432_v61 = vld [vmem:[%s11978_s18 + $0x288] sm:$0xff] }
 0x1c6   : > { %6694 = vst.msk [vmem:[#allocation5 + $0x30] sm:$0xff] %vm5962_vm11, %v12994_v9  ;;  %v13016_v25 = vpop.f32.mrb[11].mxu0  ;;  %v915_v26 = vpop.permute.xlu1 %914  ;;  %v5583_v55 = vmul.f32 %v13007_v19, %v12852_v23  ;;  %v422_v19 = vld [vmem:[%s11978_s18 + $0x270] sm:$0xff] }
 0x1c7   : > { %6885 = vst.msk [vmem:[#allocation5 + $0x10] sm:$0xff] %vm5962_vm11, %v6869_v17  ;;  %v4504_v31 = vpop.permute.xlu0 %4503  ;;  %v5581_v56 = vmul.f32 %v12852_v23, %v13016_v25  ;;  %v421_v17 = vld [vmem:[%s11978_s18 + $0x268] sm:$0xff] }
 0x1c8   : > { %1086 = vst.msk [vmem:[#allocation2 + $0xa8] sm:$0xff] %vm1064_vm2, %v915_v26  ;;  %3493 = vrot.lane.b32.xlu1 %v13001_v14, %s11903_s24  ;;  %v5717_v0 = vadd.f32 %v12863_v28, %v5583_v55  ;;  %v10559_v26 = vld [vmem:[%s11978_s18 + $0x281] sm:$0xff]  ;;  %v518_v29 = vpack.c.bf16 %v422_v19, %v421_v17 }
 0x1c9   : > { %4677 = vst.msk [vmem:[#allocation2 + $0x98] sm:$0xff] %vm4657_vm9, %v4504_v31  ;;  %3491 = vrot.lane.b32.xlu0 %v3337_v20, %s11903_s24 }
 0x1ca   : > { %v1428_v34 = vpop.permute.xlu1 %1427  ;;  %582 = vst.msk [vmem:[#allocation2 + $0xf0] sm:$0xff] %vm551_vm0, %v517_v48  ;;  %v5845_v36 = vmax.f32 %v5717_v0, 0.0  ;;  %583 = vst.msk [vmem:[#allocation2 + $0xf8] sm:$0xff] %vm551_vm0, %v518_v29 }
 0x1cb   : > { %1599 = vst.msk [vmem:[#allocation2 + $0xa8] sm:$0xff] %vm1577_vm3, %v1428_v34  ;;  %v1426_v38 = vpop.permute.xlu0 %1425  ;;  %v4740_v39 = vld [vmem:[#allocation2 + $0x90] sm:$0xff] }
 0x1cc   : > { %1598 = vst.msk [vmem:[#allocation2 + $0xa0] sm:$0xff] %vm1577_vm3, %v1426_v38  ;;  %11389 = vmatprep.mubr.msk.bf16.mxu0 %vm4822_vm10, %v4740_v39  ;;  %4006 = vrot.lane.b32.xlu1 %v13025_v32, %s11904_s29 }
 0x1cd   : > { %4004 = vrot.lane.b32.xlu0 %v13029_v33, %s11904_s29 }
 0x1ce   : > { %v1942_v41 = vpop.permute.xlu1 %1941 }
 0x1cf   : > { %2113 = vst.msk [vmem:[#allocation2 + $0xa8] sm:$0xff] %vm2091_vm4, %v1942_v41  ;;  %v1940_v45 = vpop.permute.xlu0 %1939  ;;  %v13122_v41 = vpack.c.bf16 %v10562_v16, %v10561_v4 }
 0x1d0   : > { %v4741_v46 = vld [vmem:[#allocation2 + $0x98] sm:$0xff]  ;;  %2112 = vst.msk [vmem:[#allocation2 + $0xa0] sm:$0xff] %vm2091_vm4, %v1940_v45  ;;  %928 = vrot.lane.b32.xlu1 %v12921_v15, %s11899_s20 }
 0x1d1   : > { %11390 = vmatmul.mubr.msk.bf16.gmra.mrb[36].mxu0 %vm4822_vm10, %v4741_v46  ;;  %4517 = vrot.lane.b32.xlu0 %v13040_v40, %s11905_s25  ;;  %v13128_v46 = vpack.c.bf16 %v10560_v27, %v10559_v26 }
 0x1d2   : > { %v2455_v49 = vpop.permute.xlu1 %2454 }
 0x1d3   : > { %2626 = vst.msk [vmem:[#allocation2 + $0xa8] sm:$0xff] %vm2604_vm5, %v2455_v49  ;;  %v2453_v6 = vpop.permute.xlu0 %2452 }
 0x1d4   : > { %2625 = vst.msk [vmem:[#allocation2 + $0xa0] sm:$0xff] %vm2604_vm5, %v2453_v6  ;;  %930 = vrot.lane.b32.xlu1 %v12915_v10, %s11899_s20 }
 0x1d5   : > { %4519 = vrot.lane.b32.xlu0 %v13051_v47, %s11905_s25 }
 0x1d6   : > { %v2968_v50 = vpop.permute.xlu1 %2967 }
 0x1d7   : > { %3139 = vst.msk [vmem:[#allocation2 + $0xa8] sm:$0xff] %vm3117_vm6, %v2968_v50  ;;  %v2966_v15 = vpop.permute.xlu0 %2965 }
 0x1d8   : > { %3138 = vst.msk [vmem:[#allocation2 + $0xa0] sm:$0xff] %vm3117_vm6, %v2966_v15  ;;  %1443 = vrot.lane.b32.xlu1 %v12955_v44, %s11898_s19  ;;  %v5582_v44 = vmul.f32 %v12990_v7, %v12852_v23  ;;  %v5715_v7 = vadd.f32 %v12863_v28, %v5581_v56  ;;  %v5984_v56 = vsel %vm5962_vm11, %v5845_v36, -inf }
 0x1d9   : > { %1441 = vrot.lane.b32.xlu0 %v12941_v37, %s11898_s19  ;;  %v5580_v37 = vmul.f32 %v12852_v23, %v12997_v13 }
 0x1da   : > { %v3482_v51 = vpop.permute.xlu1 %3481  ;;  %v5716_v58 = vadd.f32 %v12863_v28, %v5582_v44  ;;  %v5843_v42 = vmax.f32 %v5715_v7, 0.0 }
 0x1db   : > { %3653 = vst.msk [vmem:[#allocation2 + $0xa8] sm:$0xff] %vm3631_vm7, %v3482_v51  ;;  %v3480_v10 = vpop.permute.xlu0 %3479  ;;  %v5714_v53 = vadd.f32 %v12863_v28, %v5580_v37  ;;  %v10687_v51 = vld [vmem:[%s11978_s18 + $0x282] sm:$0xff] }
 0x1dc   : > { %3652 = vst.msk [vmem:[#allocation2 + $0xa0] sm:$0xff] %vm3631_vm7, %v3480_v10  ;;  %1957 = vrot.lane.b32.xlu1 %v13001_v14, %s11900_s21  ;;  %v13106_v14 = vpack.c.bf16 %v10432_v61, %v10431_v60  ;;  %v10688_v10 = vld [vmem:[%s11978_s18 + $0x28a] sm:$0xff]  ;;  %v5978_v57 = vsel %vm5962_vm11, %v5843_v42, -inf }
 0x1dd   : > { %1955 = vrot.lane.b32.xlu0 %v3337_v20, %s11900_s21  ;;  %v5844_v20 = vmax.f32 %v5716_v58, 0.0  ;;  %v5842_v30 = vmax.f32 %v5714_v53, 0.0  ;;  %v13148_v60 = vpack.c.bf16 %v10688_v10, %v10687_v51  ;;  %v10689_v53 = vld [vmem:[%s11978_s18 + $0x292] sm:$0xff] }
 0x1de   : > { %v3995_v52 = vpop.permute.xlu1 %3994  ;;  %v10565_v51 = vld [vmem:[%s11978_s18 + $0x2b9] sm:$0xff] }
 0x1df   : > { %4166 = vst.msk [vmem:[#allocation2 + $0xa8] sm:$0xff] %vm4144_vm8, %v3995_v52  ;;  %v3993_v54 = vpop.permute.xlu0 %3992  ;;  %v5981_v49 = vsel %vm5962_vm11, %v5844_v20, -inf  ;;  %v5975_v44 = vsel %vm5962_vm11, %v5842_v30, -inf }
 0x1e0   : > { %4165 = vst.msk [vmem:[#allocation2 + $0xa0] sm:$0xff] %vm4144_vm8, %v3993_v54  ;;  %2470 = vrot.lane.b32.xlu1 %v13025_v32, %s11901_s22 }
 0x1e1   : > { %2468 = vrot.lane.b32.xlu0 %v13029_v33, %s11901_s22 }
 0x1e2   : > { %v917_v59 = vpop.permute.xlu1 %916 }
 0x1e3   : > { %1087 = vst.msk [vmem:[#allocation2 + $0xb0] sm:$0xff] %vm1064_vm2, %v917_v59  ;;  %v4506_v62 = vpop.permute.xlu0 %4505  ;;  %v11367_v63 = vpop.f32.mrb[12].mxu0 }
 0x1e4   : > { %4678 = vst.msk [vmem:[#allocation2 + $0xa0] sm:$0xff] %vm4657_vm9, %v4506_v62  ;;  %v5586_v1 = vmul.f32 %v11367_v63, %v12852_v23  ;;  %v5101_v2 = vpop.f32.mrb[13].mxu0  ;;  %2983 = vrot.lane.b32.xlu1 %v13051_v47, %s11902_s23  ;;  %v10690_v62 = vld [vmem:[%s11978_s18 + $0x29a] sm:$0xff] }
 0x1e5   : > { %v5584_v11 = vmul.f32 %v12852_v23, %v5101_v2  ;;  %2981 = vrot.lane.b32.xlu0 %v13040_v40, %s11902_s23  ;;  %v11368_v13 = vpop.f32.mrb[14].mxu0 }
 0x1e6   : > { %v5720_v21 = vadd.f32 %v12863_v28, %v5586_v1  ;;  %v5587_v22 = vmul.f32 %v11368_v13, %v12852_v23  ;;  %v5104_v24 = vpop.f32.mrb[15].mxu0  ;;  %v919_v25 = vpop.permute.xlu1 %918  ;;  %v13162_v1 = vpack.c.bf16 %v10690_v62, %v10689_v53 }
 0x1e7   : > { %v5718_v31 = vadd.f32 %v12863_v28, %v5584_v11  ;;  %v5585_v34 = vmul.f32 %v12852_v23, %v5104_v24  ;;  %1088 = vst.msk [vmem:[#allocation2 + $0xb8] sm:$0xff] %vm1064_vm2, %v919_v25  ;;  %v4508_v35 = vpop.permute.xlu0 %4507  ;;  %v10438_v24 = vld [vmem:[%s11978_s18 + $0x2c0] sm:$0xff]  ;;  %v10435_v25 = vld [vmem:[%s11978_s18 + $0x2a8] sm:$0xff] }
 0x1e8   : > { %v5848_v38 = vmax.f32 %v5720_v21, 0.0  ;;  %v5721_v39 = vadd.f32 %v12863_v28, %v5587_v22  ;;  %4679 = vst.msk [vmem:[#allocation2 + $0xa8] sm:$0xff] %vm4657_vm9, %v4508_v35  ;;  %3497 = vrot.lane.b32.xlu1 %v13098_v3, %s11903_s24  ;;  %v10437_v22 = vld [vmem:[%s11978_s18 + $0x2b8] sm:$0xff] }
 0x1e9   : > { %v5846_v43 = vmax.f32 %v5718_v31, 0.0  ;;  %v5719_v45 = vadd.f32 %v12863_v28, %v5585_v34  ;;  %3495 = vrot.lane.b32.xlu0 %v13106_v14, %s11903_s24  ;;  %v10436_v31 = vld [vmem:[%s11978_s18 + $0x2b0] sm:$0xff] }
 0x1ea   : > { %v5982_v6 = vsel %vm5962_vm11, %v5848_v38, -inf  ;;  %v5849_v50 = vmax.f32 %v5721_v39, 0.0  ;;  %v1432_v15 = vpop.permute.xlu1 %1431 }
 0x1eb   : > { %v5983_v52 = vmax.f32 %v5981_v49, %v5982_v6  ;;  %v5976_v37 = vsel %vm5962_vm11, %v5846_v43, -inf  ;;  %v5847_v54 = vmax.f32 %v5719_v45, 0.0  ;;  %1601 = vst.msk [vmem:[#allocation2 + $0xb8] sm:$0xff] %vm1577_vm3, %v1432_v15  ;;  %v1430_v55 = vpop.permute.xlu0 %1429  ;;  %v4742_v5 = vld [vmem:[#allocation2 + $0xa0] sm:$0xff]  ;;  %v13208_v15 = vpack.c.bf16 %v10438_v24, %v10437_v22 }
 0x1ec   : > { %v5977_v18 = vmax.f32 %v5975_v44, %v5976_v37  ;;  %v5985_v12 = vsel %vm5962_vm11, %v5849_v50, -inf  ;;  %1600 = vst.msk [vmem:[#allocation2 + $0xb0] sm:$0xff] %vm1577_vm3, %v1430_v55  ;;  %11393 = vmatprep.mubr.msk.bf16.mxu0 %vm4822_vm10, %v4742_v5  ;;  %4010 = vrot.lane.b32.xlu1 %v13122_v41, %s11904_s29  ;;  %v3341_v55 = vpack.c.bf16 %v10436_v31, %v10435_v25  ;;  %v10566_v5 = vld [vmem:[%s11978_s18 + $0x2c1] sm:$0xff] }
 0x1ed   : > { %6161 = vst.msk [vmem:[#allocation3 + $0x30] sm:$0xff] %vm5962_vm11, %v5983_v52  ;;  %v5986_v58 = vmax.f32 %v5984_v56, %v5985_v12  ;;  %v5979_v59 = vsel %vm5962_vm11, %v5847_v54, -inf  ;;  %4008 = vrot.lane.b32.xlu0 %v13128_v46, %s11904_s29  ;;  %v425_v56 = vld [vmem:[%s11978_s18 + $0x290] sm:$0xff]  ;;  %v13234_v62 = vpack.c.bf16 %v10566_v5, %v10565_v51  ;;  %v429_v5 = vld [vmem:[%s11978_s18 + $0x2b8] sm:$0xff] }
 0x1ee   : > { %6159 = vst.msk [vmem:[#allocation3 + $0x20] sm:$0xff] %vm5962_vm11, %v5977_v18  ;;  %v5980_v61 = vmax.f32 %v5978_v57, %v5979_v59  ;;  %v1946_v48 = vpop.permute.xlu1 %1945  ;;  %v426_v18 = vld [vmem:[%s11978_s18 + $0x298] sm:$0xff]  ;;  %v10563_v59 = vld [vmem:[%s11978_s18 + $0x2a9] sm:$0xff] }
 0x1ef   : > { %6162 = vst.msk [vmem:[#allocation3 + $0x38] sm:$0xff] %vm5962_vm11, %v5986_v58  ;;  %v1944_v63 = vpop.permute.xlu0 %1943  ;;  %v4743_v0 = vld [vmem:[#allocation2 + $0xa8] sm:$0xff] }
 0x1f0   : > { %2115 = vst.msk [vmem:[#allocation2 + $0xb8] sm:$0xff] %vm2091_vm4, %v1946_v48  ;;  %2114 = vst.msk [vmem:[#allocation2 + $0xb0] sm:$0xff] %vm2091_vm4, %v1944_v63  ;;  %11394 = vmatmul.mubr.msk.bf16.gmra.mrb[40].mxu0 %vm4822_vm10, %v4743_v0  ;;  %932 = vrot.lane.b32.xlu1 %v13029_v33, %s11899_s20  ;;  %v520_v48 = vpack.c.bf16 %v426_v18, %v425_v56  ;;  %v430_v56 = vld [vmem:[%s11978_s18 + $0x2c0] sm:$0xff] }
 0x1f1   : > { %6160 = vst.msk [vmem:[#allocation3 + $0x28] sm:$0xff] %vm5962_vm11, %v5980_v61  ;;  %4521 = vrot.lane.b32.xlu0 %v13148_v60, %s11905_s25  ;;  %v10564_v61 = vld [vmem:[%s11978_s18 + $0x2b1] sm:$0xff] }
 0x1f2   : > { %v2459_v2 = vpop.permute.xlu1 %2458  ;;  %585 = vst.msk [vmem:[#allocation2 + $0x108] sm:$0xff] %vm551_vm0, %v520_v48  ;;  %v13238_v63 = vpack.c.bf16 %v10564_v61, %v10563_v59  ;;  %v10567_v61 = vld [vmem:[%s11978_s18 + $0x2d1] sm:$0xff]  ;;  %v10568_v48 = vld [vmem:[%s11978_s18 + $0x2d9] sm:$0xff] }
 0x1f3   : > { %2628 = vst.msk [vmem:[#allocation2 + $0xb8] sm:$0xff] %vm2604_vm5, %v2459_v2  ;;  %v2457_v4 = vpop.permute.xlu0 %2456  ;;  %v10691_v2 = vld [vmem:[%s11978_s18 + $0x2aa] sm:$0xff] }
 0x1f4   : > { %2627 = vst.msk [vmem:[#allocation2 + $0xb0] sm:$0xff] %vm2604_vm5, %v2457_v4  ;;  %934 = vrot.lane.b32.xlu1 %v13025_v32, %s11899_s20  ;;  %v10692_v4 = vld [vmem:[%s11978_s18 + $0x2b2] sm:$0xff] }
 0x1f5   : > { %4523 = vrot.lane.b32.xlu0 %v13162_v1, %s11905_s25 }
 0x1f6   : > { %v6225_v7 = vld [vmem:[#allocation3 + $0x30] ss:$2 sm:$0xff]  ;;  %v6289_v11 = vld [vmem:[#allocation3 + $0x31] ss:$2 sm:$0xff]  ;;  %v2972_v33 = vpop.permute.xlu1 %2971 }
 0x1f7   : > { %v6349_v13 = vmax.f32 %v6225_v7, %v6289_v11  ;;  %3141 = vst.msk [vmem:[#allocation2 + $0xb8] sm:$0xff] %vm3117_vm6, %v2972_v33  ;;  %v2970_v19 = vpop.permute.xlu0 %2969  ;;  %v13249_v33 = vpack.c.bf16 %v10692_v4, %v10691_v2  ;;  %v13328_v4 = vld [vmem:[%s16460_s2] ss:$0 sm:$0xff] }
 0x1f8   : > { %v6223_v16 = vld [vmem:[#allocation3 + $0x20] ss:$2 sm:$0xff]  ;;  %v6287_v17 = vld [vmem:[#allocation3 + $0x21] ss:$2 sm:$0xff]  ;;  %3140 = vst.msk [vmem:[#allocation2 + $0xb0] sm:$0xff] %vm3117_vm6, %v2970_v19  ;;  %1447 = vrot.lane.b32.xlu1 %v13051_v47, %s11898_s19 }
 0x1f9   : > { %v6348_v20 = vmax.f32 %v6223_v16, %v6287_v17  ;;  %6423 = vst.msk [vmem:[#allocation4 + $0x50] sm:$0xff] %vm5962_vm11, %v6349_v13  ;;  %1445 = vrot.lane.b32.xlu0 %v13040_v40, %s11898_s19  ;;  %v10693_v16 = vld [vmem:[%s11978_s18 + $0x2ba] sm:$0xff]  ;;  %v10694_v17 = vld [vmem:[%s11978_s18 + $0x2c2] sm:$0xff] }
 0x1fa   : > { %v3486_v32 = vpop.permute.xlu1 %3485 }
 0x1fb   : > { %6422 = vst.msk [vmem:[#allocation4 + $0x48] sm:$0xff] %vm5962_vm11, %v6348_v20  ;;  %v3484_v21 = vpop.permute.xlu0 %3483 }
 0x1fc   : > { %3655 = vst.msk [vmem:[#allocation2 + $0xb8] sm:$0xff] %vm3631_vm7, %v3486_v32  ;;  %3654 = vst.msk [vmem:[#allocation2 + $0xb0] sm:$0xff] %vm3631_vm7, %v3484_v21  ;;  %1961 = vrot.lane.b32.xlu1 %v13098_v3, %s11900_s21  ;;  %v423_v3 = vld [vmem:[%s11978_s18 + $0x280] sm:$0xff]  ;;  %v13260_v32 = vpack.c.bf16 %v10694_v17, %v10693_v16 }
 0x1fd   : > { %1959 = vrot.lane.b32.xlu0 %v13106_v14, %s11900_s21  ;;  %v424_v14 = vld [vmem:[%s11978_s18 + $0x288] sm:$0xff] }
 0x1fe   : > { %v3999_v47 = vpop.permute.xlu1 %3998  ;;  %v519_v34 = vpack.c.bf16 %v424_v14, %v423_v3  ;;  %v10442_v14 = vld [vmem:[%s11978_s18 + $0x2e8] sm:$0xff] }
 0x1ff   : > { %4168 = vst.msk [vmem:[#allocation2 + $0xb8] sm:$0xff] %vm4144_vm8, %v3999_v47  ;;  %v3997_v40 = vpop.permute.xlu0 %3996 }
 0x200   : > { %4167 = vst.msk [vmem:[#allocation2 + $0xb0] sm:$0xff] %vm4144_vm8, %v3997_v40  ;;  %2474 = vrot.lane.b32.xlu1 %v13122_v41, %s11901_s22  ;;  %v6650_v26 = vld [vmem:[#allocation4 + $0x51] sm:$0xff] }
 0x201   : > { %v6840_v27 = vld [vmem:[#allocation4 + $0x50] sm:$0xff]  ;;  %2472 = vrot.lane.b32.xlu0 %v13128_v46, %s11901_s22  ;;  %584 = vst.msk [vmem:[#allocation2 + $0x100] sm:$0xff] %vm551_vm0, %v519_v34 }
 0x202   : > { %v6711_v29 = vld [vmem:[#allocation4 + $0x47] sm:$0xff]  ;;  %v921_v30 = vpop.permute.xlu1 %920  ;;  %v6712_v35 = vld [vmem:[#allocation4 + $0x4f] sm:$0xff] }
 0x203   : > { %v6649_v36 = vld [vmem:[#allocation4 + $0x49] sm:$0xff]  ;;  %1089 = vst.msk [vmem:[#allocation2 + $0xc0] sm:$0xff] %vm1064_vm2, %v921_v30  ;;  %v4510_v38 = vpop.permute.xlu0 %4509  ;;  %v13197_v39 = vpop.f32.mrb[16].mxu0  ;;  %v13199_v42 = vpack.c.bf16 %v6712_v35, %v6711_v29  ;;  %v7223_v37 = vld [vmem:[#allocation4 + $0x51] sm:$0xff] }
 0x204   : > { %v13201_v43 = vpack.c.bf16 %v6650_v26, %v6649_v36  ;;  %v6839_v45 = vld [vmem:[#allocation4 + $0x48] sm:$0xff]  ;;  %4680 = vst.msk [vmem:[#allocation2 + $0xb0] sm:$0xff] %vm4657_vm9, %v4510_v38  ;;  %v13204_v50 = vpop.f32.mrb[17].mxu0  ;;  %2987 = vrot.lane.b32.xlu1 %v13162_v1, %s11902_s23  ;;  %v428_v30 = vld [vmem:[%s11978_s18 + $0x2b0] sm:$0xff]  ;;  %v10440_v36 = vld [vmem:[%s11978_s18 + $0x2d8] sm:$0xff] }
 0x205   : > { %v7030_v49 = vld [vmem:[#allocation4 + $0x47] sm:$0xff]  ;;  %v7031_v6 = vld [vmem:[#allocation4 + $0x4f] sm:$0xff]  ;;  %v6870_v10 = vpack.c.bf16 %v6840_v27, %v6839_v45  ;;  %2985 = vrot.lane.b32.xlu0 %v13148_v60, %s11902_s23  ;;  %v13214_v54 = vpop.f32.mrb[18].mxu0  ;;  %6502 = vst.msk [vmem:[#allocation5 + $0x50] sm:$0xff] %vm5962_vm11, %v13199_v42 }
 0x206   : > { %v7062_v44 = vpack.c.bf16 %v7031_v6, %v7030_v49  ;;  %v7222_v52 = vld [vmem:[#allocation4 + $0x49] sm:$0xff]  ;;  %6695 = vst.msk [vmem:[#allocation5 + $0x58] sm:$0xff] %vm5962_vm11, %v13201_v43  ;;  %v13223_v57 = vpop.f32.mrb[19].mxu0  ;;  %v923_v58 = vpop.permute.xlu1 %922  ;;  %v5591_v26 = vmul.f32 %v13214_v54, %v12852_v23  ;;  %v10441_v27 = vld [vmem:[%s11978_s18 + $0x2e0] sm:$0xff] }
 0x207   : > { %v7254_v12 = vpack.c.bf16 %v7223_v37, %v7222_v52  ;;  %6886 = vst.msk [vmem:[#allocation5 + $0x38] sm:$0xff] %vm5962_vm11, %v6870_v10  ;;  %v4512_v53 = vpop.permute.xlu0 %4511  ;;  %v5589_v3 = vmul.f32 %v12852_v23, %v13223_v57  ;;  %v427_v29 = vld [vmem:[%s11978_s18 + $0x2a8] sm:$0xff]  ;;  %v10439_v35 = vld [vmem:[%s11978_s18 + $0x2d0] sm:$0xff]  ;;  %v13307_v51 = vpack.c.bf16 %v10442_v14, %v10441_v27 }
 0x208   : > { %7078 = vst.msk [vmem:[#allocation5 + $0x18] sm:$0xff] %vm5962_vm11, %v7062_v44  ;;  %3501 = vrot.lane.b32.xlu1 %v13208_v15, %s11903_s24  ;;  %v521_v38 = vpack.c.bf16 %v428_v30, %v427_v29  ;;  %v5725_v6 = vadd.f32 %v12863_v28, %v5591_v26  ;;  %v10569_v10 = vld [vmem:[%s11978_s18 + $0x2e1] sm:$0xff]  ;;  %v13315_v54 = vpack.c.bf16 %v10440_v36, %v10439_v35 }
 0x209   : > { %1090 = vst.msk [vmem:[#allocation2 + $0xc8] sm:$0xff] %vm1064_vm2, %v923_v58  ;;  %3499 = vrot.lane.b32.xlu0 %v3341_v55, %s11903_s24  ;;  %v5723_v44 = vadd.f32 %v12863_v28, %v5589_v3 }
 0x20a   : > { %7270 = vst.msk [vmem:[#allocation5 + $0x20] sm:$0xff] %vm5962_vm11, %v7254_v12  ;;  %v1436_v0 = vpop.permute.xlu1 %1435 }
 0x20b   : > { %4681 = vst.msk [vmem:[#allocation2 + $0xb8] sm:$0xff] %vm4657_vm9, %v4512_v53  ;;  %v1434_v7 = vpop.permute.xlu0 %1433  ;;  %v4744_v11 = vld [vmem:[#allocation2 + $0xb0] sm:$0xff]  ;;  %v522_v53 = vpack.c.bf16 %v430_v56, %v429_v5 }
 0x20c   : > { %1603 = vst.msk [vmem:[#allocation2 + $0xc8] sm:$0xff] %vm1577_vm3, %v1436_v0  ;;  %1602 = vst.msk [vmem:[#allocation2 + $0xc0] sm:$0xff] %vm1577_vm3, %v1434_v7  ;;  %11397 = vmatprep.mubr.msk.bf16.mxu0 %vm4822_vm10, %v4744_v11  ;;  %4014 = vrot.lane.b32.xlu1 %v13234_v62, %s11904_s29 }
 0x20d   : > { %4012 = vrot.lane.b32.xlu0 %v13238_v63, %s11904_s29  ;;  %586 = vst.msk [vmem:[#allocation2 + $0x110] sm:$0xff] %vm551_vm0, %v521_v38  ;;  %587 = vst.msk [vmem:[#allocation2 + $0x118] sm:$0xff] %vm551_vm0, %v522_v53  ;;  %v10444_v53 = vld [vmem:[%s11978_s18 + $0x300] sm:$0xff] }
 0x20e   : > { %v1950_v13 = vpop.permute.xlu1 %1949 }
 0x20f   : > { %2117 = vst.msk [vmem:[#allocation2 + $0xc8] sm:$0xff] %vm2091_vm4, %v1950_v13  ;;  %v1948_v19 = vpop.permute.xlu0 %1947  ;;  %v5853_v13 = vmax.f32 %v5725_v6, 0.0  ;;  %v10698_v6 = vld [vmem:[%s11978_s18 + $0x2ea] sm:$0xff] }
 0x210   : > { %2116 = vst.msk [vmem:[#allocation2 + $0xc0] sm:$0xff] %vm2091_vm4, %v1948_v19  ;;  %936 = vrot.lane.b32.xlu1 %v13128_v46, %s11899_s20  ;;  %v5851_v19 = vmax.f32 %v5723_v44, 0.0 }
 0x211   : > { %4525 = vrot.lane.b32.xlu0 %v13249_v33, %s11905_s25  ;;  %v5996_v29 = vsel %vm5962_vm11, %v5853_v13, -inf }
 0x212   : > { %v4745_v20 = vld [vmem:[#allocation2 + $0xb8] sm:$0xff]  ;;  %v2463_v21 = vpop.permute.xlu1 %2462 }
 0x213   : > { %11398 = vmatmul.mubr.msk.bf16.gmra.mrb[44].mxu0 %vm4822_vm10, %v4745_v20  ;;  %2630 = vst.msk [vmem:[#allocation2 + $0xc8] sm:$0xff] %vm2604_vm5, %v2463_v21  ;;  %v2461_v47 = vpop.permute.xlu0 %2460  ;;  %v13342_v21 = vld [vmem:[%s16461_s3] ss:$0 sm:$0xff] }
 0x214   : > { %2629 = vst.msk [vmem:[#allocation2 + $0xc0] sm:$0xff] %vm2604_vm5, %v2461_v47  ;;  %938 = vrot.lane.b32.xlu1 %v13122_v41, %s11899_s20 }
 0x215   : > { %4527 = vrot.lane.b32.xlu0 %v13260_v32, %s11905_s25 }
 0x216   : > { %v2976_v40 = vpop.permute.xlu1 %2975 }
 0x217   : > { %3143 = vst.msk [vmem:[#allocation2 + $0xc8] sm:$0xff] %vm3117_vm6, %v2976_v40  ;;  %v2974_v46 = vpop.permute.xlu0 %2973 }
 0x218   : > { %3142 = vst.msk [vmem:[#allocation2 + $0xc0] sm:$0xff] %vm3117_vm6, %v2974_v46  ;;  %1451 = vrot.lane.b32.xlu1 %v13162_v1, %s11898_s19  ;;  %v5590_v1 = vmul.f32 %v13197_v39, %v12852_v23 }
 0x219   : > { %1449 = vrot.lane.b32.xlu0 %v13148_v60, %s11898_s19  ;;  %v5588_v60 = vmul.f32 %v12852_v23, %v13204_v50 }
 0x21a   : > { %v3490_v22 = vpop.permute.xlu1 %3489  ;;  %v5724_v31 = vadd.f32 %v12863_v28, %v5590_v1  ;;  %v10695_v1 = vld [vmem:[%s11978_s18 + $0x2d2] sm:$0xff] }
 0x21b   : > { %3657 = vst.msk [vmem:[#allocation2 + $0xc8] sm:$0xff] %vm3631_vm7, %v3490_v22  ;;  %v3488_v41 = vpop.permute.xlu0 %3487  ;;  %v5722_v39 = vadd.f32 %v12863_v28, %v5588_v60 }
 0x21c   : > { %3656 = vst.msk [vmem:[#allocation2 + $0xc0] sm:$0xff] %vm3631_vm7, %v3488_v41  ;;  %1965 = vrot.lane.b32.xlu1 %v13208_v15, %s11900_s21  ;;  %v5852_v18 = vmax.f32 %v5724_v31, 0.0 }
 0x21d   : > { %1963 = vrot.lane.b32.xlu0 %v3341_v55, %s11900_s21  ;;  %v10570_v55 = vld [vmem:[%s11978_s18 + $0x2e9] sm:$0xff]  ;;  %v5850_v0 = vmax.f32 %v5722_v39, 0.0 }
 0x21e   : > { %v4003_v24 = vpop.permute.xlu1 %4002  ;;  %v13336_v17 = vpack.c.bf16 %v10570_v55, %v10569_v10  ;;  %v5993_v40 = vsel %vm5962_vm11, %v5852_v18, -inf }
 0x21f   : > { %4170 = vst.msk [vmem:[#allocation2 + $0xc8] sm:$0xff] %vm4144_vm8, %v4003_v24  ;;  %v4001_v25 = vpop.permute.xlu0 %4000  ;;  %v10696_v24 = vld [vmem:[%s11978_s18 + $0x2da] sm:$0xff]  ;;  %v5987_v60 = vsel %vm5962_vm11, %v5850_v0, -inf }
 0x220   : > { %4169 = vst.msk [vmem:[#allocation2 + $0xc0] sm:$0xff] %vm4144_vm8, %v4001_v25  ;;  %2478 = vrot.lane.b32.xlu1 %v13234_v62, %s11901_s22  ;;  %v13367_v38 = vpack.c.bf16 %v10696_v24, %v10695_v1 }
 0x221   : > { %2476 = vrot.lane.b32.xlu0 %v13238_v63, %s11901_s22 }
 0x222   : > { %v925_v34 = vpop.permute.xlu1 %924 }
 0x223   : > { %1091 = vst.msk [vmem:[#allocation2 + $0xd0] sm:$0xff] %vm1064_vm2, %v925_v34  ;;  %v4514_v45 = vpop.permute.xlu0 %4513  ;;  %v11375_v49 = vpop.f32.mrb[20].mxu0  ;;  %v5990_v34 = vsel %vm5962_vm11, %v5851_v19, -inf }
 0x224   : > { %4682 = vst.msk [vmem:[#allocation2 + $0xc0] sm:$0xff] %vm4657_vm9, %v4514_v45  ;;  %v5594_v50 = vmul.f32 %v11375_v49, %v12852_v23  ;;  %v5133_v15 = vpop.f32.mrb[21].mxu0  ;;  %2991 = vrot.lane.b32.xlu1 %v13260_v32, %s11902_s23  ;;  %v10697_v49 = vld [vmem:[%s11978_s18 + $0x2e2] sm:$0xff] }
 0x225   : > { %v5592_v52 = vmul.f32 %v12852_v23, %v5133_v15  ;;  %2989 = vrot.lane.b32.xlu0 %v13249_v33, %s11902_s23  ;;  %v11376_v37 = vpop.f32.mrb[22].mxu0  ;;  %v13381_v10 = vpack.c.bf16 %v10698_v6, %v10697_v49  ;;  %v10572_v49 = vld [vmem:[%s11978_s18 + $0x301] sm:$0xff] }
 0x226   : > { %v5728_v12 = vadd.f32 %v12863_v28, %v5594_v50  ;;  %v5595_v57 = vmul.f32 %v11376_v37, %v12852_v23  ;;  %v5136_v58 = vpop.f32.mrb[23].mxu0  ;;  %v927_v59 = vpop.permute.xlu1 %926 }
 0x227   : > { %v5726_v2 = vadd.f32 %v12863_v28, %v5592_v52  ;;  %v5593_v7 = vmul.f32 %v13328_v4, %v5136_v58  ;;  %1092 = vst.msk [vmem:[#allocation2 + $0xd8] sm:$0xff] %vm1064_vm2, %v927_v59  ;;  %v4516_v11 = vpop.permute.xlu0 %4515  ;;  %v10445_v59 = vld [vmem:[%s11978_s18 + $0x308] sm:$0xff] }
 0x228   : > { %v5856_v23 = vmax.f32 %v5728_v12, 0.0  ;;  %v5729_v16 = vadd.f32 %v12863_v28, %v5595_v57  ;;  %4683 = vst.msk [vmem:[#allocation2 + $0xc8] sm:$0xff] %vm4657_vm9, %v4516_v11  ;;  %3505 = vrot.lane.b32.xlu1 %v13307_v51, %s11903_s24  ;;  %v13347_v28 = vpack.c.bf16 %v10568_v48, %v10567_v61  ;;  %v10446_v61 = vld [vmem:[%s11978_s18 + $0x310] sm:$0xff]  ;;  %v10443_v48 = vld [vmem:[%s11978_s18 + $0x2f8] sm:$0xff] }
 0x229   : > { %v5854_v20 = vmax.f32 %v5726_v2, 0.0  ;;  %v5727_v47 = vadd.f32 %v13342_v21, %v5593_v7  ;;  %3503 = vrot.lane.b32.xlu0 %v13315_v54, %s11903_s24  ;;  %v432_v7 = vld [vmem:[%s11978_s18 + $0x2d8] sm:$0xff] }
 0x22a   : > { %v5994_v46 = vsel %vm5962_vm11, %v5856_v23, -inf  ;;  %v5857_v22 = vmax.f32 %v5729_v16, 0.0  ;;  %v1440_v41 = vpop.permute.xlu1 %1439 }
 0x22b   : > { %v5995_v25 = vmax.f32 %v5993_v40, %v5994_v46  ;;  %v5988_v26 = vsel %vm5962_vm11, %v5854_v20, -inf  ;;  %v5855_v27 = vmax.f32 %v5727_v47, 0.0  ;;  %1605 = vst.msk [vmem:[#allocation2 + $0xd8] sm:$0xff] %vm1577_vm3, %v1440_v41  ;;  %v1438_v3 = vpop.permute.xlu0 %1437  ;;  %v4746_v14 = vld [vmem:[#allocation2 + $0xc0] sm:$0xff] }
 0x22c   : > { %v5989_v30 = vmax.f32 %v5987_v60, %v5988_v26  ;;  %v5997_v31 = vsel %vm5962_vm11, %v5857_v22, -inf  ;;  %1604 = vst.msk [vmem:[#allocation2 + $0xd0] sm:$0xff] %vm1577_vm3, %v1438_v3  ;;  %11401 = vmatprep.mubr.msk.bf16.mxu0 %vm4822_vm10, %v4746_v14  ;;  %4018 = vrot.lane.b32.xlu1 %v13336_v17, %s11904_s29  ;;  %v13429_v26 = vpack.c.bf16 %v10446_v61, %v10445_v59 }
 0x22d   : > { %6165 = vst.msk [vmem:[#allocation3 + $0x50] sm:$0xff] %vm5962_vm11, %v5995_v25  ;;  %v5998_v35 = vmax.f32 %v5996_v29, %v5997_v31  ;;  %v5991_v36 = vsel %vm5962_vm11, %v5855_v27, -inf  ;;  %4016 = vrot.lane.b32.xlu0 %v13347_v28, %s11904_s29  ;;  %v10573_v27 = vld [vmem:[%s11978_s18 + $0x309] sm:$0xff]  ;;  %v10574_v31 = vld [vmem:[%s11978_s18 + $0x311] sm:$0xff] }
 0x22e   : > { %6163 = vst.msk [vmem:[#allocation3 + $0x40] sm:$0xff] %vm5962_vm11, %v5989_v30  ;;  %v5992_v39 = vmax.f32 %v5990_v34, %v5991_v36  ;;  %v1954_v45 = vpop.permute.xlu1 %1953  ;;  %v3345_v30 = vpack.c.bf16 %v10444_v53, %v10443_v48  ;;  %v433_v34 = vld [vmem:[%s11978_s18 + $0x2e0] sm:$0xff] }
 0x22f   : > { %6166 = vst.msk [vmem:[#allocation3 + $0x58] sm:$0xff] %vm5962_vm11, %v5998_v35  ;;  %v1952_v50 = vpop.permute.xlu0 %1951  ;;  %v4747_v15 = vld [vmem:[#allocation2 + $0xc8] sm:$0xff] }
 0x230   : > { %2119 = vst.msk [vmem:[#allocation2 + $0xd8] sm:$0xff] %vm2091_vm4, %v1954_v45  ;;  %2118 = vst.msk [vmem:[#allocation2 + $0xd0] sm:$0xff] %vm2091_vm4, %v1952_v50  ;;  %11402 = vmatmul.mubr.msk.bf16.gmra.mrb[48].mxu0 %vm4822_vm10, %v4747_v15  ;;  %940 = vrot.lane.b32.xlu1 %v13238_v63, %s11899_s20  ;;  %v434_v35 = vld [vmem:[%s11978_s18 + $0x2e8] sm:$0xff]  ;;  %v10571_v45 = vld [vmem:[%s11978_s18 + $0x2f9] sm:$0xff]  ;;  %v13456_v15 = vpack.c.bf16 %v10574_v31, %v10573_v27 }
 0x231   : > { %6164 = vst.msk [vmem:[#allocation3 + $0x48] sm:$0xff] %vm5962_vm11, %v5992_v39  ;;  %4529 = vrot.lane.b32.xlu0 %v13367_v38, %s11905_s25  ;;  %v524_v6 = vpack.c.bf16 %v434_v35, %v433_v34  ;;  %v10578_v34 = vld [vmem:[%s11978_s18 + $0x339] sm:$0xff]  ;;  %v437_v35 = vld [vmem:[%s11978_s18 + $0x308] sm:$0xff] }
 0x232   : > { %v2467_v44 = vpop.permute.xlu1 %2466 }
 0x233   : > { %2632 = vst.msk [vmem:[#allocation2 + $0xd8] sm:$0xff] %vm2604_vm5, %v2467_v44  ;;  %v2465_v52 = vpop.permute.xlu0 %2464  ;;  %v13460_v44 = vpack.c.bf16 %v10572_v49, %v10571_v45 }
 0x234   : > { %2631 = vst.msk [vmem:[#allocation2 + $0xd0] sm:$0xff] %vm2604_vm5, %v2465_v52  ;;  %942 = vrot.lane.b32.xlu1 %v13234_v62, %s11899_s20 }
 0x235   : > { %4531 = vrot.lane.b32.xlu0 %v13381_v10, %s11905_s25  ;;  %589 = vst.msk [vmem:[#allocation2 + $0x128] sm:$0xff] %vm551_vm0, %v524_v6 }
 0x236   : > { %v6229_v37 = vld [vmem:[#allocation3 + $0x50] ss:$2 sm:$0xff]  ;;  %v6293_v55 = vld [vmem:[#allocation3 + $0x51] ss:$2 sm:$0xff]  ;;  %v2980_v63 = vpop.permute.xlu1 %2979 }
 0x237   : > { %v6351_v5 = vmax.f32 %v6229_v37, %v6293_v55  ;;  %3145 = vst.msk [vmem:[#allocation2 + $0xd8] sm:$0xff] %vm3117_vm6, %v2980_v63  ;;  %v2978_v12 = vpop.permute.xlu0 %2977  ;;  %v10699_v37 = vld [vmem:[%s11978_s18 + $0x2fa] sm:$0xff]  ;;  %v10700_v55 = vld [vmem:[%s11978_s18 + $0x302] sm:$0xff] }
 0x238   : > { %v6227_v56 = vld [vmem:[#allocation3 + $0x40] ss:$2 sm:$0xff]  ;;  %v6291_v18 = vld [vmem:[#allocation3 + $0x41] ss:$2 sm:$0xff]  ;;  %3144 = vst.msk [vmem:[#allocation2 + $0xd0] sm:$0xff] %vm3117_vm6, %v2978_v12  ;;  %1455 = vrot.lane.b32.xlu1 %v13260_v32, %s11898_s19 }
 0x239   : > { %v6350_v57 = vmax.f32 %v6227_v56, %v6291_v18  ;;  %6425 = vst.msk [vmem:[#allocation4 + $0x70] sm:$0xff] %vm5962_vm11, %v6351_v5  ;;  %1453 = vrot.lane.b32.xlu0 %v13249_v33, %s11898_s19  ;;  %v13471_v56 = vpack.c.bf16 %v10700_v55, %v10699_v37  ;;  %v10701_v12 = vld [vmem:[%s11978_s18 + $0x30a] sm:$0xff] }
 0x23a   : > { %v3494_v62 = vpop.permute.xlu1 %3493  ;;  %v10576_v37 = vld [vmem:[%s11978_s18 + $0x329] sm:$0xff] }
 0x23b   : > { %6424 = vst.msk [vmem:[#allocation4 + $0x68] sm:$0xff] %vm5962_vm11, %v6350_v57  ;;  %v3492_v58 = vpop.permute.xlu0 %3491  ;;  %v10702_v57 = vld [vmem:[%s11978_s18 + $0x312] sm:$0xff] }
 0x23c   : > { %3659 = vst.msk [vmem:[#allocation2 + $0xd8] sm:$0xff] %vm3631_vm7, %v3494_v62  ;;  %3658 = vst.msk [vmem:[#allocation2 + $0xd0] sm:$0xff] %vm3631_vm7, %v3492_v58  ;;  %1969 = vrot.lane.b32.xlu1 %v13307_v51, %s11900_s21 }
 0x23d   : > { %1967 = vrot.lane.b32.xlu0 %v13315_v54, %s11900_s21  ;;  %v431_v54 = vld [vmem:[%s11978_s18 + $0x2d0] sm:$0xff] }
 0x23e   : > { %v4007_v32 = vpop.permute.xlu1 %4006  ;;  %v523_v23 = vpack.c.bf16 %v432_v7, %v431_v54  ;;  %v10450_v7 = vld [vmem:[%s11978_s18 + $0x338] sm:$0xff] }
 0x23f   : > { %4172 = vst.msk [vmem:[#allocation2 + $0xd8] sm:$0xff] %vm4144_vm8, %v4007_v32  ;;  %v4005_v33 = vpop.permute.xlu0 %4004  ;;  %v13482_v32 = vpack.c.bf16 %v10702_v57, %v10701_v12 }
 0x240   : > { %4171 = vst.msk [vmem:[#allocation2 + $0xd0] sm:$0xff] %vm4144_vm8, %v4005_v33  ;;  %2482 = vrot.lane.b32.xlu1 %v13336_v17, %s11901_s22  ;;  %v6523_v0 = vld [vmem:[#allocation4 + $0x70] sm:$0xff] }
 0x241   : > { %v6906_v2 = vld [vmem:[#allocation4 + $0x71] sm:$0xff]  ;;  %2480 = vrot.lane.b32.xlu0 %v13347_v28, %s11901_s22  ;;  %588 = vst.msk [vmem:[#allocation2 + $0x120] sm:$0xff] %vm551_vm0, %v523_v23 }
 0x242   : > { %v7225_v51 = vld [vmem:[#allocation4 + $0x71] sm:$0xff]  ;;  %v6713_v11 = vld [vmem:[#allocation4 + $0x67] sm:$0xff]  ;;  %v929_v13 = vpop.permute.xlu1 %928 }
 0x243   : > { %v6714_v16 = vld [vmem:[#allocation4 + $0x6f] sm:$0xff]  ;;  %1093 = vst.msk [vmem:[#allocation2 + $0xe0] sm:$0xff] %vm1064_vm2, %v929_v13  ;;  %v4518_v47 = vpop.permute.xlu0 %4517  ;;  %v13416_v40 = vpop.f32.mrb[24].mxu0  ;;  %v7032_v1 = vld [vmem:[#allocation4 + $0x67] sm:$0xff] }
 0x244   : > { %v6522_v19 = vld [vmem:[#allocation4 + $0x68] sm:$0xff]  ;;  %v13418_v46 = vpack.c.bf16 %v6714_v16, %v6713_v11  ;;  %4684 = vst.msk [vmem:[#allocation2 + $0xd0] sm:$0xff] %vm4657_vm9, %v4518_v47  ;;  %v13425_v25 = vpop.f32.mrb[25].mxu0  ;;  %2995 = vrot.lane.b32.xlu1 %v13381_v10, %s11902_s23  ;;  %v435_v11 = vld [vmem:[%s11978_s18 + $0x2f8] sm:$0xff]  ;;  %v436_v13 = vld [vmem:[%s11978_s18 + $0x300] sm:$0xff] }
 0x245   : > { %v6905_v20 = vld [vmem:[#allocation4 + $0x69] sm:$0xff]  ;;  %v13420_v22 = vpack.c.bf16 %v6523_v0, %v6522_v19  ;;  %2993 = vrot.lane.b32.xlu0 %v13367_v38, %s11902_s23  ;;  %v13435_v29 = vpop.f32.mrb[26].mxu0  ;;  %v10447_v19 = vld [vmem:[%s11978_s18 + $0x320] sm:$0xff]  ;;  %v525_v47 = vpack.c.bf16 %v436_v13, %v435_v11 }
 0x246   : > { %v13422_v41 = vpack.c.bf16 %v6906_v2, %v6905_v20  ;;  %v7033_v24 = vld [vmem:[#allocation4 + $0x6f] sm:$0xff]  ;;  %6503 = vst.msk [vmem:[#allocation5 + $0x78] sm:$0xff] %vm5962_vm11, %v13418_v46  ;;  %v13446_v36 = vpop.f32.mrb[27].mxu0  ;;  %v931_v39 = vpop.permute.xlu1 %930  ;;  %v5599_v2 = vmul.f32 %v13328_v4, %v13435_v29 }
 0x247   : > { %v7224_v60 = vld [vmem:[#allocation4 + $0x69] sm:$0xff]  ;;  %v7063_v3 = vpack.c.bf16 %v7033_v24, %v7032_v1  ;;  %6887 = vst.msk [vmem:[#allocation5 + $0x60] sm:$0xff] %vm5962_vm11, %v13420_v22  ;;  %v4520_v50 = vpop.permute.xlu0 %4519  ;;  %v5597_v54 = vmul.f32 %v13328_v4, %v13446_v36 }
 0x248   : > { %v7255_v14 = vpack.c.bf16 %v7225_v51, %v7224_v60  ;;  %6696 = vst.msk [vmem:[#allocation5 + $0x80] sm:$0xff] %vm5962_vm11, %v13422_v41  ;;  %3509 = vrot.lane.b32.xlu1 %v13429_v26, %s11903_s24  ;;  %v10449_v51 = vld [vmem:[%s11978_s18 + $0x330] sm:$0xff]  ;;  %v10448_v20 = vld [vmem:[%s11978_s18 + $0x328] sm:$0xff]  ;;  %v5733_v60 = vadd.f32 %v13342_v21, %v5599_v2 }
 0x249   : > { %7079 = vst.msk [vmem:[#allocation5 + $0x40] sm:$0xff] %vm5962_vm11, %v7063_v3  ;;  %3507 = vrot.lane.b32.xlu0 %v3345_v30, %s11903_s24  ;;  %v13529_v27 = vpack.c.bf16 %v10450_v7, %v10449_v51  ;;  %v10577_v3 = vld [vmem:[%s11978_s18 + $0x331] sm:$0xff]  ;;  %v13537_v31 = vpack.c.bf16 %v10448_v20, %v10447_v19 }
 0x24a   : > { %7271 = vst.msk [vmem:[#allocation5 + $0x48] sm:$0xff] %vm5962_vm11, %v7255_v14  ;;  %v1444_v52 = vpop.permute.xlu1 %1443  ;;  %v5731_v14 = vadd.f32 %v13342_v21, %v5597_v54  ;;  %v438_v36 = vld [vmem:[%s11978_s18 + $0x310] sm:$0xff]  ;;  %v5861_v57 = vmax.f32 %v5733_v60, 0.0 }
 0x24b   : > { %1094 = vst.msk [vmem:[#allocation2 + $0xe8] sm:$0xff] %vm1064_vm2, %v931_v39  ;;  %v1442_v63 = vpop.permute.xlu0 %1441  ;;  %v4748_v5 = vld [vmem:[#allocation2 + $0xd0] sm:$0xff]  ;;  %v526_v55 = vpack.c.bf16 %v438_v36, %v437_v35 }
 0x24c   : > { %4685 = vst.msk [vmem:[#allocation2 + $0xd8] sm:$0xff] %vm4657_vm9, %v4520_v50  ;;  %11405 = vmatprep.mubr.msk.bf16.mxu0 %vm4822_vm10, %v4748_v5  ;;  %4022 = vrot.lane.b32.xlu1 %v13456_v15, %s11904_s29  ;;  %v10704_v2 = vld [vmem:[%s11978_s18 + $0x32a] sm:$0xff] }
 0x24d   : > { %1607 = vst.msk [vmem:[#allocation2 + $0xe8] sm:$0xff] %vm1577_vm3, %v1444_v52  ;;  %1606 = vst.msk [vmem:[#allocation2 + $0xe0] sm:$0xff] %vm1577_vm3, %v1442_v63  ;;  %4020 = vrot.lane.b32.xlu0 %v13460_v44, %s11904_s29  ;;  %v10575_v52 = vld [vmem:[%s11978_s18 + $0x321] sm:$0xff] }
 0x24e   : > { %v1958_v18 = vpop.permute.xlu1 %1957  ;;  %590 = vst.msk [vmem:[#allocation2 + $0x130] sm:$0xff] %vm551_vm0, %v525_v47  ;;  %591 = vst.msk [vmem:[#allocation2 + $0x138] sm:$0xff] %vm551_vm0, %v526_v55  ;;  %v10453_v55 = vld [vmem:[%s11978_s18 + $0x358] sm:$0xff] }
 0x24f   : > { %2121 = vst.msk [vmem:[#allocation2 + $0xe8] sm:$0xff] %vm2091_vm4, %v1958_v18  ;;  %v1956_v62 = vpop.permute.xlu0 %1955 }
 0x250   : > { %2120 = vst.msk [vmem:[#allocation2 + $0xe0] sm:$0xff] %vm2091_vm4, %v1956_v62  ;;  %944 = vrot.lane.b32.xlu1 %v13347_v28, %s11899_s20 }
 0x251   : > { %4533 = vrot.lane.b32.xlu0 %v13471_v56, %s11905_s25 }
 0x252   : > { %v2471_v33 = vpop.permute.xlu1 %2470 }
 0x253   : > { %v4749_v58 = vld [vmem:[#allocation2 + $0xd8] sm:$0xff]  ;;  %2634 = vst.msk [vmem:[#allocation2 + $0xe8] sm:$0xff] %vm2604_vm5, %v2471_v33  ;;  %v2469_v59 = vpop.permute.xlu0 %2468  ;;  %v13553_v33 = vpack.c.bf16 %v10578_v34, %v10577_v3 }
 0x254   : > { %11406 = vmatmul.mubr.msk.bf16.gmra.mrb[52].mxu0 %vm4822_vm10, %v4749_v58  ;;  %2633 = vst.msk [vmem:[#allocation2 + $0xe0] sm:$0xff] %vm2604_vm5, %v2469_v59  ;;  %946 = vrot.lane.b32.xlu1 %v13336_v17, %s11899_s20  ;;  %v5859_v59 = vmax.f32 %v5731_v14, 0.0  ;;  %v10706_v3 = vld [vmem:[%s11978_s18 + $0x33a] sm:$0xff] }
 0x255   : > { %4535 = vrot.lane.b32.xlu0 %v13482_v32, %s11905_s25 }
 0x256   : > { %v2984_v61 = vpop.permute.xlu1 %2983  ;;  %v6002_v47 = vsel %vm5962_vm11, %v5859_v59, -inf }
 0x257   : > { %3147 = vst.msk [vmem:[#allocation2 + $0xe8] sm:$0xff] %vm3117_vm6, %v2984_v61  ;;  %v2982_v28 = vpop.permute.xlu0 %2981 }
 0x258   : > { %3146 = vst.msk [vmem:[#allocation2 + $0xe0] sm:$0xff] %vm3117_vm6, %v2982_v28  ;;  %1459 = vrot.lane.b32.xlu1 %v13381_v10, %s11898_s19  ;;  %v5598_v10 = vmul.f32 %v13328_v4, %v13416_v40 }
 0x259   : > { %1457 = vrot.lane.b32.xlu0 %v13367_v38, %s11898_s19  ;;  %v5596_v38 = vmul.f32 %v13328_v4, %v13425_v25 }
 0x25a   : > { %v3498_v48 = vpop.permute.xlu1 %3497  ;;  %v5732_v23 = vadd.f32 %v13342_v21, %v5598_v10 }
 0x25b   : > { %3661 = vst.msk [vmem:[#allocation2 + $0xe8] sm:$0xff] %vm3631_vm7, %v3498_v48  ;;  %v3496_v17 = vpop.permute.xlu0 %3495  ;;  %v5730_v40 = vadd.f32 %v13342_v21, %v5596_v38  ;;  %v13559_v48 = vpack.c.bf16 %v10576_v37, %v10575_v52 }
 0x25c   : > { %3660 = vst.msk [vmem:[#allocation2 + $0xe0] sm:$0xff] %vm3631_vm7, %v3496_v17  ;;  %1973 = vrot.lane.b32.xlu1 %v13429_v26, %s11900_s21  ;;  %v5860_v39 = vmax.f32 %v5732_v23, 0.0 }
 0x25d   : > { %1971 = vrot.lane.b32.xlu0 %v3345_v30, %s11900_s21  ;;  %v5858_v63 = vmax.f32 %v5730_v40, 0.0 }
 0x25e   : > { %v4011_v53 = vpop.permute.xlu1 %4010  ;;  %v6005_v17 = vsel %vm5962_vm11, %v5860_v39, -inf }
 0x25f   : > { %4174 = vst.msk [vmem:[#allocation2 + $0xe8] sm:$0xff] %vm4144_vm8, %v4011_v53  ;;  %v4009_v0 = vpop.permute.xlu0 %4008  ;;  %v5999_v51 = vsel %vm5962_vm11, %v5858_v63, -inf  ;;  %v10454_v63 = vld [vmem:[%s11978_s18 + $0x360] sm:$0xff] }
 0x260   : > { %4173 = vst.msk [vmem:[#allocation2 + $0xe0] sm:$0xff] %vm4144_vm8, %v4009_v0  ;;  %2486 = vrot.lane.b32.xlu1 %v13456_v15, %s11901_s22  ;;  %v10703_v0 = vld [vmem:[%s11978_s18 + $0x322] sm:$0xff] }
 0x261   : > { %2484 = vrot.lane.b32.xlu0 %v13460_v44, %s11901_s22 }
 0x262   : > { %v933_v16 = vpop.permute.xlu1 %932 }
 0x263   : > { %1095 = vst.msk [vmem:[#allocation2 + $0xf0] sm:$0xff] %vm1064_vm2, %v933_v16  ;;  %v4522_v1 = vpop.permute.xlu0 %4521  ;;  %v11383_v24 = vpop.f32.mrb[28].mxu0  ;;  %v6008_v16 = vsel %vm5962_vm11, %v5861_v57, -inf }
 0x264   : > { %4686 = vst.msk [vmem:[#allocation2 + $0xe0] sm:$0xff] %vm4657_vm9, %v4522_v1  ;;  %v5602_v25 = vmul.f32 %v13328_v4, %v11383_v24  ;;  %v5165_v26 = vpop.f32.mrb[29].mxu0  ;;  %2999 = vrot.lane.b32.xlu1 %v13482_v32, %s11902_s23  ;;  %v13579_v24 = vpack.c.bf16 %v10704_v2, %v10703_v0 }
 0x265   : > { %v5600_v29 = vmul.f32 %v13328_v4, %v5165_v26  ;;  %2997 = vrot.lane.b32.xlu0 %v13471_v56, %s11902_s23  ;;  %v11384_v30 = vpop.f32.mrb[30].mxu0  ;;  %v10705_v26 = vld [vmem:[%s11978_s18 + $0x332] sm:$0xff] }
 0x266   : > { %v5736_v45 = vadd.f32 %v13342_v21, %v5602_v25  ;;  %v5603_v49 = vmul.f32 %v13328_v4, %v11384_v30  ;;  %v5168_v6 = vpop.f32.mrb[31].mxu0  ;;  %v935_v50 = vpop.permute.xlu1 %934  ;;  %v13593_v30 = vpack.c.bf16 %v10706_v3, %v10705_v26 }
 0x267   : > { %v5734_v5 = vadd.f32 %v13342_v21, %v5600_v29  ;;  %v5601_v18 = vmul.f32 %v13328_v4, %v5168_v6  ;;  %1096 = vst.msk [vmem:[#allocation2 + $0xf8] sm:$0xff] %vm1064_vm2, %v935_v50  ;;  %v4524_v12 = vpop.permute.xlu0 %4523 }
 0x268   : > { %v5864_v62 = vmax.f32 %v5736_v45, 0.0  ;;  %v5737_v58 = vadd.f32 %v13342_v21, %v5603_v49  ;;  %4687 = vst.msk [vmem:[#allocation2 + $0xe8] sm:$0xff] %vm4657_vm9, %v4524_v12  ;;  %3513 = vrot.lane.b32.xlu1 %v13529_v27, %s11903_s24 }
 0x269   : > { %v5862_v61 = vmax.f32 %v5734_v5, 0.0  ;;  %v5735_v28 = vadd.f32 %v13342_v21, %v5601_v18  ;;  %3511 = vrot.lane.b32.xlu0 %v13537_v31, %s11903_s24  ;;  %v10451_v5 = vld [vmem:[%s11978_s18 + $0x348] sm:$0xff]  ;;  %v10452_v18 = vld [vmem:[%s11978_s18 + $0x350] sm:$0xff] }
 0x26a   : > { %v6006_v10 = vsel %vm5962_vm11, %v5864_v62, -inf  ;;  %v5865_v53 = vmax.f32 %v5737_v58, 0.0  ;;  %v1448_v38 = vpop.permute.xlu1 %1447  ;;  %v440_v62 = vld [vmem:[%s11978_s18 + $0x328] sm:$0xff] }
 0x26b   : > { %v6007_v54 = vmax.f32 %v6005_v17, %v6006_v10  ;;  %v6000_v7 = vsel %vm5962_vm11, %v5862_v61, -inf  ;;  %v5863_v11 = vmax.f32 %v5735_v28, 0.0  ;;  %1609 = vst.msk [vmem:[#allocation2 + $0xf8] sm:$0xff] %vm1577_vm3, %v1448_v38  ;;  %v1446_v13 = vpop.permute.xlu0 %1445  ;;  %v4750_v23 = vld [vmem:[#allocation2 + $0xe0] sm:$0xff] }
 0x26c   : > { %v6001_v19 = vmax.f32 %v5999_v51, %v6000_v7  ;;  %v6009_v20 = vsel %vm5962_vm11, %v5865_v53, -inf  ;;  %1608 = vst.msk [vmem:[#allocation2 + $0xf0] sm:$0xff] %vm1577_vm3, %v1446_v13  ;;  %11409 = vmatprep.mubr.msk.bf16.mxu0 %vm4822_vm10, %v4750_v23  ;;  %4026 = vrot.lane.b32.xlu1 %v13553_v33, %s11904_s29  ;;  %v13641_v23 = vpack.c.bf16 %v10454_v63, %v10453_v55 }
 0x26d   : > { %6169 = vst.msk [vmem:[#allocation3 + $0x70] sm:$0xff] %vm5962_vm11, %v6007_v54  ;;  %v6010_v40 = vmax.f32 %v6008_v16, %v6009_v20  ;;  %v6003_v1 = vsel %vm5962_vm11, %v5863_v11, -inf  ;;  %4024 = vrot.lane.b32.xlu0 %v13559_v48, %s11904_s29  ;;  %v10581_v16 = vld [vmem:[%s11978_s18 + $0x359] sm:$0xff] }
 0x26e   : > { %6167 = vst.msk [vmem:[#allocation3 + $0x60] sm:$0xff] %vm5962_vm11, %v6001_v19  ;;  %v6004_v60 = vmax.f32 %v6002_v47, %v6003_v1  ;;  %v1962_v25 = vpop.permute.xlu1 %1961  ;;  %v10582_v1 = vld [vmem:[%s11978_s18 + $0x361] sm:$0xff] }
 0x26f   : > { %6170 = vst.msk [vmem:[#allocation3 + $0x78] sm:$0xff] %vm5962_vm11, %v6010_v40  ;;  %v1960_v14 = vpop.permute.xlu0 %1959  ;;  %v4751_v29 = vld [vmem:[#allocation2 + $0xe8] sm:$0xff]  ;;  %v3349_v40 = vpack.c.bf16 %v10452_v18, %v10451_v5 }
 0x270   : > { %2123 = vst.msk [vmem:[#allocation2 + $0xf8] sm:$0xff] %vm2091_vm4, %v1962_v25  ;;  %2122 = vst.msk [vmem:[#allocation2 + $0xf0] sm:$0xff] %vm2091_vm4, %v1960_v14  ;;  %11410 = vmatmul.mubr.msk.bf16.gmra.mrb[56].mxu0 %vm4822_vm10, %v4751_v29  ;;  %948 = vrot.lane.b32.xlu1 %v13460_v44, %s11899_s20  ;;  %v442_v25 = vld [vmem:[%s11978_s18 + $0x338] sm:$0xff]  ;;  %v10579_v14 = vld [vmem:[%s11978_s18 + $0x349] sm:$0xff] }
 0x271   : > { %6168 = vst.msk [vmem:[#allocation3 + $0x68] sm:$0xff] %vm5962_vm11, %v6004_v60  ;;  %4537 = vrot.lane.b32.xlu0 %v13579_v24, %s11905_s25  ;;  %v441_v60 = vld [vmem:[%s11978_s18 + $0x330] sm:$0xff] }
 0x272   : > { %v2475_v34 = vpop.permute.xlu1 %2474  ;;  %v10580_v29 = vld [vmem:[%s11978_s18 + $0x351] sm:$0xff] }
 0x273   : > { %2636 = vst.msk [vmem:[#allocation2 + $0xf8] sm:$0xff] %vm2604_vm5, %v2475_v34  ;;  %v2473_v35 = vpop.permute.xlu0 %2472  ;;  %v528_v34 = vpack.c.bf16 %v442_v25, %v441_v60 }
 0x274   : > { %2635 = vst.msk [vmem:[#allocation2 + $0xf0] sm:$0xff] %vm2604_vm5, %v2473_v35  ;;  %950 = vrot.lane.b32.xlu1 %v13456_v15, %s11899_s20 }
 0x275   : > { %4539 = vrot.lane.b32.xlu0 %v13593_v30, %s11905_s25  ;;  %593 = vst.msk [vmem:[#allocation2 + $0x148] sm:$0xff] %vm551_vm0, %v528_v34 }
 0x276   : > { %v6233_v36 = vld [vmem:[#allocation3 + $0x70] ss:$2 sm:$0xff]  ;;  %v6297_v39 = vld [vmem:[#allocation3 + $0x71] ss:$2 sm:$0xff]  ;;  %v2988_v44 = vpop.permute.xlu1 %2987 }
 0x277   : > { %v6353_v45 = vmax.f32 %v6233_v36, %v6297_v39  ;;  %3149 = vst.msk [vmem:[#allocation2 + $0xf8] sm:$0xff] %vm3117_vm6, %v2988_v44  ;;  %v2986_v50 = vpop.permute.xlu0 %2985  ;;  %v13668_v36 = vpack.c.bf16 %v10582_v1, %v10581_v16  ;;  %v13672_v39 = vpack.c.bf16 %v10580_v29, %v10579_v14  ;;  %v445_v14 = vld [vmem:[%s11978_s18 + $0x358] sm:$0xff]  ;;  %v446_v29 = vld [vmem:[%s11978_s18 + $0x360] sm:$0xff] }
 0x278   : > { %v6231_v49 = vld [vmem:[#allocation3 + $0x60] ss:$2 sm:$0xff]  ;;  %v6295_v6 = vld [vmem:[#allocation3 + $0x61] ss:$2 sm:$0xff]  ;;  %3148 = vst.msk [vmem:[#allocation2 + $0xf0] sm:$0xff] %vm3117_vm6, %v2986_v50  ;;  %1463 = vrot.lane.b32.xlu1 %v13482_v32, %s11898_s19 }
 0x279   : > { %v6352_v52 = vmax.f32 %v6231_v49, %v6295_v6  ;;  %6427 = vst.msk [vmem:[#allocation4 + $0x90] sm:$0xff] %vm5962_vm11, %v6353_v45  ;;  %1461 = vrot.lane.b32.xlu0 %v13471_v56, %s11898_s19  ;;  %v10707_v45 = vld [vmem:[%s11978_s18 + $0x34a] sm:$0xff]  ;;  %v10708_v49 = vld [vmem:[%s11978_s18 + $0x352] sm:$0xff] }
 0x27a   : > { %v3502_v15 = vpop.permute.xlu1 %3501 }
 0x27b   : > { %6426 = vst.msk [vmem:[#allocation4 + $0x88] sm:$0xff] %vm5962_vm11, %v6352_v52  ;;  %v3500_v37 = vpop.permute.xlu0 %3499  ;;  %v13683_v52 = vpack.c.bf16 %v10708_v49, %v10707_v45 }
 0x27c   : > { %3663 = vst.msk [vmem:[#allocation2 + $0xf8] sm:$0xff] %vm3631_vm7, %v3502_v15  ;;  %3662 = vst.msk [vmem:[#allocation2 + $0xf0] sm:$0xff] %vm3631_vm7, %v3500_v37  ;;  %1977 = vrot.lane.b32.xlu1 %v13529_v27, %s11900_s21  ;;  %v10709_v37 = vld [vmem:[%s11978_s18 + $0x35a] sm:$0xff] }
 0x27d   : > { %1975 = vrot.lane.b32.xlu0 %v13537_v31, %s11900_s21  ;;  %v439_v31 = vld [vmem:[%s11978_s18 + $0x320] sm:$0xff] }
 0x27e   : > { %v4015_v32 = vpop.permute.xlu1 %4014  ;;  %v527_v61 = vpack.c.bf16 %v440_v62, %v439_v31 }
 0x27f   : > { %4176 = vst.msk [vmem:[#allocation2 + $0xf8] sm:$0xff] %vm4144_vm8, %v4015_v32  ;;  %v4013_v56 = vpop.permute.xlu0 %4012  ;;  %v10710_v32 = vld [vmem:[%s11978_s18 + $0x362] sm:$0xff] }
 0x280   : > { %4175 = vst.msk [vmem:[#allocation2 + $0xf0] sm:$0xff] %vm4144_vm8, %v4013_v56  ;;  %2490 = vrot.lane.b32.xlu1 %v13553_v33, %s11901_s22  ;;  %v6525_v12 = vld [vmem:[#allocation4 + $0x90] sm:$0xff]  ;;  %v13694_v63 = vpack.c.bf16 %v10710_v32, %v10709_v37 }
 0x281   : > { %v6908_v57 = vld [vmem:[#allocation4 + $0x91] sm:$0xff]  ;;  %2488 = vrot.lane.b32.xlu0 %v13559_v48, %s11901_s22  ;;  %592 = vst.msk [vmem:[#allocation2 + $0x140] sm:$0xff] %vm551_vm0, %v527_v61  ;;  %v10458_v61 = vld [vmem:[%s11978_s18 + $0x388] sm:$0xff] }
 0x282   : > { %v7227_v27 = vld [vmem:[#allocation4 + $0x91] sm:$0xff]  ;;  %v6715_v58 = vld [vmem:[#allocation4 + $0x87] sm:$0xff]  ;;  %v937_v59 = vpop.permute.xlu1 %936 }
 0x283   : > { %v6716_v28 = vld [vmem:[#allocation4 + $0x8f] sm:$0xff]  ;;  %1097 = vst.msk [vmem:[#allocation2 + $0x100] sm:$0xff] %vm1064_vm2, %v937_v59  ;;  %v4526_v53 = vpop.permute.xlu0 %4525  ;;  %v13628_v38 = vpop.f32.mrb[32].mxu0  ;;  %v7034_v54 = vld [vmem:[#allocation4 + $0x87] sm:$0xff] }
 0x284   : > { %v6524_v17 = vld [vmem:[#allocation4 + $0x88] sm:$0xff]  ;;  %v13630_v0 = vpack.c.bf16 %v6716_v28, %v6715_v58  ;;  %4688 = vst.msk [vmem:[#allocation2 + $0xf0] sm:$0xff] %vm4657_vm9, %v4526_v53  ;;  %v13637_v13 = vpop.f32.mrb[33].mxu0  ;;  %3003 = vrot.lane.b32.xlu1 %v13593_v30, %s11902_s23  ;;  %v10457_v58 = vld [vmem:[%s11978_s18 + $0x380] sm:$0xff] }
 0x285   : > { %v6907_v10 = vld [vmem:[#allocation4 + $0x89] sm:$0xff]  ;;  %v13632_v2 = vpack.c.bf16 %v6525_v12, %v6524_v17  ;;  %3001 = vrot.lane.b32.xlu0 %v13579_v24, %s11902_s23  ;;  %v13647_v47 = vpop.f32.mrb[34].mxu0 }
 0x286   : > { %v13634_v51 = vpack.c.bf16 %v6908_v57, %v6907_v10  ;;  %v7035_v7 = vld [vmem:[#allocation4 + $0x8f] sm:$0xff]  ;;  %6504 = vst.msk [vmem:[#allocation5 + $0xa0] sm:$0xff] %vm5962_vm11, %v13630_v0  ;;  %v13658_v26 = vpop.f32.mrb[35].mxu0  ;;  %v939_v3 = vpop.permute.xlu1 %938  ;;  %v5607_v62 = vmul.f32 %v13328_v4, %v13647_v47  ;;  %v13741_v47 = vpack.c.bf16 %v10458_v61, %v10457_v58 }
 0x287   : > { %v7226_v11 = vld [vmem:[#allocation4 + $0x89] sm:$0xff]  ;;  %v7064_v19 = vpack.c.bf16 %v7035_v7, %v7034_v54  ;;  %6888 = vst.msk [vmem:[#allocation5 + $0x88] sm:$0xff] %vm5962_vm11, %v13632_v2  ;;  %v4528_v35 = vpop.permute.xlu0 %4527  ;;  %v5605_v59 = vmul.f32 %v13328_v4, %v13658_v26  ;;  %v10456_v54 = vld [vmem:[%s11978_s18 + $0x378] sm:$0xff] }
 0x288   : > { %v7256_v20 = vpack.c.bf16 %v7227_v27, %v7226_v11  ;;  %6697 = vst.msk [vmem:[#allocation5 + $0xa8] sm:$0xff] %vm5962_vm11, %v13634_v51  ;;  %3517 = vrot.lane.b32.xlu1 %v13641_v23, %s11903_s24  ;;  %v443_v28 = vld [vmem:[%s11978_s18 + $0x348] sm:$0xff]  ;;  %v444_v17 = vld [vmem:[%s11978_s18 + $0x350] sm:$0xff]  ;;  %v5741_v16 = vadd.f32 %v13342_v21, %v5607_v62 }
 0x289   : > { %7080 = vst.msk [vmem:[#allocation5 + $0x68] sm:$0xff] %vm5962_vm11, %v7064_v19  ;;  %3515 = vrot.lane.b32.xlu0 %v3349_v40, %s11903_s24  ;;  %v529_v7 = vpack.c.bf16 %v444_v17, %v443_v28  ;;  %v5739_v1 = vadd.f32 %v13342_v21, %v5605_v59  ;;  %v10711_v58 = vld [vmem:[%s11978_s18 + $0x372] sm:$0xff]  ;;  %v10712_v59 = vld [vmem:[%s11978_s18 + $0x37a] sm:$0xff] }
 0x28a   : > { %7272 = vst.msk [vmem:[#allocation5 + $0x70] sm:$0xff] %vm5962_vm11, %v7256_v20  ;;  %v1452_v44 = vpop.permute.xlu1 %1451 }
 0x28b   : > { %1098 = vst.msk [vmem:[#allocation2 + $0x108] sm:$0xff] %vm1064_vm2, %v939_v3  ;;  %v1450_v6 = vpop.permute.xlu0 %1449  ;;  %v4752_v50 = vld [vmem:[#allocation2 + $0xf0] sm:$0xff] }
 0x28c   : > { %4689 = vst.msk [vmem:[#allocation2 + $0xf8] sm:$0xff] %vm4657_vm9, %v4528_v35  ;;  %11413 = vmatprep.mubr.msk.bf16.mxu0 %vm4822_vm10, %v4752_v50  ;;  %4030 = vrot.lane.b32.xlu1 %v13668_v36, %s11904_s29  ;;  %v10586_v3 = vld [vmem:[%s11978_s18 + $0x389] sm:$0xff]  ;;  %v10584_v50 = vld [vmem:[%s11978_s18 + $0x379] sm:$0xff] }
 0x28d   : > { %1611 = vst.msk [vmem:[#allocation2 + $0x108] sm:$0xff] %vm1577_vm3, %v1452_v44  ;;  %1610 = vst.msk [vmem:[#allocation2 + $0x100] sm:$0xff] %vm1577_vm3, %v1450_v6  ;;  %4028 = vrot.lane.b32.xlu0 %v13672_v39, %s11904_s29  ;;  %v10583_v6 = vld [vmem:[%s11978_s18 + $0x371] sm:$0xff] }
 0x28e   : > { %v1966_v15 = vpop.permute.xlu1 %1965  ;;  %594 = vst.msk [vmem:[#allocation2 + $0x150] sm:$0xff] %vm551_vm0, %v529_v7 }
 0x28f   : > { %2125 = vst.msk [vmem:[#allocation2 + $0x108] sm:$0xff] %vm2091_vm4, %v1966_v15  ;;  %v1964_v56 = vpop.permute.xlu0 %1963  ;;  %v530_v15 = vpack.c.bf16 %v446_v29, %v445_v14 }
 0x290   : > { %2124 = vst.msk [vmem:[#allocation2 + $0x100] sm:$0xff] %vm2091_vm4, %v1964_v56  ;;  %952 = vrot.lane.b32.xlu1 %v13559_v48, %s11899_s20 }
 0x291   : > { %4541 = vrot.lane.b32.xlu0 %v13683_v52, %s11905_s25  ;;  %595 = vst.msk [vmem:[#allocation2 + $0x158] sm:$0xff] %vm551_vm0, %v530_v15 }
 0x292   : > { %v2479_v5 = vpop.permute.xlu1 %2478 }
 0x293   : > { %v4753_v55 = vld [vmem:[#allocation2 + $0xf8] sm:$0xff]  ;;  %2638 = vst.msk [vmem:[#allocation2 + $0x108] sm:$0xff] %vm2604_vm5, %v2479_v5  ;;  %v2477_v18 = vpop.permute.xlu0 %2476  ;;  %v5869_v5 = vmax.f32 %v5741_v16, 0.0  ;;  %v13791_v16 = vpack.c.bf16 %v10712_v59, %v10711_v58 }
 0x294   : > { %11414 = vmatmul.mubr.msk.bf16.gmra.mrb[60].mxu0 %vm4822_vm10, %v4753_v55  ;;  %2637 = vst.msk [vmem:[#allocation2 + $0x100] sm:$0xff] %vm2604_vm5, %v2477_v18  ;;  %954 = vrot.lane.b32.xlu1 %v13553_v33, %s11899_s20 }
 0x295   : > { %4543 = vrot.lane.b32.xlu0 %v13694_v63, %s11905_s25 }
 0x296   : > { %v2992_v12 = vpop.permute.xlu1 %2991 }
 0x297   : > { %3151 = vst.msk [vmem:[#allocation2 + $0x108] sm:$0xff] %vm3117_vm6, %v2992_v12  ;;  %v2990_v48 = vpop.permute.xlu0 %2989 }
 0x298   : > { %3150 = vst.msk [vmem:[#allocation2 + $0x100] sm:$0xff] %vm3117_vm6, %v2990_v48  ;;  %1467 = vrot.lane.b32.xlu1 %v13593_v30, %s11898_s19  ;;  %v5606_v30 = vmul.f32 %v13328_v4, %v13628_v38  ;;  %v10455_v38 = vld [vmem:[%s11978_s18 + $0x370] sm:$0xff] }
 0x299   : > { %1465 = vrot.lane.b32.xlu0 %v13579_v24, %s11898_s19  ;;  %v5604_v24 = vmul.f32 %v13328_v4, %v13637_v13  ;;  %v13749_v26 = vpack.c.bf16 %v10456_v54, %v10455_v38  ;;  %v6020_v38 = vsel %vm5962_vm11, %v5869_v5, -inf }
 0x29a   : > { %v3506_v57 = vpop.permute.xlu1 %3505  ;;  %v5740_v10 = vadd.f32 %v13342_v21, %v5606_v30  ;;  %v13771_v30 = vpack.c.bf16 %v10584_v50, %v10583_v6 }
 0x29b   : > { %3665 = vst.msk [vmem:[#allocation2 + $0x108] sm:$0xff] %vm3631_vm7, %v3506_v57  ;;  %v3504_v33 = vpop.permute.xlu0 %3503  ;;  %v5738_v11 = vadd.f32 %v13342_v21, %v5604_v24  ;;  %v5867_v57 = vmax.f32 %v5739_v1, 0.0  ;;  %v10714_v1 = vld [vmem:[%s11978_s18 + $0x38a] sm:$0xff] }
 0x29c   : > { %3664 = vst.msk [vmem:[#allocation2 + $0x100] sm:$0xff] %vm3631_vm7, %v3504_v33  ;;  %1981 = vrot.lane.b32.xlu1 %v13641_v23, %s11900_s21  ;;  %v5868_v34 = vmax.f32 %v5740_v10, 0.0 }
 0x29d   : > { %1979 = vrot.lane.b32.xlu0 %v3349_v40, %s11900_s21  ;;  %v10585_v40 = vld [vmem:[%s11978_s18 + $0x381] sm:$0xff]  ;;  %v5866_v37 = vmax.f32 %v5738_v11, 0.0  ;;  %v6014_v11 = vsel %vm5962_vm11, %v5867_v57, -inf }
 0x29e   : > { %v4019_v27 = vpop.permute.xlu1 %4018  ;;  %v13765_v48 = vpack.c.bf16 %v10586_v3, %v10585_v40  ;;  %v10713_v40 = vld [vmem:[%s11978_s18 + $0x382] sm:$0xff] }
 0x29f   : > { %4178 = vst.msk [vmem:[#allocation2 + $0x108] sm:$0xff] %vm4144_vm8, %v4019_v27  ;;  %v4017_v31 = vpop.permute.xlu0 %4016  ;;  %v6017_v27 = vsel %vm5962_vm11, %v5868_v34, -inf  ;;  %v6011_v61 = vsel %vm5962_vm11, %v5866_v37, -inf  ;;  %v13805_v3 = vpack.c.bf16 %v10714_v1, %v10713_v40  ;;  %v10461_v37 = vld [vmem:[%s11978_s18 + $0x3a8] sm:$0xff] }
 0x2a0   : > { %4177 = vst.msk [vmem:[#allocation2 + $0x100] sm:$0xff] %vm4144_vm8, %v4017_v31  ;;  %2494 = vrot.lane.b32.xlu1 %v13668_v36, %s11901_s22  ;;  %v450_v40 = vld [vmem:[%s11978_s18 + $0x388] sm:$0xff] }
 0x2a1   : > { %2492 = vrot.lane.b32.xlu0 %v13672_v39, %s11901_s22 }
 0x2a2   : > { %v941_v53 = vpop.permute.xlu1 %940 }
 0x2a3   : > { %1099 = vst.msk [vmem:[#allocation2 + $0x110] sm:$0xff] %vm1064_vm2, %v941_v53  ;;  %v4530_v13 = vpop.permute.xlu0 %4529 }
 0x2a4   : > { %v11391_v23 = vpop.f32.mrb[36].mxu0  ;;  %4690 = vst.msk [vmem:[#allocation2 + $0x100] sm:$0xff] %vm4657_vm9, %v4530_v13  ;;  %3007 = vrot.lane.b32.xlu1 %v13694_v63, %s11902_s23 }
 0x2a5   : > { %v5610_v19 = vmul.f32 %v13328_v4, %v11391_v23  ;;  %v5197_v20 = vpop.f32.mrb[37].mxu0  ;;  %3005 = vrot.lane.b32.xlu0 %v13683_v52, %s11902_s23 }
 0x2a6   : > { %v5608_v60 = vmul.f32 %v13328_v4, %v5197_v20  ;;  %v11392_v25 = vpop.f32.mrb[38].mxu0  ;;  %v943_v49 = vpop.permute.xlu1 %942 }
 0x2a7   : > { %v5744_v35 = vadd.f32 %v13342_v21, %v5610_v19  ;;  %v5611_v44 = vmul.f32 %v13328_v4, %v11392_v25  ;;  %v5200_v45 = vpop.f32.mrb[39].mxu0  ;;  %1100 = vst.msk [vmem:[#allocation2 + $0x118] sm:$0xff] %vm1064_vm2, %v943_v49  ;;  %v4532_v55 = vpop.permute.xlu0 %4531 }
 0x2a8   : > { %v5742_v32 = vadd.f32 %v13342_v21, %v5608_v60  ;;  %v5609_v56 = vmul.f32 %v13328_v4, %v5200_v45  ;;  %4691 = vst.msk [vmem:[#allocation2 + $0x108] sm:$0xff] %vm4657_vm9, %v4532_v55  ;;  %3521 = vrot.lane.b32.xlu1 %v13741_v47, %s11903_s24  ;;  %v10460_v55 = vld [vmem:[%s11978_s18 + $0x3a0] sm:$0xff] }
 0x2a9   : > { %v5872_v18 = vmax.f32 %v5744_v35, 0.0  ;;  %v5745_v12 = vadd.f32 %v13342_v21, %v5611_v44  ;;  %3519 = vrot.lane.b32.xlu0 %v13749_v26, %s11903_s24 }
 0x2aa   : > { %v5870_v4 = vmax.f32 %v5742_v32, 0.0  ;;  %v5743_v33 = vadd.f32 %v13342_v21, %v5609_v56  ;;  %v1456_v62 = vpop.permute.xlu1 %1455  ;;  %v10462_v32 = vld [vmem:[%s11978_s18 + $0x3b0] sm:$0xff]  ;;  %v10459_v56 = vld [vmem:[%s11978_s18 + $0x398] sm:$0xff] }
 0x2ab   : > { %v6018_v24 = vsel %vm5962_vm11, %v5872_v18, -inf  ;;  %v5873_v31 = vmax.f32 %v5745_v12, 0.0  ;;  %1613 = vst.msk [vmem:[#allocation2 + $0x118] sm:$0xff] %vm1577_vm3, %v1456_v62  ;;  %v1454_v21 = vpop.permute.xlu0 %1453  ;;  %v4754_v53 = vld [vmem:[#allocation2 + $0x100] sm:$0xff]  ;;  %v448_v12 = vld [vmem:[%s11978_s18 + $0x378] sm:$0xff] }
 0x2ac   : > { %v6019_v28 = vmax.f32 %v6017_v27, %v6018_v24  ;;  %v6012_v17 = vsel %vm5962_vm11, %v5870_v4, -inf  ;;  %v5871_v10 = vmax.f32 %v5743_v33, 0.0  ;;  %1612 = vst.msk [vmem:[#allocation2 + $0x110] sm:$0xff] %vm1577_vm3, %v1454_v21  ;;  %11417 = vmatprep.mubr.msk.bf16.mxu0 %vm4822_vm10, %v4754_v53  ;;  %4034 = vrot.lane.b32.xlu1 %v13765_v48, %s11904_s29 }
 0x2ad   : > { %v6013_v54 = vmax.f32 %v6011_v61, %v6012_v17  ;;  %v6021_v7 = vsel %vm5962_vm11, %v5873_v31, -inf  ;;  %4032 = vrot.lane.b32.xlu0 %v13771_v30, %s11904_s29 }
 0x2ae   : > { %6173 = vst.msk [vmem:[#allocation3 + $0x90] sm:$0xff] %vm5962_vm11, %v6019_v28  ;;  %v6022_v13 = vmax.f32 %v6020_v38, %v6021_v7  ;;  %v6015_v23 = vsel %vm5962_vm11, %v5871_v10, -inf  ;;  %v1970_v20 = vpop.permute.xlu1 %1969  ;;  %v13853_v38 = vpack.c.bf16 %v10462_v32, %v10461_v37 }
 0x2af   : > { %6171 = vst.msk [vmem:[#allocation3 + $0x80] sm:$0xff] %vm5962_vm11, %v6013_v54  ;;  %v6016_v19 = vmax.f32 %v6014_v11, %v6015_v23  ;;  %v1968_v60 = vpop.permute.xlu0 %1967  ;;  %v4755_v25 = vld [vmem:[#allocation2 + $0x108] sm:$0xff]  ;;  %v3353_v23 = vpack.c.bf16 %v10460_v55, %v10459_v56 }
 0x2b0   : > { %6174 = vst.msk [vmem:[#allocation3 + $0x98] sm:$0xff] %vm5962_vm11, %v6022_v13  ;;  %11418 = vmatmul.mubr.msk.bf16.gmra.mrb[64].mxu0 %vm4822_vm10, %v4755_v25  ;;  %956 = vrot.lane.b32.xlu1 %v13672_v39, %s11899_s20  ;;  %v10589_v54 = vld [vmem:[%s11978_s18 + $0x3a9] sm:$0xff]  ;;  %v10587_v25 = vld [vmem:[%s11978_s18 + $0x399] sm:$0xff] }
 0x2b1   : > { %2127 = vst.msk [vmem:[#allocation2 + $0x118] sm:$0xff] %vm2091_vm4, %v1970_v20  ;;  %2126 = vst.msk [vmem:[#allocation2 + $0x110] sm:$0xff] %vm2091_vm4, %v1968_v60  ;;  %4545 = vrot.lane.b32.xlu0 %v13791_v16, %s11905_s25  ;;  %v449_v20 = vld [vmem:[%s11978_s18 + $0x380] sm:$0xff] }
 0x2b2   : > { %6172 = vst.msk [vmem:[#allocation3 + $0x88] sm:$0xff] %vm5962_vm11, %v6016_v19  ;;  %v2483_v14 = vpop.permute.xlu1 %2482  ;;  %v10590_v19 = vld [vmem:[%s11978_s18 + $0x3b1] sm:$0xff] }
 0x2b3   : > { %2640 = vst.msk [vmem:[#allocation2 + $0x118] sm:$0xff] %vm2604_vm5, %v2483_v14  ;;  %v2481_v29 = vpop.permute.xlu0 %2480  ;;  %v10588_v14 = vld [vmem:[%s11978_s18 + $0x3a1] sm:$0xff] }
 0x2b4   : > { %2639 = vst.msk [vmem:[#allocation2 + $0x110] sm:$0xff] %vm2604_vm5, %v2481_v29  ;;  %958 = vrot.lane.b32.xlu1 %v13668_v36, %s11899_s20  ;;  %v532_v29 = vpack.c.bf16 %v450_v40, %v449_v20  ;;  %v10593_v40 = vld [vmem:[%s11978_s18 + $0x3d1] sm:$0xff] }
 0x2b5   : > { %4547 = vrot.lane.b32.xlu0 %v13805_v3, %s11905_s25 }
 0x2b6   : > { %v2996_v39 = vpop.permute.xlu1 %2995  ;;  %597 = vst.msk [vmem:[#allocation2 + $0x168] sm:$0xff] %vm551_vm0, %v532_v29  ;;  %v10594_v29 = vld [vmem:[%s11978_s18 + $0x3d9] sm:$0xff] }
 0x2b7   : > { %v6237_v34 = vld [vmem:[#allocation3 + $0x90] ss:$2 sm:$0xff]  ;;  %v6301_v35 = vld [vmem:[#allocation3 + $0x91] ss:$2 sm:$0xff]  ;;  %3153 = vst.msk [vmem:[#allocation2 + $0x118] sm:$0xff] %vm3117_vm6, %v2996_v39  ;;  %v2994_v6 = vpop.permute.xlu0 %2993  ;;  %v13884_v39 = vpack.c.bf16 %v10588_v14, %v10587_v25 }
 0x2b8   : > { %v6355_v44 = vmax.f32 %v6237_v34, %v6301_v35  ;;  %3152 = vst.msk [vmem:[#allocation2 + $0x110] sm:$0xff] %vm3117_vm6, %v2994_v6  ;;  %1471 = vrot.lane.b32.xlu1 %v13694_v63, %s11898_s19  ;;  %v13880_v35 = vpack.c.bf16 %v10590_v19, %v10589_v54 }
 0x2b9   : > { %v6235_v45 = vld [vmem:[#allocation3 + $0x80] ss:$2 sm:$0xff]  ;;  %v6299_v49 = vld [vmem:[#allocation3 + $0x81] ss:$2 sm:$0xff]  ;;  %1469 = vrot.lane.b32.xlu0 %v13683_v52, %s11898_s19 }
 0x2ba   : > { %v6354_v50 = vmax.f32 %v6235_v45, %v6299_v49  ;;  %6429 = vst.msk [vmem:[#allocation4 + $0xb0] sm:$0xff] %vm5962_vm11, %v6355_v44  ;;  %v3510_v36 = vpop.permute.xlu1 %3509  ;;  %v10715_v45 = vld [vmem:[%s11978_s18 + $0x39a] sm:$0xff]  ;;  %v10716_v49 = vld [vmem:[%s11978_s18 + $0x3a2] sm:$0xff] }
 0x2bb   : > { %3667 = vst.msk [vmem:[#allocation2 + $0x118] sm:$0xff] %vm3631_vm7, %v3510_v36  ;;  %v3508_v15 = vpop.permute.xlu0 %3507  ;;  %v13895_v36 = vpack.c.bf16 %v10716_v49, %v10715_v45 }
 0x2bc   : > { %6428 = vst.msk [vmem:[#allocation4 + $0xa8] sm:$0xff] %vm5962_vm11, %v6354_v50  ;;  %1985 = vrot.lane.b32.xlu1 %v13741_v47, %s11900_s21 }
 0x2bd   : > { %3666 = vst.msk [vmem:[#allocation2 + $0x110] sm:$0xff] %vm3631_vm7, %v3508_v15  ;;  %1983 = vrot.lane.b32.xlu0 %v13749_v26, %s11900_s21  ;;  %v447_v26 = vld [vmem:[%s11978_s18 + $0x370] sm:$0xff] }
 0x2be   : > { %v4023_v63 = vpop.permute.xlu1 %4022  ;;  %v531_v33 = vpack.c.bf16 %v448_v12, %v447_v26 }
 0x2bf   : > { %4180 = vst.msk [vmem:[#allocation2 + $0x118] sm:$0xff] %vm4144_vm8, %v4023_v63  ;;  %v4021_v52 = vpop.permute.xlu0 %4020  ;;  %v10717_v63 = vld [vmem:[%s11978_s18 + $0x3aa] sm:$0xff] }
 0x2c0   : > { %4179 = vst.msk [vmem:[#allocation2 + $0x110] sm:$0xff] %vm4144_vm8, %v4021_v52  ;;  %2498 = vrot.lane.b32.xlu1 %v13765_v48, %s11901_s22  ;;  %v10718_v52 = vld [vmem:[%s11978_s18 + $0x3b2] sm:$0xff] }
 0x2c1   : > { %v6527_v5 = vld [vmem:[#allocation4 + $0xb0] sm:$0xff]  ;;  %2496 = vrot.lane.b32.xlu0 %v13771_v30, %s11901_s22  ;;  %596 = vst.msk [vmem:[#allocation2 + $0x160] sm:$0xff] %vm551_vm0, %v531_v33  ;;  %v13906_v56 = vpack.c.bf16 %v10718_v52, %v10717_v63  ;;  %v10591_v63 = vld [vmem:[%s11978_s18 + $0x3c1] sm:$0xff] }
 0x2c2   : > { %v6910_v18 = vld [vmem:[#allocation4 + $0xb1] sm:$0xff]  ;;  %v945_v4 = vpop.permute.xlu1 %944  ;;  %v10592_v52 = vld [vmem:[%s11978_s18 + $0x3c9] sm:$0xff] }
 0x2c3   : > { %v7229_v47 = vld [vmem:[#allocation4 + $0xb1] sm:$0xff]  ;;  %v6717_v57 = vld [vmem:[#allocation4 + $0xa7] sm:$0xff]  ;;  %1101 = vst.msk [vmem:[#allocation2 + $0x120] sm:$0xff] %vm1064_vm2, %v945_v4  ;;  %v4534_v62 = vpop.permute.xlu0 %4533  ;;  %v13840_v58 = vpop.f32.mrb[40].mxu0 }
 0x2c4   : > { %v6718_v27 = vld [vmem:[#allocation4 + $0xaf] sm:$0xff]  ;;  %v7036_v17 = vld [vmem:[#allocation4 + $0xa7] sm:$0xff]  ;;  %4692 = vst.msk [vmem:[#allocation2 + $0x110] sm:$0xff] %vm4657_vm9, %v4534_v62  ;;  %v13849_v53 = vpop.f32.mrb[41].mxu0  ;;  %3011 = vrot.lane.b32.xlu1 %v13805_v3, %s11902_s23 }
 0x2c5   : > { %v6526_v24 = vld [vmem:[#allocation4 + $0xa8] sm:$0xff]  ;;  %v13842_v59 = vpack.c.bf16 %v6718_v27, %v6717_v57  ;;  %3009 = vrot.lane.b32.xlu0 %v13791_v16, %s11902_s23  ;;  %v13859_v13 = vpop.f32.mrb[42].mxu0  ;;  %v10465_v33 = vld [vmem:[%s11978_s18 + $0x3d0] sm:$0xff]  ;;  %v452_v62 = vld [vmem:[%s11978_s18 + $0x3a0] sm:$0xff] }
 0x2c6   : > { %v6909_v31 = vld [vmem:[#allocation4 + $0xa9] sm:$0xff]  ;;  %v13844_v61 = vpack.c.bf16 %v6527_v5, %v6526_v24  ;;  %v13870_v1 = vpop.f32.mrb[43].mxu0  ;;  %v947_v60 = vpop.permute.xlu1 %946  ;;  %v10466_v24 = vld [vmem:[%s11978_s18 + $0x3d8] sm:$0xff] }
 0x2c7   : > { %v13846_v28 = vpack.c.bf16 %v6910_v18, %v6909_v31  ;;  %v7037_v10 = vld [vmem:[#allocation4 + $0xaf] sm:$0xff]  ;;  %6505 = vst.msk [vmem:[#allocation5 + $0xc8] sm:$0xff] %vm5962_vm11, %v13842_v59  ;;  %v4536_v34 = vpop.permute.xlu0 %4535  ;;  %v451_v31 = vld [vmem:[%s11978_s18 + $0x398] sm:$0xff]  ;;  %v13963_v20 = vpack.c.bf16 %v10466_v24, %v10465_v33 }
 0x2c8   : > { %v7228_v21 = vld [vmem:[#allocation4 + $0xa9] sm:$0xff]  ;;  %v7065_v7 = vpack.c.bf16 %v7037_v10, %v7036_v17  ;;  %6889 = vst.msk [vmem:[#allocation5 + $0xb0] sm:$0xff] %vm5962_vm11, %v13844_v61  ;;  %3525 = vrot.lane.b32.xlu1 %v13853_v38, %s11903_s24 }
 0x2c9   : > { %v7257_v11 = vpack.c.bf16 %v7229_v47, %v7228_v21  ;;  %6698 = vst.msk [vmem:[#allocation5 + $0xd0] sm:$0xff] %vm5962_vm11, %v13846_v28  ;;  %3523 = vrot.lane.b32.xlu0 %v3353_v23, %s11903_s24  ;;  %v10463_v21 = vld [vmem:[%s11978_s18 + $0x3c0] sm:$0xff] }
 0x2ca   : > { %7081 = vst.msk [vmem:[#allocation5 + $0x90] sm:$0xff] %vm5962_vm11, %v7065_v7  ;;  %v1460_v44 = vpop.permute.xlu1 %1459 }
 0x2cb   : > { %7273 = vst.msk [vmem:[#allocation5 + $0x98] sm:$0xff] %vm5962_vm11, %v7257_v11  ;;  %v1458_v6 = vpop.permute.xlu0 %1457  ;;  %v4756_v50 = vld [vmem:[#allocation2 + $0x110] sm:$0xff] }
 0x2cc   : > { %1102 = vst.msk [vmem:[#allocation2 + $0x128] sm:$0xff] %vm1064_vm2, %v947_v60  ;;  %11421 = vmatprep.mubr.msk.bf16.mxu0 %vm4822_vm10, %v4756_v50  ;;  %4038 = vrot.lane.b32.xlu1 %v13880_v35, %s11904_s29 }
 0x2cd   : > { %4693 = vst.msk [vmem:[#allocation2 + $0x118] sm:$0xff] %vm4657_vm9, %v4536_v34  ;;  %4036 = vrot.lane.b32.xlu0 %v13884_v39, %s11904_s29  ;;  %v453_v34 = vld [vmem:[%s11978_s18 + $0x3a8] sm:$0xff] }
 0x2ce   : > { %1615 = vst.msk [vmem:[#allocation2 + $0x128] sm:$0xff] %vm1577_vm3, %v1460_v44  ;;  %1614 = vst.msk [vmem:[#allocation2 + $0x120] sm:$0xff] %vm1577_vm3, %v1458_v6  ;;  %v1974_v15 = vpop.permute.xlu1 %1973  ;;  %v454_v44 = vld [vmem:[%s11978_s18 + $0x3b0] sm:$0xff] }
 0x2cf   : > { %2129 = vst.msk [vmem:[#allocation2 + $0x128] sm:$0xff] %vm2091_vm4, %v1974_v15  ;;  %v1972_v37 = vpop.permute.xlu0 %1971 }
 0x2d0   : > { %2128 = vst.msk [vmem:[#allocation2 + $0x120] sm:$0xff] %vm2091_vm4, %v1972_v37  ;;  %960 = vrot.lane.b32.xlu1 %v13771_v30, %s11899_s20  ;;  %v534_v37 = vpack.c.bf16 %v454_v44, %v453_v34  ;;  %v10721_v34 = vld [vmem:[%s11978_s18 + $0x3d2] sm:$0xff]  ;;  %v10722_v44 = vld [vmem:[%s11978_s18 + $0x3da] sm:$0xff] }
 0x2d1   : > { %4549 = vrot.lane.b32.xlu0 %v13895_v36, %s11905_s25 }
 0x2d2   : > { %v2487_v55 = vpop.permute.xlu1 %2486  ;;  %599 = vst.msk [vmem:[#allocation2 + $0x178] sm:$0xff] %vm551_vm0, %v534_v37 }
 0x2d3   : > { %2642 = vst.msk [vmem:[#allocation2 + $0x128] sm:$0xff] %vm2604_vm5, %v2487_v55  ;;  %v2485_v5 = vpop.permute.xlu0 %2484 }
 0x2d4   : > { %v4757_v32 = vld [vmem:[#allocation2 + $0x118] sm:$0xff]  ;;  %2641 = vst.msk [vmem:[#allocation2 + $0x120] sm:$0xff] %vm2604_vm5, %v2485_v5  ;;  %962 = vrot.lane.b32.xlu1 %v13765_v48, %s11899_s20 }
 0x2d5   : > { %11422 = vmatmul.mubr.msk.bf16.gmra.mrb[68].mxu0 %vm4822_vm10, %v4757_v32  ;;  %4551 = vrot.lane.b32.xlu0 %v13906_v56, %s11905_s25 }
 0x2d6   : > { %v3000_v18 = vpop.permute.xlu1 %2999 }
 0x2d7   : > { %3155 = vst.msk [vmem:[#allocation2 + $0x128] sm:$0xff] %vm3117_vm6, %v3000_v18  ;;  %v2998_v30 = vpop.permute.xlu0 %2997 }
 0x2d8   : > { %3154 = vst.msk [vmem:[#allocation2 + $0x120] sm:$0xff] %vm3117_vm6, %v2998_v30  ;;  %1475 = vrot.lane.b32.xlu1 %v13805_v3, %s11898_s19  ;;  %v13928_v3 = vld [vmem:[%s16460_s2] ss:$0 sm:$0xff] }
 0x2d9   : > { %1473 = vrot.lane.b32.xlu0 %v13791_v16, %s11898_s19  ;;  %v5614_v16 = vmul.f32 %v13928_v3, %v13840_v58  ;;  %v5612_v12 = vmul.f32 %v13928_v3, %v13849_v53  ;;  %v5615_v4 = vmul.f32 %v13928_v3, %v13859_v13  ;;  %v5613_v27 = vmul.f32 %v13928_v3, %v13870_v1  ;;  %v13951_v58 = vld [vmem:[%s16461_s3] ss:$0 sm:$0xff]  ;;  %v10464_v53 = vld [vmem:[%s11978_s18 + $0x3c8] sm:$0xff] }
 0x2da   : > { %v3514_v47 = vpop.permute.xlu1 %3513  ;;  %v13971_v14 = vpack.c.bf16 %v10464_v53, %v10463_v21 }
 0x2db   : > { %3669 = vst.msk [vmem:[#allocation2 + $0x128] sm:$0xff] %vm3631_vm7, %v3514_v47  ;;  %v3512_v48 = vpop.permute.xlu0 %3511  ;;  %v5748_v17 = vadd.f32 %v13951_v58, %v5614_v16  ;;  %v5746_v54 = vadd.f32 %v13951_v58, %v5612_v12  ;;  %v5749_v13 = vadd.f32 %v13951_v58, %v5615_v4  ;;  %v5747_v1 = vadd.f32 %v13951_v58, %v5613_v27 }
 0x2dc   : > { %3668 = vst.msk [vmem:[#allocation2 + $0x120] sm:$0xff] %vm3631_vm7, %v3512_v48  ;;  %1989 = vrot.lane.b32.xlu1 %v13853_v38, %s11900_s21  ;;  %v533_v38 = vpack.c.bf16 %v452_v62, %v451_v31  ;;  %v13987_v16 = vpack.c.bf16 %v10594_v29, %v10593_v40  ;;  %v13993_v4 = vpack.c.bf16 %v10592_v52, %v10591_v63  ;;  %v10719_v62 = vld [vmem:[%s11978_s18 + $0x3c2] sm:$0xff] }
 0x2dd   : > { %1987 = vrot.lane.b32.xlu0 %v3353_v23, %s11900_s21  ;;  %v5876_v45 = vmax.f32 %v5748_v17, 0.0  ;;  %v5874_v32 = vmax.f32 %v5746_v54, 0.0  ;;  %v5877_v30 = vmax.f32 %v5749_v13, 0.0  ;;  %v10720_v17 = vld [vmem:[%s11978_s18 + $0x3ca] sm:$0xff] }
 0x2de   : > { %v4027_v26 = vpop.permute.xlu1 %4026  ;;  %598 = vst.msk [vmem:[#allocation2 + $0x170] sm:$0xff] %vm551_vm0, %v533_v38 }
 0x2df   : > { %4182 = vst.msk [vmem:[#allocation2 + $0x128] sm:$0xff] %vm4144_vm8, %v4027_v26  ;;  %v4025_v57 = vpop.permute.xlu0 %4024  ;;  %v5875_v26 = vmax.f32 %v5747_v1, 0.0  ;;  %v6029_v33 = vsel %vm5962_vm11, %v5876_v45, -inf }
 0x2e0   : > { %4181 = vst.msk [vmem:[#allocation2 + $0x120] sm:$0xff] %vm4144_vm8, %v4025_v57  ;;  %2502 = vrot.lane.b32.xlu1 %v13880_v35, %s11901_s22 }
 0x2e1   : > { %2500 = vrot.lane.b32.xlu0 %v13884_v39, %s11901_s22 }
 0x2e2   : > { %v949_v10 = vpop.permute.xlu1 %948 }
 0x2e3   : > { %1103 = vst.msk [vmem:[#allocation2 + $0x130] sm:$0xff] %vm1064_vm2, %v949_v10  ;;  %v4538_v7 = vpop.permute.xlu0 %4537  ;;  %v6023_v10 = vsel %vm5962_vm11, %v5874_v32, -inf }
 0x2e4   : > { %4694 = vst.msk [vmem:[#allocation2 + $0x120] sm:$0xff] %vm4657_vm9, %v4538_v7  ;;  %3015 = vrot.lane.b32.xlu1 %v13906_v56, %s11902_s23 }
 0x2e5   : > { %3013 = vrot.lane.b32.xlu0 %v13895_v36, %s11902_s23 }
 0x2e6   : > { %v11399_v11 = vpop.f32.mrb[44].mxu0  ;;  %v951_v15 = vpop.permute.xlu1 %950 }
 0x2e7   : > { %v5618_v23 = vmul.f32 %v13928_v3, %v11399_v11  ;;  %v5229_v19 = vpop.f32.mrb[45].mxu0  ;;  %1104 = vst.msk [vmem:[#allocation2 + $0x138] sm:$0xff] %vm1064_vm2, %v951_v15  ;;  %v4540_v18 = vpop.permute.xlu0 %4539  ;;  %v6032_v11 = vsel %vm5962_vm11, %v5877_v30, -inf }
 0x2e8   : > { %v5616_v60 = vmul.f32 %v13928_v3, %v5229_v19  ;;  %v11400_v25 = vpop.f32.mrb[46].mxu0  ;;  %4695 = vst.msk [vmem:[#allocation2 + $0x128] sm:$0xff] %vm4657_vm9, %v4540_v18  ;;  %3529 = vrot.lane.b32.xlu1 %v13963_v20, %s11903_s24  ;;  %v6026_v19 = vsel %vm5962_vm11, %v5875_v26, -inf  ;;  %v10467_v26 = vld [vmem:[%s11978_s18 + $0x3e8] sm:$0xff] }
 0x2e9   : > { %v5752_v49 = vadd.f32 %v13951_v58, %v5618_v23  ;;  %v5619_v6 = vmul.f32 %v13928_v3, %v11400_v25  ;;  %v5232_v50 = vpop.f32.mrb[47].mxu0  ;;  %3527 = vrot.lane.b32.xlu0 %v13971_v14, %s11903_s24 }
 0x2ea   : > { %v5750_v55 = vadd.f32 %v13951_v58, %v5616_v60  ;;  %v5617_v5 = vmul.f32 %v13928_v3, %v5232_v50  ;;  %v1464_v31 = vpop.permute.xlu1 %1463  ;;  %v14013_v60 = vpack.c.bf16 %v10720_v17, %v10719_v62 }
 0x2eb   : > { %v5880_v47 = vmax.f32 %v5752_v49, 0.0  ;;  %v5753_v48 = vadd.f32 %v13951_v58, %v5619_v6  ;;  %1617 = vst.msk [vmem:[#allocation2 + $0x138] sm:$0xff] %vm1577_vm3, %v1464_v31  ;;  %v1462_v54 = vpop.permute.xlu0 %1461  ;;  %v4758_v7 = vld [vmem:[#allocation2 + $0x120] sm:$0xff]  ;;  %v14027_v6 = vpack.c.bf16 %v10722_v44, %v10721_v34  ;;  %v457_v44 = vld [vmem:[%s11978_s18 + $0x3d0] sm:$0xff] }
 0x2ec   : > { %v5878_v12 = vmax.f32 %v5750_v55, 0.0  ;;  %v5751_v57 = vadd.f32 %v13951_v58, %v5617_v5  ;;  %1616 = vst.msk [vmem:[#allocation2 + $0x130] sm:$0xff] %vm1577_vm3, %v1462_v54  ;;  %11425 = vmatprep.mubr.msk.bf16.mxu0 %vm4822_vm10, %v4758_v7  ;;  %4042 = vrot.lane.b32.xlu1 %v13987_v16, %s11904_s29  ;;  %v10598_v34 = vld [vmem:[%s11978_s18 + $0x401] sm:$0xff] }
 0x2ed   : > { %v6030_v27 = vsel %vm5962_vm11, %v5880_v47, -inf  ;;  %v5881_v24 = vmax.f32 %v5753_v48, 0.0  ;;  %4040 = vrot.lane.b32.xlu0 %v13993_v4, %s11904_s29  ;;  %v10469_v47 = vld [vmem:[%s11978_s18 + $0x3f8] sm:$0xff]  ;;  %v10470_v48 = vld [vmem:[%s11978_s18 + $0x400] sm:$0xff] }
 0x2ee   : > { %v6031_v21 = vmax.f32 %v6029_v33, %v6030_v27  ;;  %v6024_v53 = vsel %vm5962_vm11, %v5878_v12, -inf  ;;  %v5879_v38 = vmax.f32 %v5751_v57, 0.0  ;;  %v1978_v29 = vpop.permute.xlu1 %1977  ;;  %v10468_v12 = vld [vmem:[%s11978_s18 + $0x3f0] sm:$0xff]  ;;  %v456_v27 = vld [vmem:[%s11978_s18 + $0x3c8] sm:$0xff] }
 0x2ef   : > { %v6025_v13 = vmax.f32 %v6023_v10, %v6024_v53  ;;  %v6033_v23 = vsel %vm5962_vm11, %v5881_v24, -inf  ;;  %2131 = vst.msk [vmem:[#allocation2 + $0x138] sm:$0xff] %vm2091_vm4, %v1978_v29  ;;  %v1976_v45 = vpop.permute.xlu0 %1975  ;;  %v4759_v49 = vld [vmem:[#allocation2 + $0x128] sm:$0xff]  ;;  %v3357_v29 = vpack.c.bf16 %v10468_v12, %v10467_v26 }
 0x2f0   : > { %6177 = vst.msk [vmem:[#allocation3 + $0xb0] sm:$0xff] %vm5962_vm11, %v6031_v21  ;;  %v6034_v40 = vmax.f32 %v6032_v11, %v6033_v23  ;;  %v6027_v1 = vsel %vm5962_vm11, %v5879_v38, -inf  ;;  %11426 = vmatmul.mubr.msk.bf16.gmra.mrb[72].mxu0 %vm4822_vm10, %v4759_v49  ;;  %964 = vrot.lane.b32.xlu1 %v13884_v39, %s11899_s20 }
 0x2f1   : > { %6175 = vst.msk [vmem:[#allocation3 + $0xa0] sm:$0xff] %vm5962_vm11, %v6025_v13  ;;  %v6028_v25 = vmax.f32 %v6026_v19, %v6027_v1  ;;  %4553 = vrot.lane.b32.xlu0 %v14013_v60, %s11905_s25  ;;  %v14075_v19 = vpack.c.bf16 %v10470_v48, %v10469_v47  ;;  %v10725_v47 = vld [vmem:[%s11978_s18 + $0x3fa] sm:$0xff]  ;;  %v10726_v48 = vld [vmem:[%s11978_s18 + $0x402] sm:$0xff] }
 0x2f2   : > { %6178 = vst.msk [vmem:[#allocation3 + $0xb8] sm:$0xff] %vm5962_vm11, %v6034_v40  ;;  %v2491_v50 = vpop.permute.xlu1 %2490  ;;  %v10597_v40 = vld [vmem:[%s11978_s18 + $0x3f9] sm:$0xff] }
 0x2f3   : > { %6176 = vst.msk [vmem:[#allocation3 + $0xa8] sm:$0xff] %vm5962_vm11, %v6028_v25  ;;  %v2489_v15 = vpop.permute.xlu0 %2488 }
 0x2f4   : > { %2130 = vst.msk [vmem:[#allocation2 + $0x130] sm:$0xff] %vm2091_vm4, %v1976_v45  ;;  %966 = vrot.lane.b32.xlu1 %v13880_v35, %s11899_s20  ;;  %v458_v45 = vld [vmem:[%s11978_s18 + $0x3d8] sm:$0xff] }
 0x2f5   : > { %2644 = vst.msk [vmem:[#allocation2 + $0x138] sm:$0xff] %vm2604_vm5, %v2491_v50  ;;  %2643 = vst.msk [vmem:[#allocation2 + $0x130] sm:$0xff] %vm2604_vm5, %v2489_v15  ;;  %4555 = vrot.lane.b32.xlu0 %v14027_v6, %s11905_s25  ;;  %v10595_v15 = vld [vmem:[%s11978_s18 + $0x3e9] sm:$0xff] }
 0x2f6   : > { %v3004_v39 = vpop.permute.xlu1 %3003 }
 0x2f7   : > { %3157 = vst.msk [vmem:[#allocation2 + $0x138] sm:$0xff] %vm3117_vm6, %v3004_v39  ;;  %v3002_v5 = vpop.permute.xlu0 %3001 }
 0x2f8   : > { %3156 = vst.msk [vmem:[#allocation2 + $0x130] sm:$0xff] %vm3117_vm6, %v3002_v5  ;;  %1479 = vrot.lane.b32.xlu1 %v13906_v56, %s11898_s19  ;;  %v10723_v5 = vld [vmem:[%s11978_s18 + $0x3ea] sm:$0xff] }
 0x2f9   : > { %v6241_v63 = vld [vmem:[#allocation3 + $0xb0] ss:$2 sm:$0xff]  ;;  %v6305_v52 = vld [vmem:[#allocation3 + $0xb1] ss:$2 sm:$0xff]  ;;  %1477 = vrot.lane.b32.xlu0 %v13895_v36, %s11898_s19 }
 0x2fa   : > { %v6357_v37 = vmax.f32 %v6241_v63, %v6305_v52  ;;  %v6239_v32 = vld [vmem:[#allocation3 + $0xa0] ss:$2 sm:$0xff]  ;;  %v6303_v55 = vld [vmem:[#allocation3 + $0xa1] ss:$2 sm:$0xff]  ;;  %v3518_v35 = vpop.permute.xlu1 %3517  ;;  %v10596_v63 = vld [vmem:[%s11978_s18 + $0x3f1] sm:$0xff]  ;;  %v536_v52 = vpack.c.bf16 %v458_v45, %v457_v44 }
 0x2fb   : > { %v6356_v18 = vmax.f32 %v6239_v32, %v6303_v55  ;;  %3671 = vst.msk [vmem:[#allocation2 + $0x138] sm:$0xff] %vm3631_vm7, %v3518_v35  ;;  %v3516_v30 = vpop.permute.xlu0 %3515  ;;  %v14107_v32 = vpack.c.bf16 %v10596_v63, %v10595_v15  ;;  %v10601_v15 = vld [vmem:[%s11978_s18 + $0x421] sm:$0xff] }
 0x2fc   : > { %6431 = vst.msk [vmem:[#allocation4 + $0xd0] sm:$0xff] %vm5962_vm11, %v6357_v37  ;;  %1993 = vrot.lane.b32.xlu1 %v13963_v20, %s11900_s21  ;;  %v14103_v37 = vpack.c.bf16 %v10598_v34, %v10597_v40  ;;  %v10472_v40 = vld [vmem:[%s11978_s18 + $0x418] sm:$0xff] }
 0x2fd   : > { %6430 = vst.msk [vmem:[#allocation4 + $0xc8] sm:$0xff] %vm5962_vm11, %v6356_v18  ;;  %1991 = vrot.lane.b32.xlu0 %v13971_v14, %s11900_s21  ;;  %v455_v14 = vld [vmem:[%s11978_s18 + $0x3c0] sm:$0xff]  ;;  %v10724_v18 = vld [vmem:[%s11978_s18 + $0x3f2] sm:$0xff] }
 0x2fe   : > { %3670 = vst.msk [vmem:[#allocation2 + $0x130] sm:$0xff] %vm3631_vm7, %v3516_v30  ;;  %v4031_v56 = vpop.permute.xlu1 %4030  ;;  %v535_v62 = vpack.c.bf16 %v456_v27, %v455_v14 }
 0x2ff   : > { %4184 = vst.msk [vmem:[#allocation2 + $0x138] sm:$0xff] %vm4144_vm8, %v4031_v56  ;;  %v4029_v36 = vpop.permute.xlu0 %4028  ;;  %v14118_v56 = vpack.c.bf16 %v10724_v18, %v10723_v5  ;;  %v10602_v5 = vld [vmem:[%s11978_s18 + $0x429] sm:$0xff]  ;;  %v461_v18 = vld [vmem:[%s11978_s18 + $0x3f8] sm:$0xff] }
 0x300   : > { %4183 = vst.msk [vmem:[#allocation2 + $0x130] sm:$0xff] %vm4144_vm8, %v4029_v36  ;;  %2506 = vrot.lane.b32.xlu1 %v13987_v16, %s11901_s22 }
 0x301   : > { %2504 = vrot.lane.b32.xlu0 %v13993_v4, %s11901_s22  ;;  %600 = vst.msk [vmem:[#allocation2 + $0x180] sm:$0xff] %vm551_vm0, %v535_v62  ;;  %601 = vst.msk [vmem:[#allocation2 + $0x188] sm:$0xff] %vm551_vm0, %v536_v52 }
 0x302   : > { %v953_v31 = vpop.permute.xlu1 %952 }
 0x303   : > { %v6529_v57 = vld [vmem:[#allocation4 + $0xd0] sm:$0xff]  ;;  %1105 = vst.msk [vmem:[#allocation2 + $0x140] sm:$0xff] %vm1064_vm2, %v953_v31  ;;  %v4542_v38 = vpop.permute.xlu0 %4541  ;;  %v14064_v54 = vpop.f32.mrb[48].mxu0 }
 0x304   : > { %v6912_v33 = vld [vmem:[#allocation4 + $0xd1] sm:$0xff]  ;;  %v6528_v24 = vld [vmem:[#allocation4 + $0xc8] sm:$0xff]  ;;  %4696 = vst.msk [vmem:[#allocation2 + $0x130] sm:$0xff] %vm4657_vm9, %v4542_v38  ;;  %v14071_v23 = vpop.f32.mrb[49].mxu0  ;;  %3019 = vrot.lane.b32.xlu1 %v14027_v6, %s11902_s23 }
 0x305   : > { %v7231_v20 = vld [vmem:[#allocation4 + $0xd1] sm:$0xff]  ;;  %v14061_v17 = vpack.c.bf16 %v6529_v57, %v6528_v24  ;;  %v6911_v10 = vld [vmem:[#allocation4 + $0xc9] sm:$0xff]  ;;  %3017 = vrot.lane.b32.xlu0 %v14013_v60, %s11902_s23  ;;  %v14083_v25 = vpop.f32.mrb[50].mxu0  ;;  %v14129_v57 = vpack.c.bf16 %v10726_v48, %v10725_v47 }
 0x306   : > { %v6719_v21 = vld [vmem:[#allocation4 + $0xc7] sm:$0xff]  ;;  %v6720_v53 = vld [vmem:[#allocation4 + $0xcf] sm:$0xff]  ;;  %v14066_v7 = vpack.c.bf16 %v6912_v33, %v6911_v10  ;;  %v14094_v49 = vpop.f32.mrb[51].mxu0  ;;  %v955_v50 = vpop.permute.xlu1 %954  ;;  %v5623_v62 = vmul.f32 %v13928_v3, %v14083_v25 }
 0x307   : > { %v14068_v11 = vpack.c.bf16 %v6720_v53, %v6719_v21  ;;  %v7230_v13 = vld [vmem:[#allocation4 + $0xc9] sm:$0xff]  ;;  %6890 = vst.msk [vmem:[#allocation5 + $0xd8] sm:$0xff] %vm5962_vm11, %v14061_v17  ;;  %v4544_v39 = vpop.permute.xlu0 %4543  ;;  %v10473_v10 = vld [vmem:[%s11978_s18 + $0x420] sm:$0xff]  ;;  %v5621_v21 = vmul.f32 %v13928_v3, %v14094_v49 }
 0x308   : > { %v7258_v1 = vpack.c.bf16 %v7231_v20, %v7230_v13  ;;  %6699 = vst.msk [vmem:[#allocation5 + $0xf8] sm:$0xff] %vm5962_vm11, %v14066_v7  ;;  %3533 = vrot.lane.b32.xlu1 %v14075_v19, %s11903_s24  ;;  %v10474_v53 = vld [vmem:[%s11978_s18 + $0x428] sm:$0xff]  ;;  %v5757_v44 = vadd.f32 %v13951_v58, %v5623_v62 }
 0x309   : > { %6506 = vst.msk [vmem:[#allocation5 + $0xf0] sm:$0xff] %vm5962_vm11, %v14068_v11  ;;  %7082 = vst.msk [vmem:[#allocation5 + $0xb8] sm:$0xff] %vm5962_vm11, %v14068_v11  ;;  %3531 = vrot.lane.b32.xlu0 %v3357_v29, %s11903_s24  ;;  %v459_v38 = vld [vmem:[%s11978_s18 + $0x3e8] sm:$0xff]  ;;  %v5755_v63 = vadd.f32 %v13951_v58, %v5621_v21 }
 0x30a   : > { %7274 = vst.msk [vmem:[#allocation5 + $0xc0] sm:$0xff] %vm5962_vm11, %v7258_v1  ;;  %v1468_v55 = vpop.permute.xlu1 %1467 }
 0x30b   : > { %1106 = vst.msk [vmem:[#allocation2 + $0x148] sm:$0xff] %vm1064_vm2, %v955_v50  ;;  %v1466_v35 = vpop.permute.xlu0 %1465  ;;  %v4760_v30 = vld [vmem:[#allocation2 + $0x130] sm:$0xff]  ;;  %v14176_v50 = vpack.c.bf16 %v10474_v53, %v10473_v10  ;;  %v5883_v62 = vmax.f32 %v5755_v63, 0.0 }
 0x30c   : > { %4697 = vst.msk [vmem:[#allocation2 + $0x138] sm:$0xff] %vm4657_vm9, %v4544_v39  ;;  %11429 = vmatprep.mubr.msk.bf16.mxu0 %vm4822_vm10, %v4760_v30  ;;  %4046 = vrot.lane.b32.xlu1 %v14103_v37, %s11904_s29 }
 0x30d   : > { %1619 = vst.msk [vmem:[#allocation2 + $0x148] sm:$0xff] %vm1577_vm3, %v1468_v55  ;;  %1618 = vst.msk [vmem:[#allocation2 + $0x140] sm:$0xff] %vm1577_vm3, %v1466_v35  ;;  %4044 = vrot.lane.b32.xlu0 %v14107_v32, %s11904_s29  ;;  %v462_v35 = vld [vmem:[%s11978_s18 + $0x400] sm:$0xff] }
 0x30e   : > { %v1982_v36 = vpop.permute.xlu1 %1981 }
 0x30f   : > { %2133 = vst.msk [vmem:[#allocation2 + $0x148] sm:$0xff] %vm2091_vm4, %v1982_v36  ;;  %v1980_v26 = vpop.permute.xlu0 %1979 }
 0x310   : > { %2132 = vst.msk [vmem:[#allocation2 + $0x140] sm:$0xff] %vm2091_vm4, %v1980_v26  ;;  %968 = vrot.lane.b32.xlu1 %v13993_v4, %s11899_s20 }
 0x311   : > { %4557 = vrot.lane.b32.xlu0 %v14118_v56, %s11905_s25 }
 0x312   : > { %v2495_v33 = vpop.permute.xlu1 %2494 }
 0x313   : > { %v4761_v12 = vld [vmem:[#allocation2 + $0x138] sm:$0xff]  ;;  %2646 = vst.msk [vmem:[#allocation2 + $0x148] sm:$0xff] %vm2604_vm5, %v2495_v33  ;;  %v2493_v20 = vpop.permute.xlu0 %2492 }
 0x314   : > { %11430 = vmatmul.mubr.msk.bf16.gmra.mrb[76].mxu0 %vm4822_vm10, %v4761_v12  ;;  %2645 = vst.msk [vmem:[#allocation2 + $0x140] sm:$0xff] %vm2604_vm5, %v2493_v20  ;;  %970 = vrot.lane.b32.xlu1 %v13987_v16, %s11899_s20  ;;  %v10599_v12 = vld [vmem:[%s11978_s18 + $0x411] sm:$0xff]  ;;  %v10600_v33 = vld [vmem:[%s11978_s18 + $0x419] sm:$0xff]  ;;  %v538_v20 = vpack.c.bf16 %v462_v35, %v461_v18 }
 0x315   : > { %4559 = vrot.lane.b32.xlu0 %v14129_v57, %s11905_s25  ;;  %v14206_v53 = vpack.c.bf16 %v10600_v33, %v10599_v12 }
 0x316   : > { %v3008_v14 = vpop.permute.xlu1 %3007  ;;  %603 = vst.msk [vmem:[#allocation2 + $0x198] sm:$0xff] %vm551_vm0, %v538_v20 }
 0x317   : > { %3159 = vst.msk [vmem:[#allocation2 + $0x148] sm:$0xff] %vm3117_vm6, %v3008_v14  ;;  %v3006_v4 = vpop.permute.xlu0 %3005 }
 0x318   : > { %3158 = vst.msk [vmem:[#allocation2 + $0x140] sm:$0xff] %vm3117_vm6, %v3006_v4  ;;  %1483 = vrot.lane.b32.xlu1 %v14027_v6, %s11898_s19  ;;  %v5622_v6 = vmul.f32 %v13928_v3, %v14064_v54  ;;  %v460_v54 = vld [vmem:[%s11978_s18 + $0x3f0] sm:$0xff] }
 0x319   : > { %1481 = vrot.lane.b32.xlu0 %v14013_v60, %s11898_s19  ;;  %v5620_v60 = vmul.f32 %v13928_v3, %v14071_v23  ;;  %v537_v1 = vpack.c.bf16 %v460_v54, %v459_v38 }
 0x31a   : > { %v3522_v27 = vpop.permute.xlu1 %3521  ;;  %v5756_v13 = vadd.f32 %v13951_v58, %v5622_v6  ;;  %v5885_v6 = vmax.f32 %v5757_v44, 0.0 }
 0x31b   : > { %3673 = vst.msk [vmem:[#allocation2 + $0x148] sm:$0xff] %vm3631_vm7, %v3522_v27  ;;  %v3520_v16 = vpop.permute.xlu0 %3519  ;;  %v5754_v25 = vadd.f32 %v13951_v58, %v5620_v60 }
 0x31c   : > { %3672 = vst.msk [vmem:[#allocation2 + $0x140] sm:$0xff] %vm3631_vm7, %v3520_v16  ;;  %1997 = vrot.lane.b32.xlu1 %v14075_v19, %s11900_s21  ;;  %v10471_v19 = vld [vmem:[%s11978_s18 + $0x410] sm:$0xff]  ;;  %v5884_v30 = vmax.f32 %v5756_v13, 0.0 }
 0x31d   : > { %1995 = vrot.lane.b32.xlu0 %v3357_v29, %s11900_s21  ;;  %602 = vst.msk [vmem:[#allocation2 + $0x190] sm:$0xff] %vm551_vm0, %v537_v1  ;;  %v14184_v55 = vpack.c.bf16 %v10472_v40, %v10471_v19  ;;  %v5882_v14 = vmax.f32 %v5754_v25, 0.0  ;;  %v10727_v19 = vld [vmem:[%s11978_s18 + $0x412] sm:$0xff]  ;;  %v10728_v40 = vld [vmem:[%s11978_s18 + $0x41a] sm:$0xff] }
 0x31e   : > { %v4035_v24 = vpop.permute.xlu1 %4034  ;;  %v6041_v38 = vsel %vm5962_vm11, %v5884_v30, -inf  ;;  %v14226_v18 = vpack.c.bf16 %v10728_v40, %v10727_v19  ;;  %v464_v19 = vld [vmem:[%s11978_s18 + $0x418] sm:$0xff] }
 0x31f   : > { %4186 = vst.msk [vmem:[#allocation2 + $0x148] sm:$0xff] %vm4144_vm8, %v4035_v24  ;;  %v4033_v31 = vpop.permute.xlu0 %4032  ;;  %v6035_v1 = vsel %vm5962_vm11, %v5882_v14, -inf }
 0x320   : > { %4185 = vst.msk [vmem:[#allocation2 + $0x140] sm:$0xff] %vm4144_vm8, %v4033_v31  ;;  %2510 = vrot.lane.b32.xlu1 %v14103_v37, %s11901_s22  ;;  %v14200_v31 = vpack.c.bf16 %v10602_v5, %v10601_v15 }
 0x321   : > { %2508 = vrot.lane.b32.xlu0 %v14107_v32, %s11901_s22 }
 0x322   : > { %v957_v23 = vpop.permute.xlu1 %956 }
 0x323   : > { %1107 = vst.msk [vmem:[#allocation2 + $0x150] sm:$0xff] %vm1064_vm2, %v957_v23  ;;  %v4546_v29 = vpop.permute.xlu0 %4545 }
 0x324   : > { %4698 = vst.msk [vmem:[#allocation2 + $0x140] sm:$0xff] %vm4657_vm9, %v4546_v29  ;;  %3023 = vrot.lane.b32.xlu1 %v14129_v57, %s11902_s23 }
 0x325   : > { %3021 = vrot.lane.b32.xlu0 %v14118_v56, %s11902_s23 }
 0x326   : > { %v959_v26 = vpop.permute.xlu1 %958 }
 0x327   : > { %v11407_v34 = vpop.f32.mrb[52].mxu0  ;;  %1108 = vst.msk [vmem:[#allocation2 + $0x158] sm:$0xff] %vm1064_vm2, %v959_v26  ;;  %v4548_v16 = vpop.permute.xlu0 %4547 }
 0x328   : > { %v5626_v45 = vmul.f32 %v13928_v3, %v11407_v34  ;;  %v5261_v49 = vpop.f32.mrb[53].mxu0  ;;  %4699 = vst.msk [vmem:[#allocation2 + $0x148] sm:$0xff] %vm4657_vm9, %v4548_v16  ;;  %3537 = vrot.lane.b32.xlu1 %v14176_v50, %s11903_s24 }
 0x329   : > { %v5624_v52 = vmul.f32 %v13928_v3, %v5261_v49  ;;  %v11408_v39 = vpop.f32.mrb[54].mxu0  ;;  %3535 = vrot.lane.b32.xlu0 %v14184_v55, %s11903_s24  ;;  %v6044_v49 = vsel %vm5962_vm11, %v5885_v6, -inf }
 0x32a   : > { %v5760_v36 = vadd.f32 %v13951_v58, %v5626_v45  ;;  %v5627_v47 = vmul.f32 %v13928_v3, %v11408_v39  ;;  %v5264_v48 = vpop.f32.mrb[55].mxu0  ;;  %v1472_v23 = vpop.permute.xlu1 %1471 }
 0x32b   : > { %v5758_v4 = vadd.f32 %v13951_v58, %v5624_v52  ;;  %v5625_v27 = vmul.f32 %v13928_v3, %v5264_v48  ;;  %1621 = vst.msk [vmem:[#allocation2 + $0x158] sm:$0xff] %vm1577_vm3, %v1472_v23  ;;  %v1470_v44 = vpop.permute.xlu0 %1469  ;;  %v4762_v45 = vld [vmem:[#allocation2 + $0x140] sm:$0xff]  ;;  %v6038_v52 = vsel %vm5962_vm11, %v5883_v62, -inf }
 0x32c   : > { %v5888_v24 = vmax.f32 %v5760_v36, 0.0  ;;  %v5761_v60 = vadd.f32 %v13951_v58, %v5627_v47  ;;  %1620 = vst.msk [vmem:[#allocation2 + $0x150] sm:$0xff] %vm1577_vm3, %v1470_v44  ;;  %11433 = vmatprep.mubr.msk.bf16.mxu0 %vm4822_vm10, %v4762_v45  ;;  %4050 = vrot.lane.b32.xlu1 %v14200_v31, %s11904_s29  ;;  %v10729_v36 = vld [vmem:[%s11978_s18 + $0x422] sm:$0xff]  ;;  %v10730_v47 = vld [vmem:[%s11978_s18 + $0x42a] sm:$0xff] }
 0x32d   : > { %v5886_v10 = vmax.f32 %v5758_v4, 0.0  ;;  %v5759_v21 = vadd.f32 %v13951_v58, %v5625_v27  ;;  %4048 = vrot.lane.b32.xlu0 %v14206_v53, %s11904_s29  ;;  %v14240_v12 = vpack.c.bf16 %v10730_v47, %v10729_v36 }
 0x32e   : > { %v6042_v54 = vsel %vm5962_vm11, %v5888_v24, -inf  ;;  %v5889_v13 = vmax.f32 %v5761_v60, 0.0  ;;  %v1986_v30 = vpop.permute.xlu1 %1985 }
 0x32f   : > { %v6043_v25 = vmax.f32 %v6041_v38, %v6042_v54  ;;  %v6036_v29 = vsel %vm5962_vm11, %v5886_v10, -inf  ;;  %v5887_v34 = vmax.f32 %v5759_v21, 0.0  ;;  %2135 = vst.msk [vmem:[#allocation2 + $0x158] sm:$0xff] %vm2091_vm4, %v1986_v30  ;;  %v1984_v48 = vpop.permute.xlu0 %1983  ;;  %v4763_v26 = vld [vmem:[#allocation2 + $0x148] sm:$0xff]  ;;  %v10478_v21 = vld [vmem:[%s11978_s18 + $0x450] sm:$0xff]  ;;  %v10475_v38 = vld [vmem:[%s11978_s18 + $0x438] sm:$0xff] }
 0x330   : > { %v6037_v15 = vmax.f32 %v6035_v1, %v6036_v29  ;;  %v6045_v63 = vsel %vm5962_vm11, %v5889_v13, -inf  ;;  %2134 = vst.msk [vmem:[#allocation2 + $0x150] sm:$0xff] %vm2091_vm4, %v1984_v48  ;;  %11434 = vmatmul.mubr.msk.bf16.gmra.mrb[80].mxu0 %vm4822_vm10, %v4763_v26  ;;  %972 = vrot.lane.b32.xlu1 %v14107_v32, %s11899_s20  ;;  %v10477_v10 = vld [vmem:[%s11978_s18 + $0x448] sm:$0xff]  ;;  %v10476_v54 = vld [vmem:[%s11978_s18 + $0x440] sm:$0xff]  ;;  %v10606_v26 = vld [vmem:[%s11978_s18 + $0x451] sm:$0xff] }
 0x331   : > { %6181 = vst.msk [vmem:[#allocation3 + $0xd0] sm:$0xff] %vm5962_vm11, %v6043_v25  ;;  %v6046_v39 = vmax.f32 %v6044_v49, %v6045_v63  ;;  %v6039_v5 = vsel %vm5962_vm11, %v5887_v34, -inf  ;;  %4561 = vrot.lane.b32.xlu0 %v14226_v18, %s11905_s25  ;;  %v10605_v30 = vld [vmem:[%s11978_s18 + $0x449] sm:$0xff]  ;;  %v3361_v48 = vpack.c.bf16 %v10476_v54, %v10475_v38 }
 0x332   : > { %6179 = vst.msk [vmem:[#allocation3 + $0xc0] sm:$0xff] %vm5962_vm11, %v6037_v15  ;;  %v6040_v35 = vmax.f32 %v6038_v52, %v6039_v5  ;;  %v2499_v33 = vpop.permute.xlu1 %2498  ;;  %v10733_v54 = vld [vmem:[%s11978_s18 + $0x44a] sm:$0xff] }
 0x333   : > { %6182 = vst.msk [vmem:[#allocation3 + $0xd8] sm:$0xff] %vm5962_vm11, %v6046_v39  ;;  %v2497_v20 = vpop.permute.xlu0 %2496 }
 0x334   : > { %6180 = vst.msk [vmem:[#allocation3 + $0xc8] sm:$0xff] %vm5962_vm11, %v6040_v35  ;;  %974 = vrot.lane.b32.xlu1 %v14103_v37, %s11899_s20  ;;  %v14288_v35 = vpack.c.bf16 %v10478_v21, %v10477_v10 }
 0x335   : > { %2648 = vst.msk [vmem:[#allocation2 + $0x158] sm:$0xff] %vm2604_vm5, %v2499_v33  ;;  %2647 = vst.msk [vmem:[#allocation2 + $0x150] sm:$0xff] %vm2604_vm5, %v2497_v20  ;;  %4563 = vrot.lane.b32.xlu0 %v14240_v12, %s11905_s25  ;;  %v465_v33 = vld [vmem:[%s11978_s18 + $0x420] sm:$0xff]  ;;  %v466_v20 = vld [vmem:[%s11978_s18 + $0x428] sm:$0xff] }
 0x336   : > { %v3012_v32 = vpop.permute.xlu1 %3011 }
 0x337   : > { %3161 = vst.msk [vmem:[#allocation2 + $0x158] sm:$0xff] %vm3117_vm6, %v3012_v32  ;;  %v3010_v24 = vpop.permute.xlu0 %3009  ;;  %v10603_v32 = vld [vmem:[%s11978_s18 + $0x439] sm:$0xff] }
 0x338   : > { %3160 = vst.msk [vmem:[#allocation2 + $0x150] sm:$0xff] %vm3117_vm6, %v3010_v24  ;;  %1487 = vrot.lane.b32.xlu1 %v14129_v57, %s11898_s19  ;;  %v14316_v24 = vpack.c.bf16 %v10606_v26, %v10605_v30 }
 0x339   : > { %1485 = vrot.lane.b32.xlu0 %v14118_v56, %s11898_s19 }
 0x33a   : > { %v6245_v14 = vld [vmem:[#allocation3 + $0xd0] ss:$2 sm:$0xff]  ;;  %v6309_v4 = vld [vmem:[#allocation3 + $0xd1] ss:$2 sm:$0xff]  ;;  %v3526_v37 = vpop.permute.xlu1 %3525 }
 0x33b   : > { %v6359_v27 = vmax.f32 %v6245_v14, %v6309_v4  ;;  %v6243_v16 = vld [vmem:[#allocation3 + $0xc0] ss:$2 sm:$0xff]  ;;  %v6307_v6 = vld [vmem:[#allocation3 + $0xc1] ss:$2 sm:$0xff]  ;;  %3675 = vst.msk [vmem:[#allocation2 + $0x158] sm:$0xff] %vm3631_vm7, %v3526_v37  ;;  %v3524_v62 = vpop.permute.xlu0 %3523 }
 0x33c   : > { %v6358_v60 = vmax.f32 %v6243_v16, %v6307_v6  ;;  %3674 = vst.msk [vmem:[#allocation2 + $0x150] sm:$0xff] %vm3631_vm7, %v3524_v62  ;;  %2001 = vrot.lane.b32.xlu1 %v14176_v50, %s11900_s21  ;;  %v540_v16 = vpack.c.bf16 %v466_v20, %v465_v33  ;;  %v10731_v62 = vld [vmem:[%s11978_s18 + $0x43a] sm:$0xff] }
 0x33d   : > { %6433 = vst.msk [vmem:[#allocation4 + $0xf0] sm:$0xff] %vm5962_vm11, %v6359_v27  ;;  %1999 = vrot.lane.b32.xlu0 %v14184_v55, %s11900_s21  ;;  %v463_v55 = vld [vmem:[%s11978_s18 + $0x410] sm:$0xff]  ;;  %v10604_v27 = vld [vmem:[%s11978_s18 + $0x441] sm:$0xff] }
 0x33e   : > { %6432 = vst.msk [vmem:[#allocation4 + $0xe8] sm:$0xff] %vm5962_vm11, %v6358_v60  ;;  %v4039_v57 = vpop.permute.xlu1 %4038  ;;  %v539_v25 = vpack.c.bf16 %v464_v19, %v463_v55  ;;  %v14320_v60 = vpack.c.bf16 %v10604_v27, %v10603_v32 }
 0x33f   : > { %4188 = vst.msk [vmem:[#allocation2 + $0x158] sm:$0xff] %vm4144_vm8, %v4039_v57  ;;  %v4037_v56 = vpop.permute.xlu0 %4036  ;;  %v10732_v57 = vld [vmem:[%s11978_s18 + $0x442] sm:$0xff] }
 0x340   : > { %4187 = vst.msk [vmem:[#allocation2 + $0x150] sm:$0xff] %vm4144_vm8, %v4037_v56  ;;  %2514 = vrot.lane.b32.xlu1 %v14200_v31, %s11901_s22  ;;  %v14331_v21 = vpack.c.bf16 %v10732_v57, %v10731_v62 }
 0x341   : > { %2512 = vrot.lane.b32.xlu0 %v14206_v53, %s11901_s22  ;;  %604 = vst.msk [vmem:[#allocation2 + $0x1a0] sm:$0xff] %vm551_vm0, %v539_v25  ;;  %605 = vst.msk [vmem:[#allocation2 + $0x1a8] sm:$0xff] %vm551_vm0, %v540_v16 }
 0x342   : > { %v961_v1 = vpop.permute.xlu1 %960 }
 0x343   : > { %1109 = vst.msk [vmem:[#allocation2 + $0x160] sm:$0xff] %vm1064_vm2, %v961_v1  ;;  %v4550_v49 = vpop.permute.xlu0 %4549  ;;  %v14277_v15 = vpop.f32.mrb[56].mxu0 }
 0x344   : > { %v6531_v13 = vld [vmem:[#allocation4 + $0xf0] sm:$0xff]  ;;  %4700 = vst.msk [vmem:[#allocation2 + $0x150] sm:$0xff] %vm4657_vm9, %v4550_v49  ;;  %v14284_v5 = vpop.f32.mrb[57].mxu0  ;;  %3027 = vrot.lane.b32.xlu1 %v14240_v12, %s11902_s23 }
 0x345   : > { %v6914_v23 = vld [vmem:[#allocation4 + $0xf1] sm:$0xff]  ;;  %v6530_v40 = vld [vmem:[#allocation4 + $0xe8] sm:$0xff]  ;;  %3025 = vrot.lane.b32.xlu0 %v14226_v18, %s11902_s23  ;;  %v14296_v47 = vpop.f32.mrb[58].mxu0 }
 0x346   : > { %v7233_v50 = vld [vmem:[#allocation4 + $0xf1] sm:$0xff]  ;;  %v14274_v29 = vpack.c.bf16 %v6531_v13, %v6530_v40  ;;  %v6913_v34 = vld [vmem:[#allocation4 + $0xe9] sm:$0xff]  ;;  %v14307_v14 = vpop.f32.mrb[59].mxu0  ;;  %v963_v4 = vpop.permute.xlu1 %962 }
 0x347   : > { %v6721_v44 = vld [vmem:[#allocation4 + $0xe7] sm:$0xff]  ;;  %v6722_v45 = vld [vmem:[#allocation4 + $0xef] sm:$0xff]  ;;  %v14279_v63 = vpack.c.bf16 %v6914_v23, %v6913_v34  ;;  %1110 = vst.msk [vmem:[#allocation2 + $0x168] sm:$0xff] %vm1064_vm2, %v963_v4  ;;  %v4552_v6 = vpop.permute.xlu0 %4551 }
 0x348   : > { %v14281_v52 = vpack.c.bf16 %v6722_v45, %v6721_v44  ;;  %v7232_v39 = vld [vmem:[#allocation4 + $0xe9] sm:$0xff]  ;;  %6891 = vst.msk [vmem:[#allocation5 + $0x100] sm:$0xff] %vm5962_vm11, %v14274_v29  ;;  %3541 = vrot.lane.b32.xlu1 %v14288_v35, %s11903_s24  ;;  %v10734_v13 = vld [vmem:[%s11978_s18 + $0x452] sm:$0xff]  ;;  %v5631_v45 = vmul.f32 %v13928_v3, %v14296_v47  ;;  %v10479_v47 = vld [vmem:[%s11978_s18 + $0x460] sm:$0xff] }
 0x349   : > { %v7259_v36 = vpack.c.bf16 %v7233_v50, %v7232_v39  ;;  %6700 = vst.msk [vmem:[#allocation5 + $0x120] sm:$0xff] %vm5962_vm11, %v14279_v63  ;;  %3539 = vrot.lane.b32.xlu0 %v3361_v48, %s11903_s24  ;;  %v14342_v55 = vpack.c.bf16 %v10734_v13, %v10733_v54  ;;  %v10481_v49 = vld [vmem:[%s11978_s18 + $0x470] sm:$0xff]  ;;  %v10482_v39 = vld [vmem:[%s11978_s18 + $0x478] sm:$0xff] }
 0x34a   : > { %6507 = vst.msk [vmem:[#allocation5 + $0x118] sm:$0xff] %vm5962_vm11, %v14281_v52  ;;  %7083 = vst.msk [vmem:[#allocation5 + $0xe0] sm:$0xff] %vm5962_vm11, %v14281_v52  ;;  %v1476_v37 = vpop.permute.xlu1 %1475  ;;  %v5765_v4 = vadd.f32 %v13951_v58, %v5631_v45  ;;  %v14389_v16 = vpack.c.bf16 %v10482_v39, %v10481_v49  ;;  %v470_v54 = vld [vmem:[%s11978_s18 + $0x450] sm:$0xff] }
 0x34b   : > { %7275 = vst.msk [vmem:[#allocation5 + $0xe8] sm:$0xff] %vm5962_vm11, %v7259_v36  ;;  %v1474_v56 = vpop.permute.xlu0 %1473  ;;  %v4764_v10 = vld [vmem:[#allocation2 + $0x150] sm:$0xff] }
 0x34c   : > { %4701 = vst.msk [vmem:[#allocation2 + $0x158] sm:$0xff] %vm4657_vm9, %v4552_v6  ;;  %11437 = vmatprep.mubr.msk.bf16.mxu0 %vm4822_vm10, %v4764_v10  ;;  %4054 = vrot.lane.b32.xlu1 %v14316_v24, %s11904_s29  ;;  %v10609_v6 = vld [vmem:[%s11978_s18 + $0x471] sm:$0xff]  ;;  %v10610_v10 = vld [vmem:[%s11978_s18 + $0x479] sm:$0xff] }
 0x34d   : > { %1623 = vst.msk [vmem:[#allocation2 + $0x168] sm:$0xff] %vm1577_vm3, %v1476_v37  ;;  %1622 = vst.msk [vmem:[#allocation2 + $0x160] sm:$0xff] %vm1577_vm3, %v1474_v56  ;;  %4052 = vrot.lane.b32.xlu0 %v14320_v60, %s11904_s29 }
 0x34e   : > { %v1990_v38 = vpop.permute.xlu1 %1989 }
 0x34f   : > { %2137 = vst.msk [vmem:[#allocation2 + $0x168] sm:$0xff] %vm2091_vm4, %v1990_v38  ;;  %v1988_v23 = vpop.permute.xlu0 %1987  ;;  %v469_v38 = vld [vmem:[%s11978_s18 + $0x448] sm:$0xff] }
 0x350   : > { %2136 = vst.msk [vmem:[#allocation2 + $0x160] sm:$0xff] %vm2091_vm4, %v1988_v23  ;;  %976 = vrot.lane.b32.xlu1 %v14206_v53, %s11899_s20 }
 0x351   : > { %4565 = vrot.lane.b32.xlu0 %v14331_v21, %s11905_s25 }
 0x352   : > { %v2503_v19 = vpop.permute.xlu1 %2502 }
 0x353   : > { %v4765_v50 = vld [vmem:[#allocation2 + $0x158] sm:$0xff]  ;;  %2650 = vst.msk [vmem:[#allocation2 + $0x168] sm:$0xff] %vm2604_vm5, %v2503_v19  ;;  %v2501_v40 = vpop.permute.xlu0 %2500 }
 0x354   : > { %11438 = vmatmul.mubr.msk.bf16.gmra.mrb[84].mxu0 %vm4822_vm10, %v4765_v50  ;;  %2649 = vst.msk [vmem:[#allocation2 + $0x160] sm:$0xff] %vm2604_vm5, %v2501_v40  ;;  %978 = vrot.lane.b32.xlu1 %v14200_v31, %s11899_s20 }
 0x355   : > { %4567 = vrot.lane.b32.xlu0 %v14342_v55, %s11905_s25 }
 0x356   : > { %v3016_v1 = vpop.permute.xlu1 %3015 }
 0x357   : > { %3163 = vst.msk [vmem:[#allocation2 + $0x168] sm:$0xff] %vm3117_vm6, %v3016_v1  ;;  %v3014_v53 = vpop.permute.xlu0 %3013  ;;  %v10607_v1 = vld [vmem:[%s11978_s18 + $0x461] sm:$0xff] }
 0x358   : > { %3162 = vst.msk [vmem:[#allocation2 + $0x160] sm:$0xff] %vm3117_vm6, %v3014_v53  ;;  %1491 = vrot.lane.b32.xlu1 %v14240_v12, %s11898_s19  ;;  %v5630_v12 = vmul.f32 %v13928_v3, %v14277_v15  ;;  %v5629_v15 = vmul.f32 %v13928_v3, %v14307_v14  ;;  %v10608_v53 = vld [vmem:[%s11978_s18 + $0x469] sm:$0xff] }
 0x359   : > { %1489 = vrot.lane.b32.xlu0 %v14226_v18, %s11898_s19  ;;  %v5628_v18 = vmul.f32 %v13928_v3, %v14284_v5  ;;  %v467_v5 = vld [vmem:[%s11978_s18 + $0x438] sm:$0xff] }
 0x35a   : > { %v3530_v25 = vpop.permute.xlu1 %3529  ;;  %v5764_v30 = vadd.f32 %v13951_v58, %v5630_v12  ;;  %v5763_v37 = vadd.f32 %v13951_v58, %v5629_v15  ;;  %v14413_v15 = vpack.c.bf16 %v10610_v10, %v10609_v6 }
 0x35b   : > { %3677 = vst.msk [vmem:[#allocation2 + $0x168] sm:$0xff] %vm3631_vm7, %v3530_v25  ;;  %v3528_v31 = vpop.permute.xlu0 %3527  ;;  %v5762_v33 = vadd.f32 %v13951_v58, %v5628_v18  ;;  %v542_v25 = vpack.c.bf16 %v470_v54, %v469_v38 }
 0x35c   : > { %3676 = vst.msk [vmem:[#allocation2 + $0x160] sm:$0xff] %vm3631_vm7, %v3528_v31  ;;  %2005 = vrot.lane.b32.xlu1 %v14288_v35, %s11900_s21  ;;  %v468_v35 = vld [vmem:[%s11978_s18 + $0x440] sm:$0xff]  ;;  %v5892_v13 = vmax.f32 %v5764_v30, 0.0  ;;  %v5891_v39 = vmax.f32 %v5763_v37, 0.0 }
 0x35d   : > { %2003 = vrot.lane.b32.xlu0 %v3361_v48, %s11900_s21  ;;  %v10480_v48 = vld [vmem:[%s11978_s18 + $0x468] sm:$0xff]  ;;  %v541_v26 = vpack.c.bf16 %v468_v35, %v467_v5  ;;  %v5890_v31 = vmax.f32 %v5762_v33, 0.0  ;;  %607 = vst.msk [vmem:[#allocation2 + $0x1b8] sm:$0xff] %vm551_vm0, %v542_v25  ;;  %v14419_v35 = vpack.c.bf16 %v10608_v53, %v10607_v1 }
 0x35e   : > { %v4043_v34 = vpop.permute.xlu1 %4042  ;;  %v14397_v56 = vpack.c.bf16 %v10480_v48, %v10479_v47  ;;  %v6053_v30 = vsel %vm5962_vm11, %v5892_v13, -inf  ;;  %v10736_v33 = vld [vmem:[%s11978_s18 + $0x46a] sm:$0xff] }
 0x35f   : > { %4190 = vst.msk [vmem:[#allocation2 + $0x168] sm:$0xff] %vm4144_vm8, %v4043_v34  ;;  %v4041_v44 = vpop.permute.xlu0 %4040 }
 0x360   : > { %4189 = vst.msk [vmem:[#allocation2 + $0x160] sm:$0xff] %vm4144_vm8, %v4041_v44  ;;  %2518 = vrot.lane.b32.xlu1 %v14316_v24, %s11901_s22  ;;  %v5893_v44 = vmax.f32 %v5765_v4, 0.0 }
 0x361   : > { %2516 = vrot.lane.b32.xlu0 %v14320_v60, %s11901_s22  ;;  %606 = vst.msk [vmem:[#allocation2 + $0x1b0] sm:$0xff] %vm551_vm0, %v541_v26  ;;  %v10735_v26 = vld [vmem:[%s11978_s18 + $0x462] sm:$0xff] }
 0x362   : > { %v965_v36 = vpop.permute.xlu1 %964  ;;  %v6056_v6 = vsel %vm5962_vm11, %v5893_v44, -inf  ;;  %v14439_v54 = vpack.c.bf16 %v10736_v33, %v10735_v26  ;;  %v472_v33 = vld [vmem:[%s11978_s18 + $0x468] sm:$0xff] }
 0x363   : > { %1111 = vst.msk [vmem:[#allocation2 + $0x170] sm:$0xff] %vm1064_vm2, %v965_v36  ;;  %v4554_v20 = vpop.permute.xlu0 %4553 }
 0x364   : > { %4702 = vst.msk [vmem:[#allocation2 + $0x160] sm:$0xff] %vm4657_vm9, %v4554_v20  ;;  %3031 = vrot.lane.b32.xlu1 %v14342_v55, %s11902_s23  ;;  %v6047_v20 = vsel %vm5962_vm11, %v5890_v31, -inf }
 0x365   : > { %3029 = vrot.lane.b32.xlu0 %v14331_v21, %s11902_s23 }
 0x366   : > { %v967_v40 = vpop.permute.xlu1 %966 }
 0x367   : > { %v11415_v14 = vpop.f32.mrb[60].mxu0  ;;  %1112 = vst.msk [vmem:[#allocation2 + $0x178] sm:$0xff] %vm1064_vm2, %v967_v40  ;;  %v4556_v18 = vpop.permute.xlu0 %4555 }
 0x368   : > { %v5634_v32 = vmul.f32 %v13928_v3, %v11415_v14  ;;  %v5293_v27 = vpop.f32.mrb[61].mxu0  ;;  %4703 = vst.msk [vmem:[#allocation2 + $0x168] sm:$0xff] %vm4657_vm9, %v4556_v18  ;;  %3545 = vrot.lane.b32.xlu1 %v14389_v16, %s11903_s24 }
 0x369   : > { %v5632_v62 = vmul.f32 %v13928_v3, %v5293_v27  ;;  %v11416_v57 = vpop.f32.mrb[62].mxu0  ;;  %3543 = vrot.lane.b32.xlu0 %v14397_v56, %s11903_s24 }
 0x36a   : > { %v5768_v23 = vadd.f32 %v13951_v58, %v5634_v32  ;;  %v5635_v50 = vmul.f32 %v13928_v3, %v11416_v57  ;;  %v5296_v19 = vpop.f32.mrb[63].mxu0  ;;  %v1480_v48 = vpop.permute.xlu1 %1479  ;;  %v6050_v57 = vsel %vm5962_vm11, %v5891_v39, -inf }
 0x36b   : > { %v5766_v12 = vadd.f32 %v13951_v58, %v5632_v62  ;;  %v5633_v34 = vmul.f32 %v13928_v3, %v5296_v19  ;;  %1625 = vst.msk [vmem:[#allocation2 + $0x178] sm:$0xff] %vm1577_vm3, %v1480_v48  ;;  %v4766_v27 = vld [vmem:[#allocation2 + $0x160] sm:$0xff] }
 0x36c   : > { %v5896_v45 = vmax.f32 %v5768_v23, 0.0  ;;  %v5769_v49 = vadd.f32 %v13951_v58, %v5635_v50  ;;  %11441 = vmatprep.mubr.msk.bf16.mxu0 %vm4822_vm10, %v4766_v27  ;;  %4058 = vrot.lane.b32.xlu1 %v14413_v15, %s11904_s29  ;;  %v10737_v50 = vld [vmem:[%s11978_s18 + $0x472] sm:$0xff]  ;;  %v10738_v19 = vld [vmem:[%s11978_s18 + $0x47a] sm:$0xff] }
 0x36d   : > { %v5894_v3 = vmax.f32 %v5766_v12, 0.0  ;;  %v5767_v5 = vadd.f32 %v13951_v58, %v5633_v34  ;;  %v1478_v58 = vpop.permute.xlu0 %1477  ;;  %4056 = vrot.lane.b32.xlu0 %v14419_v35, %s11904_s29  ;;  %v14453_v53 = vpack.c.bf16 %v10738_v19, %v10737_v50  ;;  %v10613_v50 = vld [vmem:[%s11978_s18 + $0x499] sm:$0xff] }
 0x36e   : > { %v6054_v36 = vsel %vm5962_vm11, %v5896_v45, -inf  ;;  %v5897_v47 = vmax.f32 %v5769_v49, 0.0  ;;  %1624 = vst.msk [vmem:[#allocation2 + $0x170] sm:$0xff] %vm1577_vm3, %v1478_v58  ;;  %v1994_v23 = vpop.permute.xlu1 %1993 }
 0x36f   : > { %v6055_v14 = vmax.f32 %v6053_v30, %v6054_v36  ;;  %v6048_v4 = vsel %vm5962_vm11, %v5894_v3, -inf  ;;  %v5895_v32 = vmax.f32 %v5767_v5, 0.0  ;;  %2139 = vst.msk [vmem:[#allocation2 + $0x178] sm:$0xff] %vm2091_vm4, %v1994_v23  ;;  %v4767_v1 = vld [vmem:[#allocation2 + $0x168] sm:$0xff]  ;;  %v10485_v5 = vld [vmem:[%s11978_s18 + $0x498] sm:$0xff]  ;;  %v10486_v30 = vld [vmem:[%s11978_s18 + $0x4a0] sm:$0xff] }
 0x370   : > { %v6049_v37 = vmax.f32 %v6047_v20, %v6048_v4  ;;  %v6057_v62 = vsel %vm5962_vm11, %v5897_v47, -inf  ;;  %11442 = vmatmul.mubr.msk.bf16.gmra.mrb[88].mxu0 %vm4822_vm10, %v4767_v1  ;;  %980 = vrot.lane.b32.xlu1 %v14320_v60, %s11899_s20  ;;  %v10483_v36 = vld [vmem:[%s11978_s18 + $0x488] sm:$0xff]  ;;  %v10484_v47 = vld [vmem:[%s11978_s18 + $0x490] sm:$0xff]  ;;  %v14501_v23 = vpack.c.bf16 %v10486_v30, %v10485_v5 }
 0x371   : > { %6185 = vst.msk [vmem:[#allocation3 + $0xf0] sm:$0xff] %vm5962_vm11, %v6055_v14  ;;  %v6058_v10 = vmax.f32 %v6056_v6, %v6057_v62  ;;  %v6051_v38 = vsel %vm5962_vm11, %v5895_v32, -inf  ;;  %v1992_v40 = vpop.permute.xlu0 %1991  ;;  %4569 = vrot.lane.b32.xlu0 %v14439_v54, %s11905_s25  ;;  %v3365_v1 = vpack.c.bf16 %v10484_v47, %v10483_v36 }
 0x372   : > { %6183 = vst.msk [vmem:[#allocation3 + $0xe0] sm:$0xff] %vm5962_vm11, %v6049_v37  ;;  %v6052_v13 = vmax.f32 %v6050_v57, %v6051_v38  ;;  %v2507_v25 = vpop.permute.xlu1 %2506 }
 0x373   : > { %6186 = vst.msk [vmem:[#allocation3 + $0xf8] sm:$0xff] %vm5962_vm11, %v6058_v10 }
 0x374   : > { %6184 = vst.msk [vmem:[#allocation3 + $0xe8] sm:$0xff] %vm5962_vm11, %v6052_v13  ;;  %982 = vrot.lane.b32.xlu1 %v14316_v24, %s11899_s20 }
 0x375   : > { %2138 = vst.msk [vmem:[#allocation2 + $0x170] sm:$0xff] %vm2091_vm4, %v1992_v40  ;;  %v2505_v31 = vpop.permute.xlu0 %2504  ;;  %4571 = vrot.lane.b32.xlu0 %v14453_v53, %s11905_s25 }
 0x376   : > { %2652 = vst.msk [vmem:[#allocation2 + $0x178] sm:$0xff] %vm2604_vm5, %v2507_v25  ;;  %2651 = vst.msk [vmem:[#allocation2 + $0x170] sm:$0xff] %vm2604_vm5, %v2505_v31  ;;  %v3020_v60 = vpop.permute.xlu1 %3019  ;;  %v10614_v25 = vld [vmem:[%s11978_s18 + $0x4a1] sm:$0xff]  ;;  %v473_v31 = vld [vmem:[%s11978_s18 + $0x470] sm:$0xff] }
 0x377   : > { %3165 = vst.msk [vmem:[#allocation2 + $0x178] sm:$0xff] %vm3117_vm6, %v3020_v60 }
 0x378   : > { %1495 = vrot.lane.b32.xlu1 %v14342_v55, %s11898_s19 }
 0x379   : > { %v3018_v49 = vpop.permute.xlu0 %3017  ;;  %1493 = vrot.lane.b32.xlu0 %v14331_v21, %s11898_s19 }
 0x37a   : > { %v6249_v12 = vld [vmem:[#allocation3 + $0xf0] ss:$2 sm:$0xff]  ;;  %v6313_v34 = vld [vmem:[#allocation3 + $0xf1] ss:$2 sm:$0xff]  ;;  %3164 = vst.msk [vmem:[#allocation2 + $0x170] sm:$0xff] %vm3117_vm6, %v3018_v49  ;;  %v3534_v24 = vpop.permute.xlu1 %3533 }
 0x37b   : > { %v6361_v18 = vmax.f32 %v6249_v12, %v6313_v34  ;;  %v6247_v44 = vld [vmem:[#allocation3 + $0xe0] ss:$2 sm:$0xff]  ;;  %v6311_v45 = vld [vmem:[#allocation3 + $0xe1] ss:$2 sm:$0xff]  ;;  %3679 = vst.msk [vmem:[#allocation2 + $0x178] sm:$0xff] %vm3631_vm7, %v3534_v24  ;;  %v474_v12 = vld [vmem:[%s11978_s18 + $0x478] sm:$0xff] }
 0x37c   : > { %v6360_v39 = vmax.f32 %v6247_v44, %v6311_v45  ;;  %2009 = vrot.lane.b32.xlu1 %v14389_v16, %s11900_s21  ;;  %v10612_v44 = vld [vmem:[%s11978_s18 + $0x491] sm:$0xff]  ;;  %v544_v45 = vpack.c.bf16 %v474_v12, %v473_v31  ;;  %v475_v31 = vld [vmem:[%s11978_s18 + $0x488] sm:$0xff] }
 0x37d   : > { %6435 = vst.msk [vmem:[#allocation4 + $0x110] sm:$0xff] %vm5962_vm11, %v6361_v18  ;;  %v3532_v3 = vpop.permute.xlu0 %3531  ;;  %2007 = vrot.lane.b32.xlu0 %v14397_v56, %s11900_s21  ;;  %v471_v56 = vld [vmem:[%s11978_s18 + $0x460] sm:$0xff]  ;;  %v10611_v18 = vld [vmem:[%s11978_s18 + $0x489] sm:$0xff] }
 0x37e   : > { %6434 = vst.msk [vmem:[#allocation4 + $0x108] sm:$0xff] %vm5962_vm11, %v6360_v39  ;;  %v4047_v55 = vpop.permute.xlu1 %4046  ;;  %v543_v4 = vpack.c.bf16 %v472_v33, %v471_v56  ;;  %v14529_v39 = vpack.c.bf16 %v10614_v25, %v10613_v50  ;;  %v14533_v24 = vpack.c.bf16 %v10612_v44, %v10611_v18  ;;  %v10487_v50 = vld [vmem:[%s11978_s18 + $0x4b0] sm:$0xff]  ;;  %v10488_v25 = vld [vmem:[%s11978_s18 + $0x4b8] sm:$0xff] }
 0x37f   : > { %3678 = vst.msk [vmem:[#allocation2 + $0x170] sm:$0xff] %vm3631_vm7, %v3532_v3  ;;  %v476_v12 = vld [vmem:[%s11978_s18 + $0x490] sm:$0xff] }
 0x380   : > { %4192 = vst.msk [vmem:[#allocation2 + $0x178] sm:$0xff] %vm4144_vm8, %v4047_v55  ;;  %2522 = vrot.lane.b32.xlu1 %v14413_v15, %s11901_s22  ;;  %v10739_v55 = vld [vmem:[%s11978_s18 + $0x48a] sm:$0xff]  ;;  %v545_v44 = vpack.c.bf16 %v476_v12, %v475_v31 }
 0x381   : > { %v4045_v21 = vpop.permute.xlu0 %4044  ;;  %2520 = vrot.lane.b32.xlu0 %v14419_v35, %s11901_s22  ;;  %608 = vst.msk [vmem:[#allocation2 + $0x1c0] sm:$0xff] %vm551_vm0, %v543_v4  ;;  %609 = vst.msk [vmem:[#allocation2 + $0x1c8] sm:$0xff] %vm551_vm0, %v544_v45 }
 0x382   : > { %4191 = vst.msk [vmem:[#allocation2 + $0x170] sm:$0xff] %vm4144_vm8, %v4045_v21  ;;  %v969_v14 = vpop.permute.xlu1 %968  ;;  %v10740_v21 = vld [vmem:[%s11978_s18 + $0x492] sm:$0xff] }
 0x383   : > { %1113 = vst.msk [vmem:[#allocation2 + $0x180] sm:$0xff] %vm1064_vm2, %v969_v14  ;;  %v14490_v62 = vpop.f32.mrb[64].mxu0  ;;  %v14544_v36 = vpack.c.bf16 %v10740_v21, %v10739_v55 }
 0x384   : > { %v6533_v48 = vld [vmem:[#allocation4 + $0x110] sm:$0xff]  ;;  %v14497_v13 = vpop.f32.mrb[65].mxu0  ;;  %3035 = vrot.lane.b32.xlu1 %v14453_v53, %s11902_s23  ;;  %610 = vst.msk [vmem:[#allocation2 + $0x1d0] sm:$0xff] %vm551_vm0, %v545_v44 }
 0x385   : > { %v6916_v26 = vld [vmem:[#allocation4 + $0x111] sm:$0xff]  ;;  %v6532_v20 = vld [vmem:[#allocation4 + $0x108] sm:$0xff]  ;;  %v4558_v37 = vpop.permute.xlu0 %4557  ;;  %3033 = vrot.lane.b32.xlu0 %v14439_v54, %s11902_s23  ;;  %v14509_v40 = vpop.f32.mrb[66].mxu0 }
 0x386   : > { %v7235_v16 = vld [vmem:[#allocation4 + $0x111] sm:$0xff]  ;;  %v14487_v32 = vpack.c.bf16 %v6533_v48, %v6532_v20  ;;  %v6915_v58 = vld [vmem:[#allocation4 + $0x109] sm:$0xff]  ;;  %4704 = vst.msk [vmem:[#allocation2 + $0x170] sm:$0xff] %vm4657_vm9, %v4558_v37  ;;  %v14520_v34 = vpop.f32.mrb[67].mxu0  ;;  %v971_v60 = vpop.permute.xlu1 %970  ;;  %v10741_v48 = vld [vmem:[%s11978_s18 + $0x49a] sm:$0xff] }
 0x387   : > { %v6723_v27 = vld [vmem:[#allocation4 + $0x107] sm:$0xff]  ;;  %v6724_v6 = vld [vmem:[#allocation4 + $0x10f] sm:$0xff]  ;;  %v14492_v57 = vpack.c.bf16 %v6916_v26, %v6915_v58  ;;  %1114 = vst.msk [vmem:[#allocation2 + $0x188] sm:$0xff] %vm1064_vm2, %v971_v60 }
 0x388   : > { %v14494_v10 = vpack.c.bf16 %v6724_v6, %v6723_v27  ;;  %v7234_v38 = vld [vmem:[#allocation4 + $0x109] sm:$0xff]  ;;  %6892 = vst.msk [vmem:[#allocation5 + $0x128] sm:$0xff] %vm5962_vm11, %v14487_v32  ;;  %3549 = vrot.lane.b32.xlu1 %v14501_v23, %s11903_s24 }
 0x389   : > { %v7260_v19 = vpack.c.bf16 %v7235_v16, %v7234_v38  ;;  %6701 = vst.msk [vmem:[#allocation5 + $0x148] sm:$0xff] %vm5962_vm11, %v14492_v57  ;;  %v4560_v49 = vpop.permute.xlu0 %4559  ;;  %3547 = vrot.lane.b32.xlu0 %v3365_v1, %s11903_s24  ;;  %v10742_v26 = vld [vmem:[%s11978_s18 + $0x4a2] sm:$0xff] }
 0x38a   : > { %6508 = vst.msk [vmem:[#allocation5 + $0x140] sm:$0xff] %vm5962_vm11, %v14494_v10  ;;  %7084 = vst.msk [vmem:[#allocation5 + $0x108] sm:$0xff] %vm5962_vm11, %v14494_v10  ;;  %v1484_v3 = vpop.permute.xlu1 %1483  ;;  %v14555_v33 = vpack.c.bf16 %v10742_v26, %v10741_v48  ;;  %v10617_v48 = vld [vmem:[%s11978_s18 + $0x4c1] sm:$0xff]  ;;  %v10618_v26 = vld [vmem:[%s11978_s18 + $0x4c9] sm:$0xff] }
 0x38b   : > { %7276 = vst.msk [vmem:[#allocation5 + $0x110] sm:$0xff] %vm5962_vm11, %v7260_v19  ;;  %v14599_v19 = vld [vmem:[%s16461_s3] ss:$0 sm:$0xff] }
 0x38c   : > { %4705 = vst.msk [vmem:[#allocation2 + $0x178] sm:$0xff] %vm4657_vm9, %v4560_v49  ;;  %4062 = vrot.lane.b32.xlu1 %v14529_v39, %s11904_s29 }
 0x38d   : > { %1627 = vst.msk [vmem:[#allocation2 + $0x188] sm:$0xff] %vm1577_vm3, %v1484_v3  ;;  %v1482_v5 = vpop.permute.xlu0 %1481  ;;  %v4768_v30 = vld [vmem:[#allocation2 + $0x170] sm:$0xff]  ;;  %4060 = vrot.lane.b32.xlu0 %v14533_v24, %s11904_s29 }
 0x38e   : > { %1626 = vst.msk [vmem:[#allocation2 + $0x180] sm:$0xff] %vm1577_vm3, %v1482_v5  ;;  %11445 = vmatprep.mubr.msk.bf16.mxu0 %vm4822_vm10, %v4768_v30  ;;  %v1998_v47 = vpop.permute.xlu1 %1997 }
 0x38f   : > { %2141 = vst.msk [vmem:[#allocation2 + $0x188] sm:$0xff] %vm2091_vm4, %v1998_v47  ;;  %v14618_v47 = vpack.c.bf16 %v10488_v25, %v10487_v50 }
 0x390   : > { %984 = vrot.lane.b32.xlu1 %v14419_v35, %s11899_s20 }
 0x391   : > { %v1996_v16 = vpop.permute.xlu0 %1995  ;;  %4573 = vrot.lane.b32.xlu0 %v14544_v36, %s11905_s25 }
 0x392   : > { %2140 = vst.msk [vmem:[#allocation2 + $0x180] sm:$0xff] %vm2091_vm4, %v1996_v16  ;;  %v2511_v20 = vpop.permute.xlu1 %2510  ;;  %v10615_v16 = vld [vmem:[%s11978_s18 + $0x4b1] sm:$0xff] }
 0x393   : > { %v4769_v56 = vld [vmem:[#allocation2 + $0x178] sm:$0xff]  ;;  %2654 = vst.msk [vmem:[#allocation2 + $0x188] sm:$0xff] %vm2604_vm5, %v2511_v20 }
 0x394   : > { %11446 = vmatmul.mubr.msk.bf16.gmra.mrb[92].mxu0 %vm4822_vm10, %v4769_v56  ;;  %986 = vrot.lane.b32.xlu1 %v14413_v15, %s11899_s20 }
 0x395   : > { %v2509_v14 = vpop.permute.xlu0 %2508  ;;  %4575 = vrot.lane.b32.xlu0 %v14555_v33, %s11905_s25 }
 0x396   : > { %2653 = vst.msk [vmem:[#allocation2 + $0x180] sm:$0xff] %vm2604_vm5, %v2509_v14  ;;  %v3024_v4 = vpop.permute.xlu1 %3023 }
 0x397   : > { %3167 = vst.msk [vmem:[#allocation2 + $0x188] sm:$0xff] %vm3117_vm6, %v3024_v4 }
 0x398   : > { %1499 = vrot.lane.b32.xlu1 %v14453_v53, %s11898_s19  ;;  %v14577_v53 = vld [vmem:[%s16460_s2] ss:$0 sm:$0xff] }
 0x399   : > { %v3022_v35 = vpop.permute.xlu0 %3021  ;;  %1497 = vrot.lane.b32.xlu0 %v14439_v54, %s11898_s19  ;;  %v5638_v54 = vmul.f32 %v14577_v53, %v14490_v62  ;;  %v5636_v6 = vmul.f32 %v14577_v53, %v14497_v13  ;;  %v5639_v38 = vmul.f32 %v14577_v53, %v14509_v40  ;;  %v5637_v62 = vmul.f32 %v14577_v53, %v14520_v34  ;;  %v10490_v13 = vld [vmem:[%s11978_s18 + $0x4c8] sm:$0xff] }
 0x39a   : > { %3166 = vst.msk [vmem:[#allocation2 + $0x180] sm:$0xff] %vm3117_vm6, %v3022_v35  ;;  %v3538_v58 = vpop.permute.xlu1 %3537 }
 0x39b   : > { %3681 = vst.msk [vmem:[#allocation2 + $0x188] sm:$0xff] %vm3631_vm7, %v3538_v58  ;;  %v5772_v40 = vadd.f32 %v14599_v19, %v5638_v54  ;;  %v5770_v60 = vadd.f32 %v14599_v19, %v5636_v6  ;;  %v5773_v45 = vadd.f32 %v14599_v19, %v5639_v38  ;;  %v5771_v21 = vadd.f32 %v14599_v19, %v5637_v62  ;;  %v10616_v58 = vld [vmem:[%s11978_s18 + $0x4b9] sm:$0xff] }
 0x39c   : > { %2013 = vrot.lane.b32.xlu1 %v14501_v23, %s11900_s21  ;;  %v10489_v23 = vld [vmem:[%s11978_s18 + $0x4c0] sm:$0xff]  ;;  %v14641_v12 = vpack.c.bf16 %v10616_v58, %v10615_v16 }
 0x39d   : > { %v3536_v15 = vpop.permute.xlu0 %3535  ;;  %2011 = vrot.lane.b32.xlu0 %v3365_v1, %s11900_s21  ;;  %v14612_v55 = vpack.c.bf16 %v10490_v13, %v10489_v23  ;;  %v5900_v56 = vmax.f32 %v5772_v40, 0.0  ;;  %v478_v54 = vld [vmem:[%s11978_s18 + $0x4a0] sm:$0xff]  ;;  %v5901_v23 = vmax.f32 %v5773_v45, 0.0  ;;  %v14636_v40 = vpack.c.bf16 %v10618_v26, %v10617_v48  ;;  %v10743_v45 = vld [vmem:[%s11978_s18 + $0x4b2] sm:$0xff] }
 0x39e   : > { %3680 = vst.msk [vmem:[#allocation2 + $0x180] sm:$0xff] %vm3631_vm7, %v3536_v15  ;;  %v4051_v27 = vpop.permute.xlu1 %4050  ;;  %v477_v15 = vld [vmem:[%s11978_s18 + $0x498] sm:$0xff] }
 0x39f   : > { %4194 = vst.msk [vmem:[#allocation2 + $0x188] sm:$0xff] %vm4144_vm8, %v4051_v27  ;;  %v5898_v27 = vmax.f32 %v5770_v60, 0.0  ;;  %v546_v62 = vpack.c.bf16 %v478_v54, %v477_v15  ;;  %v6065_v60 = vsel %vm5962_vm11, %v5900_v56, -inf  ;;  %v6068_v16 = vsel %vm5962_vm11, %v5901_v23, -inf }
 0x3a0   : > { %2526 = vrot.lane.b32.xlu1 %v14529_v39, %s11901_s22 }
 0x3a1   : > { %v4049_v37 = vpop.permute.xlu0 %4048  ;;  %2524 = vrot.lane.b32.xlu0 %v14533_v24, %s11901_s22  ;;  %611 = vst.msk [vmem:[#allocation2 + $0x1d8] sm:$0xff] %vm551_vm0, %v546_v62 }
 0x3a2   : > { %4193 = vst.msk [vmem:[#allocation2 + $0x180] sm:$0xff] %vm4144_vm8, %v4049_v37  ;;  %v973_v1 = vpop.permute.xlu1 %972 }
 0x3a3   : > { %1115 = vst.msk [vmem:[#allocation2 + $0x190] sm:$0xff] %vm1064_vm2, %v973_v1  ;;  %v5899_v1 = vmax.f32 %v5771_v21, 0.0 }
 0x3a4   : > { %3039 = vrot.lane.b32.xlu1 %v14555_v33, %s11902_s23 }
 0x3a5   : > { %v4562_v34 = vpop.permute.xlu0 %4561  ;;  %3037 = vrot.lane.b32.xlu0 %v14544_v36, %s11902_s23 }
 0x3a6   : > { %4706 = vst.msk [vmem:[#allocation2 + $0x180] sm:$0xff] %vm4657_vm9, %v4562_v34  ;;  %v975_v35 = vpop.permute.xlu1 %974 }
 0x3a7   : > { %1116 = vst.msk [vmem:[#allocation2 + $0x198] sm:$0xff] %vm1064_vm2, %v975_v35 }
 0x3a8   : > { %v11423_v18 = vpop.f32.mrb[68].mxu0  ;;  %3553 = vrot.lane.b32.xlu1 %v14612_v55, %s11903_s24 }
 0x3a9   : > { %v5642_v49 = vmul.f32 %v14577_v53, %v11423_v18  ;;  %v5325_v3 = vpop.f32.mrb[69].mxu0  ;;  %v4564_v38 = vpop.permute.xlu0 %4563  ;;  %3551 = vrot.lane.b32.xlu0 %v14618_v47, %s11903_s24 }
 0x3aa   : > { %v5640_v5 = vmul.f32 %v14577_v53, %v5325_v3  ;;  %v11424_v30 = vpop.f32.mrb[70].mxu0  ;;  %4707 = vst.msk [vmem:[#allocation2 + $0x188] sm:$0xff] %vm4657_vm9, %v4564_v38  ;;  %v1488_v44 = vpop.permute.xlu1 %1487  ;;  %v6059_v3 = vsel %vm5962_vm11, %v5898_v27, -inf  ;;  %v10745_v27 = vld [vmem:[%s11978_s18 + $0x4c2] sm:$0xff] }
 0x3ab   : > { %v5776_v20 = vadd.f32 %v14599_v19, %v5642_v49  ;;  %v5643_v14 = vmul.f32 %v14577_v53, %v11424_v30  ;;  %v5328_v4 = vpop.f32.mrb[71].mxu0  ;;  %v10744_v49 = vld [vmem:[%s11978_s18 + $0x4ba] sm:$0xff]  ;;  %1629 = vst.msk [vmem:[#allocation2 + $0x198] sm:$0xff] %vm1577_vm3, %v1488_v44 }
 0x3ac   : > { %v5774_v6 = vadd.f32 %v14599_v19, %v5640_v5  ;;  %v5641_v37 = vmul.f32 %v14577_v53, %v5328_v4  ;;  %4066 = vrot.lane.b32.xlu1 %v14636_v40, %s11904_s29  ;;  %v14662_v58 = vpack.c.bf16 %v10744_v49, %v10743_v45  ;;  %v10493_v45 = vld [vmem:[%s11978_s18 + $0x4e8] sm:$0xff]  ;;  %v10494_v49 = vld [vmem:[%s11978_s18 + $0x4f0] sm:$0xff] }
 0x3ad   : > { %v5904_v13 = vmax.f32 %v5776_v20, 0.0  ;;  %v5777_v50 = vadd.f32 %v14599_v19, %v5643_v14  ;;  %v1486_v48 = vpop.permute.xlu0 %1485  ;;  %v4770_v26 = vld [vmem:[#allocation2 + $0x180] sm:$0xff]  ;;  %v6062_v14 = vsel %vm5962_vm11, %v5899_v1, -inf  ;;  %4064 = vrot.lane.b32.xlu0 %v14641_v12, %s11904_s29 }
 0x3ae   : > { %v5902_v25 = vmax.f32 %v5774_v6, 0.0  ;;  %v5775_v31 = vadd.f32 %v14599_v19, %v5641_v37  ;;  %1628 = vst.msk [vmem:[#allocation2 + $0x190] sm:$0xff] %vm1577_vm3, %v1486_v48  ;;  %11449 = vmatprep.mubr.msk.bf16.mxu0 %vm4822_vm10, %v4770_v26  ;;  %v2002_v54 = vpop.permute.xlu1 %2001  ;;  %v10746_v6 = vld [vmem:[%s11978_s18 + $0x4ca] sm:$0xff] }
 0x3af   : > { %v6066_v34 = vsel %vm5962_vm11, %v5904_v13, -inf  ;;  %v5905_v18 = vmax.f32 %v5777_v50, 0.0  ;;  %2143 = vst.msk [vmem:[#allocation2 + $0x198] sm:$0xff] %vm2091_vm4, %v2002_v54  ;;  %v14676_v62 = vpack.c.bf16 %v10746_v6, %v10745_v27 }
 0x3b0   : > { %v6067_v21 = vmax.f32 %v6065_v60, %v6066_v34  ;;  %v6060_v5 = vsel %vm5962_vm11, %v5902_v25, -inf  ;;  %v5903_v30 = vmax.f32 %v5775_v31, 0.0  ;;  %988 = vrot.lane.b32.xlu1 %v14533_v24, %s11899_s20 }
 0x3b1   : > { %v6061_v56 = vmax.f32 %v6059_v3, %v6060_v5  ;;  %v6069_v20 = vsel %vm5962_vm11, %v5905_v18, -inf  ;;  %v2000_v37 = vpop.permute.xlu0 %1999  ;;  %v4771_v38 = vld [vmem:[#allocation2 + $0x188] sm:$0xff]  ;;  %4577 = vrot.lane.b32.xlu0 %v14662_v58, %s11905_s25  ;;  %v10491_v3 = vld [vmem:[%s11978_s18 + $0x4d8] sm:$0xff] }
 0x3b2   : > { %6189 = vst.msk [vmem:[#allocation3 + $0x110] sm:$0xff] %vm5962_vm11, %v6067_v21  ;;  %v6070_v4 = vmax.f32 %v6068_v16, %v6069_v20  ;;  %v6063_v35 = vsel %vm5962_vm11, %v5903_v30, -inf  ;;  %11450 = vmatmul.mubr.msk.bf16.gmra.mrb[96].mxu0 %vm4822_vm10, %v4771_v38  ;;  %v2515_v23 = vpop.permute.xlu1 %2514  ;;  %v10492_v21 = vld [vmem:[%s11978_s18 + $0x4e0] sm:$0xff]  ;;  %v480_v20 = vld [vmem:[%s11978_s18 + $0x4b8] sm:$0xff] }
 0x3b3   : > { %6187 = vst.msk [vmem:[#allocation3 + $0x100] sm:$0xff] %vm5962_vm11, %v6061_v56  ;;  %v6064_v15 = vmax.f32 %v6062_v14, %v6063_v35  ;;  %v479_v56 = vld [vmem:[%s11978_s18 + $0x4b0] sm:$0xff] }
 0x3b4   : > { %6190 = vst.msk [vmem:[#allocation3 + $0x118] sm:$0xff] %vm5962_vm11, %v6070_v4  ;;  %990 = vrot.lane.b32.xlu1 %v14529_v39, %s11899_s20  ;;  %v547_v27 = vpack.c.bf16 %v480_v20, %v479_v56 }
 0x3b5   : > { %6188 = vst.msk [vmem:[#allocation3 + $0x108] sm:$0xff] %vm5962_vm11, %v6064_v15  ;;  %v2513_v13 = vpop.permute.xlu0 %2512  ;;  %4579 = vrot.lane.b32.xlu0 %v14676_v62, %s11905_s25 }
 0x3b6   : > { %2142 = vst.msk [vmem:[#allocation2 + $0x190] sm:$0xff] %vm2091_vm4, %v2000_v37  ;;  %v3028_v24 = vpop.permute.xlu1 %3027 }
 0x3b7   : > { %2656 = vst.msk [vmem:[#allocation2 + $0x198] sm:$0xff] %vm2604_vm5, %v2515_v23  ;;  %2655 = vst.msk [vmem:[#allocation2 + $0x190] sm:$0xff] %vm2604_vm5, %v2513_v13  ;;  %v14724_v23 = vpack.c.bf16 %v10494_v49, %v10493_v45 }
 0x3b8   : > { %3169 = vst.msk [vmem:[#allocation2 + $0x198] sm:$0xff] %vm3117_vm6, %v3028_v24  ;;  %1503 = vrot.lane.b32.xlu1 %v14555_v33, %s11898_s19  ;;  %v10621_v24 = vld [vmem:[%s11978_s18 + $0x4e9] sm:$0xff] }
 0x3b9   : > { %v3026_v34 = vpop.permute.xlu0 %3025  ;;  %1501 = vrot.lane.b32.xlu0 %v14544_v36, %s11898_s19  ;;  %612 = vst.msk [vmem:[#allocation2 + $0x1e0] sm:$0xff] %vm551_vm0, %v547_v27 }
 0x3ba   : > { %3168 = vst.msk [vmem:[#allocation2 + $0x190] sm:$0xff] %vm3117_vm6, %v3026_v34  ;;  %v3542_v39 = vpop.permute.xlu1 %3541 }
 0x3bb   : > { %v6253_v50 = vld [vmem:[#allocation3 + $0x110] ss:$2 sm:$0xff]  ;;  %v6317_v1 = vld [vmem:[#allocation3 + $0x111] ss:$2 sm:$0xff]  ;;  %3683 = vst.msk [vmem:[#allocation2 + $0x198] sm:$0xff] %vm3631_vm7, %v3542_v39  ;;  %v481_v39 = vld [vmem:[%s11978_s18 + $0x4c0] sm:$0xff] }
 0x3bc   : > { %v6363_v25 = vmax.f32 %v6253_v50, %v6317_v1  ;;  %v6251_v31 = vld [vmem:[#allocation3 + $0x100] ss:$2 sm:$0xff]  ;;  %v6315_v60 = vld [vmem:[#allocation3 + $0x101] ss:$2 sm:$0xff]  ;;  %2017 = vrot.lane.b32.xlu1 %v14612_v55, %s11900_s21  ;;  %v3369_v1 = vpack.c.bf16 %v10492_v21, %v10491_v3 }
 0x3bd   : > { %v6362_v18 = vmax.f32 %v6251_v31, %v6315_v60  ;;  %v3540_v44 = vpop.permute.xlu0 %3539  ;;  %2015 = vrot.lane.b32.xlu0 %v14618_v47, %s11900_s21  ;;  %v10619_v31 = vld [vmem:[%s11978_s18 + $0x4d9] sm:$0xff] }
 0x3be   : > { %6437 = vst.msk [vmem:[#allocation4 + $0x130] sm:$0xff] %vm5962_vm11, %v6363_v25  ;;  %v4055_v33 = vpop.permute.xlu1 %4054  ;;  %v10622_v25 = vld [vmem:[%s11978_s18 + $0x4f1] sm:$0xff]  ;;  %v10747_v21 = vld [vmem:[%s11978_s18 + $0x4da] sm:$0xff] }
 0x3bf   : > { %6436 = vst.msk [vmem:[#allocation4 + $0x128] sm:$0xff] %vm5962_vm11, %v6362_v18  ;;  %v10620_v18 = vld [vmem:[%s11978_s18 + $0x4e1] sm:$0xff]  ;;  %v14752_v45 = vpack.c.bf16 %v10622_v25, %v10621_v24 }
 0x3c0   : > { %3682 = vst.msk [vmem:[#allocation2 + $0x190] sm:$0xff] %vm3631_vm7, %v3540_v44  ;;  %2530 = vrot.lane.b32.xlu1 %v14636_v40, %s11901_s22  ;;  %v482_v44 = vld [vmem:[%s11978_s18 + $0x4c8] sm:$0xff]  ;;  %v14755_v49 = vpack.c.bf16 %v10620_v18, %v10619_v31 }
 0x3c1   : > { %4196 = vst.msk [vmem:[#allocation2 + $0x198] sm:$0xff] %vm4144_vm8, %v4055_v33  ;;  %v4053_v36 = vpop.permute.xlu0 %4052  ;;  %2528 = vrot.lane.b32.xlu0 %v14641_v12, %s11901_s22 }
 0x3c2   : > { %4195 = vst.msk [vmem:[#allocation2 + $0x190] sm:$0xff] %vm4144_vm8, %v4053_v36  ;;  %v977_v16 = vpop.permute.xlu1 %976  ;;  %v548_v36 = vpack.c.bf16 %v482_v44, %v481_v39  ;;  %v10496_v39 = vld [vmem:[%s11978_s18 + $0x508] sm:$0xff]  ;;  %v483_v44 = vld [vmem:[%s11978_s18 + $0x4d8] sm:$0xff] }
 0x3c3   : > { %1117 = vst.msk [vmem:[#allocation2 + $0x1a0] sm:$0xff] %vm1064_vm2, %v977_v16  ;;  %v14715_v54 = vpop.f32.mrb[72].mxu0  ;;  %v10750_v16 = vld [vmem:[%s11978_s18 + $0x4f2] sm:$0xff] }
 0x3c4   : > { %v14720_v38 = vpop.f32.mrb[73].mxu0  ;;  %3043 = vrot.lane.b32.xlu1 %v14676_v62, %s11902_s23  ;;  %613 = vst.msk [vmem:[#allocation2 + $0x1e8] sm:$0xff] %vm551_vm0, %v548_v36 }
 0x3c5   : > { %v6535_v5 = vld [vmem:[#allocation4 + $0x130] sm:$0xff]  ;;  %v4566_v15 = vpop.permute.xlu0 %4565  ;;  %3041 = vrot.lane.b32.xlu0 %v14662_v58, %s11902_s23  ;;  %v14732_v50 = vpop.f32.mrb[74].mxu0  ;;  %v5644_v24 = vmul.f32 %v14577_v53, %v14720_v38  ;;  %v10495_v38 = vld [vmem:[%s11978_s18 + $0x500] sm:$0xff] }
 0x3c6   : > { %v6918_v55 = vld [vmem:[#allocation4 + $0x131] sm:$0xff]  ;;  %v6534_v47 = vld [vmem:[#allocation4 + $0x128] sm:$0xff]  ;;  %4708 = vst.msk [vmem:[#allocation2 + $0x190] sm:$0xff] %vm4657_vm9, %v4566_v15  ;;  %v14742_v60 = vpop.f32.mrb[75].mxu0  ;;  %v979_v34 = vpop.permute.xlu1 %978  ;;  %v5647_v31 = vmul.f32 %v14577_v53, %v14732_v50  ;;  %v484_v50 = vld [vmem:[%s11978_s18 + $0x4e0] sm:$0xff] }
 0x3c7   : > { %v7237_v30 = vld [vmem:[#allocation4 + $0x131] sm:$0xff]  ;;  %v6917_v48 = vld [vmem:[#allocation4 + $0x129] sm:$0xff]  ;;  %v14710_v14 = vpack.c.bf16 %v6535_v5, %v6534_v47  ;;  %1118 = vst.msk [vmem:[#allocation2 + $0x1a8] sm:$0xff] %vm1064_vm2, %v979_v34 }
 0x3c8   : > { %v6725_v26 = vld [vmem:[#allocation4 + $0x127] sm:$0xff]  ;;  %v14712_v4 = vpack.c.bf16 %v6918_v55, %v6917_v48  ;;  %v6726_v35 = vld [vmem:[#allocation4 + $0x12f] sm:$0xff]  ;;  %3557 = vrot.lane.b32.xlu1 %v14724_v23, %s11903_s24 }
 0x3c9   : > { %v14717_v6 = vpack.c.bf16 %v6726_v35, %v6725_v26  ;;  %v7236_v37 = vld [vmem:[#allocation4 + $0x129] sm:$0xff]  ;;  %6893 = vst.msk [vmem:[#allocation5 + $0x150] sm:$0xff] %vm5962_vm11, %v14710_v14  ;;  %v4568_v33 = vpop.permute.xlu0 %4567  ;;  %3555 = vrot.lane.b32.xlu0 %v3369_v1, %s11903_s24 }
 0x3ca   : > { %6702 = vst.msk [vmem:[#allocation5 + $0x170] sm:$0xff] %vm5962_vm11, %v14712_v4  ;;  %v7261_v13 = vpack.c.bf16 %v7237_v30, %v7236_v37  ;;  %v1492_v3 = vpop.permute.xlu1 %1491  ;;  %v10748_v5 = vld [vmem:[%s11978_s18 + $0x4e2] sm:$0xff]  ;;  %v10749_v26 = vld [vmem:[%s11978_s18 + $0x4ea] sm:$0xff] }
 0x3cb   : > { %6509 = vst.msk [vmem:[#allocation5 + $0x168] sm:$0xff] %vm5962_vm11, %v14717_v6  ;;  %7085 = vst.msk [vmem:[#allocation5 + $0x130] sm:$0xff] %vm5962_vm11, %v14717_v6  ;;  %v14767_v47 = vpack.c.bf16 %v10748_v5, %v10747_v21  ;;  %v14778_v35 = vpack.c.bf16 %v10750_v16, %v10749_v26  ;;  %v5781_v21 = vadd.f32 %v14599_v19, %v5647_v31 }
 0x3cc   : > { %7277 = vst.msk [vmem:[#allocation5 + $0x138] sm:$0xff] %vm5962_vm11, %v7261_v13  ;;  %4070 = vrot.lane.b32.xlu1 %v14752_v45, %s11904_s29 }
 0x3cd   : > { %4709 = vst.msk [vmem:[#allocation2 + $0x198] sm:$0xff] %vm4657_vm9, %v4568_v33  ;;  %v1490_v55 = vpop.permute.xlu0 %1489  ;;  %v4772_v30 = vld [vmem:[#allocation2 + $0x190] sm:$0xff]  ;;  %4068 = vrot.lane.b32.xlu0 %v14755_v49, %s11904_s29  ;;  %v5778_v33 = vadd.f32 %v14599_v19, %v5644_v24  ;;  %v485_v24 = vld [vmem:[%s11978_s18 + $0x4e8] sm:$0xff] }
 0x3ce   : > { %1631 = vst.msk [vmem:[#allocation2 + $0x1a8] sm:$0xff] %vm1577_vm3, %v1492_v3  ;;  %1630 = vst.msk [vmem:[#allocation2 + $0x1a0] sm:$0xff] %vm1577_vm3, %v1490_v55  ;;  %11453 = vmatprep.mubr.msk.bf16.mxu0 %vm4822_vm10, %v4772_v30  ;;  %v2006_v48 = vpop.permute.xlu1 %2005  ;;  %v549_v3 = vpack.c.bf16 %v484_v50, %v483_v44 }
 0x3cf   : > { %2145 = vst.msk [vmem:[#allocation2 + $0x1a8] sm:$0xff] %vm2091_vm4, %v2006_v48  ;;  %v5906_v31 = vmax.f32 %v5778_v33, 0.0 }
 0x3d0   : > { %992 = vrot.lane.b32.xlu1 %v14641_v12, %s11899_s20  ;;  %614 = vst.msk [vmem:[#allocation2 + $0x1f0] sm:$0xff] %vm551_vm0, %v549_v3 }
 0x3d1   : > { %v2004_v56 = vpop.permute.xlu0 %2003  ;;  %4581 = vrot.lane.b32.xlu0 %v14767_v47, %s11905_s25 }
 0x3d2   : > { %2144 = vst.msk [vmem:[#allocation2 + $0x1a0] sm:$0xff] %vm2091_vm4, %v2004_v56  ;;  %v2519_v15 = vpop.permute.xlu1 %2518  ;;  %v14831_v56 = vpack.c.bf16 %v10496_v39, %v10495_v38 }
 0x3d3   : > { %2658 = vst.msk [vmem:[#allocation2 + $0x1a8] sm:$0xff] %vm2604_vm5, %v2519_v15  ;;  %v10626_v15 = vld [vmem:[%s11978_s18 + $0x519] sm:$0xff] }
 0x3d4   : > { %v4773_v20 = vld [vmem:[#allocation2 + $0x198] sm:$0xff]  ;;  %994 = vrot.lane.b32.xlu1 %v14636_v40, %s11899_s20 }
 0x3d5   : > { %11454 = vmatmul.mubr.msk.bf16.gmra.mrb[100].mxu0 %vm4822_vm10, %v4773_v20  ;;  %v2517_v27 = vpop.permute.xlu0 %2516  ;;  %4583 = vrot.lane.b32.xlu0 %v14778_v35, %s11905_s25  ;;  %v10625_v20 = vld [vmem:[%s11978_s18 + $0x511] sm:$0xff] }
 0x3d6   : > { %2657 = vst.msk [vmem:[#allocation2 + $0x1a0] sm:$0xff] %vm2604_vm5, %v2517_v27  ;;  %v3032_v37 = vpop.permute.xlu1 %3031  ;;  %v10623_v27 = vld [vmem:[%s11978_s18 + $0x501] sm:$0xff]  ;;  %v14849_v44 = vpack.c.bf16 %v10626_v15, %v10625_v20 }
 0x3d7   : > { %3171 = vst.msk [vmem:[#allocation2 + $0x1a8] sm:$0xff] %vm3117_vm6, %v3032_v37 }
 0x3d8   : > { %1507 = vrot.lane.b32.xlu1 %v14676_v62, %s11898_s19  ;;  %v5646_v62 = vmul.f32 %v14577_v53, %v14715_v54  ;;  %v5645_v54 = vmul.f32 %v14577_v53, %v14742_v60 }
 0x3d9   : > { %v3030_v12 = vpop.permute.xlu0 %3029  ;;  %1505 = vrot.lane.b32.xlu0 %v14662_v58, %s11898_s19 }
 0x3da   : > { %3170 = vst.msk [vmem:[#allocation2 + $0x1a0] sm:$0xff] %vm3117_vm6, %v3030_v12  ;;  %v3546_v13 = vpop.permute.xlu1 %3545  ;;  %v5780_v34 = vadd.f32 %v14599_v19, %v5646_v62  ;;  %v5779_v48 = vadd.f32 %v14599_v19, %v5645_v54 }
 0x3db   : > { %3685 = vst.msk [vmem:[#allocation2 + $0x1a8] sm:$0xff] %vm3631_vm7, %v3546_v13 }
 0x3dc   : > { %2021 = vrot.lane.b32.xlu1 %v14724_v23, %s11900_s21  ;;  %v10497_v23 = vld [vmem:[%s11978_s18 + $0x510] sm:$0xff]  ;;  %v5908_v37 = vmax.f32 %v5780_v34, 0.0  ;;  %v5907_v50 = vmax.f32 %v5779_v48, 0.0  ;;  %v6071_v48 = vsel %vm5962_vm11, %v5906_v31, -inf }
 0x3dd   : > { %v3544_v40 = vpop.permute.xlu0 %3543  ;;  %2019 = vrot.lane.b32.xlu0 %v3369_v1, %s11900_s21  ;;  %v10498_v1 = vld [vmem:[%s11978_s18 + $0x518] sm:$0xff] }
 0x3de   : > { %3684 = vst.msk [vmem:[#allocation2 + $0x1a0] sm:$0xff] %vm3631_vm7, %v3544_v40  ;;  %v4059_v58 = vpop.permute.xlu1 %4058  ;;  %v14825_v30 = vpack.c.bf16 %v10498_v1, %v10497_v23  ;;  %v6077_v3 = vsel %vm5962_vm11, %v5908_v37, -inf }
 0x3df   : > { %4198 = vst.msk [vmem:[#allocation2 + $0x1a8] sm:$0xff] %vm4144_vm8, %v4059_v58  ;;  %v10624_v58 = vld [vmem:[%s11978_s18 + $0x509] sm:$0xff] }
 0x3e0   : > { %2534 = vrot.lane.b32.xlu1 %v14752_v45, %s11901_s22 }
 0x3e1   : > { %v4057_v25 = vpop.permute.xlu0 %4056  ;;  %2532 = vrot.lane.b32.xlu0 %v14755_v49, %s11901_s22 }
 0x3e2   : > { %4197 = vst.msk [vmem:[#allocation2 + $0x1a0] sm:$0xff] %vm4144_vm8, %v4057_v25  ;;  %v981_v18 = vpop.permute.xlu1 %980  ;;  %v486_v25 = vld [vmem:[%s11978_s18 + $0x4f0] sm:$0xff] }
 0x3e3   : > { %1119 = vst.msk [vmem:[#allocation2 + $0x1b0] sm:$0xff] %vm1064_vm2, %v981_v18  ;;  %v550_v38 = vpack.c.bf16 %v486_v25, %v485_v24  ;;  %v5909_v18 = vmax.f32 %v5781_v21, 0.0 }
 0x3e4   : > { %3047 = vrot.lane.b32.xlu1 %v14778_v35, %s11902_s23 }
 0x3e5   : > { %v4570_v36 = vpop.permute.xlu0 %4569  ;;  %3045 = vrot.lane.b32.xlu0 %v14767_v47, %s11902_s23  ;;  %615 = vst.msk [vmem:[#allocation2 + $0x1f8] sm:$0xff] %vm551_vm0, %v550_v38  ;;  %v10754_v38 = vld [vmem:[%s11978_s18 + $0x51a] sm:$0xff] }
 0x3e6   : > { %4710 = vst.msk [vmem:[#allocation2 + $0x1a0] sm:$0xff] %vm4657_vm9, %v4570_v36  ;;  %v983_v62 = vpop.permute.xlu1 %982 }
 0x3e7   : > { %v11431_v60 = vpop.f32.mrb[76].mxu0  ;;  %1120 = vst.msk [vmem:[#allocation2 + $0x1b8] sm:$0xff] %vm1064_vm2, %v983_v62 }
 0x3e8   : > { %v5650_v5 = vmul.f32 %v14577_v53, %v11431_v60  ;;  %v5357_v55 = vpop.f32.mrb[77].mxu0  ;;  %3561 = vrot.lane.b32.xlu1 %v14825_v30, %s11903_s24  ;;  %v14854_v60 = vpack.c.bf16 %v10624_v58, %v10623_v27  ;;  %v6074_v58 = vsel %vm5962_vm11, %v5907_v50, -inf }
 0x3e9   : > { %v5648_v26 = vmul.f32 %v14577_v53, %v5357_v55  ;;  %v11432_v16 = vpop.f32.mrb[78].mxu0  ;;  %v4572_v1 = vpop.permute.xlu0 %4571  ;;  %3559 = vrot.lane.b32.xlu0 %v14831_v56, %s11903_s24 }
 0x3ea   : > { %v5784_v12 = vadd.f32 %v14599_v19, %v5650_v5  ;;  %v5651_v13 = vmul.f32 %v14577_v53, %v11432_v16  ;;  %v5360_v40 = vpop.f32.mrb[79].mxu0  ;;  %4711 = vst.msk [vmem:[#allocation2 + $0x1a8] sm:$0xff] %vm4657_vm9, %v4572_v1  ;;  %v1496_v55 = vpop.permute.xlu1 %1495  ;;  %v10752_v16 = vld [vmem:[%s11978_s18 + $0x50a] sm:$0xff]  ;;  %v10753_v1 = vld [vmem:[%s11978_s18 + $0x512] sm:$0xff] }
 0x3eb   : > { %v5782_v54 = vadd.f32 %v14599_v19, %v5648_v26  ;;  %v5649_v23 = vmul.f32 %v14577_v53, %v5360_v40  ;;  %v10751_v26 = vld [vmem:[%s11978_s18 + $0x502] sm:$0xff]  ;;  %1633 = vst.msk [vmem:[#allocation2 + $0x1b8] sm:$0xff] %vm1577_vm3, %v1496_v55  ;;  %v6080_v40 = vsel %vm5962_vm11, %v5909_v18, -inf }
 0x3ec   : > { %v5912_v34 = vmax.f32 %v5784_v12, 0.0  ;;  %v5785_v39 = vadd.f32 %v14599_v19, %v5651_v13  ;;  %4074 = vrot.lane.b32.xlu1 %v14849_v44, %s11904_s29  ;;  %v14875_v31 = vpack.c.bf16 %v10752_v16, %v10751_v26 }
 0x3ed   : > { %v5910_v33 = vmax.f32 %v5782_v54, 0.0  ;;  %v5783_v36 = vadd.f32 %v14599_v19, %v5649_v23  ;;  %v1494_v27 = vpop.permute.xlu0 %1493  ;;  %v4774_v13 = vld [vmem:[#allocation2 + $0x1a0] sm:$0xff]  ;;  %4072 = vrot.lane.b32.xlu0 %v14854_v60, %s11904_s29 }
 0x3ee   : > { %v6078_v21 = vsel %vm5962_vm11, %v5912_v34, -inf  ;;  %v5913_v5 = vmax.f32 %v5785_v39, 0.0  ;;  %1632 = vst.msk [vmem:[#allocation2 + $0x1b0] sm:$0xff] %vm1577_vm3, %v1494_v27  ;;  %11457 = vmatprep.mubr.msk.bf16.mxu0 %vm4822_vm10, %v4774_v13  ;;  %v2010_v23 = vpop.permute.xlu1 %2009  ;;  %v14889_v39 = vpack.c.bf16 %v10754_v38, %v10753_v1  ;;  %v11632_v27 = vld [vmem:[%s16462_s4 + $0x10] sm:$0xff]  }
 0x3ef   : > { %v6079_v20 = vmax.f32 %v6077_v3, %v6078_v21  ;;  %v6072_v15 = vsel %vm5962_vm11, %v5910_v33, -inf  ;;  %v5911_v12 = vmax.f32 %v5783_v36, 0.0  ;;  %2147 = vst.msk [vmem:[#allocation2 + $0x1b8] sm:$0xff] %vm2091_vm4, %v2010_v23  ;;  %v11627_v36 = vld [vmem:[%s16462_s4 + $0x40] sm:$0xff]  }
 0x3f0   : > { %v6073_v37 = vmax.f32 %v6071_v48, %v6072_v15  ;;  %v6081_v62 = vsel %vm5962_vm11, %v5913_v5, -inf  ;;  %996 = vrot.lane.b32.xlu1 %v14755_v49, %s11899_s20  ;;  %v11628_v49 = vld [vmem:[%s16462_s4] sm:$0xff]   ;;  %11099 = vmatprep.subr.bf16.mxu0 %v11627_v36  ;;  %v11630_v15 = vld [vmem:[%s16462_s4 + $0x8] sm:$0xff]  }
 0x3f1   : > { %6193 = vst.msk [vmem:[#allocation3 + $0x130] sm:$0xff] %vm5962_vm11, %v6079_v20  ;;  %v6082_v24 = vmax.f32 %v6080_v40, %v6081_v62  ;;  %v6075_v25 = vsel %vm5962_vm11, %v5911_v12, -inf  ;;  %v2008_v18 = vpop.permute.xlu0 %2007  ;;  %v4775_v34 = vld [vmem:[#allocation2 + $0x1a8] sm:$0xff]  ;;  %4585 = vrot.lane.b32.xlu0 %v14875_v31, %s11905_s25  ;;  %11521 = vmatprep.subr.bf16.mxu1 %v11627_v36 }
 0x3f2   : > { %6191 = vst.msk [vmem:[#allocation3 + $0x120] sm:$0xff] %vm5962_vm11, %v6073_v37  ;;  %v6076_v54 = vmax.f32 %v6074_v58, %v6075_v25  ;;  %11458 = vmatmul.mubr.msk.bf16.gmra.mrb[104].mxu0 %vm4822_vm10, %v4775_v34  ;;  %v2523_v50 = vpop.permute.xlu1 %2522  ;;  %11529 = vmatpush3.bf16.msra.mxu1 %v11628_v49  ;;  %v11629_v20 = vld [vmem:[%s16462_s4 + $0x48] sm:$0xff]   ;;  %v10501_v37 = vld [vmem:[%s11978_s18 + $0x538] sm:$0xff]  ;;  %v10500_v58 = vld [vmem:[%s11978_s18 + $0x530] sm:$0xff] }
 0x3f3   : > { %6194 = vst.msk [vmem:[#allocation3 + $0x138] sm:$0xff] %vm5962_vm11, %v6082_v24  ;;  %11100 = vmatpush3.bf16.msra.mxu0 %v11628_v49  ;;  %11522 = vmatprep.subr.bf16.mxu1 %v11629_v20  ;;  %v10499_v62 = vld [vmem:[%s11978_s18 + $0x528] sm:$0xff]  ;;  %v11634_v24 = vld [vmem:[%s16462_s4 + $0x18] sm:$0xff]  }
 0x3f4   : > { %6192 = vst.msk [vmem:[#allocation3 + $0x128] sm:$0xff] %vm5962_vm11, %v6076_v54  ;;  %998 = vrot.lane.b32.xlu1 %v14752_v45, %s11899_s20  ;;  %11101 = vmatprep.subr.bf16.mxu0 %v11629_v20  ;;  %v11636_v20 = vld [vmem:[%s16462_s4 + $0x20] sm:$0xff]  }
 0x3f5   : > { %2146 = vst.msk [vmem:[#allocation2 + $0x1b0] sm:$0xff] %vm2091_vm4, %v2008_v18  ;;  %v2521_v33 = vpop.permute.xlu0 %2520  ;;  %4587 = vrot.lane.b32.xlu0 %v14889_v39, %s11905_s25 }
 0x3f6   : > { %2660 = vst.msk [vmem:[#allocation2 + $0x1b8] sm:$0xff] %vm2604_vm5, %v2523_v50  ;;  %2659 = vst.msk [vmem:[#allocation2 + $0x1b0] sm:$0xff] %vm2604_vm5, %v2521_v33  ;;  %v3036_v5 = vpop.permute.xlu1 %3035  ;;  %11530 = vmatpush3.bf16.msra.mxu1 %v11630_v15 }
 0x3f7   : > { %3173 = vst.msk [vmem:[#allocation2 + $0x1b8] sm:$0xff] %vm3117_vm6, %v3036_v5  ;;  %11102 = vmatpush3.bf16.msra.mxu0 %v11630_v15  ;;  %v6645_v15 = vld [vmem:[#allocation4 + $0x9] sm:$0xff] }
 0x3f8   : > { %1511 = vrot.lane.b32.xlu1 %v14778_v35, %s11898_s19 }
 0x3f9   : > { %v3034_v45 = vpop.permute.xlu0 %3033  ;;  %1509 = vrot.lane.b32.xlu0 %v14767_v47, %s11898_s19  ;;  %v11631_v47 = vld [vmem:[%s16462_s4 + $0x50] sm:$0xff]   ;;  %s357_s19 = scalar_lea.vmem %s16468_s10, %s9990_s30 }
 0x3fa   : > { %v6257_v3 = vld [vmem:[#allocation3 + $0x130] ss:$2 sm:$0xff]  ;;  %v6321_v21 = vld [vmem:[#allocation3 + $0x131] ss:$2 sm:$0xff]  ;;  %3172 = vst.msk [vmem:[#allocation2 + $0x1b0] sm:$0xff] %vm3117_vm6, %v3034_v45  ;;  %v3550_v12 = vpop.permute.xlu1 %3549  ;;  %11103 = vmatprep.subr.bf16.mxu0 %v11631_v47  ;;  %11523 = vmatprep.subr.bf16.mxu1 %v11631_v47 }
 0x3fb   : > { %v6365_v55 = vmax.f32 %v6257_v3, %v6321_v21  ;;  %v6255_v26 = vld [vmem:[#allocation3 + $0x120] ss:$2 sm:$0xff]  ;;  %v6319_v16 = vld [vmem:[#allocation3 + $0x121] ss:$2 sm:$0xff]  ;;  %3687 = vst.msk [vmem:[#allocation2 + $0x1b8] sm:$0xff] %vm3631_vm7, %v3550_v12  ;;  %11104 = vmatpush3.bf16.msra.mxu0 %v11632_v27  ;;  %11531 = vmatpush3.bf16.msra.mxu1 %v11632_v27  ;;  %v6646_v12 = vld [vmem:[#allocation4 + $0x11] sm:$0xff] }
 0x3fc   : > { %v6364_v48 = vmax.f32 %v6255_v26, %v6319_v16  ;;  %2025 = vrot.lane.b32.xlu1 %v14825_v30, %s11900_s21  ;;  %v10502_v30 = vld [vmem:[%s11978_s18 + $0x540] sm:$0xff]  ;;  %v10628_v27 = vld [vmem:[%s11978_s18 + $0x531] sm:$0xff] }
 0x3fd   : > { %6439 = vst.msk [vmem:[#allocation4 + $0x150] sm:$0xff] %vm5962_vm11, %v6365_v55  ;;  %v3548_v35 = vpop.permute.xlu0 %3547  ;;  %2023 = vrot.lane.b32.xlu0 %v14831_v56, %s11900_s21  ;;  %v11633_v56 = vld [vmem:[%s16462_s4 + $0x58] sm:$0xff]   ;;  %v3374_v5 = vpack.c.bf16 %v10502_v30, %v10501_v37  ;;  %v10630_v26 = vld [vmem:[%s11978_s18 + $0x541] sm:$0xff] }
 0x3fe   : > { %6438 = vst.msk [vmem:[#allocation4 + $0x148] sm:$0xff] %vm5962_vm11, %v6364_v48  ;;  %v4063_v13 = vpop.permute.xlu1 %4062  ;;  %11105 = vmatprep.subr.bf16.mxu0 %v11633_v56  ;;  %11524 = vmatprep.subr.bf16.mxu1 %v11633_v56  ;;  %v10629_v55 = vld [vmem:[%s11978_s18 + $0x539] sm:$0xff]  ;;  %v3373_v48 = vpack.c.bf16 %v10500_v58, %v10499_v62  ;;  %v11637_v62 = vld [vmem:[%s16462_s4 + $0x68] sm:$0xff]  }
 0x3ff   : > { %3686 = vst.msk [vmem:[#allocation2 + $0x1b0] sm:$0xff] %vm3631_vm7, %v3548_v35  ;;  %11106 = vmatpush3.bf16.msra.mxu0 %v11634_v24  ;;  %11532 = vmatpush3.bf16.msra.mxu1 %v11634_v24  ;;  %v11635_v16 = vld [vmem:[%s16462_s4 + $0x60] sm:$0xff]   ;;  %v3887_v37 = vpack.c.bf16 %v10630_v26, %v10629_v55  ;;  %v10755_v24 = vld [vmem:[%s11978_s18 + $0x52a] sm:$0xff] }
 0x400   : > { %4200 = vst.msk [vmem:[#allocation2 + $0x1b8] sm:$0xff] %vm4144_vm8, %v4063_v13  ;;  %2538 = vrot.lane.b32.xlu1 %v14849_v44, %s11901_s22  ;;  %11107 = vmatprep.subr.bf16.mxu0 %v11635_v16  ;;  %v6677_v13 = vpack.c.bf16 %v6646_v12, %v6645_v15  ;;  %v10757_v30 = vld [vmem:[%s11978_s18 + $0x53a] sm:$0xff]  ;;  %v10758_v56 = vld [vmem:[%s11978_s18 + $0x542] sm:$0xff]  ;;  %v6517_v26 = vld [vmem:[#allocation4 + $0x10] sm:$0xff] }
 0x401   : > { %v4061_v40 = vpop.permute.xlu0 %4060  ;;  %2536 = vrot.lane.b32.xlu0 %v14854_v60, %s11901_s22  ;;  %11525 = vmatprep.subr.bf16.mxu1 %v11635_v16  ;;  %v6516_v55 = vld [vmem:[#allocation4 + $0x8] sm:$0xff]  ;;  %v11640_v16 = vld [vmem:[%s16462_s4 + $0x30] sm:$0xff]   ;;  %v11641_v12 = vld [vmem:[%s16462_s4 + $0x78] sm:$0xff]  }
 0x402   : > { %4199 = vst.msk [vmem:[#allocation2 + $0x1b0] sm:$0xff] %vm4144_vm8, %v4061_v40  ;;  %v985_v38 = vpop.permute.xlu1 %984  ;;  %v6548_v15 = vpack.c.bf16 %v6517_v26, %v6516_v55 }
 0x403   : > { %1121 = vst.msk [vmem:[#allocation2 + $0x1c0] sm:$0xff] %vm1064_vm2, %v985_v38  ;;  %v14950_v49 = vpop.f32.mrb[80].mxu0  ;;  %11108 = vmatpush3.bf16.msra.mxu0 %v11636_v20  ;;  %11533 = vmatpush3.bf16.msra.mxu1 %v11636_v20  ;;  %v6453_v38 = vld [vmem:[#allocation4 + $0xf] sm:$0xff] }
 0x404   : > { %v6537_v25 = vld [vmem:[#allocation4 + $0x150] sm:$0xff]  ;;  %v14955_v21 = vpop.f32.mrb[81].mxu0  ;;  %3051 = vrot.lane.b32.xlu1 %v14889_v39, %s11902_s23  ;;  %6693 = vst.msk [vmem:[#allocation5 + $0x8] sm:$0xff] %vm5962_vm11, %v6677_v13  ;;  %11109 = vmatprep.subr.bf16.mxu0 %v11637_v62  ;;  %v6518_v13 = vld [vmem:[#allocation4 + $0x28] sm:$0xff] }
 0x405   : > { %v6536_v54 = vld [vmem:[#allocation4 + $0x148] sm:$0xff]  ;;  %v6920_v1 = vld [vmem:[#allocation4 + $0x151] sm:$0xff]  ;;  %v4574_v36 = vpop.permute.xlu0 %4573  ;;  %3049 = vrot.lane.b32.xlu0 %v14875_v31, %s11902_s23  ;;  %v14970_v39 = vpop.f32.mrb[82].mxu0  ;;  %11526 = vmatprep.subr.bf16.mxu1 %v11637_v62 }
 0x406   : > { %v6919_v23 = vld [vmem:[#allocation4 + $0x149] sm:$0xff]  ;;  %v14945_v44 = vpack.c.bf16 %v6537_v25, %v6536_v54  ;;  %v7239_v3 = vld [vmem:[#allocation4 + $0x151] sm:$0xff]  ;;  %4712 = vst.msk [vmem:[#allocation2 + $0x1b0] sm:$0xff] %vm4657_vm9, %v4574_v36  ;;  %v14979_v35 = vpop.f32.mrb[83].mxu0  ;;  %v987_v47 = vpop.permute.xlu1 %986  ;;  %v4400_v36 = vpack.c.bf16 %v10758_v56, %v10757_v30 }
 0x407   : > { %v14947_v18 = vpack.c.bf16 %v6920_v1, %v6919_v23  ;;  %v6727_v34 = vld [vmem:[#allocation4 + $0x147] sm:$0xff]  ;;  %v6728_v50 = vld [vmem:[#allocation4 + $0x14f] sm:$0xff]  ;;  %1122 = vst.msk [vmem:[#allocation2 + $0x1c8] sm:$0xff] %vm1064_vm2, %v987_v47  ;;  %v11642_v47 = vld [vmem:[%s16462_s4 + $0x38] sm:$0xff]  }
 0x408   : > { %v7238_v33 = vld [vmem:[#allocation4 + $0x149] sm:$0xff]  ;;  %v14952_v60 = vpack.c.bf16 %v6728_v50, %v6727_v34  ;;  %6894 = vst.msk [vmem:[#allocation5 + $0x178] sm:$0xff] %vm5962_vm11, %v14945_v44  ;;  %3565 = vrot.lane.b32.xlu1 %v3374_v5, %s11903_s24  ;;  %v10756_v23 = vld [vmem:[%s11978_s18 + $0x532] sm:$0xff] }
 0x409   : > { %6703 = vst.msk [vmem:[#allocation5 + $0x198] sm:$0xff] %vm5962_vm11, %v14947_v18  ;;  %v7262_v45 = vpack.c.bf16 %v7239_v3, %v7238_v33  ;;  %v10627_v31 = vld [vmem:[%s11978_s18 + $0x529] sm:$0xff]  ;;  %v4576_v40 = vpop.permute.xlu0 %4575  ;;  %3563 = vrot.lane.b32.xlu0 %v3373_v48, %s11903_s24  ;;  %v4399_v5 = vpack.c.bf16 %v10756_v23, %v10755_v24 }
 0x40a   : > { %6510 = vst.msk [vmem:[#allocation5 + $0x190] sm:$0xff] %vm5962_vm11, %v14952_v60  ;;  %7086 = vst.msk [vmem:[#allocation5 + $0x158] sm:$0xff] %vm5962_vm11, %v14952_v60  ;;  %v3886_v58 = vpack.c.bf16 %v10628_v27, %v10627_v31  ;;  %v11638_v25 = vld [vmem:[%s16462_s4 + $0x28] sm:$0xff]   ;;  %v1500_v54 = vpop.permute.xlu1 %1499  ;;  %v11639_v3 = vld [vmem:[%s16462_s4 + $0x70] sm:$0xff]  }
 0x40b   : > { %7278 = vst.msk [vmem:[#allocation5 + $0x160] sm:$0xff] %vm5962_vm11, %v7262_v45  ;;  %v6452_v1 = vld [vmem:[#allocation4 + $0x7] sm:$0xff]  ;;  %11110 = vmatpush3.bf16.msra.mxu0 %v11638_v25  ;;  %11534 = vmatpush3.bf16.msra.mxu1 %v11638_v25  ;;  %v15039_v25 = vld [vmem:[%s16460_s2] ss:$0 sm:$0xff] }
 0x40c   : > { %4713 = vst.msk [vmem:[#allocation2 + $0x1b8] sm:$0xff] %vm4657_vm9, %v4576_v40  ;;  %v6484_v33 = vpack.c.bf16 %v6453_v38, %v6452_v1  ;;  %4078 = vrot.lane.b32.xlu1 %v3887_v37, %s11904_s29  ;;  %11111 = vmatprep.subr.bf16.mxu0 %v11639_v3  ;;  %v6519_v40 = vld [vmem:[#allocation4 + $0x30] sm:$0xff]  ;;  %v5655_v23 = vmul.f32 %v15039_v25, %v14970_v39 }
 0x40d   : > { %1635 = vst.msk [vmem:[#allocation2 + $0x1c8] sm:$0xff] %vm1577_vm3, %v1500_v54  ;;  %v1498_v34 = vpop.permute.xlu0 %1497  ;;  %v4776_v50 = vld [vmem:[#allocation2 + $0x1b0] sm:$0xff]  ;;  %4076 = vrot.lane.b32.xlu0 %v3886_v58, %s11904_s29  ;;  %11527 = vmatprep.subr.bf16.mxu1 %v11639_v3  ;;  %v6549_v30 = vpack.c.bf16 %v6519_v40, %v6518_v13  ;;  %v5652_v54 = vmul.f32 %v15039_v25, %v14955_v21 }
 0x40e   : > { %1634 = vst.msk [vmem:[#allocation2 + $0x1c0] sm:$0xff] %vm1577_vm3, %v1498_v34  ;;  %11461 = vmatprep.mubr.msk.bf16.mxu0 %vm4822_vm10, %v4776_v50  ;;  %v2014_v45 = vpop.permute.xlu1 %2013  ;;  %v5789_v50 = vadd.f32 %v14599_v19, %v5655_v23 }
 0x40f   : > { %6500 = vst.msk [vmem:[#allocation5] sm:$0xff] %vm5962_vm11, %v6484_v33  ;;  %11112 = vmatpush3.bf16.msra.mxu0 %v11640_v16  ;;  %11535 = vmatpush3.bf16.msra.mxu1 %v11640_v16  ;;  %v5786_v38 = vadd.f32 %v14599_v19, %v5652_v54 }
 0x410   : > { %2149 = vst.msk [vmem:[#allocation2 + $0x1c8] sm:$0xff] %vm2091_vm4, %v2014_v45  ;;  %4591 = vrot.lane.b32.xlu1 %v4400_v36, %s11905_s25  ;;  %11113 = vmatprep.subr.bf16.mxu0 %v11641_v12 }
 0x411   : > { %v2012_v48 = vpop.permute.xlu0 %2011  ;;  %4589 = vrot.lane.b32.xlu0 %v4399_v5, %s11905_s25  ;;  %11528 = vmatprep.subr.bf16.mxu1 %v11641_v12 }
 0x412   : > { %2148 = vst.msk [vmem:[#allocation2 + $0x1c0] sm:$0xff] %vm2091_vm4, %v2012_v48  ;;  %v2527_v31 = vpop.permute.xlu1 %2526  ;;  %v5914_v48 = vmax.f32 %v5786_v38, 0.0 }
 0x413   : > { %v4777_v20 = vld [vmem:[#allocation2 + $0x1b8] sm:$0xff]  ;;  %2662 = vst.msk [vmem:[#allocation2 + $0x1c8] sm:$0xff] %vm2604_vm5, %v2527_v31  ;;  %11114 = vmatpush3.bf16.msra.mxu0 %v11642_v47  ;;  %11536 = vmatpush3.bf16.msra.mxu1 %v11642_v47  ;;  %v5917_v47 = vmax.f32 %v5789_v50, 0.0 }
 0x414   : > { %11462 = vmatmul.mubr.msk.bf16.gmra.mrb[108].mxu0 %vm4822_vm10, %v4777_v20  ;;  %6580 = vrot.lane.b32.xlu1 %v6548_v15, %s11905_s25 }
 0x415   : > { %v2525_v27 = vpop.permute.xlu0 %2524  ;;  %6773 = vrot.lane.b32.xlu0 %v12992_v8, %s11905_s25  ;;  %v5654_v8 = vmul.f32 %v14577_v53, %v14950_v49  ;;  %v5653_v53 = vmul.f32 %v15039_v25, %v14979_v35  ;;  %v15058_v35 = vld [vmem:[%s16461_s3] ss:$0 sm:$0xff] }
 0x416   : > { %2661 = vst.msk [vmem:[#allocation2 + $0x1c0] sm:$0xff] %vm2604_vm5, %v2525_v27  ;;  %v3040_v37 = vpop.permute.xlu1 %3039 }
 0x417   : > { %3175 = vst.msk [vmem:[#allocation2 + $0x1c8] sm:$0xff] %vm3117_vm6, %v3040_v37  ;;  %v5788_v49 = vadd.f32 %v14599_v19, %v5654_v8  ;;  %v5787_v36 = vadd.f32 %v15058_v35, %v5653_v53  ;;  %v6083_v8 = vsel %vm5962_vm11, %v5914_v48, -inf }
 0x418   : > { %6582 = vrot.lane.b32.xlu1 %v6549_v30, %s11905_s25 }
 0x419   : > { %v3038_v62 = vpop.permute.xlu0 %3037  ;;  %6775 = vrot.lane.b32.xlu0 %v13199_v42, %s11905_s25  ;;  %v5916_v55 = vmax.f32 %v5788_v49, 0.0  ;;  %v5915_v13 = vmax.f32 %v5787_v36, 0.0  ;;  %v6092_v49 = vsel %vm5962_vm11, %v5917_v47, -inf }
 0x41a   : > { %3174 = vst.msk [vmem:[#allocation2 + $0x1c0] sm:$0xff] %vm3117_vm6, %v3038_v62  ;;  %v3554_v58 = vpop.permute.xlu1 %3553 }
 0x41b   : > { %3689 = vst.msk [vmem:[#allocation2 + $0x1c8] sm:$0xff] %vm3631_vm7, %v3554_v58  ;;  %v6089_v30 = vsel %vm5962_vm11, %v5916_v55, -inf }
 0x41d   : > { %v3552_v56 = vpop.permute.xlu0 %3551 }
 0x41e   : > { %3688 = vst.msk [vmem:[#allocation2 + $0x1c0] sm:$0xff] %vm3631_vm7, %v3552_v56  ;;  %v4067_v24 = vpop.permute.xlu1 %4066 }
 0x41f   : > { %4202 = vst.msk [vmem:[#allocation2 + $0x1c8] sm:$0xff] %vm4144_vm8, %v4067_v24 }
 0x421   : > { %v4065_v42 = vpop.permute.xlu0 %4064 }
 0x422   : > { %4201 = vst.msk [vmem:[#allocation2 + $0x1c0] sm:$0xff] %vm4144_vm8, %v4065_v42  ;;  %v989_v1 = vpop.permute.xlu1 %988 }
 0x423   : > { %1123 = vst.msk [vmem:[#allocation2 + $0x1d0] sm:$0xff] %vm1064_vm2, %v989_v1 }
 0x425   : > { %v4578_v34 = vpop.permute.xlu0 %4577 }
 0x426   : > { %4714 = vst.msk [vmem:[#allocation2 + $0x1c0] sm:$0xff] %vm4657_vm9, %v4578_v34  ;;  %v991_v45 = vpop.permute.xlu1 %990  ;;  %v6086_v34 = vsel %vm5962_vm11, %v5915_v13, -inf }
 0x427   : > { %v11439_v21 = vpop.f32.mrb[84].mxu0  ;;  %1124 = vst.msk [vmem:[#allocation2 + $0x1d8] sm:$0xff] %vm1064_vm2, %v991_v45 }
 0x428   : > { %v5658_v39 = vmul.f32 %v15039_v25, %v11439_v21  ;;  %v5389_v33 = vpop.f32.mrb[85].mxu0 }
 0x429   : > { %v5656_v3 = vmul.f32 %v15039_v25, %v5389_v33  ;;  %v11440_v5 = vpop.f32.mrb[86].mxu0  ;;  %v4580_v12 = vpop.permute.xlu0 %4579 }
 0x42a   : > { %v5792_v26 = vadd.f32 %v15058_v35, %v5658_v39  ;;  %v5659_v19 = vmul.f32 %v15039_v25, %v11440_v5  ;;  %v5392_v16 = vpop.f32.mrb[87].mxu0  ;;  %4715 = vst.msk [vmem:[#allocation2 + $0x1c8] sm:$0xff] %vm4657_vm9, %v4580_v12  ;;  %v1504_v56 = vpop.permute.xlu1 %1503 }
 0x42b   : > { %v5790_v20 = vadd.f32 %v15058_v35, %v5656_v3  ;;  %v5657_v15 = vmul.f32 %v15039_v25, %v5392_v16  ;;  %1637 = vst.msk [vmem:[#allocation2 + $0x1d8] sm:$0xff] %vm1577_vm3, %v1504_v56 }
 0x42c   : > { %v5920_v31 = vmax.f32 %v5792_v26, 0.0  ;;  %v5793_v27 = vadd.f32 %v15058_v35, %v5659_v19 }
 0x42d   : > { %v5918_v40 = vmax.f32 %v5790_v20, 0.0  ;;  %v5791_v37 = vadd.f32 %v15058_v35, %v5657_v15  ;;  %v1502_v23 = vpop.permute.xlu0 %1501  ;;  %v4778_v53 = vld [vmem:[#allocation2 + $0x1c0] sm:$0xff] }
 0x42e   : > { %v6090_v62 = vsel %vm5962_vm11, %v5920_v31, -inf  ;;  %v5921_v58 = vmax.f32 %v5793_v27, 0.0  ;;  %1636 = vst.msk [vmem:[#allocation2 + $0x1d0] sm:$0xff] %vm1577_vm3, %v1502_v23  ;;  %11465 = vmatprep.mubr.msk.bf16.mxu0 %vm4822_vm10, %v4778_v53  ;;  %v2018_v33 = vpop.permute.xlu1 %2017 }
 0x42f   : > { %v6091_v24 = vmax.f32 %v6089_v30, %v6090_v62  ;;  %v6084_v54 = vsel %vm5962_vm11, %v5918_v40, -inf  ;;  %v5919_v42 = vmax.f32 %v5791_v37, 0.0  ;;  %2151 = vst.msk [vmem:[#allocation2 + $0x1d8] sm:$0xff] %vm2091_vm4, %v2018_v33 }
 0x430   : > { %v6085_v1 = vmax.f32 %v6083_v8, %v6084_v54  ;;  %v6093_v38 = vsel %vm5962_vm11, %v5921_v58, -inf }
 0x431   : > { %6197 = vst.msk [vmem:[#allocation3 + $0x150] sm:$0xff] %vm5962_vm11, %v6091_v24  ;;  %v6094_v21 = vmax.f32 %v6092_v49, %v6093_v38  ;;  %v6087_v50 = vsel %vm5962_vm11, %v5919_v42, -inf  ;;  %v2016_v36 = vpop.permute.xlu0 %2015  ;;  %v4779_v3 = vld [vmem:[#allocation2 + $0x1c8] sm:$0xff] }
 0x432   : > { %6195 = vst.msk [vmem:[#allocation3 + $0x140] sm:$0xff] %vm5962_vm11, %v6085_v1  ;;  %v6088_v39 = vmax.f32 %v6086_v34, %v6087_v50  ;;  %11466 = vmatmul.mubr.msk.bf16.gmra.mrb[112].mxu0 %vm4822_vm10, %v4779_v3  ;;  %v2531_v5 = vpop.permute.xlu1 %2530 }
 0x433   : > { %6198 = vst.msk [vmem:[#allocation3 + $0x158] sm:$0xff] %vm5962_vm11, %v6094_v21 }
 0x434   : > { %6196 = vst.msk [vmem:[#allocation3 + $0x148] sm:$0xff] %vm5962_vm11, %v6088_v39 }
 0x435   : > { %2150 = vst.msk [vmem:[#allocation2 + $0x1d0] sm:$0xff] %vm2091_vm4, %v2016_v36  ;;  %v2529_v55 = vpop.permute.xlu0 %2528 }
 0x436   : > { %2664 = vst.msk [vmem:[#allocation2 + $0x1d8] sm:$0xff] %vm2604_vm5, %v2531_v5  ;;  %2663 = vst.msk [vmem:[#allocation2 + $0x1d0] sm:$0xff] %vm2604_vm5, %v2529_v55  ;;  %v3044_v16 = vpop.permute.xlu1 %3043 }
 0x437   : > { %3177 = vst.msk [vmem:[#allocation2 + $0x1d8] sm:$0xff] %vm3117_vm6, %v3044_v16 }
 0x439   : > { %v3042_v15 = vpop.permute.xlu0 %3041 }
 0x43a   : > { %v6261_v26 = vld [vmem:[#allocation3 + $0x150] ss:$2 sm:$0xff]  ;;  %v6325_v19 = vld [vmem:[#allocation3 + $0x151] ss:$2 sm:$0xff]  ;;  %3176 = vst.msk [vmem:[#allocation2 + $0x1d0] sm:$0xff] %vm3117_vm6, %v3042_v15  ;;  %v3558_v47 = vpop.permute.xlu1 %3557 }
 0x43b   : > { %v6367_v45 = vmax.f32 %v6261_v26, %v6325_v19  ;;  %v6259_v48 = vld [vmem:[#allocation3 + $0x140] ss:$2 sm:$0xff]  ;;  %v6323_v20 = vld [vmem:[#allocation3 + $0x141] ss:$2 sm:$0xff]  ;;  %3691 = vst.msk [vmem:[#allocation2 + $0x1d8] sm:$0xff] %vm3631_vm7, %v3558_v47 }
 0x43c   : > { %v6366_v12 = vmax.f32 %v6259_v48, %v6323_v20 }
 0x43d   : > { %6441 = vst.msk [vmem:[#allocation4 + $0x170] sm:$0xff] %vm5962_vm11, %v6367_v45  ;;  %v3556_v31 = vpop.permute.xlu0 %3555 }
 0x43e   : > { %6440 = vst.msk [vmem:[#allocation4 + $0x168] sm:$0xff] %vm5962_vm11, %v6366_v12  ;;  %v4071_v27 = vpop.permute.xlu1 %4070 }
 0x43f   : > { %3690 = vst.msk [vmem:[#allocation2 + $0x1d0] sm:$0xff] %vm3631_vm7, %v3556_v31 }
 0x440   : > { %4204 = vst.msk [vmem:[#allocation2 + $0x1d8] sm:$0xff] %vm4144_vm8, %v4071_v27 }
 0x441   : > { %v4069_v13 = vpop.permute.xlu0 %4068 }
 0x442   : > { %4203 = vst.msk [vmem:[#allocation2 + $0x1d0] sm:$0xff] %vm4144_vm8, %v4069_v13  ;;  %v993_v8 = vpop.permute.xlu1 %992 }
 0x443   : > { %1125 = vst.msk [vmem:[#allocation2 + $0x1e0] sm:$0xff] %vm1064_vm2, %v993_v8  ;;  %v11443_v49 = vpop.f32.mrb[88].mxu0 }
 0x444   : > { %v6539_v40 = vld [vmem:[#allocation4 + $0x170] sm:$0xff]  ;;  %v5405_v34 = vpop.f32.mrb[89].mxu0  ;;  %v5662_v47 = vmul.f32 %v15039_v25, %v11443_v49 }
 0x445   : > { %v6922_v37 = vld [vmem:[#allocation4 + $0x171] sm:$0xff]  ;;  %v6538_v62 = vld [vmem:[#allocation4 + $0x168] sm:$0xff]  ;;  %v4582_v53 = vpop.permute.xlu0 %4581  ;;  %v11444_v21 = vpop.f32.mrb[90].mxu0  ;;  %v5660_v27 = vmul.f32 %v15039_v25, %v5405_v34 }
 0x446   : > { %v7241_v30 = vld [vmem:[#allocation4 + $0x171] sm:$0xff]  ;;  %v6921_v58 = vld [vmem:[#allocation4 + $0x169] sm:$0xff]  ;;  %v15098_v24 = vpack.c.bf16 %v6539_v40, %v6538_v62  ;;  %4716 = vst.msk [vmem:[#allocation2 + $0x1d0] sm:$0xff] %vm4657_vm9, %v4582_v53  ;;  %v5408_v50 = vpop.f32.mrb[91].mxu0  ;;  %v995_v39 = vpop.permute.xlu1 %994  ;;  %v5663_v40 = vmul.f32 %v15039_v25, %v11444_v21 }
 0x447   : > { %v6729_v56 = vld [vmem:[#allocation4 + $0x167] sm:$0xff]  ;;  %v15100_v54 = vpack.c.bf16 %v6922_v37, %v6921_v58  ;;  %v6730_v42 = vld [vmem:[#allocation4 + $0x16f] sm:$0xff]  ;;  %1126 = vst.msk [vmem:[#allocation2 + $0x1e8] sm:$0xff] %vm1064_vm2, %v995_v39  ;;  %v5661_v37 = vmul.f32 %v15039_v25, %v5408_v50  ;;  %v5794_v58 = vadd.f32 %v15058_v35, %v5660_v27 }
 0x448   : > { %v7240_v23 = vld [vmem:[#allocation4 + $0x169] sm:$0xff]  ;;  %v15103_v1 = vpack.c.bf16 %v6730_v42, %v6729_v56  ;;  %6895 = vst.msk [vmem:[#allocation5 + $0x1a0] sm:$0xff] %vm5962_vm11, %v15098_v24  ;;  %v5797_v42 = vadd.f32 %v15058_v35, %v5663_v40 }
 0x449   : > { %v7263_v38 = vpack.c.bf16 %v7241_v30, %v7240_v23  ;;  %6704 = vst.msk [vmem:[#allocation5 + $0x1c0] sm:$0xff] %vm5962_vm11, %v15100_v54  ;;  %v4584_v33 = vpop.permute.xlu0 %4583  ;;  %v5796_v30 = vadd.f32 %v15058_v35, %v5662_v47  ;;  %v5795_v49 = vadd.f32 %v15058_v35, %v5661_v37 }
 0x44a   : > { %6511 = vst.msk [vmem:[#allocation5 + $0x1b8] sm:$0xff] %vm5962_vm11, %v15103_v1  ;;  %7087 = vst.msk [vmem:[#allocation5 + $0x180] sm:$0xff] %vm5962_vm11, %v15103_v1  ;;  %v1508_v36 = vpop.permute.xlu1 %1507 }
 0x44b   : > { %7279 = vst.msk [vmem:[#allocation5 + $0x188] sm:$0xff] %vm5962_vm11, %v7263_v38  ;;  %v5924_v21 = vmax.f32 %v5796_v30, 0.0 }
 0x44c   : > { %4717 = vst.msk [vmem:[#allocation2 + $0x1d8] sm:$0xff] %vm4657_vm9, %v4584_v33 }
 0x44d   : > { %1639 = vst.msk [vmem:[#allocation2 + $0x1e8] sm:$0xff] %vm1577_vm3, %v1508_v36  ;;  %v1506_v3 = vpop.permute.xlu0 %1505  ;;  %v4780_v5 = vld [vmem:[#allocation2 + $0x1d0] sm:$0xff] }
 0x44e   : > { %1638 = vst.msk [vmem:[#allocation2 + $0x1e0] sm:$0xff] %vm1577_vm3, %v1506_v3  ;;  %11469 = vmatprep.mubr.msk.bf16.mxu0 %vm4822_vm10, %v4780_v5  ;;  %v2022_v55 = vpop.permute.xlu1 %2021  ;;  %v5922_v3 = vmax.f32 %v5794_v58, 0.0 }
 0x44f   : > { %2153 = vst.msk [vmem:[#allocation2 + $0x1e8] sm:$0xff] %vm2091_vm4, %v2022_v55 }
 0x451   : > { %v2020_v26 = vpop.permute.xlu0 %2019 }
 0x452   : > { %2152 = vst.msk [vmem:[#allocation2 + $0x1e0] sm:$0xff] %vm2091_vm4, %v2020_v26  ;;  %v2535_v16 = vpop.permute.xlu1 %2534 }
 0x453   : > { %v4781_v19 = vld [vmem:[#allocation2 + $0x1d8] sm:$0xff]  ;;  %2666 = vst.msk [vmem:[#allocation2 + $0x1e8] sm:$0xff] %vm2604_vm5, %v2535_v16 }
 0x454   : > { %11470 = vmatmul.mubr.msk.bf16.gmra.mrb[116].mxu0 %vm4822_vm10, %v4781_v19  ;;  %v5925_v19 = vmax.f32 %v5797_v42, 0.0 }
 0x455   : > { %v2533_v45 = vpop.permute.xlu0 %2532 }
 0x456   : > { %2665 = vst.msk [vmem:[#allocation2 + $0x1e0] sm:$0xff] %vm2604_vm5, %v2533_v45  ;;  %v3048_v48 = vpop.permute.xlu1 %3047 }
 0x457   : > { %3179 = vst.msk [vmem:[#allocation2 + $0x1e8] sm:$0xff] %vm3117_vm6, %v3048_v48  ;;  %v5923_v48 = vmax.f32 %v5795_v49, 0.0 }
 0x459   : > { %v3046_v20 = vpop.permute.xlu0 %3045 }
 0x45a   : > { %3178 = vst.msk [vmem:[#allocation2 + $0x1e0] sm:$0xff] %vm3117_vm6, %v3046_v20  ;;  %v3562_v15 = vpop.permute.xlu1 %3561 }
 0x45b   : > { %3693 = vst.msk [vmem:[#allocation2 + $0x1e8] sm:$0xff] %vm3631_vm7, %v3562_v15 }
 0x45d   : > { %v3560_v12 = vpop.permute.xlu0 %3559 }
 0x45e   : > { %3692 = vst.msk [vmem:[#allocation2 + $0x1e0] sm:$0xff] %vm3631_vm7, %v3560_v12  ;;  %v4075_v31 = vpop.permute.xlu1 %4074  ;;  %v6101_v12 = vsel %vm5962_vm11, %v5924_v21, -inf }
 0x45f   : > { %4206 = vst.msk [vmem:[#allocation2 + $0x1e8] sm:$0xff] %vm4144_vm8, %v4075_v31 }
 0x461   : > { %v4073_v13 = vpop.permute.xlu0 %4072 }
 0x462   : > { %4205 = vst.msk [vmem:[#allocation2 + $0x1e0] sm:$0xff] %vm4144_vm8, %v4073_v13  ;;  %v997_v62 = vpop.permute.xlu1 %996  ;;  %v6095_v13 = vsel %vm5962_vm11, %v5922_v3, -inf }
 0x463   : > { %1127 = vst.msk [vmem:[#allocation2 + $0x1f0] sm:$0xff] %vm1064_vm2, %v997_v62 }
 0x465   : > { %v4586_v56 = vpop.permute.xlu0 %4585 }
 0x466   : > { %4718 = vst.msk [vmem:[#allocation2 + $0x1e0] sm:$0xff] %vm4657_vm9, %v4586_v56  ;;  %v999_v36 = vpop.permute.xlu1 %998  ;;  %v6104_v56 = vsel %vm5962_vm11, %v5925_v19, -inf }
 0x467   : > { %v11447_v8 = vpop.f32.mrb[92].mxu0  ;;  %1128 = vst.msk [vmem:[#allocation2 + $0x1f8] sm:$0xff] %vm1064_vm2, %v999_v36 }
 0x468   : > { %v5666_v23 = vmul.f32 %v15039_v25, %v11447_v8  ;;  %v5421_v53 = vpop.f32.mrb[93].mxu0 }
 0x469   : > { %v5664_v38 = vmul.f32 %v15039_v25, %v5421_v53  ;;  %v11448_v34 = vpop.f32.mrb[94].mxu0  ;;  %v4588_v26 = vpop.permute.xlu0 %4587 }
 0x46a   : > { %v5800_v50 = vadd.f32 %v15058_v35, %v5666_v23  ;;  %v5667_v39 = vmul.f32 %v15039_v25, %v11448_v34  ;;  %v5424_v33 = vpop.f32.mrb[95].mxu0  ;;  %4719 = vst.msk [vmem:[#allocation2 + $0x1e8] sm:$0xff] %vm4657_vm9, %v4588_v26  ;;  %v1512_v27 = vpop.permute.xlu1 %1511  ;;  %v6098_v23 = vsel %vm5962_vm11, %v5923_v48, -inf }
 0x46b   : > { %v5798_v5 = vadd.f32 %v15058_v35, %v5664_v38  ;;  %v5665_v55 = vmul.f32 %v15039_v25, %v5424_v33  ;;  %1641 = vst.msk [vmem:[#allocation2 + $0x1f8] sm:$0xff] %vm1577_vm3, %v1512_v27 }
 0x46c   : > { %v5928_v16 = vmax.f32 %v5800_v50, 0.0  ;;  %v5801_v45 = vadd.f32 %v15058_v35, %v5667_v39 }
 0x46d   : > { %v5926_v20 = vmax.f32 %v5798_v5, 0.0  ;;  %v5799_v15 = vadd.f32 %v15058_v35, %v5665_v55  ;;  %v1510_v62 = vpop.permute.xlu0 %1509  ;;  %v4782_v58 = vld [vmem:[#allocation2 + $0x1e0] sm:$0xff] }
 0x46e   : > { %v6102_v47 = vsel %vm5962_vm11, %v5928_v16, -inf  ;;  %v5929_v31 = vmax.f32 %v5801_v45, 0.0  ;;  %1640 = vst.msk [vmem:[#allocation2 + $0x1f0] sm:$0xff] %vm1577_vm3, %v1510_v62  ;;  %11473 = vmatprep.mubr.msk.bf16.mxu0 %vm4822_vm10, %v4782_v58  ;;  %v2026_v34 = vpop.permute.xlu1 %2025 }
 0x46f   : > { %v6103_v40 = vmax.f32 %v6101_v12, %v6102_v47  ;;  %v6096_v37 = vsel %vm5962_vm11, %v5926_v20, -inf  ;;  %v5927_v30 = vmax.f32 %v5799_v15, 0.0  ;;  %2155 = vst.msk [vmem:[#allocation2 + $0x1f8] sm:$0xff] %vm2091_vm4, %v2026_v34 }
 0x470   : > { %v6097_v8 = vmax.f32 %v6095_v13, %v6096_v37  ;;  %v6105_v42 = vsel %vm5962_vm11, %v5929_v31, -inf  ;;  %v6521_v37 = vld [vmem:[#allocation4 + $0x50] sm:$0xff] }
 0x471   : > { %6201 = vst.msk [vmem:[#allocation3 + $0x170] sm:$0xff] %vm5962_vm11, %v6103_v40  ;;  %v6106_v53 = vmax.f32 %v6104_v56, %v6105_v42  ;;  %v6099_v49 = vsel %vm5962_vm11, %v5927_v30, -inf  ;;  %v2024_v21 = vpop.permute.xlu0 %2023  ;;  %v4783_v50 = vld [vmem:[#allocation2 + $0x1e8] sm:$0xff] }
 0x472   : > { %6199 = vst.msk [vmem:[#allocation3 + $0x160] sm:$0xff] %vm5962_vm11, %v6097_v8  ;;  %v6100_v38 = vmax.f32 %v6098_v23, %v6099_v49  ;;  %11474 = vmatmul.mubr.msk.bf16.gmra.mrb[120].mxu0 %vm4822_vm10, %v4783_v50  ;;  %v2539_v39 = vpop.permute.xlu1 %2538  ;;  %v6520_v40 = vld [vmem:[#allocation4 + $0x48] sm:$0xff] }
 0x473   : > { %6202 = vst.msk [vmem:[#allocation3 + $0x178] sm:$0xff] %vm5962_vm11, %v6106_v53 }
 0x474   : > { %6200 = vst.msk [vmem:[#allocation3 + $0x168] sm:$0xff] %vm5962_vm11, %v6100_v38 }
 0x475   : > { %2154 = vst.msk [vmem:[#allocation2 + $0x1f0] sm:$0xff] %vm2091_vm4, %v2024_v21  ;;  %v2537_v33 = vpop.permute.xlu0 %2536 }
 0x476   : > { %2668 = vst.msk [vmem:[#allocation2 + $0x1f8] sm:$0xff] %vm2604_vm5, %v2539_v39  ;;  %2667 = vst.msk [vmem:[#allocation2 + $0x1f0] sm:$0xff] %vm2604_vm5, %v2537_v33  ;;  %v3052_v5 = vpop.permute.xlu1 %3051 }
 0x477   : > { %3181 = vst.msk [vmem:[#allocation2 + $0x1f8] sm:$0xff] %vm3117_vm6, %v3052_v5 }
 0x479   : > { %v3050_v16 = vpop.permute.xlu0 %3049 }
 0x47a   : > { %v6265_v36 = vld [vmem:[#allocation3 + $0x170] ss:$2 sm:$0xff]  ;;  %v6329_v3 = vld [vmem:[#allocation3 + $0x171] ss:$2 sm:$0xff]  ;;  %3180 = vst.msk [vmem:[#allocation2 + $0x1f0] sm:$0xff] %vm3117_vm6, %v3050_v16  ;;  %v3566_v48 = vpop.permute.xlu1 %3565  ;;  %v15194_v16 = vpack.c.bf16 %v6521_v37, %v6520_v40 }
 0x47b   : > { %v6369_v55 = vmax.f32 %v6265_v36, %v6329_v3  ;;  %v6263_v26 = vld [vmem:[#allocation3 + $0x160] ss:$2 sm:$0xff]  ;;  %v6327_v19 = vld [vmem:[#allocation3 + $0x161] ss:$2 sm:$0xff]  ;;  %3695 = vst.msk [vmem:[#allocation2 + $0x1f8] sm:$0xff] %vm3631_vm7, %v3566_v48 }
 0x47c   : > { %v6368_v45 = vmax.f32 %v6263_v26, %v6327_v19 }
 0x47d   : > { %6443 = vst.msk [vmem:[#allocation4 + $0x190] sm:$0xff] %vm5962_vm11, %v6369_v55  ;;  %v3564_v20 = vpop.permute.xlu0 %3563 }
 0x47e   : > { %6442 = vst.msk [vmem:[#allocation4 + $0x188] sm:$0xff] %vm5962_vm11, %v6368_v45  ;;  %v4079_v15 = vpop.permute.xlu1 %4078 }
 0x47f   : > { %3694 = vst.msk [vmem:[#allocation2 + $0x1f0] sm:$0xff] %vm3631_vm7, %v3564_v20 }
 0x480   : > { %4208 = vst.msk [vmem:[#allocation2 + $0x1f8] sm:$0xff] %vm4144_vm8, %v4079_v15 }
 0x481   : > { %v4077_v12 = vpop.permute.xlu0 %4076 }
 0x482   : > { %4207 = vst.msk [vmem:[#allocation2 + $0x1f0] sm:$0xff] %vm4144_vm8, %v4077_v12  ;;  %v4592_v58 = vpop.permute.xlu1 %4591 }
 0x483   : > { %4721 = vst.msk [vmem:[#allocation2 + $0x1f8] sm:$0xff] %vm4657_vm9, %v4592_v58 }
 0x484   : > { %v6541_v47 = vld [vmem:[#allocation4 + $0x190] sm:$0xff] }
 0x485   : > { %v6670_v31 = vld [vmem:[#allocation4 + $0x191] sm:$0xff]  ;;  %v6540_v13 = vld [vmem:[#allocation4 + $0x188] sm:$0xff]  ;;  %v4590_v49 = vpop.permute.xlu0 %4589  ;;  %v11451_v38 = vpop.f32.mrb[96].mxu0 }
 0x486   : > { %v7115_v27 = vld [vmem:[#allocation4 + $0x190] sm:$0xff]  ;;  %v6476_v30 = vld [vmem:[#allocation4 + $0x187] sm:$0xff]  ;;  %v6560_v56 = vpack.c.bf16 %v6541_v47, %v6540_v13  ;;  %4720 = vst.msk [vmem:[#allocation2 + $0x1f0] sm:$0xff] %vm4657_vm9, %v4590_v49  ;;  %v5437_v36 = vpop.f32.mrb[97].mxu0  ;;  %v6581_v19 = vpop.permute.xlu1 %6580  ;;  %v5670_v40 = vmul.f32 %v15039_v25, %v11451_v38 }
 0x487   : > { %v6477_v62 = vld [vmem:[#allocation4 + $0x18f] sm:$0xff]  ;;  %v7050_v53 = vld [vmem:[#allocation4 + $0x187] sm:$0xff]  ;;  %v11452_v55 = vpop.f32.mrb[98].mxu0  ;;  %6629 = vst.msk [vmem:[#allocation5] sm:$0xff] %vm6628_vm12, %v6581_v19  ;;  %v5668_v37 = vmul.f32 %v15039_v25, %v5437_v36 }
 0x488   : > { %v15179_v8 = vpack.c.bf16 %v6477_v62, %v6476_v30  ;;  %v6669_v42 = vld [vmem:[#allocation4 + $0x189] sm:$0xff]  ;;  %v7243_v33 = vld [vmem:[#allocation4 + $0x191] sm:$0xff]  ;;  %6604 = vrot.lane.b32.xlu1 %v6560_v56, %s11905_s25  ;;  %v5440_v26 = vpop.f32.mrb[99].mxu0  ;;  %v5671_v30 = vmul.f32 %v15039_v25, %v11452_v55  ;;  %v5804_v58 = vadd.f32 %v15058_v35, %v5670_v40 }
 0x489   : > { %v7114_v23 = vld [vmem:[#allocation4 + $0x188] sm:$0xff]  ;;  %v15182_v34 = vpack.c.bf16 %v6670_v31, %v6669_v42  ;;  %v6774_v45 = vpop.permute.xlu0 %6773  ;;  %v5669_v62 = vmul.f32 %v15039_v25, %v5440_v26  ;;  %v5802_v56 = vadd.f32 %v15058_v35, %v5668_v37 }
 0x48a   : > { %v15184_v21 = vpack.c.bf16 %v7115_v27, %v7114_v23  ;;  %v7051_v50 = vld [vmem:[#allocation4 + $0x18f] sm:$0xff]  ;;  %6512 = vst.msk [vmem:[#allocation5 + $0x1e0] sm:$0xff] %vm5962_vm11, %v15179_v8  ;;  %v6583_v48 = vpop.permute.xlu1 %6582  ;;  %v4785_v20 = vld [vmem:[#allocation2 + $0x1f8] sm:$0xff]  ;;  %v5805_v23 = vadd.f32 %v15058_v35, %v5671_v30 }
 0x48b   : > { %v7242_v39 = vld [vmem:[#allocation4 + $0x189] sm:$0xff]  ;;  %v7072_v3 = vpack.c.bf16 %v7051_v50, %v7050_v53  ;;  %6705 = vst.msk [vmem:[#allocation5 + $0x1e8] sm:$0xff] %vm5962_vm11, %v15182_v34  ;;  %v5803_v50 = vadd.f32 %v15058_v35, %v5669_v62  ;;  %v5930_v55 = vmax.f32 %v5802_v56, 0.0 }
 0x48c   : > { %v7264_v5 = vpack.c.bf16 %v7243_v33, %v7242_v39  ;;  %6896 = vst.msk [vmem:[#allocation5 + $0x1c8] sm:$0xff] %vm5962_vm11, %v15184_v21  ;;  %6584 = vrot.lane.b32.xlu1 %v15194_v16, %s11905_s25  ;;  %v5932_v33 = vmax.f32 %v5804_v58, 0.0 }
 0x48d   : > { %7088 = vst.msk [vmem:[#allocation5 + $0x1a8] sm:$0xff] %vm5962_vm11, %v7072_v3  ;;  %v6776_v15 = vpop.permute.xlu0 %6775  ;;  %v4784_v12 = vld [vmem:[#allocation2 + $0x1f0] sm:$0xff]  ;;  %v6107_v40 = vsel %vm5962_vm11, %v5930_v55, -inf }
 0x48e   : > { %7280 = vst.msk [vmem:[#allocation5 + $0x1b0] sm:$0xff] %vm5962_vm11, %v7264_v5  ;;  %11477 = vmatprep.mubr.msk.bf16.mxu0 %vm4822_vm10, %v4784_v12  ;;  %v7286_v31 = vld [vmem:[#allocation5] sm:$0xff] }
 0x48f   : > { %6821 = vst.msk [vmem:[#allocation5 + $0x8] sm:$0xff] %vm6628_vm12, %v6774_v45  ;;  %6630 = vst.msk [vmem:[#allocation5 + $0x28] sm:$0xff] %vm6628_vm12, %v6583_v48  ;;  %11478 = vmatmul.mubr.msk.bf16.gmra.mrb[124].mxu0 %vm4822_vm10, %v4785_v20  ;;  %v5933_v45 = vmax.f32 %v5805_v23, 0.0 }
 0x490   : > { %6822 = vst.msk [vmem:[#allocation5 + $0x30] sm:$0xff] %vm6628_vm12, %v6776_v15  ;;  %v5931_v15 = vmax.f32 %v5803_v50, 0.0 }
 0x491   : > { %v6116_v58 = vsel %vm5962_vm11, %v5933_v45, -inf }
 0x492   : > { %v6110_v23 = vsel %vm5962_vm11, %v5931_v15, -inf }
 0x496   : > { %v7287_v47 = vld [vmem:[#allocation5 + $0x8] sm:$0xff] }
 0x497   : > { %7734 = vmatprep.mubr.bf16.mxu0 %v7287_v47  ;;  %v7292_v27 = vld [vmem:[#allocation5 + $0x30] sm:$0xff]  ;;  %v7291_v13 = vld [vmem:[#allocation5 + $0x28] sm:$0xff] }
 0x498   : > { %7735 = vmatmul.mubr.bf16.vlgmr.msra.gmra.mrb[128].mxu0 %v7286_v31  ;;  %v6113_v31 = vsel %vm5962_vm11, %v5932_v33, -inf }
 0x499   : > { %7742 = vmatprep.mubr.bf16.mxu0 %v7292_v27 }
 0x4a0   : > { %7743 = vmatmul.mubr.bf16.gmra.mrb[132].mxu0 %v7291_v13 }
 0x4a8   : > { %v11455_v42 = vpop.f32.mrb[100].mxu0 }
 0x4a9   : > { %v5674_v53 = vmul.f32 %v15039_v25, %v11455_v42  ;;  %v5453_v49 = vpop.f32.mrb[101].mxu0 }
 0x4aa   : > { %v5672_v38 = vmul.f32 %v15039_v25, %v5453_v49  ;;  %v11456_v39 = vpop.f32.mrb[102].mxu0 }
 0x4ab   : > { %v5808_v36 = vadd.f32 %v15058_v35, %v5674_v53  ;;  %v5675_v3 = vmul.f32 %v15039_v25, %v11456_v39  ;;  %v5456_v5 = vpop.f32.mrb[103].mxu0 }
 0x4ac   : > { %v5806_v26 = vadd.f32 %v15058_v35, %v5672_v38  ;;  %v5673_v19 = vmul.f32 %v15039_v25, %v5456_v5 }
 0x4ad   : > { %v5936_v48 = vmax.f32 %v5808_v36, 0.0  ;;  %v5809_v20 = vadd.f32 %v15058_v35, %v5675_v3 }
 0x4ae   : > { %v5934_v12 = vmax.f32 %v5806_v26, 0.0  ;;  %v5807_v47 = vadd.f32 %v15058_v35, %v5673_v19 }
 0x4af   : > { %v6114_v27 = vsel %vm5962_vm11, %v5936_v48, -inf  ;;  %v5937_v13 = vmax.f32 %v5809_v20, 0.0 }
 0x4b0   : > { %v6115_v37 = vmax.f32 %v6113_v31, %v6114_v27  ;;  %v6108_v30 = vsel %vm5962_vm11, %v5934_v12, -inf  ;;  %v5935_v62 = vmax.f32 %v5807_v47, 0.0 }
 0x4b1   : > { %v6109_v56 = vmax.f32 %v6107_v40, %v6108_v30  ;;  %v6117_v42 = vsel %vm5962_vm11, %v5937_v13, -inf }
 0x4b2   : > { %6205 = vst.msk [vmem:[#allocation3 + $0x190] sm:$0xff] %vm5962_vm11, %v6115_v37  ;;  %v6118_v53 = vmax.f32 %v6116_v58, %v6117_v42  ;;  %v6111_v49 = vsel %vm5962_vm11, %v5935_v62, -inf }
 0x4b3   : > { %6203 = vst.msk [vmem:[#allocation3 + $0x180] sm:$0xff] %vm5962_vm11, %v6109_v56  ;;  %v6112_v50 = vmax.f32 %v6110_v23, %v6111_v49 }
 0x4b4   : > { %6206 = vst.msk [vmem:[#allocation3 + $0x198] sm:$0xff] %vm5962_vm11, %v6118_v53 }
 0x4b5   : > { %6204 = vst.msk [vmem:[#allocation3 + $0x188] sm:$0xff] %vm5962_vm11, %v6112_v50 }
 0x4bb   : > { %v6269_v38 = vld [vmem:[#allocation3 + $0x190] ss:$2 sm:$0xff]  ;;  %v6333_v39 = vld [vmem:[#allocation3 + $0x191] ss:$2 sm:$0xff] }
 0x4bc   : > { %v6371_v33 = vmax.f32 %v6269_v38, %v6333_v39  ;;  %v6267_v36 = vld [vmem:[#allocation3 + $0x180] ss:$2 sm:$0xff]  ;;  %v6331_v3 = vld [vmem:[#allocation3 + $0x181] ss:$2 sm:$0xff] }
 0x4bd   : > { %v6370_v5 = vmax.f32 %v6267_v36, %v6331_v3 }
 0x4be   : > { %6445 = vst.msk [vmem:[#allocation4 + $0x1b0] sm:$0xff] %vm5962_vm11, %v6371_v33 }
 0x4bf   : > { %6444 = vst.msk [vmem:[#allocation4 + $0x1a8] sm:$0xff] %vm5962_vm11, %v6370_v5 }
 0x4c5   : > { %v6543_v55 = vld [vmem:[#allocation4 + $0x1b0] sm:$0xff]  ;;  %v11459_v13 = vpop.f32.mrb[104].mxu0 }
 0x4c6   : > { %v6672_v26 = vld [vmem:[#allocation4 + $0x1b1] sm:$0xff]  ;;  %v6733_v45 = vld [vmem:[#allocation4 + $0x1a7] sm:$0xff]  ;;  %v5469_v56 = vpop.f32.mrb[105].mxu0  ;;  %v5678_v50 = vmul.f32 %v15039_v25, %v11459_v13 }
 0x4c7   : > { %v7117_v19 = vld [vmem:[#allocation4 + $0x1b0] sm:$0xff]  ;;  %v6542_v20 = vld [vmem:[#allocation4 + $0x1a8] sm:$0xff]  ;;  %v11460_v53 = vpop.f32.mrb[106].mxu0  ;;  %v5676_v38 = vmul.f32 %v15039_v25, %v5469_v56 }
 0x4c8   : > { %v6734_v48 = vld [vmem:[#allocation4 + $0x1af] sm:$0xff]  ;;  %v6561_v12 = vpack.c.bf16 %v6543_v55, %v6542_v20  ;;  %v7052_v27 = vld [vmem:[#allocation4 + $0x1a7] sm:$0xff]  ;;  %v5472_v49 = vpop.f32.mrb[107].mxu0  ;;  %v5679_v39 = vmul.f32 %v15039_v25, %v11460_v53  ;;  %v5812_v36 = vadd.f32 %v15058_v35, %v5678_v50 }
 0x4c9   : > { %v6753_v15 = vpack.c.bf16 %v6734_v48, %v6733_v45  ;;  %v6671_v47 = vld [vmem:[#allocation4 + $0x1a9] sm:$0xff]  ;;  %v7245_v58 = vld [vmem:[#allocation4 + $0x1b1] sm:$0xff]  ;;  %v5677_v33 = vmul.f32 %v15039_v25, %v5472_v49  ;;  %v5810_v3 = vadd.f32 %v15058_v35, %v5676_v38 }
 0x4ca   : > { %v7116_v31 = vld [vmem:[#allocation4 + $0x1a8] sm:$0xff]  ;;  %v15236_v40 = vpack.c.bf16 %v6672_v26, %v6671_v47  ;;  %6606 = vrot.lane.b32.xlu1 %v6561_v12, %s11905_s25  ;;  %v5813_v55 = vadd.f32 %v15058_v35, %v5679_v39  ;;  %v5940_v20 = vmax.f32 %v5812_v36, 0.0 }
 0x4cb   : > { %v15238_v37 = vpack.c.bf16 %v7117_v19, %v7116_v31  ;;  %v7053_v30 = vld [vmem:[#allocation4 + $0x1af] sm:$0xff]  ;;  %6797 = vrot.lane.b32.xlu0 %v6753_v15, %s11905_s25  ;;  %6513 = vst.msk [vmem:[#allocation5 + $0x208] sm:$0xff] %vm5962_vm11, %v6753_v15  ;;  %v5811_v19 = vadd.f32 %v15058_v35, %v5677_v33  ;;  %v5938_v31 = vmax.f32 %v5810_v3, 0.0 }
 0x4cc   : > { %v7244_v62 = vld [vmem:[#allocation4 + $0x1a9] sm:$0xff]  ;;  %v7073_v42 = vpack.c.bf16 %v7053_v30, %v7052_v27  ;;  %6706 = vst.msk [vmem:[#allocation5 + $0x210] sm:$0xff] %vm5962_vm11, %v15236_v40  ;;  %v5941_v30 = vmax.f32 %v5813_v55, 0.0  ;;  %v6125_v53 = vsel %vm5962_vm11, %v5940_v20, -inf }
 0x4cd   : > { %v7265_v23 = vpack.c.bf16 %v7245_v58, %v7244_v62  ;;  %6897 = vst.msk [vmem:[#allocation5 + $0x1f0] sm:$0xff] %vm5962_vm11, %v15238_v37  ;;  %v5939_v56 = vmax.f32 %v5811_v19, 0.0  ;;  %v6119_v38 = vsel %vm5962_vm11, %v5938_v31, -inf }
 0x4ce   : > { %7089 = vst.msk [vmem:[#allocation5 + $0x1d0] sm:$0xff] %vm5962_vm11, %v7073_v42  ;;  %6586 = vrot.lane.b32.xlu1 %v13420_v22, %s11905_s25  ;;  %v6128_v3 = vsel %vm5962_vm11, %v5941_v30, -inf }
 0x4cf   : > { %7281 = vst.msk [vmem:[#allocation5 + $0x1d8] sm:$0xff] %vm5962_vm11, %v7265_v23  ;;  %6777 = vrot.lane.b32.xlu0 %v13418_v46, %s11905_s25 }
 0x4e7   : > { %v11463_v5 = vpop.f32.mrb[108].mxu0 }
 0x4e8   : > { %v5682_v46 = vmul.f32 %v15039_v25, %v11463_v5  ;;  %v5485_v26 = vpop.f32.mrb[109].mxu0 }
 0x4e9   : > { %v5680_v45 = vmul.f32 %v15039_v25, %v5485_v26  ;;  %v11464_v48 = vpop.f32.mrb[110].mxu0 }
 0x4ea   : > { %v5816_v15 = vadd.f32 %v15058_v35, %v5682_v46  ;;  %v5683_v12 = vmul.f32 %v15039_v25, %v11464_v48  ;;  %v5488_v47 = vpop.f32.mrb[111].mxu0  ;;  %v6122_v46 = vsel %vm5962_vm11, %v5939_v56, -inf }
 0x4eb   : > { %v5814_v27 = vadd.f32 %v15058_v35, %v5680_v45  ;;  %v5681_v13 = vmul.f32 %v15039_v25, %v5488_v47 }
 0x4ec   : > { %v5944_v62 = vmax.f32 %v5816_v15, 0.0  ;;  %v5817_v58 = vadd.f32 %v15058_v35, %v5683_v12 }
 0x4ed   : > { %v5942_v42 = vmax.f32 %v5814_v27, 0.0  ;;  %v5815_v23 = vadd.f32 %v15058_v35, %v5681_v13 }
 0x4ee   : > { %v6126_v49 = vsel %vm5962_vm11, %v5944_v62, -inf  ;;  %v5945_v50 = vmax.f32 %v5817_v58, 0.0 }
 0x4ef   : > { %v6127_v39 = vmax.f32 %v6125_v53, %v6126_v49  ;;  %v6120_v33 = vsel %vm5962_vm11, %v5942_v42, -inf  ;;  %v5943_v36 = vmax.f32 %v5815_v23, 0.0 }
 0x4f0   : > { %v6121_v5 = vmax.f32 %v6119_v38, %v6120_v33  ;;  %v6129_v55 = vsel %vm5962_vm11, %v5945_v50, -inf }
 0x4f1   : > { %6209 = vst.msk [vmem:[#allocation3 + $0x1b0] sm:$0xff] %vm5962_vm11, %v6127_v39  ;;  %v6130_v26 = vmax.f32 %v6128_v3, %v6129_v55  ;;  %v6123_v19 = vsel %vm5962_vm11, %v5943_v36, -inf }
 0x4f2   : > { %6207 = vst.msk [vmem:[#allocation3 + $0x1a0] sm:$0xff] %vm5962_vm11, %v6121_v5  ;;  %v6124_v45 = vmax.f32 %v6122_v46, %v6123_v19 }
 0x4f3   : > { %6210 = vst.msk [vmem:[#allocation3 + $0x1b8] sm:$0xff] %vm5962_vm11, %v6130_v26 }
 0x4f4   : > { %6208 = vst.msk [vmem:[#allocation3 + $0x1a8] sm:$0xff] %vm5962_vm11, %v6124_v45 }
 0x4fa   : > { %v6273_v48 = vld [vmem:[#allocation3 + $0x1b0] ss:$2 sm:$0xff]  ;;  %v6337_v20 = vld [vmem:[#allocation3 + $0x1b1] ss:$2 sm:$0xff]  ;;  %v6605_v15 = vpop.permute.xlu1 %6604 }
 0x4fb   : > { %v6373_v12 = vmax.f32 %v6273_v48, %v6337_v20  ;;  %v6271_v47 = vld [vmem:[#allocation3 + $0x1a0] ss:$2 sm:$0xff]  ;;  %v6335_v31 = vld [vmem:[#allocation3 + $0x1a1] ss:$2 sm:$0xff]  ;;  %6641 = vst.msk [vmem:[#allocation5 + $0x1e0] sm:$0xff] %vm6628_vm12, %v6605_v15 }
 0x4fc   : > { %v6372_v27 = vmax.f32 %v6271_v47, %v6335_v31 }
 0x4fd   : > { %6447 = vst.msk [vmem:[#allocation4 + $0x1d0] sm:$0xff] %vm5962_vm11, %v6373_v12 }
 0x4fe   : > { %6446 = vst.msk [vmem:[#allocation4 + $0x1c8] sm:$0xff] %vm5962_vm11, %v6372_v27  ;;  %v6585_v13 = vpop.permute.xlu1 %6584 }
 0x4ff   : > { %6631 = vst.msk [vmem:[#allocation5 + $0x50] sm:$0xff] %vm6628_vm12, %v6585_v13 }
 0x504   : > { %v6545_v30 = vld [vmem:[#allocation4 + $0x1d0] sm:$0xff] }
 0x505   : > { %v6928_v62 = vld [vmem:[#allocation4 + $0x1d1] sm:$0xff]  ;;  %v6735_v56 = vld [vmem:[#allocation4 + $0x1c7] sm:$0xff]  ;;  %v11467_v39 = vpop.f32.mrb[112].mxu0 }
 0x506   : > { %v6864_v58 = vld [vmem:[#allocation4 + $0x1d0] sm:$0xff]  ;;  %v6544_v23 = vld [vmem:[#allocation4 + $0x1c8] sm:$0xff]  ;;  %v5501_v46 = vpop.f32.mrb[113].mxu0  ;;  %v5686_v15 = vmul.f32 %v15039_v25, %v11467_v39 }
 0x507   : > { %v6736_v42 = vld [vmem:[#allocation4 + $0x1cf] sm:$0xff]  ;;  %v15285_v49 = vpack.c.bf16 %v6545_v30, %v6544_v23  ;;  %v7054_v3 = vld [vmem:[#allocation4 + $0x1c7] sm:$0xff]  ;;  %v11468_v45 = vpop.f32.mrb[114].mxu0  ;;  %v5684_v12 = vmul.f32 %v15039_v25, %v5501_v46 }
 0x508   : > { %v6754_v53 = vpack.c.bf16 %v6736_v42, %v6735_v56  ;;  %v6927_v50 = vld [vmem:[#allocation4 + $0x1c9] sm:$0xff]  ;;  %v7247_v19 = vld [vmem:[#allocation4 + $0x1d1] sm:$0xff]  ;;  %v5504_v20 = vpop.f32.mrb[115].mxu0  ;;  %v5687_v47 = vmul.f32 %v15039_v25, %v11468_v45  ;;  %v5820_v27 = vadd.f32 %v15058_v35, %v5686_v15 }
 0x509   : > { %v6863_v38 = vld [vmem:[#allocation4 + $0x1c8] sm:$0xff]  ;;  %v15287_v33 = vpack.c.bf16 %v6928_v62, %v6927_v50  ;;  %6608 = vrot.lane.b32.xlu1 %v15285_v49, %s11905_s25  ;;  %v5685_v31 = vmul.f32 %v15039_v25, %v5504_v20  ;;  %v5818_v13 = vadd.f32 %v15058_v35, %v5684_v12 }
 0x50a   : > { %v6882_v36 = vpack.c.bf16 %v6864_v58, %v6863_v38  ;;  %v7055_v5 = vld [vmem:[#allocation4 + $0x1cf] sm:$0xff]  ;;  %6799 = vrot.lane.b32.xlu0 %v6754_v53, %s11905_s25  ;;  %6514 = vst.msk [vmem:[#allocation5 + $0x230] sm:$0xff] %vm5962_vm11, %v6754_v53  ;;  %v5821_v62 = vadd.f32 %v15058_v35, %v5687_v47  ;;  %v5948_v53 = vmax.f32 %v5820_v27, 0.0 }
 0x50b   : > { %v7246_v55 = vld [vmem:[#allocation4 + $0x1c9] sm:$0xff]  ;;  %v7074_v26 = vpack.c.bf16 %v7055_v5, %v7054_v3  ;;  %6707 = vst.msk [vmem:[#allocation5 + $0x238] sm:$0xff] %vm5962_vm11, %v15287_v33  ;;  %v5819_v56 = vadd.f32 %v15058_v35, %v5685_v31 }
 0x50c   : > { %6898 = vst.msk [vmem:[#allocation5 + $0x218] sm:$0xff] %vm5962_vm11, %v6882_v36  ;;  %v7266_v48 = vpack.c.bf16 %v7247_v19, %v7246_v55  ;;  %v5946_v36 = vmax.f32 %v5818_v13, 0.0  ;;  %v5949_v55 = vmax.f32 %v5821_v62, 0.0  ;;  %v6137_v20 = vsel %vm5962_vm11, %v5948_v53, -inf }
 0x50d   : > { %7090 = vst.msk [vmem:[#allocation5 + $0x1f8] sm:$0xff] %vm5962_vm11, %v7074_v26  ;;  %6588 = vrot.lane.b32.xlu1 %v13632_v2, %s11905_s25  ;;  %v5947_v19 = vmax.f32 %v5819_v56, 0.0 }
 0x50e   : > { %7282 = vst.msk [vmem:[#allocation5 + $0x200] sm:$0xff] %vm5962_vm11, %v7266_v48  ;;  %6779 = vrot.lane.b32.xlu0 %v13630_v0, %s11905_s25  ;;  %v6131_v47 = vsel %vm5962_vm11, %v5946_v36, -inf }
 0x527   : > { %v11471_v30 = vpop.f32.mrb[116].mxu0 }
 0x528   : > { %v5690_v0 = vmul.f32 %v15039_v25, %v11471_v30  ;;  %v5517_v58 = vpop.f32.mrb[117].mxu0 }
 0x529   : > { %v5688_v42 = vmul.f32 %v15039_v25, %v5517_v58  ;;  %v11472_v23 = vpop.f32.mrb[118].mxu0 }
 0x52a   : > { %v5824_v50 = vadd.f32 %v15058_v35, %v5690_v0  ;;  %v5691_v38 = vmul.f32 %v15039_v25, %v11472_v23  ;;  %v5520_v39 = vpop.f32.mrb[119].mxu0  ;;  %v6134_v0 = vsel %vm5962_vm11, %v5947_v19, -inf }
 0x52b   : > { %v5822_v3 = vadd.f32 %v15058_v35, %v5688_v42  ;;  %v5689_v5 = vmul.f32 %v15039_v25, %v5520_v39  ;;  %v6140_v25 = vsel %vm5962_vm11, %v5949_v55, -inf }
 0x52c   : > { %v5952_v46 = vmax.f32 %v5824_v50, 0.0  ;;  %v5825_v26 = vadd.f32 %v15058_v35, %v5691_v38 }
 0x52d   : > { %v5950_v45 = vmax.f32 %v5822_v3, 0.0  ;;  %v5823_v48 = vadd.f32 %v15058_v35, %v5689_v5 }
 0x52e   : > { %v6138_v15 = vsel %vm5962_vm11, %v5952_v46, -inf  ;;  %v5953_v12 = vmax.f32 %v5825_v26, 0.0  ;;  %v7346_v26 = vld [vmem:[#allocation5 + $0x1e0] sm:$0xff] }
 0x52f   : > { %v6139_v31 = vmax.f32 %v6137_v20, %v6138_v15  ;;  %v6132_v27 = vsel %vm5962_vm11, %v5950_v45, -inf  ;;  %v5951_v13 = vmax.f32 %v5823_v48, 0.0 }
 0x530   : > { %v6133_v30 = vmax.f32 %v6131_v47, %v6132_v27  ;;  %v6141_v62 = vsel %vm5962_vm11, %v5953_v12, -inf }
 0x531   : > { %6213 = vst.msk [vmem:[#allocation3 + $0x1d0] sm:$0xff] %vm5962_vm11, %v6139_v31  ;;  %v6142_v35 = vmax.f32 %v6140_v25, %v6141_v62  ;;  %v6135_v58 = vsel %vm5962_vm11, %v5951_v13, -inf  ;;  %v7296_v31 = vld [vmem:[#allocation5 + $0x50] sm:$0xff] }
 0x532   : > { %6211 = vst.msk [vmem:[#allocation3 + $0x1c0] sm:$0xff] %vm5962_vm11, %v6133_v30  ;;  %v6136_v56 = vmax.f32 %v6134_v0, %v6135_v58 }
 0x533   : > { %6214 = vst.msk [vmem:[#allocation3 + $0x1d8] sm:$0xff] %vm5962_vm11, %v6142_v35 }
 0x534   : > { %6212 = vst.msk [vmem:[#allocation3 + $0x1c8] sm:$0xff] %vm5962_vm11, %v6136_v56 }
 0x53a   : > { %v6277_v42 = vld [vmem:[#allocation3 + $0x1d0] ss:$2 sm:$0xff]  ;;  %v6341_v23 = vld [vmem:[#allocation3 + $0x1d1] ss:$2 sm:$0xff] }
 0x53b   : > { %v6375_v38 = vmax.f32 %v6277_v42, %v6341_v23  ;;  %v6275_v39 = vld [vmem:[#allocation3 + $0x1c0] ss:$2 sm:$0xff]  ;;  %v6339_v36 = vld [vmem:[#allocation3 + $0x1c1] ss:$2 sm:$0xff] }
 0x53c   : > { %v6607_v50 = vpop.permute.xlu1 %6606  ;;  %v6374_v3 = vmax.f32 %v6275_v39, %v6339_v36 }
 0x53d   : > { %v6798_v53 = vpop.permute.xlu0 %6797  ;;  %6642 = vst.msk [vmem:[#allocation5 + $0x208] sm:$0xff] %vm6628_vm12, %v6607_v50 }
 0x53e   : > { %6833 = vst.msk [vmem:[#allocation5 + $0x1e8] sm:$0xff] %vm6628_vm12, %v6798_v53 }
 0x53f   : > { %6449 = vst.msk [vmem:[#allocation4 + $0x1f0] sm:$0xff] %vm5962_vm11, %v6375_v38  ;;  %6448 = vst.msk [vmem:[#allocation4 + $0x1e8] sm:$0xff] %vm5962_vm11, %v6374_v3  ;;  %v11643_v3 = vld [vmem:[%s16462_s4 + $0x100] sm:$0xff]  }
 0x540   : > { %v6587_v55 = vpop.permute.xlu1 %6586  ;;  %11481 = vmatprep.subr.bf16.mxu0 %v11643_v3 }
 0x541   : > { %v6778_v5 = vpop.permute.xlu0 %6777  ;;  %6632 = vst.msk [vmem:[#allocation5 + $0x78] sm:$0xff] %vm6628_vm12, %v6587_v55  ;;  %11482 = vmatpush3.bf16.msra.mxu0 %v11643_v3 }
 0x542   : > { %6823 = vst.msk [vmem:[#allocation5 + $0x58] sm:$0xff] %vm6628_vm12, %v6778_v5 }
 0x545   : > { %v7347_v46 = vld [vmem:[#allocation5 + $0x1e8] sm:$0xff]  ;;  %v11475_v30 = vpop.f32.mrb[120].mxu0 }
 0x546   : > { %7830 = vmatprep.mubr.bf16.mxu1 %v7347_v46  ;;  %v6547_v19 = vld [vmem:[#allocation4 + $0x1f0] sm:$0xff]  ;;  %v6737_v20 = vld [vmem:[#allocation4 + $0x1e7] sm:$0xff]  ;;  %v5533_v56 = vpop.f32.mrb[121].mxu0  ;;  %v11888_v46 = vld [vmem:[%s16461_s3] ss:$0 sm:$0xff] }
 0x547   : > { %7831 = vmatmul.mubr.bf16.vlgmr.msra.gmra.mrb[0].mxu1 %v7346_v26  ;;  %v6930_v45 = vld [vmem:[#allocation4 + $0x1f1] sm:$0xff]  ;;  %v6546_v12 = vld [vmem:[#allocation4 + $0x1e8] sm:$0xff]  ;;  %v11476_v38 = vpop.f32.mrb[122].mxu0 }
 0x548   : > { %v6866_v48 = vld [vmem:[#allocation4 + $0x1f0] sm:$0xff]  ;;  %v15336_v13 = vpack.c.bf16 %v6547_v19, %v6546_v12  ;;  %v6865_v0 = vld [vmem:[#allocation4 + $0x1e8] sm:$0xff]  ;;  %v5536_v36 = vpop.f32.mrb[123].mxu0 }
 0x549   : > { %v6738_v15 = vld [vmem:[#allocation4 + $0x1ef] sm:$0xff]  ;;  %v7297_v47 = vld [vmem:[#allocation5 + $0x58] sm:$0xff]  ;;  %v7056_v35 = vld [vmem:[#allocation4 + $0x1e7] sm:$0xff]  ;;  %v6883_v42 = vpack.c.bf16 %v6866_v48, %v6865_v0 }
 0x54a   : > { %v6755_v27 = vpack.c.bf16 %v6738_v15, %v6737_v20  ;;  %v6929_v25 = vld [vmem:[#allocation4 + $0x1e9] sm:$0xff]  ;;  %7750 = vmatprep.mubr.bf16.mxu0 %v7297_v47  ;;  %v7249_v50 = vld [vmem:[#allocation4 + $0x1f1] sm:$0xff]  ;;  %6610 = vrot.lane.b32.xlu1 %v15336_v13, %s11905_s25 }
 0x54b   : > { %v15338_v62 = vpack.c.bf16 %v6930_v45, %v6929_v25  ;;  %v7057_v58 = vld [vmem:[#allocation4 + $0x1ef] sm:$0xff]  ;;  %7751 = vmatmul.mubr.bf16.gmra.mrb[136].mxu0 %v7296_v31  ;;  %6899 = vst.msk [vmem:[#allocation5 + $0x240] sm:$0xff] %vm5962_vm11, %v6883_v42  ;;  %v11645_v42 = vld [vmem:[%s16462_s4 + $0x80] sm:$0xff]  }
 0x54c   : > { %6801 = vrot.lane.b32.xlu0 %v6755_v27, %s11905_s25  ;;  %6515 = vst.msk [vmem:[#allocation5 + $0x258] sm:$0xff] %vm5962_vm11, %v6755_v27  ;;  %v7075_v23 = vpack.c.bf16 %v7057_v58, %v7056_v35  ;;  %v7248_v53 = vld [vmem:[#allocation4 + $0x1e9] sm:$0xff] }
 0x54d   : > { %6708 = vst.msk [vmem:[#allocation5 + $0x260] sm:$0xff] %vm5962_vm11, %v15338_v62  ;;  %v7267_v39 = vpack.c.bf16 %v7249_v50, %v7248_v53 }
 0x54e   : > { %7091 = vst.msk [vmem:[#allocation5 + $0x220] sm:$0xff] %vm5962_vm11, %v7075_v23  ;;  %6590 = vrot.lane.b32.xlu1 %v13844_v61, %s11905_s25 }
 0x54f   : > { %7283 = vst.msk [vmem:[#allocation5 + $0x228] sm:$0xff] %vm5962_vm11, %v7267_v39 }
 0x550   : > { %6781 = vrot.lane.b32.xlu0 %v13842_v59, %s11905_s25  ;;  %v11887_v59 = vld [vmem:[%s16460_s2] ss:$0 sm:$0xff] }
 0x551   : > { %v5694_v5 = vmul.f32 %v11887_v59, %v11475_v30  ;;  %v5695_v55 = vmul.f32 %v11887_v59, %v11476_v38 }
 0x552   : > { %6965 = vrot.lane.b32.xlu1 %v12994_v9, %s11905_s25  ;;  %v5692_v9 = vmul.f32 %v11887_v59, %v5533_v56  ;;  %v11644_v56 = vld [vmem:[%s16462_s4 + $0xc0] sm:$0xff]  }
 0x553   : > { %v5828_v26 = vadd.f32 %v11888_v46, %v5694_v5  ;;  %v5829_v48 = vadd.f32 %v11888_v46, %v5695_v55  ;;  %11211 = vmatprep.subr.bf16.mxu1 %v11644_v56 }
 0x554   : > { %v5826_v19 = vadd.f32 %v11888_v46, %v5692_v9  ;;  %11212 = vmatpush3.bf16.msra.mxu1 %v11645_v42  ;;  %v11650_v42 = vld [vmem:[%s16462_s4 + $0xd8] sm:$0xff]  }
 0x555   : > { %v5956_v27 = vmax.f32 %v5828_v26, 0.0  ;;  %v5957_v23 = vmax.f32 %v5829_v48, 0.0 }
 0x556   : > { %6592 = vrot.lane.b32.xlu1 %v14061_v17, %s11905_s25  ;;  %v5954_v0 = vmax.f32 %v5826_v19, 0.0 }
 0x557   : > { %v6149_v3 = vsel %vm5962_vm11, %v5956_v27, -inf }
 0x558   : > { %v6143_v9 = vsel %vm5962_vm11, %v5954_v0, -inf }
 0x55a   : > { %6967 = vrot.lane.b32.xlu1 %v13201_v43, %s11905_s25  ;;  %v5693_v43 = vmul.f32 %v11887_v59, %v5536_v36 }
 0x55c   : > { %v5827_v12 = vadd.f32 %v11888_v46, %v5693_v43 }
 0x55e   : > { %6594 = vrot.lane.b32.xlu1 %v14274_v29, %s11905_s25  ;;  %v5955_v38 = vmax.f32 %v5827_v12, 0.0 }
 0x560   : > { %v6146_v12 = vsel %vm5962_vm11, %v5955_v38, -inf }
 0x562   : > { %6969 = vrot.lane.b32.xlu1 %v13422_v41, %s11905_s25  ;;  %v11479_v45 = vpop.f32.mrb[124].mxu0 }
 0x563   : > { %v5698_v20 = vmul.f32 %v11887_v59, %v11479_v45  ;;  %v5549_v15 = vpop.f32.mrb[125].mxu0  ;;  %v6152_v45 = vsel %vm5962_vm11, %v5957_v23, -inf  ;;  %v11651_v23 = vld [vmem:[%s16462_s4 + $0x108] sm:$0xff]  }
 0x564   : > { %v5696_v47 = vmul.f32 %v11887_v59, %v5549_v15  ;;  %v11480_v31 = vpop.f32.mrb[126].mxu0  ;;  %11483 = vmatprep.subr.bf16.mxu0 %v11651_v23 }
 0x565   : > { %v5832_v25 = vadd.f32 %v11888_v46, %v5698_v20  ;;  %v5699_v41 = vmul.f32 %v11887_v59, %v11480_v31  ;;  %v5552_v30 = vpop.f32.mrb[127].mxu0  ;;  %11484 = vmatpush3.bf16.msra.mxu0 %v11651_v23 }
 0x566   : > { %6596 = vrot.lane.b32.xlu1 %v14487_v32, %s11905_s25  ;;  %v5830_v35 = vadd.f32 %v11888_v46, %v5696_v47  ;;  %v5697_v58 = vmul.f32 %v11887_v59, %v5552_v30 }
 0x567   : > { %v5960_v53 = vmax.f32 %v5832_v25, 0.0  ;;  %v5833_v50 = vadd.f32 %v11888_v46, %v5699_v41 }
 0x568   : > { %v5958_v39 = vmax.f32 %v5830_v35, 0.0  ;;  %v5831_v36 = vadd.f32 %v11888_v46, %v5697_v58  ;;  %v11647_v46 = vld [vmem:[%s16462_s4 + $0x88] sm:$0xff]   ;;  %v11648_v35 = vld [vmem:[%s16462_s4 + $0xd0] sm:$0xff]  }
 0x569   : > { %v6150_v59 = vsel %vm5962_vm11, %v5960_v53, -inf  ;;  %v5961_v5 = vmax.f32 %v5833_v50, 0.0  ;;  %v11649_v58 = vld [vmem:[%s16462_s4 + $0x90] sm:$0xff]   ;;  %v11652_v53 = vld [vmem:[%s16462_s4 + $0x98] sm:$0xff]  }
 0x56a   : > { %6971 = vrot.lane.b32.xlu1 %v13634_v51, %s11905_s25  ;;  %v6151_v55 = vmax.f32 %v6149_v3, %v6150_v59  ;;  %v6144_v43 = vsel %vm5962_vm11, %v5958_v39, -inf  ;;  %v5959_v26 = vmax.f32 %v5831_v36, 0.0  ;;  %v11646_v51 = vld [vmem:[%s16462_s4 + $0xc8] sm:$0xff]  }
 0x56b   : > { %v11115_v19 = vpop.f32.mrb[128].mxu0  ;;  %v6145_v48 = vmax.f32 %v6143_v9, %v6144_v43  ;;  %v6153_v20 = vsel %vm5962_vm11, %v5961_v5, -inf  ;;  %11213 = vmatprep.subr.bf16.mxu1 %v11646_v51  ;;  %v11653_v43 = vld [vmem:[%s16462_s4 + $0xe0] sm:$0xff]  }
 0x56c   : > { %v11116_v15 = vpop.f32.mrb[129].mxu0  ;;  %6217 = vst.msk [vmem:[#allocation3 + $0x1f0] sm:$0xff] %vm5962_vm11, %v6151_v55  ;;  %v6154_v47 = vmax.f32 %v6152_v45, %v6153_v20  ;;  %v6147_v31 = vsel %vm5962_vm11, %v5959_v26, -inf  ;;  %11214 = vmatpush3.bf16.msra.mxu1 %v11647_v46  ;;  %v11656_v45 = vld [vmem:[%s16462_s4 + $0xa8] sm:$0xff]  }
 0x56d   : > { %v15399_v27 = vadd.f32 %v11116_v15, %v11115_v19  ;;  %v11118_v25 = vpop.f32.mrb[130].mxu0  ;;  %6215 = vst.msk [vmem:[#allocation3 + $0x1e0] sm:$0xff] %vm5962_vm11, %v6145_v48  ;;  %v6148_v41 = vmax.f32 %v6146_v12, %v6147_v31  ;;  %11215 = vmatprep.subr.bf16.mxu1 %v11648_v35  ;;  %v11654_v19 = vld [vmem:[%s16462_s4 + $0xa0] sm:$0xff]   ;;  %v11657_v12 = vld [vmem:[%s16462_s4 + $0xf0] sm:$0xff]  }
 0x56e   : > { %6598 = vrot.lane.b32.xlu1 %v14710_v14, %s11905_s25  ;;  %v11119_v30 = vpop.f32.mrb[131].mxu0  ;;  %6218 = vst.msk [vmem:[#allocation3 + $0x1f8] sm:$0xff] %vm5962_vm11, %v6154_v47 }
 0x56f   : > { %v15403_v0 = vadd.f32 %v11119_v30, %v11118_v25  ;;  %6216 = vst.msk [vmem:[#allocation3 + $0x1e8] sm:$0xff] %vm5962_vm11, %v6148_v41  ;;  %v7351_v41 = vld [vmem:[#allocation5 + $0x208] sm:$0xff] }
 0x570   : > { %11216 = vmatpush3.bf16.msra.mxu1 %v11649_v58 }
 0x571   : > { %11217 = vmatprep.subr.bf16.mxu1 %v11650_v42 }
 0x572   : > { %6973 = vrot.lane.b32.xlu1 %v13846_v28, %s11905_s25 }
 0x573   : > { %v11121_v56 = vpop.f32.mrb[132].mxu0 }
 0x574   : > { %v11122_v50 = vpop.f32.mrb[133].mxu0  ;;  %11218 = vmatpush3.bf16.msra.mxu1 %v11652_v53  ;;  %v11660_v53 = vld [vmem:[%s16462_s4 + $0xb8] sm:$0xff]  }
 0x575   : > { %v15425_v28 = vadd.f32 %v11122_v50, %v11121_v56  ;;  %v11124_v38 = vpop.f32.mrb[134].mxu0  ;;  %v6281_v39 = vld [vmem:[#allocation3 + $0x1f0] ss:$2 sm:$0xff]  ;;  %v6345_v36 = vld [vmem:[#allocation3 + $0x1f1] ss:$2 sm:$0xff]  ;;  %11219 = vmatprep.subr.bf16.mxu1 %v11653_v43 }
 0x576   : > { %6600 = vrot.lane.b32.xlu1 %v14945_v44, %s11905_s25  ;;  %v11125_v3 = vpop.f32.mrb[135].mxu0  ;;  %v6377_v59 = vmax.f32 %v6281_v39, %v6345_v36  ;;  %v6279_v5 = vld [vmem:[#allocation3 + $0x1e0] ss:$2 sm:$0xff]  ;;  %v6343_v9 = vld [vmem:[#allocation3 + $0x1e1] ss:$2 sm:$0xff]  ;;  %v11659_v56 = vld [vmem:[%s16462_s4 + $0xf8] sm:$0xff]  }
 0x577   : > { %v15427_v55 = vadd.f32 %v11125_v3, %v11124_v38  ;;  %v6376_v26 = vmax.f32 %v6279_v5, %v6343_v9  ;;  %v7301_v38 = vld [vmem:[#allocation5 + $0x78] sm:$0xff]  ;;  %v7060_v5 = vld [vmem:[#allocation4 + $0x227] sm:$0xff]  ;;  %v7061_v9 = vld [vmem:[#allocation4 + $0x22f] sm:$0xff] }
 0x578   : > { %6451 = vst.msk [vmem:[#allocation4 + $0x210] sm:$0xff] %vm5962_vm11, %v6377_v59  ;;  %11220 = vmatpush3.bf16.msra.mxu1 %v11654_v19  ;;  %v11661_v59 = vld [vmem:[%s16462_s4 + $0x110] sm:$0xff]   ;;  %v7077_v43 = vpack.c.bf16 %v7061_v9, %v7060_v5 }
 0x579   : > { %6450 = vst.msk [vmem:[#allocation4 + $0x208] sm:$0xff] %vm5962_vm11, %v6376_v26  ;;  %11485 = vmatprep.subr.bf16.mxu0 %v11661_v59 }
 0x57a   : > { %6975 = vrot.lane.b32.xlu1 %v14066_v7, %s11905_s25  ;;  %v11655_v7 = vld [vmem:[%s16462_s4 + $0xe8] sm:$0xff]   ;;  %11486 = vmatpush3.bf16.msra.mxu0 %v11661_v59  ;;  %7093 = vst.msk [vmem:[#allocation5 + $0x270] sm:$0xff] %vm5962_vm11, %v7077_v43 }
 0x57b   : > { %v6609_v46 = vpop.permute.xlu1 %6608  ;;  %11221 = vmatprep.subr.bf16.mxu1 %v11655_v7  ;;  %v11671_v43 = vld [vmem:[%s16465_s7 + $0x24] ss:$8 sps:$4 sm:$0xff]  }
 0x57c   : > { %v6800_v51 = vpop.permute.xlu0 %6799  ;;  %6643 = vst.msk [vmem:[#allocation5 + $0x230] sm:$0xff] %vm6628_vm12, %v6609_v46  ;;  %11222 = vmatpush3.bf16.msra.mxu1 %v11656_v45  ;;  %v7253_v46 = vld [vmem:[#allocation4 + $0x231] sm:$0xff] }
 0x57d   : > { %6834 = vst.msk [vmem:[#allocation5 + $0x210] sm:$0xff] %vm6628_vm12, %v6800_v51  ;;  %11223 = vmatprep.subr.bf16.mxu1 %v11657_v12  ;;  %v7252_v51 = vld [vmem:[#allocation4 + $0x229] sm:$0xff] }
 0x57e   : > { %6602 = vrot.lane.b32.xlu1 %v15098_v24, %s11905_s25  ;;  %v7269_v7 = vpack.c.bf16 %v7253_v46, %v7252_v51 }
 0x57f   : > { %v6589_v20 = vpop.permute.xlu1 %6588  ;;  %v7123_v15 = vld [vmem:[#allocation4 + $0x210] sm:$0xff] }
 0x580   : > { %v6780_v48 = vpop.permute.xlu0 %6779  ;;  %6633 = vst.msk [vmem:[#allocation5 + $0xa0] sm:$0xff] %vm6628_vm12, %v6589_v20  ;;  %v6739_v31 = vld [vmem:[#allocation4 + $0x207] sm:$0xff]  ;;  %v6740_v25 = vld [vmem:[#allocation4 + $0x20f] sm:$0xff] }
 0x581   : > { %6824 = vst.msk [vmem:[#allocation5 + $0x80] sm:$0xff] %vm6628_vm12, %v6780_v48  ;;  %v6756_v30 = vpack.c.bf16 %v6740_v25, %v6739_v31  ;;  %v7122_v35 = vld [vmem:[#allocation4 + $0x208] sm:$0xff]  ;;  %v7251_v3 = vld [vmem:[#allocation4 + $0x211] sm:$0xff] }
 0x582   : > { %6977 = vrot.lane.b32.xlu1 %v14279_v63, %s11905_s25  ;;  %v15456_v58 = vpack.c.bf16 %v7123_v15, %v7122_v35  ;;  %v11658_v63 = vld [vmem:[%s16462_s4 + $0xb0] sm:$0xff]   ;;  %v7058_v42 = vld [vmem:[#allocation4 + $0x207] sm:$0xff]  ;;  %7285 = vst.msk [vmem:[#allocation5 + $0x278] sm:$0xff] %vm5962_vm11, %v7269_v7 }
 0x583   : > { %6803 = vrot.lane.b32.xlu0 %v6756_v30, %s11905_s25  ;;  %11224 = vmatpush3.bf16.msra.mxu1 %v11658_v63  ;;  %v7059_v50 = vld [vmem:[#allocation4 + $0x20f] sm:$0xff] }
 0x584   : > { %v7352_v47 = vld [vmem:[#allocation5 + $0x210] sm:$0xff]  ;;  %6900 = vst.msk [vmem:[#allocation5 + $0x268] sm:$0xff] %vm5962_vm11, %v15456_v58  ;;  %11225 = vmatprep.subr.bf16.mxu1 %v11659_v56  ;;  %v7076_v39 = vpack.c.bf16 %v7059_v50, %v7058_v42 }
 0x585   : > { %7838 = vmatprep.mubr.bf16.mxu1 %v7352_v47  ;;  %v7250_v36 = vld [vmem:[#allocation4 + $0x209] sm:$0xff]  ;;  %v11674_v7 = vld [vmem:[%s16465_s7 + $0x34] ss:$8 sps:$4 sm:$0xff]  }
 0x586   : > { %7839 = vmatmul.mubr.bf16.gmra.mrb[4].mxu1 %v7351_v41  ;;  %6979 = vrot.lane.b32.xlu1 %v14492_v57, %s11905_s25  ;;  %v7268_v57 = vpack.c.bf16 %v7251_v3, %v7250_v36  ;;  %7092 = vst.msk [vmem:[#allocation5 + $0x248] sm:$0xff] %vm5962_vm11, %v7076_v39 }
 0x587   : > { %6783 = vrot.lane.b32.xlu0 %v14068_v11, %s11905_s25  ;;  %11226 = vmatpush3.bf16.msra.mxu1 %v11660_v53  ;;  %v6931_v11 = vld [vmem:[#allocation4 + $0x209] sm:$0xff] }
 0x588   : > { %v7302_v23 = vld [vmem:[#allocation5 + $0x80] sm:$0xff]  ;;  %7284 = vst.msk [vmem:[#allocation5 + $0x250] sm:$0xff] %vm5962_vm11, %v7268_v57 }
 0x589   : > { %7758 = vmatprep.mubr.bf16.mxu0 %v7302_v23 }
 0x58a   : > { %7759 = vmatmul.mubr.bf16.gmra.mrb[140].mxu0 %v7301_v38  ;;  %6981 = vrot.lane.b32.xlu1 %v14712_v4, %s11905_s25 }
 0x58b   : > { %7158 = vrot.lane.b32.xlu0 %v15194_v16, %s11905_s25 }
 0x58e   : > { %6983 = vrot.lane.b32.xlu1 %v14947_v18, %s11905_s25  ;;  %v7356_v18 = vld [vmem:[#allocation5 + $0x230] sm:$0xff] }
 0x58f   : > { %6785 = vrot.lane.b32.xlu0 %v14281_v52, %s11905_s25  ;;  %v6932_v52 = vld [vmem:[#allocation4 + $0x211] sm:$0xff] }
 0x592   : > { %6985 = vrot.lane.b32.xlu1 %v15100_v54, %s11905_s25  ;;  %v7306_v54 = vld [vmem:[#allocation5 + $0xa0] sm:$0xff] }
 0x593   : > { %7160 = vrot.lane.b32.xlu0 %v13420_v22, %s11905_s25  ;;  %v6948_v22 = vpack.c.bf16 %v6932_v52, %v6931_v11 }
 0x596   : > { %6987 = vrot.lane.b32.xlu1 %v15182_v34, %s11905_s25  ;;  %v7125_v34 = vld [vmem:[#allocation4 + $0x230] sm:$0xff] }
 0x597   : > { %6787 = vrot.lane.b32.xlu0 %v14494_v10, %s11905_s25  ;;  %v11662_v10 = vld [vmem:[%s16462_s4 + $0x118] sm:$0xff]  }
 0x598   : > { %11487 = vmatprep.subr.bf16.mxu0 %v11662_v10 }
 0x599   : > { %11488 = vmatpush3.bf16.msra.mxu0 %v11662_v10 }
 0x59a   : > { %6989 = vrot.lane.b32.xlu1 %v15236_v40, %s11905_s25 }
 0x59b   : > { %7162 = vrot.lane.b32.xlu0 %v13632_v2, %s11905_s25 }
 0x59e   : > { %6991 = vrot.lane.b32.xlu1 %v15287_v33, %s11905_s25 }
 0x59f   : > { %6789 = vrot.lane.b32.xlu0 %v14717_v6, %s11905_s25 }
 0x5a2   : > { %6993 = vrot.lane.b32.xlu1 %v15338_v62, %s11905_s25 }
 0x5a3   : > { %7164 = vrot.lane.b32.xlu0 %v13844_v61, %s11905_s25 }
 0x5a6   : > { %6995 = vrot.lane.b32.xlu1 %v6948_v22, %s11905_s25 }
 0x5a7   : > { %6791 = vrot.lane.b32.xlu0 %v14952_v60, %s11905_s25 }
 0x5ab   : > { %7166 = vrot.lane.b32.xlu0 %v14061_v17, %s11905_s25 }
 0x5af   : > { %6793 = vrot.lane.b32.xlu0 %v15103_v1, %s11905_s25 }
 0x5b3   : > { %7168 = vrot.lane.b32.xlu0 %v14274_v29, %s11905_s25 }
 0x5b7   : > { %6795 = vrot.lane.b32.xlu0 %v15179_v8, %s11905_s25 }
 0x5bb   : > { %7170 = vrot.lane.b32.xlu0 %v14487_v32, %s11905_s25 }
 0x5bc   : > { %v6611_v61 = vpop.permute.xlu1 %6610 }
 0x5bd   : > { %6644 = vst.msk [vmem:[#allocation5 + $0x258] sm:$0xff] %vm6628_vm12, %v6611_v61 }
 0x5be   : > { %v6802_v2 = vpop.permute.xlu0 %6801 }
 0x5bf   : > { %6835 = vst.msk [vmem:[#allocation5 + $0x238] sm:$0xff] %vm6628_vm12, %v6802_v2  ;;  %7172 = vrot.lane.b32.xlu0 %v14710_v14, %s11905_s25 }
 0x5c0   : > { %v6591_v17 = vpop.permute.xlu1 %6590 }
 0x5c1   : > { %6634 = vst.msk [vmem:[#allocation5 + $0xc8] sm:$0xff] %vm6628_vm12, %v6591_v17 }
 0x5c2   : > { %v6782_v4 = vpop.permute.xlu0 %6781 }
 0x5c3   : > { %6825 = vst.msk [vmem:[#allocation5 + $0xa8] sm:$0xff] %vm6628_vm12, %v6782_v4  ;;  %7174 = vrot.lane.b32.xlu0 %v14945_v44, %s11905_s25 }
 0x5c4   : > { %v6966_v6 = vpop.permute.xlu1 %6965  ;;  %v7361_v47 = vld [vmem:[#allocation5 + $0x258] sm:$0xff] }
 0x5c5   : > { %7013 = vst.msk [vmem:[#allocation5 + $0x10] sm:$0xff] %vm6628_vm12, %v6966_v6 }
 0x5c6   : > { %v7357_v29 = vld [vmem:[#allocation5 + $0x238] sm:$0xff] }
 0x5c7   : > { %7846 = vmatprep.mubr.bf16.mxu1 %v7357_v29  ;;  %7176 = vrot.lane.b32.xlu0 %v15098_v24, %s11905_s25  ;;  %v7124_v24 = vld [vmem:[#allocation4 + $0x228] sm:$0xff] }
 0x5c8   : > { %7847 = vmatmul.mubr.bf16.gmra.mrb[8].mxu1 %v7356_v18  ;;  %v6593_v60 = vpop.permute.xlu1 %6592  ;;  %v7141_v16 = vpack.c.bf16 %v7125_v34, %v7124_v24  ;;  %v7311_v30 = vld [vmem:[#allocation5 + $0xc8] sm:$0xff] }
 0x5c9   : > { %6635 = vst.msk [vmem:[#allocation5 + $0xf0] sm:$0xff] %vm6628_vm12, %v6593_v60 }
 0x5ca   : > { %v7307_v32 = vld [vmem:[#allocation5 + $0xa8] sm:$0xff] }
 0x5cb   : > { %7766 = vmatprep.mubr.bf16.mxu0 %v7307_v32  ;;  %7178 = vrot.lane.b32.xlu0 %v15184_v21, %s11905_s25 }
 0x5cc   : > { %7767 = vmatmul.mubr.bf16.gmra.mrb[144].mxu0 %v7306_v54  ;;  %v6968_v14 = vpop.permute.xlu1 %6967  ;;  %v7288_v56 = vld [vmem:[#allocation5 + $0x10] sm:$0xff] }
 0x5cd   : > { %7014 = vst.msk [vmem:[#allocation5 + $0x38] sm:$0xff] %vm6628_vm12, %v6968_v14 }
 0x5cf   : > { %7180 = vrot.lane.b32.xlu0 %v15238_v37, %s11905_s25 }
 0x5d0   : > { %v6595_v1 = vpop.permute.xlu1 %6594  ;;  %v7316_v50 = vld [vmem:[#allocation5 + $0xf0] sm:$0xff] }
 0x5d1   : > { %6636 = vst.msk [vmem:[#allocation5 + $0x118] sm:$0xff] %vm6628_vm12, %v6595_v1 }
 0x5d3   : > { %7182 = vrot.lane.b32.xlu0 %v15285_v49, %s11905_s25 }
 0x5d4   : > { %v6970_v44 = vpop.permute.xlu1 %6969  ;;  %v7293_v3 = vld [vmem:[#allocation5 + $0x38] sm:$0xff] }
 0x5d5   : > { %7015 = vst.msk [vmem:[#allocation5 + $0x60] sm:$0xff] %vm6628_vm12, %v6970_v44 }
 0x5d7   : > { %7184 = vrot.lane.b32.xlu0 %v15336_v13, %s11905_s25 }
 0x5d8   : > { %v6597_v8 = vpop.permute.xlu1 %6596  ;;  %v7321_v52 = vld [vmem:[#allocation5 + $0x118] sm:$0xff] }
 0x5d9   : > { %6637 = vst.msk [vmem:[#allocation5 + $0x140] sm:$0xff] %vm6628_vm12, %v6597_v8 }
 0x5db   : > { %7186 = vrot.lane.b32.xlu0 %v15456_v58, %s11905_s25 }
 0x5dc   : > { %v6972_v21 = vpop.permute.xlu1 %6971  ;;  %v7298_v17 = vld [vmem:[#allocation5 + $0x60] sm:$0xff] }
 0x5dd   : > { %7016 = vst.msk [vmem:[#allocation5 + $0x88] sm:$0xff] %vm6628_vm12, %v6972_v21 }
 0x5df   : > { %7188 = vrot.lane.b32.xlu0 %v7141_v16, %s11905_s25  ;;  %v11663_v16 = vld [vmem:[%s16465_s7] ss:$8 sps:$4 sm:$0xff]  }
 0x5e0   : > { %v6599_v40 = vpop.permute.xlu1 %6598  ;;  %v7326_v44 = vld [vmem:[#allocation5 + $0x140] sm:$0xff] }
 0x5e1   : > { %6638 = vst.msk [vmem:[#allocation5 + $0x168] sm:$0xff] %vm6628_vm12, %v6599_v40  ;;  %v11665_v40 = vld [vmem:[%s16465_s7 + $0x4] ss:$8 sps:$4 sm:$0xff]  }
 0x5e2   : > { %9443 = vmatprep.subr.bf16.mxu1 %v11665_v40 }
 0x5e4   : > { %v6974_v37 = vpop.permute.xlu1 %6973 }
 0x5e5   : > { %7017 = vst.msk [vmem:[#allocation5 + $0xb0] sm:$0xff] %vm6628_vm12, %v6974_v37 }
 0x5e8   : > { %v6601_v49 = vpop.permute.xlu1 %6600 }
 0x5e9   : > { %6639 = vst.msk [vmem:[#allocation5 + $0x190] sm:$0xff] %vm6628_vm12, %v6601_v49 }
 0x5ec   : > { %v6976_v33 = vpop.permute.xlu1 %6975 }
 0x5ed   : > { %7018 = vst.msk [vmem:[#allocation5 + $0xd8] sm:$0xff] %vm6628_vm12, %v6976_v33  ;;  %v11668_v33 = vld [vmem:[%s16465_s7 + $0x14] ss:$8 sps:$4 sm:$0xff]  }
 0x5f0   : > { %v6603_v13 = vpop.permute.xlu1 %6602 }
 0x5f1   : > { %6640 = vst.msk [vmem:[#allocation5 + $0x1b8] sm:$0xff] %vm6628_vm12, %v6603_v13  ;;  %v7303_v13 = vld [vmem:[#allocation5 + $0x88] sm:$0xff] }
 0x5f4   : > { %v6978_v62 = vpop.permute.xlu1 %6977 }
 0x5f5   : > { %7019 = vst.msk [vmem:[#allocation5 + $0x100] sm:$0xff] %vm6628_vm12, %v6978_v62  ;;  %v6804_v19 = vpop.permute.xlu0 %6803  ;;  %v11666_v62 = vld [vmem:[%s16465_s7 + $0x10] ss:$8 sps:$4 sm:$0xff]  }
 0x5f6   : > { %6836 = vst.msk [vmem:[#allocation5 + $0x260] sm:$0xff] %vm6628_vm12, %v6804_v19  ;;  %v11669_v19 = vld [vmem:[%s16465_s7 + $0x20] ss:$8 sps:$4 sm:$0xff]  }
 0x5f8   : > { %v6980_v26 = vpop.permute.xlu1 %6979 }
 0x5f9   : > { %7020 = vst.msk [vmem:[#allocation5 + $0x128] sm:$0xff] %vm6628_vm12, %v6980_v26  ;;  %v6784_v48 = vpop.permute.xlu0 %6783  ;;  %v7331_v26 = vld [vmem:[#allocation5 + $0x168] sm:$0xff] }
 0x5fa   : > { %6826 = vst.msk [vmem:[#allocation5 + $0xd0] sm:$0xff] %vm6628_vm12, %v6784_v48  ;;  %v11672_v48 = vld [vmem:[%s16465_s7 + $0x30] ss:$8 sps:$4 sm:$0xff]  }
 0x5fc   : > { %v6982_v45 = vpop.permute.xlu1 %6981 }
 0x5fd   : > { %7021 = vst.msk [vmem:[#allocation5 + $0x150] sm:$0xff] %vm6628_vm12, %v6982_v45  ;;  %v7159_v15 = vpop.permute.xlu0 %7158  ;;  %v7362_v12 = vld [vmem:[#allocation5 + $0x260] sm:$0xff]  ;;  %v7308_v45 = vld [vmem:[#allocation5 + $0xb0] sm:$0xff] }
 0x5fe   : > { %7206 = vst.msk [vmem:[#allocation5 + $0x18] sm:$0xff] %vm6628_vm12, %v7159_v15  ;;  %7854 = vmatprep.mubr.bf16.mxu1 %v7362_v12  ;;  %v11677_v12 = vld [vmem:[%s16465_s7 + $0x44] ss:$8 sps:$4 sm:$0xff]  }
 0x5ff   : > { %7855 = vmatmul.mubr.bf16.gmra.mrb[12].mxu1 %v7361_v47  ;;  %v7336_v47 = vld [vmem:[#allocation5 + $0x190] sm:$0xff] }
 0x600   : > { %v6984_v20 = vpop.permute.xlu1 %6983 }
 0x601   : > { %7022 = vst.msk [vmem:[#allocation5 + $0x178] sm:$0xff] %vm6628_vm12, %v6984_v20  ;;  %v6786_v25 = vpop.permute.xlu0 %6785  ;;  %v7312_v41 = vld [vmem:[#allocation5 + $0xd0] sm:$0xff] }
 0x602   : > { %6827 = vst.msk [vmem:[#allocation5 + $0xf8] sm:$0xff] %vm6628_vm12, %v6786_v25  ;;  %7774 = vmatprep.mubr.bf16.mxu0 %v7312_v41 }
 0x603   : > { %7775 = vmatmul.mubr.bf16.gmra.mrb[148].mxu0 %v7311_v30  ;;  %v7313_v30 = vld [vmem:[#allocation5 + $0xd8] sm:$0xff] }
 0x604   : > { %v6986_v31 = vpop.permute.xlu1 %6985 }
 0x605   : > { %7023 = vst.msk [vmem:[#allocation5 + $0x1a0] sm:$0xff] %vm6628_vm12, %v6986_v31  ;;  %v7161_v58 = vpop.permute.xlu0 %7160  ;;  %v7289_v63 = vld [vmem:[#allocation5 + $0x18] sm:$0xff]  ;;  %v11675_v31 = vld [vmem:[%s16465_s7 + $0x40] ss:$8 sps:$4 sm:$0xff]  }
 0x606   : > { %7207 = vst.msk [vmem:[#allocation5 + $0x40] sm:$0xff] %vm6628_vm12, %v7161_v58  ;;  %7895 = vmatprep.mubr.bf16.mxu1 %v7289_v63  ;;  %v7341_v63 = vld [vmem:[#allocation5 + $0x1b8] sm:$0xff] }
 0x607   : > { %7896 = vmatmul.mubr.bf16.vlgmr.msra.gmra.mrb[16].mxu1 %v7288_v56  ;;  %v7290_v56 = vld [vmem:[#allocation5 + $0x20] sm:$0xff] }
 0x608   : > { %v6988_v35 = vpop.permute.xlu1 %6987  ;;  %9444 = vmatpush1.bf16.msra.mxu1 %v11663_v16 }
 0x609   : > { %7024 = vst.msk [vmem:[#allocation5 + $0x1c8] sm:$0xff] %vm6628_vm12, %v6988_v35  ;;  %v6788_v23 = vpop.permute.xlu0 %6787  ;;  %v7317_v53 = vld [vmem:[#allocation5 + $0xf8] sm:$0xff]  ;;  %9445 = vmatprep.subr.bf16.mxu1 %v11668_v33 }
 0x60a   : > { %6828 = vst.msk [vmem:[#allocation5 + $0x120] sm:$0xff] %vm6628_vm12, %v6788_v23  ;;  %7782 = vmatprep.mubr.bf16.mxu0 %v7317_v53  ;;  %v7318_v53 = vld [vmem:[#allocation5 + $0x100] sm:$0xff] }
 0x60b   : > { %7783 = vmatmul.mubr.bf16.gmra.mrb[152].mxu0 %v7316_v50 }
 0x60c   : > { %v6990_v42 = vpop.permute.xlu1 %6989  ;;  %9446 = vmatpush1.bf16.msra.mxu1 %v11666_v62 }
 0x60d   : > { %7025 = vst.msk [vmem:[#allocation5 + $0x1f0] sm:$0xff] %vm6628_vm12, %v6990_v42  ;;  %v7163_v39 = vpop.permute.xlu0 %7162  ;;  %v7294_v36 = vld [vmem:[#allocation5 + $0x40] sm:$0xff]  ;;  %9447 = vmatprep.subr.bf16.mxu1 %v11671_v43  ;;  %v11680_v43 = vld [vmem:[%s16465_s7 + $0x54] ss:$8 sps:$4 sm:$0xff]  }
 0x60e   : > { %7208 = vst.msk [vmem:[#allocation5 + $0x68] sm:$0xff] %vm6628_vm12, %v7163_v39  ;;  %7903 = vmatprep.mubr.bf16.mxu1 %v7294_v36  ;;  %v7295_v39 = vld [vmem:[#allocation5 + $0x48] sm:$0xff]  ;;  %v7300_v36 = vld [vmem:[#allocation5 + $0x70] sm:$0xff] }
 0x60f   : > { %7904 = vmatmul.mubr.bf16.gmra.mrb[20].mxu1 %v7293_v3 }
 0x610   : > { %v6992_v38 = vpop.permute.xlu1 %6991  ;;  %9448 = vmatpush1.bf16.msra.mxu1 %v11669_v19 }
 0x611   : > { %7026 = vst.msk [vmem:[#allocation5 + $0x218] sm:$0xff] %vm6628_vm12, %v6992_v38  ;;  %v6790_v59 = vpop.permute.xlu0 %6789  ;;  %v7322_v11 = vld [vmem:[#allocation5 + $0x120] sm:$0xff]  ;;  %9449 = vmatprep.subr.bf16.mxu1 %v11674_v7  ;;  %v7340_v7 = vld [vmem:[#allocation5 + $0x1b0] sm:$0xff] }
 0x612   : > { %6829 = vst.msk [vmem:[#allocation5 + $0x148] sm:$0xff] %vm6628_vm12, %v6790_v59  ;;  %7790 = vmatprep.mubr.bf16.mxu0 %v7322_v11 }
 0x613   : > { %7791 = vmatmul.mubr.bf16.gmra.mrb[156].mxu0 %v7321_v52  ;;  %v7305_v52 = vld [vmem:[#allocation5 + $0x98] sm:$0xff] }
 0x614   : > { %v6994_v57 = vpop.permute.xlu1 %6993  ;;  %9450 = vmatpush1.bf16.msra.mxu1 %v11672_v48  ;;  %v7343_v48 = vld [vmem:[#allocation5 + $0x1c8] sm:$0xff] }
 0x615   : > { %7027 = vst.msk [vmem:[#allocation5 + $0x240] sm:$0xff] %vm6628_vm12, %v6994_v57  ;;  %v7299_v2 = vld [vmem:[#allocation5 + $0x68] sm:$0xff]  ;;  %v7165_v61 = vpop.permute.xlu0 %7164  ;;  %9451 = vmatprep.subr.bf16.mxu1 %v11677_v12 }
 0x616   : > { %7911 = vmatprep.mubr.bf16.mxu1 %v7299_v2  ;;  %7209 = vst.msk [vmem:[#allocation5 + $0x90] sm:$0xff] %vm6628_vm12, %v7165_v61  ;;  %v7323_v57 = vld [vmem:[#allocation5 + $0x128] sm:$0xff]  ;;  %v7328_v2 = vld [vmem:[#allocation5 + $0x150] sm:$0xff] }
 0x617   : > { %7912 = vmatmul.mubr.bf16.gmra.mrb[24].mxu1 %v7298_v17  ;;  %v7315_v17 = vld [vmem:[#allocation5 + $0xe8] sm:$0xff] }
 0x618   : > { %v6996_v22 = vpop.permute.xlu1 %6995  ;;  %9452 = vmatpush1.bf16.msra.mxu1 %v11675_v31  ;;  %v11683_v12 = vld [vmem:[%s16465_s7 + $0x64] ss:$8 sps:$4 sm:$0xff]  }
 0x619   : > { %7028 = vst.msk [vmem:[#allocation5 + $0x268] sm:$0xff] %vm6628_vm12, %v6996_v22  ;;  %v7327_v54 = vld [vmem:[#allocation5 + $0x148] sm:$0xff]  ;;  %v6792_v14 = vpop.permute.xlu0 %6791  ;;  %v7310_v22 = vld [vmem:[#allocation5 + $0xc0] sm:$0xff]  ;;  %9453 = vmatprep.subr.bf16.mxu1 %v11680_v43 }
 0x61a   : > { %v11187_v10 = vpop.f32.mrb[0].mxu1  ;;  %7798 = vmatprep.mubr.bf16.mxu0 %v7327_v54  ;;  %6830 = vst.msk [vmem:[#allocation5 + $0x170] sm:$0xff] %vm6628_vm12, %v6792_v14  ;;  %v7350_v31 = vld [vmem:[#allocation5 + $0x200] sm:$0xff] }
 0x61b   : > { %v11188_v4 = vpop.f32.mrb[1].mxu1  ;;  %7799 = vmatmul.mubr.bf16.gmra.mrb[160].mxu0 %v7326_v44  ;;  %v7330_v44 = vld [vmem:[#allocation5 + $0x160] sm:$0xff] }
 0x61c   : > { %v15577_v29 = vadd.f32 %v11188_v4, %v11187_v10  ;;  %v11190_v6 = vpop.f32.mrb[2].mxu1 }
 0x61d   : > { %v11191_v18 = vpop.f32.mrb[3].mxu1  ;;  %v7167_v37 = vpop.permute.xlu0 %7166  ;;  %v7304_v49 = vld [vmem:[#allocation5 + $0x90] sm:$0xff] }
 0x61e   : > { %v15579_v32 = vadd.f32 %v11191_v18, %v11190_v6  ;;  %v11127_v60 = vpop.f32.mrb[136].mxu0  ;;  %7210 = vst.msk [vmem:[#allocation5 + $0xb8] sm:$0xff] %vm6628_vm12, %v7167_v37  ;;  %7919 = vmatprep.mubr.bf16.mxu1 %v7304_v49  ;;  %v7320_v6 = vld [vmem:[#allocation5 + $0x110] sm:$0xff]  ;;  %v7338_v37 = vld [vmem:[#allocation5 + $0x1a0] sm:$0xff] }
 0x61f   : > { %v11128_v1 = vpop.f32.mrb[137].mxu0  ;;  %7920 = vmatmul.mubr.bf16.gmra.mrb[28].mxu1 %v7303_v13 }
 0x620   : > { %v15582_v8 = vadd.f32 %v11128_v1, %v11127_v60  ;;  %v11130_v24 = vpop.f32.mrb[138].mxu0  ;;  %v7333_v60 = vld [vmem:[#allocation5 + $0x178] sm:$0xff] }
 0x621   : > { %v11131_v34 = vpop.f32.mrb[139].mxu0  ;;  %v6794_v5 = vpop.permute.xlu0 %6793  ;;  %v7332_v9 = vld [vmem:[#allocation5 + $0x170] sm:$0xff]  ;;  %v7325_v1 = vld [vmem:[#allocation5 + $0x138] sm:$0xff] }
 0x622   : > { %v15584_v21 = vadd.f32 %v11131_v34, %v11130_v24  ;;  %6831 = vst.msk [vmem:[#allocation5 + $0x198] sm:$0xff] %vm6628_vm12, %v6794_v5  ;;  %7806 = vmatprep.mubr.bf16.mxu0 %v7332_v9  ;;  %v11678_v9 = vld [vmem:[%s16465_s7 + $0x50] ss:$8 sps:$4 sm:$0xff]  }
 0x623   : > { %7807 = vmatmul.mubr.bf16.gmra.mrb[164].mxu0 %v7331_v26  ;;  %9454 = vmatpush1.bf16.msra.mxu1 %v11678_v9  ;;  %v11713_v9 = vld [vmem:[%s16465_s7 + $0x104] ss:$8 sps:$4 sm:$0xff]  }
 0x624   : > { %9455 = vmatprep.subr.bf16.mxu1 %v11683_v12 }
 0x625   : > { %v7169_v51 = vpop.permute.xlu0 %7168  ;;  %v7309_v46 = vld [vmem:[#allocation5 + $0xb8] sm:$0xff] }
 0x626   : > { %7211 = vst.msk [vmem:[#allocation5 + $0xe0] sm:$0xff] %vm6628_vm12, %v7169_v51  ;;  %7927 = vmatprep.mubr.bf16.mxu1 %v7309_v46  ;;  %v7335_v51 = vld [vmem:[#allocation5 + $0x188] sm:$0xff] }
 0x627   : > { %7928 = vmatmul.mubr.bf16.gmra.mrb[32].mxu1 %v7308_v45 }
 0x629   : > { %v6796_v20 = vpop.permute.xlu0 %6795  ;;  %v7337_v15 = vld [vmem:[#allocation5 + $0x198] sm:$0xff] }
 0x62a   : > { %6832 = vst.msk [vmem:[#allocation5 + $0x1c0] sm:$0xff] %vm6628_vm12, %v6796_v20  ;;  %7814 = vmatprep.mubr.bf16.mxu0 %v7337_v15  ;;  %v11681_v15 = vld [vmem:[%s16465_s7 + $0x60] ss:$8 sps:$4 sm:$0xff]  }
 0x62b   : > { %7815 = vmatmul.mubr.bf16.gmra.mrb[168].mxu0 %v7336_v47  ;;  %v7345_v47 = vld [vmem:[#allocation5 + $0x1d8] sm:$0xff]  ;;  %9456 = vmatpush1.bf16.msra.mxu1 %v11681_v15 }
 0x62d   : > { %v7171_v25 = vpop.permute.xlu0 %7170  ;;  %v7314_v41 = vld [vmem:[#allocation5 + $0xe0] sm:$0xff] }
 0x62e   : > { %7212 = vst.msk [vmem:[#allocation5 + $0x108] sm:$0xff] %vm6628_vm12, %v7171_v25  ;;  %7935 = vmatprep.mubr.bf16.mxu1 %v7314_v41  ;;  %v7348_v25 = vld [vmem:[#allocation5 + $0x1f0] sm:$0xff] }
 0x62f   : > { %7936 = vmatmul.mubr.bf16.gmra.mrb[36].mxu1 %v7313_v30  ;;  %v11684_v30 = vld [vmem:[%s16465_s7 + $0x70] ss:$8 sps:$4 sm:$0xff]  }
 0x631   : > { %v7173_v35 = vpop.permute.xlu0 %7172  ;;  %v7342_v58 = vld [vmem:[#allocation5 + $0x1c0] sm:$0xff] }
 0x632   : > { %7213 = vst.msk [vmem:[#allocation5 + $0x130] sm:$0xff] %vm6628_vm12, %v7173_v35  ;;  %7822 = vmatprep.mubr.bf16.mxu0 %v7342_v58  ;;  %v11686_v35 = vld [vmem:[%s16465_s7 + $0x74] ss:$8 sps:$4 sm:$0xff]   ;;  %v7355_v58 = vld [vmem:[#allocation5 + $0x228] sm:$0xff] }
 0x633   : > { %7823 = vmatmul.mubr.bf16.gmra.mrb[172].mxu0 %v7341_v63  ;;  %v7360_v63 = vld [vmem:[#allocation5 + $0x250] sm:$0xff]  ;;  %9457 = vmatprep.subr.bf16.mxu1 %v11686_v35 }
 0x634   : > { %11489 = vmatprep.mubr.msk.bf16.mxu0 %vm5962_vm11, %v7290_v56  ;;  %9458 = vmatpush1.bf16.msra.mxu1 %v11684_v30  ;;  %v7353_v56 = vld [vmem:[#allocation5 + $0x218] sm:$0xff] }
 0x635   : > { %v7175_v42 = vpop.permute.xlu0 %7174  ;;  %v7319_v23 = vld [vmem:[#allocation5 + $0x108] sm:$0xff] }
 0x636   : > { %7214 = vst.msk [vmem:[#allocation5 + $0x158] sm:$0xff] %vm6628_vm12, %v7175_v42  ;;  %7943 = vmatprep.mubr.bf16.mxu1 %v7319_v23  ;;  %v7365_v23 = vld [vmem:[#allocation5 + $0x278] sm:$0xff] }
 0x637   : > { %7944 = vmatmul.mubr.bf16.gmra.mrb[40].mxu1 %v7318_v53  ;;  %v11687_v53 = vld [vmem:[%s16465_s7 + $0x80] ss:$8 sps:$4 sm:$0xff]  }
 0x639   : > { %v7177_v50 = vpop.permute.xlu0 %7176  ;;  %v7324_v38 = vld [vmem:[#allocation5 + $0x130] sm:$0xff] }
 0x63a   : > { %7215 = vst.msk [vmem:[#allocation5 + $0x180] sm:$0xff] %vm6628_vm12, %v7177_v50  ;;  %7951 = vmatprep.mubr.bf16.mxu1 %v7324_v38  ;;  %v11689_v50 = vld [vmem:[%s16465_s7 + $0x84] ss:$8 sps:$4 sm:$0xff]  }
 0x63b   : > { %11490 = vmatmul.mubr.msk.bf16.vlgmr.msra.gmra.mrb[176].mxu0 %vm5962_vm11, %v7295_v39  ;;  %9459 = vmatprep.subr.bf16.mxu1 %v11689_v50  ;;  %v7358_v39 = vld [vmem:[#allocation5 + $0x240] sm:$0xff] }
 0x63c   : > { %11493 = vmatprep.mubr.msk.bf16.mxu0 %vm5962_vm11, %v7300_v36  ;;  %9460 = vmatpush1.bf16.msra.mxu1 %v11687_v53  ;;  %v11690_v36 = vld [vmem:[%s16465_s7 + $0x90] ss:$8 sps:$4 sm:$0xff]  }
 0x63d   : > { %v7179_v3 = vpop.permute.xlu0 %7178  ;;  %v7329_v59 = vld [vmem:[#allocation5 + $0x158] sm:$0xff] }
 0x63e   : > { %7216 = vst.msk [vmem:[#allocation5 + $0x1a8] sm:$0xff] %vm6628_vm12, %v7179_v3  ;;  %v11692_v3 = vld [vmem:[%s16465_s7 + $0x94] ss:$8 sps:$4 sm:$0xff]  }
 0x63f   : > { %7952 = vmatmul.mubr.bf16.gmra.mrb[44].mxu1 %v7323_v57  ;;  %9461 = vmatprep.subr.bf16.mxu1 %v11692_v3  ;;  %v7363_v57 = vld [vmem:[#allocation5 + $0x268] sm:$0xff] }
 0x640   : > { %7959 = vmatprep.mubr.bf16.mxu1 %v7329_v59  ;;  %9462 = vmatpush1.bf16.msra.mxu1 %v11690_v36  ;;  %v11693_v59 = vld [vmem:[%s16465_s7 + $0xa0] ss:$8 sps:$4 sm:$0xff]  }
 0x641   : > { %v7181_v11 = vpop.permute.xlu0 %7180  ;;  %v7334_v61 = vld [vmem:[#allocation5 + $0x180] sm:$0xff] }
 0x642   : > { %7217 = vst.msk [vmem:[#allocation5 + $0x1d0] sm:$0xff] %vm6628_vm12, %v7181_v11  ;;  %v11695_v11 = vld [vmem:[%s16465_s7 + $0xa4] ss:$8 sps:$4 sm:$0xff]  }
 0x643   : > { %11494 = vmatmul.mubr.msk.bf16.gmra.mrb[180].mxu0 %vm5962_vm11, %v7305_v52  ;;  %9463 = vmatprep.subr.bf16.mxu1 %v11695_v11  ;;  %v11696_v52 = vld [vmem:[%s16465_s7 + $0xb0] ss:$8 sps:$4 sm:$0xff]  }
 0x644   : > { %11497 = vmatprep.mubr.msk.bf16.mxu0 %vm5962_vm11, %v7310_v22  ;;  %9464 = vmatpush1.bf16.msra.mxu1 %v11693_v59  ;;  %v11698_v22 = vld [vmem:[%s16465_s7 + $0xb4] ss:$8 sps:$4 sm:$0xff]  }
 0x645   : > { %v7183_v10 = vpop.permute.xlu0 %7182  ;;  %v7339_v54 = vld [vmem:[#allocation5 + $0x1a8] sm:$0xff]  ;;  %9465 = vmatprep.subr.bf16.mxu1 %v11698_v22 }
 0x646   : > { %7218 = vst.msk [vmem:[#allocation5 + $0x1f8] sm:$0xff] %vm6628_vm12, %v7183_v10 }
 0x647   : > { %7960 = vmatmul.mubr.bf16.gmra.mrb[48].mxu1 %v7328_v2 }
 0x648   : > { %7967 = vmatprep.mubr.bf16.mxu1 %v7334_v61  ;;  %9466 = vmatpush1.bf16.msra.mxu1 %v11696_v52 }
 0x649   : > { %v7185_v4 = vpop.permute.xlu0 %7184  ;;  %v7344_v33 = vld [vmem:[#allocation5 + $0x1d0] sm:$0xff] }
 0x64a   : > { %7219 = vst.msk [vmem:[#allocation5 + $0x220] sm:$0xff] %vm6628_vm12, %v7185_v4 }
 0x64b   : > { %11498 = vmatmul.mubr.msk.bf16.gmra.mrb[184].mxu0 %vm5962_vm11, %v7315_v17 }
 0x64c   : > { %11501 = vmatprep.mubr.msk.bf16.mxu0 %vm5962_vm11, %v7320_v6 }
 0x64d   : > { %v7187_v18 = vpop.permute.xlu0 %7186  ;;  %v7349_v20 = vld [vmem:[#allocation5 + $0x1f8] sm:$0xff] }
 0x64e   : > { %7220 = vst.msk [vmem:[#allocation5 + $0x248] sm:$0xff] %vm6628_vm12, %v7187_v18 }
 0x64f   : > { %7968 = vmatmul.mubr.bf16.gmra.mrb[52].mxu1 %v7333_v60 }
 0x650   : > { %7975 = vmatprep.mubr.bf16.mxu1 %v7339_v54 }
 0x651   : > { %v7189_v14 = vpop.permute.xlu0 %7188  ;;  %v7354_v41 = vld [vmem:[#allocation5 + $0x220] sm:$0xff] }
 0x652   : > { %7221 = vst.msk [vmem:[#allocation5 + $0x270] sm:$0xff] %vm6628_vm12, %v7189_v14 }
 0x653   : > { %11502 = vmatmul.mubr.msk.bf16.gmra.mrb[188].mxu0 %vm5962_vm11, %v7325_v1 }
 0x654   : > { %11505 = vmatprep.mubr.msk.bf16.mxu0 %vm5962_vm11, %v7330_v44 }
 0x655   : > { %v7359_v42 = vld [vmem:[#allocation5 + $0x248] sm:$0xff] }
 0x657   : > { %7976 = vmatmul.mubr.bf16.gmra.mrb[56].mxu1 %v7338_v37  ;;  %v11704_v37 = vld [vmem:[%s16465_s7 + $0xd4] ss:$8 sps:$4 sm:$0xff]  }
 0x658   : > { %7983 = vmatprep.mubr.bf16.mxu1 %v7344_v33  ;;  %v11705_v33 = vld [vmem:[%s16465_s7 + $0xe0] ss:$8 sps:$4 sm:$0xff]  }
 0x659   : > { %v11193_v24 = vpop.f32.mrb[4].mxu1  ;;  %v7364_v38 = vld [vmem:[#allocation5 + $0x270] sm:$0xff] }
 0x65a   : > { %v11194_v34 = vpop.f32.mrb[5].mxu1 }
 0x65b   : > { %v15639_v16 = vadd.f32 %v11194_v34, %v11193_v24  ;;  %v11196_v40 = vpop.f32.mrb[6].mxu1  ;;  %11506 = vmatmul.mubr.msk.bf16.gmra.mrb[192].mxu0 %vm5962_vm11, %v7335_v51  ;;  %v11699_v24 = vld [vmem:[%s16465_s7 + $0xc0] ss:$8 sps:$4 sm:$0xff]   ;;  %v11701_v34 = vld [vmem:[%s16465_s7 + $0xc4] ss:$8 sps:$4 sm:$0xff]  }
 0x65c   : > { %v11197_v49 = vpop.f32.mrb[7].mxu1  ;;  %11509 = vmatprep.mubr.msk.bf16.mxu0 %vm5962_vm11, %v7340_v7  ;;  %9467 = vmatprep.subr.bf16.mxu1 %v11701_v34 }
 0x65d   : > { %v15641_v13 = vadd.f32 %v11197_v49, %v11196_v40  ;;  %v11133_v62 = vpop.f32.mrb[140].mxu0  ;;  %9468 = vmatpush1.bf16.msra.mxu1 %v11699_v24  ;;  %v11702_v40 = vld [vmem:[%s16465_s7 + $0xd0] ss:$8 sps:$4 sm:$0xff]   ;;  %v11707_v49 = vld [vmem:[%s16465_s7 + $0xe4] ss:$8 sps:$4 sm:$0xff]  }
 0x65e   : > { %v11134_v5 = vpop.f32.mrb[141].mxu0  ;;  %9469 = vmatprep.subr.bf16.mxu1 %v11704_v37 }
 0x65f   : > { %v15649_v26 = vadd.f32 %v11134_v5, %v11133_v62  ;;  %v11136_v19 = vpop.f32.mrb[142].mxu0  ;;  %7984 = vmatmul.mubr.bf16.gmra.mrb[60].mxu1 %v7343_v48  ;;  %v11710_v62 = vld [vmem:[%s16465_s7 + $0xf4] ss:$8 sps:$4 sm:$0xff]   ;;  %v11708_v5 = vld [vmem:[%s16465_s7 + $0xf0] ss:$8 sps:$4 sm:$0xff]  }
 0x660   : > { %v11137_v46 = vpop.f32.mrb[143].mxu0  ;;  %7991 = vmatprep.mubr.bf16.mxu1 %v7349_v20 }
 0x661   : > { %v15652_v45 = vadd.f32 %v11137_v46, %v11136_v19  ;;  %9470 = vmatpush1.bf16.msra.mxu1 %v11702_v40 }
 0x662   : > { %9471 = vmatprep.subr.bf16.mxu1 %v11707_v49 }
 0x663   : > { %11510 = vmatmul.mubr.msk.bf16.gmra.mrb[196].mxu0 %vm5962_vm11, %v7345_v47 }
 0x664   : > { %11513 = vmatprep.mubr.msk.bf16.mxu0 %vm5962_vm11, %v7350_v31 }
 0x665   : > { %9472 = vmatpush1.bf16.msra.mxu1 %v11705_v33 }
 0x666   : > { %9473 = vmatprep.subr.bf16.mxu1 %v11710_v62 }
 0x667   : > { %7992 = vmatmul.mubr.bf16.gmra.mrb[64].mxu1 %v7348_v25 }
 0x668   : > { %7999 = vmatprep.mubr.bf16.mxu1 %v7354_v41 }
 0x669   : > { %9474 = vmatpush1.bf16.msra.mxu1 %v11708_v5 }
 0x66a   : > { %9516 = vmatprep.subr.bf16.mxu1 %v11713_v9 }
 0x66b   : > { %11514 = vmatmul.mubr.msk.bf16.gmra.mrb[200].mxu0 %vm5962_vm11, %v7355_v58 }
 0x66c   : > { %11517 = vmatprep.mubr.msk.bf16.mxu0 %vm5962_vm11, %v7360_v63 }
 0x66f   : > { %8000 = vmatmul.mubr.bf16.gmra.mrb[68].mxu1 %v7353_v56 }
 0x670   : > { %8007 = vmatprep.mubr.bf16.mxu1 %v7359_v42 }
 0x673   : > { %11518 = vmatmul.mubr.msk.bf16.gmra.mrb[204].mxu0 %vm5962_vm11, %v7365_v23 }
 0x677   : > { %8008 = vmatmul.mubr.bf16.gmra.mrb[72].mxu1 %v7358_v39 }
 0x678   : > { %8015 = vmatprep.mubr.bf16.mxu1 %v7364_v38 }
 0x67f   : > { %8016 = vmatmul.mubr.bf16.gmra.mrb[76].mxu1 %v7363_v57 }
 0x69b   : > { %v11199_v10 = vpop.f32.mrb[8].mxu1 }
 0x69c   : > { %v11200_v2 = vpop.f32.mrb[9].mxu1 }
 0x69d   : > { %v15696_v61 = vadd.f32 %v11200_v2, %v11199_v10  ;;  %v11202_v4 = vpop.f32.mrb[10].mxu1 }
 0x69e   : > { %v11203_v17 = vpop.f32.mrb[11].mxu1 }
 0x69f   : > { %v15698_v6 = vadd.f32 %v11203_v17, %v11202_v4  ;;  %v11139_v18 = vpop.f32.mrb[144].mxu0 }
 0x6a0   : > { %v11140_v60 = vpop.f32.mrb[145].mxu0 }
 0x6a1   : > { %v15700_v54 = vadd.f32 %v11140_v60, %v11139_v18  ;;  %v11142_v14 = vpop.f32.mrb[146].mxu0 }
 0x6a2   : > { %v11143_v1 = vpop.f32.mrb[147].mxu0 }
 0x6a3   : > { %v15702_v44 = vadd.f32 %v11143_v1, %v11142_v14 }
 0x6d2   : > { %v11205_v43 = vpop.f32.mrb[12].mxu1 }
 0x6d3   : > { %v11206_v19 = vpop.f32.mrb[13].mxu1 }
 0x6d4   : > { %v15731_v51 = vadd.f32 %v11206_v19, %v11205_v43  ;;  %v11208_v46 = vpop.f32.mrb[14].mxu1 }
 0x6d5   : > { %v11209_v7 = vpop.f32.mrb[15].mxu1 }
 0x6d6   : > { %v15733_v48 = vadd.f32 %v11209_v7, %v11208_v46  ;;  %v11145_v20 = vpop.f32.mrb[148].mxu0 }
 0x6d7   : > { %v11146_v15 = vpop.f32.mrb[149].mxu0 }
 0x6d8   : > { %v15735_v12 = vadd.f32 %v11146_v15, %v11145_v20  ;;  %v11148_v47 = vpop.f32.mrb[150].mxu0 }
 0x6d9   : > { %v11149_v31 = vpop.f32.mrb[151].mxu0 }
 0x6da   : > { %v15737_v25 = vadd.f32 %v11149_v31, %v11148_v47  ;;  %v11227_v41 = vpop.f32.mrb[16].mxu1 }
 0x6db   : > { %v11228_v30 = vpop.f32.mrb[17].mxu1 }
 0x6dc   : > { %v11229_v35 = vadd.f32 %v11228_v30, %v11227_v41  ;;  %v11230_v58 = vpop.f32.mrb[18].mxu1 }
 0x6dd   : > { %v11231_v63 = vpop.f32.mrb[19].mxu1 }
 0x6de   : > { %v11232_v56 = vadd.f32 %v11231_v63, %v11230_v58  ;;  %v11151_v42 = vpop.f32.mrb[152].mxu0  ;;  %v15740_v23 = vadd.f32 %v11229_v35, %v15399_v27 }
 0x6df   : > { %v11152_v53 = vpop.f32.mrb[153].mxu0 }
 0x6e0   : > { %v15742_v50 = vadd.f32 %v11152_v53, %v11151_v42  ;;  %v11154_v38 = vpop.f32.mrb[154].mxu0  ;;  %v15745_v39 = vadd.f32 %v11232_v56, %v15403_v0 }
 0x6e1   : > { %v11155_v36 = vpop.f32.mrb[155].mxu0 }
 0x6e2   : > { %v15747_v3 = vadd.f32 %v11155_v36, %v11154_v38  ;;  %v11233_v57 = vpop.f32.mrb[20].mxu1 }
 0x6e3   : > { %v11234_v59 = vpop.f32.mrb[21].mxu1 }
 0x6e4   : > { %v11235_v11 = vadd.f32 %v11234_v59, %v11233_v57  ;;  %v11236_v52 = vpop.f32.mrb[22].mxu1 }
 0x6e5   : > { %v11237_v22 = vpop.f32.mrb[23].mxu1 }
 0x6e6   : > { %v11238_v10 = vadd.f32 %v11237_v22, %v11236_v52  ;;  %v11157_v2 = vpop.f32.mrb[156].mxu0  ;;  %v15750_v27 = vadd.f32 %v11235_v11, %v15425_v28 }
 0x6e7   : > { %v11158_v4 = vpop.f32.mrb[157].mxu0 }
 0x6e8   : > { %v15752_v17 = vadd.f32 %v11158_v4, %v11157_v2  ;;  %v11160_v18 = vpop.f32.mrb[158].mxu0  ;;  %v15755_v0 = vadd.f32 %v11238_v10, %v15427_v55 }
 0x6e9   : > { %v11161_v60 = vpop.f32.mrb[159].mxu0 }
 0x6ea   : > { %v15757_v14 = vadd.f32 %v11161_v60, %v11160_v18  ;;  %v11239_v1 = vpop.f32.mrb[24].mxu1 }
 0x6eb   : > { %v11240_v24 = vpop.f32.mrb[25].mxu1 }
 0x6ec   : > { %v11241_v34 = vadd.f32 %v11240_v24, %v11239_v1  ;;  %v11242_v40 = vpop.f32.mrb[26].mxu1 }
 0x6ed   : > { %v11243_v37 = vpop.f32.mrb[27].mxu1 }
 0x6ee   : > { %v11244_v49 = vadd.f32 %v11243_v37, %v11242_v40  ;;  %v11163_v33 = vpop.f32.mrb[160].mxu0  ;;  %v15760_v28 = vadd.f32 %v11241_v34, %v15582_v8 }
 0x6ef   : > { %v11164_v62 = vpop.f32.mrb[161].mxu0 }
 0x6f0   : > { %v15762_v5 = vadd.f32 %v11164_v62, %v11163_v33  ;;  %v11166_v9 = vpop.f32.mrb[162].mxu0  ;;  %v15765_v55 = vadd.f32 %v11244_v49, %v15584_v21 }
 0x6f1   : > { %v11167_v43 = vpop.f32.mrb[163].mxu0 }
 0x6f2   : > { %v15767_v19 = vadd.f32 %v11167_v43, %v11166_v9  ;;  %v11245_v46 = vpop.f32.mrb[28].mxu1 }
 0x6f3   : > { %v11246_v7 = vpop.f32.mrb[29].mxu1 }
 0x6f4   : > { %v11247_v20 = vadd.f32 %v11246_v7, %v11245_v46  ;;  %v11248_v15 = vpop.f32.mrb[30].mxu1 }
 0x6f5   : > { %v11249_v47 = vpop.f32.mrb[31].mxu1 }
 0x6f6   : > { %v11250_v31 = vadd.f32 %v11249_v47, %v11248_v15  ;;  %v11169_v41 = vpop.f32.mrb[164].mxu0  ;;  %v15770_v8 = vadd.f32 %v11247_v20, %v15649_v26 }
 0x6f7   : > { %v11170_v30 = vpop.f32.mrb[165].mxu0 }
 0x6f8   : > { %v15772_v35 = vadd.f32 %v11170_v30, %v11169_v41  ;;  %v11172_v58 = vpop.f32.mrb[166].mxu0  ;;  %v15775_v21 = vadd.f32 %v11250_v31, %v15652_v45 }
 0x6f9   : > { %v11173_v63 = vpop.f32.mrb[167].mxu0 }
 0x6fa   : > { %v15777_v56 = vadd.f32 %v11173_v63, %v11172_v58  ;;  %v11251_v42 = vpop.f32.mrb[32].mxu1  ;;  %v15811_v63 = vld [vmem:[%s16464_s6] ss:$0 sm:$0xff] }
 0x6fb   : > { %v11252_v53 = vpop.f32.mrb[33].mxu1 }
 0x6fc   : > { %v11253_v38 = vadd.f32 %v11252_v53, %v11251_v42  ;;  %v11254_v36 = vpop.f32.mrb[34].mxu1 }
 0x6fd   : > { %v11255_v57 = vpop.f32.mrb[35].mxu1 }
 0x6fe   : > { %v11256_v59 = vadd.f32 %v11255_v57, %v11254_v36  ;;  %v11175_v11 = vpop.f32.mrb[168].mxu0  ;;  %v15780_v26 = vadd.f32 %v11253_v38, %v15700_v54 }
 0x6ff   : > { %v11176_v52 = vpop.f32.mrb[169].mxu0 }
 0x700   : > { %v15782_v22 = vadd.f32 %v11176_v52, %v11175_v11  ;;  %v11178_v10 = vpop.f32.mrb[170].mxu0  ;;  %v15785_v45 = vadd.f32 %v11256_v59, %v15702_v44 }
 0x701   : > { %v11179_v2 = vpop.f32.mrb[171].mxu0 }
 0x702   : > { %v15787_v4 = vadd.f32 %v11179_v2, %v11178_v10  ;;  %v11257_v18 = vpop.f32.mrb[36].mxu1 }
 0x703   : > { %v11258_v60 = vpop.f32.mrb[37].mxu1 }
 0x704   : > { %v11259_v1 = vadd.f32 %v11258_v60, %v11257_v18  ;;  %v11260_v24 = vpop.f32.mrb[38].mxu1 }
 0x705   : > { %v11261_v34 = vpop.f32.mrb[39].mxu1 }
 0x706   : > { %v11262_v40 = vadd.f32 %v11261_v34, %v11260_v24  ;;  %v11181_v37 = vpop.f32.mrb[172].mxu0  ;;  %v15790_v54 = vadd.f32 %v11259_v1, %v15735_v12  ;;  %v15802_v12 = vld [vmem:[%s16463_s5] ss:$0 sm:$0xff] }
 0x707   : > { %v11182_v49 = vpop.f32.mrb[173].mxu0 }
 0x708   : > { %v15792_v33 = vadd.f32 %v11182_v49, %v11181_v37  ;;  %v11184_v62 = vpop.f32.mrb[174].mxu0  ;;  %v15795_v44 = vadd.f32 %v11262_v40, %v15737_v25 }
 0x709   : > { %v11185_v9 = vpop.f32.mrb[175].mxu0 }
 0x70a   : > { %v15797_v43 = vadd.f32 %v11185_v9, %v11184_v62  ;;  %v11263_v46 = vpop.f32.mrb[40].mxu1 }
 0x70b   : > { %v11264_v7 = vpop.f32.mrb[41].mxu1 }
 0x70c   : > { %v11265_v20 = vadd.f32 %v11264_v7, %v11263_v46  ;;  %v11266_v15 = vpop.f32.mrb[42].mxu1 }
 0x70d   : > { %v11267_v47 = vpop.f32.mrb[43].mxu1 }
 0x70e   : > { %v11268_v31 = vadd.f32 %v11267_v47, %v11266_v15  ;;  %v11491_v41 = vpop.f32.mrb[176].mxu0  ;;  %v15805_v30 = vadd.f32 %v11265_v20, %v15742_v50 }
 0x70f   : > { %v8067_v25 = vadd.f32 %v11491_v41, %v15750_v27  ;;  %v8058_v58 = vpop.f32.mrb[177].mxu0 }
 0x710   : > { %v8059_v42 = vadd.f32 %v8058_v58, %v15740_v23  ;;  %v11492_v53 = vpop.f32.mrb[178].mxu0  ;;  %v15815_v38 = vadd.f32 %v11268_v31, %v15747_v3 }
 0x711   : > { %v8195_v36 = vmul.f32 %v15802_v12, %v8067_v25  ;;  %v8070_v57 = vadd.f32 %v11492_v53, %v15755_v0  ;;  %v8061_v50 = vpop.f32.mrb[179].mxu0 }
 0x712   : > { %v8193_v59 = vmul.f32 %v15802_v12, %v8059_v42  ;;  %v8062_v27 = vadd.f32 %v8061_v50, %v15745_v39  ;;  %v11269_v11 = vpop.f32.mrb[44].mxu1 }
 0x713   : > { %v8233_v52 = vadd.f32 %v15811_v63, %v8195_v36  ;;  %v8196_v10 = vmul.f32 %v15802_v12, %v8070_v57  ;;  %v11270_v2 = vpop.f32.mrb[45].mxu1 }
 0x714   : > { %v8231_v23 = vadd.f32 %v15811_v63, %v8193_v59  ;;  %v8194_v3 = vmul.f32 %v15802_v12, %v8062_v27  ;;  %v11271_v18 = vadd.f32 %v11270_v2, %v11269_v11  ;;  %v11272_v60 = vpop.f32.mrb[46].mxu1 }
 0x715   : > { %v8265_v1 = vmax.f32 %v8233_v52, 0.0  ;;  %v8234_v0 = vadd.f32 %v15811_v63, %v8196_v10  ;;  %v11273_v24 = vpop.f32.mrb[47].mxu1 }
 0x716   : > { %v8263_v34 = vmax.f32 %v8231_v23, 0.0  ;;  %v8232_v40 = vadd.f32 %v15811_v63, %v8194_v3  ;;  %v11274_v39 = vadd.f32 %v11273_v24, %v11272_v60  ;;  %v11495_v37 = vpop.f32.mrb[180].mxu0  ;;  %v15828_v49 = vadd.f32 %v11271_v18, %v15752_v17 }
 0x717   : > { %v8266_v62 = vmax.f32 %v8234_v0, 0.0  ;;  %v8083_v9 = vadd.f32 %v11495_v37, %v15770_v8  ;;  %v8074_v46 = vpop.f32.mrb[181].mxu0 }
 0x718   : > { %v8295_v7 = vmax.f32 %v8263_v34, %v8265_v1  ;;  %v8264_v20 = vmax.f32 %v8232_v40, 0.0  ;;  %v8075_v15 = vadd.f32 %v8074_v46, %v15760_v28  ;;  %v11496_v47 = vpop.f32.mrb[182].mxu0  ;;  %v15833_v31 = vadd.f32 %v11274_v39, %v15757_v14 }
 0x719   : > { %v8199_v41 = vmul.f32 %v15802_v12, %v8083_v9  ;;  %v8086_v25 = vadd.f32 %v11496_v47, %v15775_v21  ;;  %v8077_v58 = vpop.f32.mrb[183].mxu0 }
 0x71a   : > { %8311 = vst [vmem:[#allocation6] sm:$0xff] %v8295_v7  ;;  %v8296_v17 = vmax.f32 %v8264_v20, %v8266_v62  ;;  %v8197_v42 = vmul.f32 %v15802_v12, %v8075_v15  ;;  %v8078_v8 = vadd.f32 %v8077_v58, %v15765_v55  ;;  %v11275_v53 = vpop.f32.mrb[48].mxu1 }
 0x71b   : > { %v8237_v36 = vadd.f32 %v15811_v63, %v8199_v41  ;;  %v8200_v28 = vmul.f32 %v15802_v12, %v8086_v25  ;;  %v11276_v57 = vpop.f32.mrb[49].mxu1 }
 0x71c   : > { %8312 = vst [vmem:[#allocation6 + $0x8] sm:$0xff] %v8296_v17  ;;  %v8235_v14 = vadd.f32 %v15811_v63, %v8197_v42  ;;  %v8198_v50 = vmul.f32 %v15802_v12, %v8078_v8  ;;  %v11277_v59 = vadd.f32 %v11276_v57, %v11275_v53  ;;  %v11278_v21 = vpop.f32.mrb[50].mxu1 }
 0x71d   : > { %v8269_v27 = vmax.f32 %v8237_v36, 0.0  ;;  %v8238_v11 = vadd.f32 %v15811_v63, %v8200_v28  ;;  %v11279_v52 = vpop.f32.mrb[51].mxu1 }
 0x71e   : > { %v8267_v10 = vmax.f32 %v8235_v14, 0.0  ;;  %v8236_v55 = vadd.f32 %v15811_v63, %v8198_v50  ;;  %v11280_v2 = vadd.f32 %v11279_v52, %v11278_v21  ;;  %v11499_v23 = vpop.f32.mrb[184].mxu0  ;;  %v15846_v3 = vadd.f32 %v11277_v59, %v15762_v5 }
 0x71f   : > { %v8270_v18 = vmax.f32 %v8238_v11, 0.0  ;;  %v8099_v60 = vadd.f32 %v11499_v23, %v15790_v54  ;;  %v8090_v1 = vpop.f32.mrb[185].mxu0 }
 0x720   : > { %v8297_v0 = vmax.f32 %v8267_v10, %v8269_v27  ;;  %v8268_v24 = vmax.f32 %v8236_v55, 0.0  ;;  %v8091_v34 = vadd.f32 %v8090_v1, %v15780_v26  ;;  %v11500_v40 = vpop.f32.mrb[186].mxu0  ;;  %v15851_v39 = vadd.f32 %v11280_v2, %v15767_v19  ;;  %v15868_v27 = vld [vmem:[#allocation7] sm:$0xff] }
 0x721   : > { %v8203_v37 = vmul.f32 %v15802_v12, %v8099_v60  ;;  %v8102_v62 = vadd.f32 %v11500_v40, %v15795_v44  ;;  %v8093_v9 = vpop.f32.mrb[187].mxu0 }
 0x722   : > { %8313 = vst [vmem:[#allocation6 + $0x10] sm:$0xff] %v8297_v0  ;;  %v8298_v5 = vmax.f32 %v8268_v24, %v8270_v18  ;;  %v8201_v46 = vmul.f32 %v15802_v12, %v8091_v34  ;;  %v8094_v54 = vadd.f32 %v8093_v9, %v15785_v45  ;;  %v11281_v7 = vpop.f32.mrb[52].mxu1 }
 0x723   : > { %v8241_v20 = vadd.f32 %v15811_v63, %v8203_v37  ;;  %v8204_v26 = vmul.f32 %v15802_v12, %v8102_v62  ;;  %v11282_v15 = vpop.f32.mrb[53].mxu1  ;;  %v8327_v47 = vld [vmem:[#allocation6] ss:$2 sm:$0xff]  ;;  %v8343_v19 = vld [vmem:[#allocation6 + $0x1] ss:$2 sm:$0xff] }
 0x724   : > { %8314 = vst [vmem:[#allocation6 + $0x18] sm:$0xff] %v8298_v5  ;;  %v8239_v41 = vadd.f32 %v15811_v63, %v8201_v46  ;;  %v8202_v44 = vmul.f32 %v15802_v12, %v8094_v54  ;;  %v11283_v25 = vadd.f32 %v11282_v15, %v11281_v7  ;;  %v11284_v58 = vpop.f32.mrb[54].mxu1  ;;  %v15861_v17 = vmax.f32 %v8327_v47, %v8343_v19  ;;  %v8398_v37 = vld [vmem:[#allocation7 + $0x7] sm:$0xff] }
 0x725   : > { %v8273_v42 = vmax.f32 %v8241_v20, 0.0  ;;  %v8242_v45 = vadd.f32 %v15811_v63, %v8204_v26  ;;  %v11285_v8 = vpop.f32.mrb[55].mxu1  ;;  %v11711_v26 = vld [vmem:[%s16465_s7 + $0x100] ss:$8 sps:$4 sm:$0xff]  }
 0x726   : > { %v8271_v53 = vmax.f32 %v8239_v41, 0.0  ;;  %v8240_v36 = vadd.f32 %v15811_v63, %v8202_v44  ;;  %v11286_v28 = vadd.f32 %v11285_v8, %v11284_v58  ;;  %v11503_v57 = vpop.f32.mrb[188].mxu0  ;;  %v7970_v14 = vadd.f32 %v11283_v25, %v15772_v35  ;;  %8390 = vst [vmem:[#allocation7 + $0x20] sm:$0xff] %v15861_v17  ;;  %v11716_v58 = vld [vmem:[%s16465_s7 + $0x114] ss:$8 sps:$4 sm:$0xff]  }
 0x727   : > { %v8274_v50 = vmax.f32 %v8242_v45, 0.0  ;;  %v8115_v59 = vadd.f32 %v11503_v57, %v15828_v49  ;;  %v8106_v21 = vpop.f32.mrb[189].mxu0  ;;  %v8422_v11 = vpack.c.bf16 %v15861_v17, %v15868_v27 }
 0x728   : > { %v8299_v52 = vmax.f32 %v8271_v53, %v8273_v42  ;;  %v8272_v10 = vmax.f32 %v8240_v36, 0.0  ;;  %v8107_v55 = vadd.f32 %v8106_v21, %v15805_v30  ;;  %v11504_v2 = vpop.f32.mrb[190].mxu0  ;;  %v7973_v23 = vadd.f32 %v11286_v28, %v15777_v56 }
 0x729   : > { %v8207_v35 = vmul.f32 %v15802_v12, %v8115_v59  ;;  %v8118_v18 = vadd.f32 %v11504_v2, %v15833_v31  ;;  %v8109_v60 = vpop.f32.mrb[191].mxu0  ;;  %9475 = vmatprep.mubr.bf16.mxu1 %v8422_v11 }
 0x72a   : > { %8315 = vst [vmem:[#allocation6 + $0x20] sm:$0xff] %v8299_v52  ;;  %v8300_v49 = vmax.f32 %v8272_v10, %v8274_v50  ;;  %v8205_v1 = vmul.f32 %v15802_v12, %v8107_v55  ;;  %v8110_v0 = vadd.f32 %v8109_v60, %v15815_v38  ;;  %v11287_v24 = vpop.f32.mrb[56].mxu1 }
 0x72b   : > { %v8245_v34 = vadd.f32 %v15811_v63, %v8207_v35  ;;  %v8208_v30 = vmul.f32 %v15802_v12, %v8118_v18  ;;  %v11288_v40 = vpop.f32.mrb[57].mxu1  ;;  %v8329_v56 = vld [vmem:[#allocation6 + $0x10] ss:$2 sm:$0xff]  ;;  %v8345_v62 = vld [vmem:[#allocation6 + $0x11] ss:$2 sm:$0xff] }
 0x72c   : > { %8316 = vst [vmem:[#allocation6 + $0x28] sm:$0xff] %v8300_v49  ;;  %v8243_v31 = vadd.f32 %v15811_v63, %v8205_v1  ;;  %v8206_v9 = vmul.f32 %v15802_v12, %v8110_v0  ;;  %v11289_v5 = vadd.f32 %v11288_v40, %v11287_v24  ;;  %v11290_v46 = vpop.f32.mrb[58].mxu1  ;;  %v15882_v54 = vmax.f32 %v8329_v56, %v8345_v62  ;;  %v11717_v56 = vld [vmem:[%s16465_s7 + $0x120] ss:$8 sps:$4 sm:$0xff]  }
 0x72d   : > { %v8277_v7 = vmax.f32 %v8245_v34, 0.0  ;;  %v8246_v38 = vadd.f32 %v15811_v63, %v8208_v30  ;;  %v11291_v20 = vpop.f32.mrb[59].mxu1  ;;  %v15888_v15 = vld [vmem:[#allocation7 + $0x1f] sm:$0xff] }
 0x72e   : > { %v8275_v47 = vmax.f32 %v8243_v31, 0.0  ;;  %v8244_v19 = vadd.f32 %v15811_v63, %v8206_v9  ;;  %v11292_v41 = vadd.f32 %v11291_v20, %v11290_v46  ;;  %v11507_v44 = vpop.f32.mrb[192].mxu0  ;;  %v8406_v25 = vpack.c.bf16 %v15888_v15, %v8398_v37  ;;  %8391 = vst [vmem:[#allocation7 + $0x38] sm:$0xff] %v15882_v54 }
 0x72f   : > { %v8278_v42 = vmax.f32 %v8246_v38, 0.0  ;;  %v8131_v45 = vadd.f32 %v11507_v44, %v7970_v14  ;;  %v8122_v8 = vpop.f32.mrb[193].mxu0  ;;  %v7978_v53 = vadd.f32 %v11289_v5, %v15782_v22  ;;  %v11714_v14 = vld [vmem:[%s16465_s7 + $0x110] ss:$8 sps:$4 sm:$0xff]   ;;  %v8470_v22 = vpack.c.bf16 %v15882_v54, %v15861_v17  ;;  %v11818_v17 = vld [vmem:[%s16465_s7 + $0x334] ss:$8 sps:$4 sm:$0xff]  }
 0x730   : > { %v8301_v36 = vmax.f32 %v8275_v47, %v8277_v7  ;;  %v8276_v28 = vmax.f32 %v8244_v19, 0.0  ;;  %v8123_v57 = vadd.f32 %v8122_v8, %v15846_v3  ;;  %v11508_v50 = vpop.f32.mrb[194].mxu0  ;;  %9476 = vmatmul.mubr.bf16.vlgmr.msra.gmra.mrb[80].mxu1 %v8406_v25  ;;  %v7981_v59 = vadd.f32 %v11292_v41, %v15787_v4  ;;  %v11719_v4 = vld [vmem:[%s16465_s7 + $0x124] ss:$8 sps:$4 sm:$0xff]   ;;  %v11722_v7 = vld [vmem:[%s16465_s7 + $0x134] ss:$8 sps:$4 sm:$0xff]  }
 0x731   : > { %v8211_v21 = vmul.f32 %v15802_v12, %v8131_v45  ;;  %v8134_v11 = vadd.f32 %v11508_v50, %v7973_v23  ;;  %v8125_v52 = vpop.f32.mrb[195].mxu0  ;;  %9517 = vmatpush1.bf16.msra.mxu1 %v11711_v26 }
 0x732   : > { %8317 = vst [vmem:[#allocation6 + $0x30] sm:$0xff] %v8301_v36  ;;  %v8302_v10 = vmax.f32 %v8276_v28, %v8278_v42  ;;  %v8209_v3 = vmul.f32 %v15802_v12, %v8123_v57  ;;  %v8126_v55 = vadd.f32 %v8125_v52, %v15851_v39  ;;  %v11293_v2 = vpop.f32.mrb[60].mxu1  ;;  %9518 = vmatprep.subr.bf16.mxu1 %v11716_v58  ;;  %v11720_v42 = vld [vmem:[%s16465_s7 + $0x130] ss:$8 sps:$4 sm:$0xff]  }
 0x733   : > { %v8249_v23 = vadd.f32 %v15811_v63, %v8211_v21  ;;  %v8212_v35 = vmul.f32 %v15802_v12, %v8134_v11  ;;  %v11294_v18 = vpop.f32.mrb[61].mxu1  ;;  %v8331_v60 = vld [vmem:[#allocation6 + $0x20] ss:$2 sm:$0xff]  ;;  %v8347_v49 = vld [vmem:[#allocation6 + $0x21] ss:$2 sm:$0xff] }
 0x734   : > { %8318 = vst [vmem:[#allocation6 + $0x38] sm:$0xff] %v8302_v10  ;;  %v8247_v1 = vadd.f32 %v15811_v63, %v8209_v3  ;;  %v8210_v0 = vmul.f32 %v15802_v12, %v8126_v55  ;;  %v11295_v24 = vadd.f32 %v11294_v18, %v11293_v2  ;;  %v11296_v39 = vpop.f32.mrb[62].mxu1  ;;  %v15914_v34 = vmax.f32 %v8331_v60, %v8347_v49 }
 0x735   : > { %v8281_v30 = vmax.f32 %v8249_v23, 0.0  ;;  %v8250_v40 = vadd.f32 %v15811_v63, %v8212_v35  ;;  %v11297_v37 = vpop.f32.mrb[63].mxu1  ;;  %9519 = vmatpush1.bf16.msra.mxu1 %v11714_v14 }
 0x736   : > { %v8279_v62 = vmax.f32 %v8247_v1, 0.0  ;;  %v8248_v31 = vadd.f32 %v15811_v63, %v8210_v0  ;;  %v11298_v9 = vadd.f32 %v11297_v37, %v11296_v39  ;;  %v7986_v5 = vadd.f32 %v11295_v24, %v15792_v33  ;;  %v11511_v46 = vpop.f32.mrb[196].mxu0  ;;  %9520 = vmatprep.subr.bf16.mxu1 %v11719_v4  ;;  %8392 = vst [vmem:[#allocation7 + $0x50] sm:$0xff] %v15914_v34  ;;  %v11723_v0 = vld [vmem:[%s16465_s7 + $0x140] ss:$8 sps:$4 sm:$0xff]   ;;  %v15952_v24 = vld [vmem:[#allocation7 + $0x37] sm:$0xff] }
 0x737   : > { %v8282_v38 = vmax.f32 %v8250_v40, 0.0  ;;  %v8138_v20 = vpop.f32.mrb[197].mxu0  ;;  %v15928_v26 = vpack.c.bf16 %v15914_v34, %v15882_v54 }
 0x738   : > { %v8303_v47 = vmax.f32 %v8279_v62, %v8281_v30  ;;  %v8280_v19 = vmax.f32 %v8248_v31, 0.0  ;;  %v8147_v41 = vadd.f32 %v11511_v46, %v7986_v5  ;;  %v8139_v44 = vadd.f32 %v8138_v20, %v7978_v53  ;;  %v11512_v25 = vpop.f32.mrb[198].mxu0 }
 0x739   : > { %v7989_v33 = vadd.f32 %v11298_v9, %v15797_v43  ;;  %v8141_v58 = vpop.f32.mrb[199].mxu0  ;;  %9521 = vmatpush1.bf16.msra.mxu1 %v11717_v56  ;;  %9485 = vmatprep.mubr.bf16.mxu1 %v15928_v26  ;;  %v11725_v43 = vld [vmem:[%s16465_s7 + $0x144] ss:$8 sps:$4 sm:$0xff]   ;;  %v11728_v56 = vld [vmem:[%s16465_s7 + $0x154] ss:$8 sps:$4 sm:$0xff]  }
 0x73a   : > { %8319 = vst [vmem:[#allocation6 + $0x40] sm:$0xff] %v8303_v47  ;;  %v8304_v45 = vmax.f32 %v8280_v19, %v8282_v38  ;;  %v8215_v8 = vmul.f32 %v15802_v12, %v8147_v41  ;;  %v8213_v36 = vmul.f32 %v15802_v12, %v8139_v44  ;;  %v8142_v28 = vadd.f32 %v8141_v58, %v7981_v59  ;;  %v11299_v57 = vpop.f32.mrb[64].mxu1  ;;  %v11726_v19 = vld [vmem:[%s16465_s7 + $0x150] ss:$8 sps:$4 sm:$0xff]  }
 0x73b   : > { %9522 = vmatprep.subr.bf16.mxu1 %v11722_v7  ;;  %v8150_v53 = vadd.f32 %v11512_v25, %v7989_v33  ;;  %v11300_v50 = vpop.f32.mrb[65].mxu1  ;;  %v8333_v21 = vld [vmem:[#allocation6 + $0x30] ss:$2 sm:$0xff]  ;;  %v8349_v11 = vld [vmem:[#allocation6 + $0x31] ss:$2 sm:$0xff] }
 0x73c   : > { %8320 = vst [vmem:[#allocation6 + $0x48] sm:$0xff] %v8304_v45  ;;  %v8253_v52 = vadd.f32 %v15811_v63, %v8215_v8  ;;  %v8251_v14 = vadd.f32 %v15811_v63, %v8213_v36  ;;  %v8214_v10 = vmul.f32 %v15802_v12, %v8142_v28  ;;  %v11301_v3 = vadd.f32 %v11300_v50, %v11299_v57  ;;  %v11302_v55 = vpop.f32.mrb[66].mxu1 }
 0x73d   : > { %v8216_v59 = vmul.f32 %v15802_v12, %v8150_v53  ;;  %v11303_v2 = vpop.f32.mrb[67].mxu1  ;;  %9523 = vmatpush1.bf16.msra.mxu1 %v11720_v42  ;;  %v15944_v4 = vld [vmem:[#allocation7 + $0x4f] sm:$0xff]  ;;  %v15946_v23 = vmax.f32 %v8333_v21, %v8349_v11 }
 0x73e   : > { %v8285_v35 = vmax.f32 %v8253_v52, 0.0  ;;  %v8283_v18 = vmax.f32 %v8251_v14, 0.0  ;;  %v8252_v60 = vadd.f32 %v15811_v63, %v8214_v10  ;;  %v11304_v49 = vadd.f32 %v11303_v2, %v11302_v55  ;;  %v11515_v1 = vpop.f32.mrb[200].mxu0  ;;  %9524 = vmatprep.subr.bf16.mxu1 %v11725_v43  ;;  %v11729_v43 = vld [vmem:[%s16465_s7 + $0x160] ss:$8 sps:$4 sm:$0xff]  }
 0x73f   : > { %v8254_v39 = vadd.f32 %v15811_v63, %v8216_v59  ;;  %v7994_v30 = vadd.f32 %v11301_v3, %v15577_v29  ;;  %v8154_v40 = vpop.f32.mrb[201].mxu0  ;;  %v15958_v37 = vpack.c.bf16 %v15944_v4, %v15952_v24  ;;  %8393 = vst [vmem:[#allocation7 + $0x68] sm:$0xff] %v15946_v23  ;;  %v8471_v46 = vpack.c.bf16 %v15946_v23, %v15914_v34  ;;  %v11824_v34 = vld [vmem:[%s16465_s7 + $0x354] ss:$8 sps:$4 sm:$0xff]  }
 0x740   : > { %v8305_v62 = vmax.f32 %v8283_v18, %v8285_v35  ;;  %v8284_v31 = vmax.f32 %v8252_v60, 0.0  ;;  %v11516_v9 = vpop.f32.mrb[202].mxu0  ;;  %v7997_v5 = vadd.f32 %v11304_v49, %v15579_v32  ;;  %v11731_v32 = vld [vmem:[%s16465_s7 + $0x164] ss:$8 sps:$4 sm:$0xff]   ;;  %v11732_v18 = vld [vmem:[%s16465_s7 + $0x170] ss:$8 sps:$4 sm:$0xff]  }
 0x741   : > { %v8286_v29 = vmax.f32 %v8254_v39, 0.0  ;;  %v8155_v7 = vadd.f32 %v8154_v40, %v7994_v30  ;;  %v8157_v38 = vpop.f32.mrb[203].mxu0  ;;  %9486 = vmatmul.mubr.bf16.gmra.mrb[84].mxu1 %v15958_v37 }
 0x742   : > { %8321 = vst [vmem:[#allocation6 + $0x50] sm:$0xff] %v8305_v62  ;;  %v8158_v20 = vadd.f32 %v8157_v38, %v7997_v5  ;;  %9525 = vmatpush1.bf16.msra.mxu1 %v11723_v0  ;;  %v11305_v47 = vpop.f32.mrb[68].mxu1 }
 0x743   : > { %v8306_v41 = vmax.f32 %v8284_v31, %v8286_v29  ;;  %v11306_v44 = vpop.f32.mrb[69].mxu1  ;;  %9526 = vmatprep.subr.bf16.mxu1 %v11728_v56  ;;  %v8335_v25 = vld [vmem:[#allocation6 + $0x40] ss:$2 sm:$0xff]  ;;  %v8351_v33 = vld [vmem:[#allocation6 + $0x41] ss:$2 sm:$0xff]  ;;  %v8217_v8 = vmul.f32 %v15802_v12, %v8155_v7 }
 0x744   : > { %v11307_v58 = vadd.f32 %v11306_v44, %v11305_v47  ;;  %v11308_v42 = vpop.f32.mrb[70].mxu1  ;;  %v15974_v45 = vmax.f32 %v8335_v25, %v8351_v33  ;;  %v8218_v21 = vmul.f32 %v15802_v12, %v8158_v20  ;;  %v11735_v47 = vld [vmem:[%s16465_s7 + $0x180] ss:$8 sps:$4 sm:$0xff]   ;;  %v11740_v44 = vld [vmem:[%s16465_s7 + $0x194] ss:$8 sps:$4 sm:$0xff]  }
 0x745   : > { %8322 = vst [vmem:[#allocation6 + $0x58] sm:$0xff] %v8306_v41  ;;  %v11309_v36 = vpop.f32.mrb[71].mxu1  ;;  %v8255_v3 = vadd.f32 %v15811_v63, %v8217_v8 }
 0x746   : > { %v8002_v28 = vadd.f32 %v11307_v58, %v15639_v16  ;;  %v11310_v57 = vadd.f32 %v11309_v36, %v11308_v42  ;;  %9527 = vmatpush1.bf16.msra.mxu1 %v11726_v19  ;;  %v15981_v53 = vpop.f32.mrb[204].mxu0  ;;  %8394 = vst [vmem:[#allocation7 + $0x80] sm:$0xff] %v15974_v45  ;;  %v15986_v50 = vpack.c.bf16 %v15974_v45, %v15946_v23  ;;  %v11734_v16 = vld [vmem:[%s16465_s7 + $0x174] ss:$8 sps:$4 sm:$0xff]   ;;  %v16016_v19 = vld [vmem:[#allocation7 + $0x67] sm:$0xff] }
 0x747   : > { %9528 = vmatprep.subr.bf16.mxu1 %v11731_v32  ;;  %v8170_v11 = vpop.f32.mrb[205].mxu0  ;;  %v8256_v60 = vadd.f32 %v15811_v63, %v8218_v21  ;;  %v8287_v62 = vmax.f32 %v8255_v3, 0.0  ;;  %v11743_v21 = vld [vmem:[%s16465_s7 + $0x1a4] ss:$8 sps:$4 sm:$0xff]  }
 0x748   : > { %v8163_v52 = vadd.f32 %v11515_v1, %v8002_v28  ;;  %v8005_v14 = vadd.f32 %v11310_v57, %v15641_v13  ;;  %v15993_v10 = vpop.f32.mrb[206].mxu0  ;;  %9495 = vmatprep.mubr.bf16.mxu1 %v15986_v50  ;;  %v11737_v13 = vld [vmem:[%s16465_s7 + $0x184] ss:$8 sps:$4 sm:$0xff]   ;;  %v11738_v57 = vld [vmem:[%s16465_s7 + $0x190] ss:$8 sps:$4 sm:$0xff]  }
 0x749   : > { %v8173_v55 = vpop.f32.mrb[207].mxu0  ;;  %v8288_v32 = vmax.f32 %v8256_v60, 0.0 }
 0x74a   : > { %v8219_v59 = vmul.f32 %v15802_v12, %v8163_v52  ;;  %v8166_v2 = vadd.f32 %v11516_v9, %v8005_v14  ;;  %9529 = vmatpush1.bf16.msra.mxu1 %v11729_v43  ;;  %v11311_v35 = vpop.f32.mrb[72].mxu1 }
 0x74b   : > { %v11312_v49 = vpop.f32.mrb[73].mxu1  ;;  %9530 = vmatprep.subr.bf16.mxu1 %v11734_v16 }
 0x74c   : > { %v8257_v1 = vadd.f32 %v15811_v63, %v8219_v59  ;;  %v8220_v0 = vmul.f32 %v15802_v12, %v8166_v2  ;;  %v11313_v39 = vadd.f32 %v11312_v49, %v11311_v35  ;;  %v11314_v30 = vpop.f32.mrb[74].mxu1  ;;  %v8337_v40 = vld [vmem:[#allocation6 + $0x50] ss:$2 sm:$0xff]  ;;  %v8353_v56 = vld [vmem:[#allocation6 + $0x51] ss:$2 sm:$0xff] }
 0x74d   : > { %v11315_v31 = vpop.f32.mrb[75].mxu1  ;;  %v16007_v9 = vld [vmem:[#allocation7 + $0x7f] sm:$0xff]  ;;  %v16009_v5 = vmax.f32 %v8337_v40, %v8353_v56 }
 0x74e   : > { %v8289_v29 = vmax.f32 %v8257_v1, 0.0  ;;  %v8258_v7 = vadd.f32 %v15811_v63, %v8220_v0  ;;  %v11316_v38 = vadd.f32 %v11315_v31, %v11314_v30  ;;  %9531 = vmatpush1.bf16.msra.mxu1 %v11732_v18  ;;  %v8010_v20 = vadd.f32 %v11313_v39, %v15696_v61  ;;  %v11746_v59 = vld [vmem:[%s16465_s7 + $0x1b4] ss:$8 sps:$4 sm:$0xff]   ;;  %v11749_v1 = vld [vmem:[%s16465_s7 + $0x1c4] ss:$8 sps:$4 sm:$0xff]  }
 0x74f   : > { %9532 = vmatprep.subr.bf16.mxu1 %v11737_v13  ;;  %v16020_v41 = vpack.c.bf16 %v16007_v9, %v16016_v19  ;;  %8395 = vst [vmem:[#allocation7 + $0x98] sm:$0xff] %v16009_v5  ;;  %v8472_v61 = vpack.c.bf16 %v16009_v5, %v15974_v45  ;;  %v11744_v13 = vld [vmem:[%s16465_s7 + $0x1b0] ss:$8 sps:$4 sm:$0xff]   ;;  %v11747_v31 = vld [vmem:[%s16465_s7 + $0x1c0] ss:$8 sps:$4 sm:$0xff]  }
 0x750   : > { %v8307_v25 = vmax.f32 %v8287_v62, %v8289_v29  ;;  %v8290_v33 = vmax.f32 %v8258_v7, 0.0  ;;  %v8171_v58 = vadd.f32 %v8170_v11, %v8010_v20  ;;  %v8013_v42 = vadd.f32 %v11316_v38, %v15698_v6  ;;  %v11830_v45 = vld [vmem:[%s16465_s7 + $0x374] ss:$8 sps:$4 sm:$0xff]  }
 0x751   : > { %9496 = vmatmul.mubr.bf16.gmra.mrb[88].mxu1 %v16020_v41 }
 0x752   : > { %8323 = vst [vmem:[#allocation6 + $0x60] sm:$0xff] %v8307_v25  ;;  %v8308_v8 = vmax.f32 %v8288_v32, %v8290_v33  ;;  %v8174_v36 = vadd.f32 %v8173_v55, %v8013_v42  ;;  %9533 = vmatpush1.bf16.msra.mxu1 %v11735_v47  ;;  %v11317_v28 = vpop.f32.mrb[76].mxu1  ;;  %v8221_v52 = vmul.f32 %v15802_v12, %v8171_v58  ;;  %v11741_v55 = vld [vmem:[%s16465_s7 + $0x1a0] ss:$8 sps:$4 sm:$0xff]   ;;  %v11750_v47 = vld [vmem:[%s16465_s7 + $0x1d0] ss:$8 sps:$4 sm:$0xff]  }
 0x753   : > { %v11318_v43 = vpop.f32.mrb[77].mxu1  ;;  %9534 = vmatprep.subr.bf16.mxu1 %v11740_v44  ;;  %v11755_v32 = vld [vmem:[%s16465_s7 + $0x1e4] ss:$8 sps:$4 sm:$0xff]   ;;  %v11753_v33 = vld [vmem:[%s16465_s7 + $0x1e0] ss:$8 sps:$4 sm:$0xff]   ;;  %v8454_v42 = vpack.c.bf16 %v15952_v24, %v15888_v15 }
 0x754   : > { %8324 = vst [vmem:[#allocation6 + $0x68] sm:$0xff] %v8308_v8  ;;  %v11319_v16 = vadd.f32 %v11318_v43, %v11317_v28  ;;  %v11320_v6 = vpop.f32.mrb[78].mxu1  ;;  %v8222_v2 = vmul.f32 %v15802_v12, %v8174_v36  ;;  %v8259_v60 = vadd.f32 %v15811_v63, %v8221_v52  ;;  %v11758_v8 = vld [vmem:[%s16465_s7 + $0x1f4] ss:$8 sps:$4 sm:$0xff]   ;;  %v11756_v36 = vld [vmem:[%s16465_s7 + $0x1f0] ss:$8 sps:$4 sm:$0xff]  }
 0x755   : > { %v11321_v11 = vpop.f32.mrb[79].mxu1  ;;  %v11761_v28 = vld [vmem:[%s16465_s7 + $0x204] ss:$8 sps:$4 sm:$0xff]   ;;  %v11764_v52 = vld [vmem:[%s16465_s7 + $0x214] ss:$8 sps:$4 sm:$0xff]  }
 0x756   : > { %v8018_v14 = vadd.f32 %v11319_v16, %v15731_v51  ;;  %v11322_v3 = vadd.f32 %v11321_v11, %v11320_v6  ;;  %9535 = vmatpush1.bf16.msra.mxu1 %v11738_v57  ;;  %v8404_v44 = vld [vmem:[#allocation7 + $0x97] sm:$0xff]  ;;  %v8430_v15 = vld [vmem:[#allocation7 + $0x9] sm:$0xff]  ;;  %v8431_v24 = vld [vmem:[#allocation7 + $0x21] sm:$0xff] }
 0x757   : > { %9536 = vmatprep.subr.bf16.mxu1 %v11743_v21  ;;  %v11759_v16 = vld [vmem:[%s16465_s7 + $0x200] ss:$8 sps:$4 sm:$0xff]   ;;  %v8438_v11 = vpack.c.bf16 %v8431_v24, %v8430_v15 }
 0x758   : > { %v8179_v35 = vadd.f32 %v15981_v53, %v8018_v14  ;;  %v8021_v18 = vadd.f32 %v11322_v3, %v15733_v48  ;;  %v8260_v48 = vadd.f32 %v15811_v63, %v8222_v2  ;;  %v8455_v14 = vpack.c.bf16 %v16016_v19, %v15944_v4  ;;  %v11762_v3 = vld [vmem:[%s16465_s7 + $0x210] ss:$8 sps:$4 sm:$0xff]   ;;  %v11765_v2 = vld [vmem:[%s16465_s7 + $0x220] ss:$8 sps:$4 sm:$0xff]  }
 0x759   : > { %v8432_v4 = vld [vmem:[#allocation7 + $0x39] sm:$0xff] }
 0x75a   : > { %v8223_v51 = vmul.f32 %v15802_v12, %v8179_v35  ;;  %v8182_v49 = vadd.f32 %v15993_v10, %v8021_v18  ;;  %9537 = vmatpush1.bf16.msra.mxu1 %v11741_v55  ;;  %v8291_v10 = vmax.f32 %v8259_v60, 0.0  ;;  %v8292_v7 = vmax.f32 %v8260_v48, 0.0  ;;  %v11767_v55 = vld [vmem:[%s16465_s7 + $0x224] ss:$8 sps:$4 sm:$0xff]   ;;  %v11770_v35 = vld [vmem:[%s16465_s7 + $0x234] ss:$8 sps:$4 sm:$0xff]  }
 0x75b   : > { %9538 = vmatprep.subr.bf16.mxu1 %v11746_v59  ;;  %v8339_v0 = vld [vmem:[#allocation6 + $0x60] ss:$2 sm:$0xff]  ;;  %v8355_v53 = vld [vmem:[#allocation6 + $0x61] ss:$2 sm:$0xff]  ;;  %v16116_v59 = vld [vmem:[#allocation7 + $0x51] sm:$0xff]  ;;  %v8456_v18 = vpack.c.bf16 %v8404_v44, %v16007_v9 }
 0x75c   : > { %v8261_v39 = vadd.f32 %v15811_v63, %v8223_v51  ;;  %v8224_v30 = vmul.f32 %v15802_v12, %v8182_v49  ;;  %v16059_v40 = vmax.f32 %v8339_v0, %v8355_v53  ;;  %v11752_v12 = vld [vmem:[%s16465_s7 + $0x1d4] ss:$8 sps:$4 sm:$0xff]   ;;  %v16122_v19 = vpack.c.bf16 %v16116_v59, %v8432_v4  ;;  %v11768_v60 = vld [vmem:[%s16465_s7 + $0x230] ss:$8 sps:$4 sm:$0xff]   ;;  %v11773_v51 = vld [vmem:[%s16465_s7 + $0x244] ss:$8 sps:$4 sm:$0xff]  }
 0x75d   : > { %v16135_v49 = vld [vmem:[#allocation7 + $0x81] sm:$0xff]  ;;  %v11776_v53 = vld [vmem:[%s16465_s7 + $0x254] ss:$8 sps:$4 sm:$0xff]  }
 0x75e   : > { %v8293_v56 = vmax.f32 %v8261_v39, 0.0  ;;  %v8262_v62 = vadd.f32 %v15811_v63, %v8224_v30  ;;  %9539 = vmatpush1.bf16.msra.mxu1 %v11744_v13  ;;  %8396 = vst [vmem:[#allocation7 + $0xb0] sm:$0xff] %v16059_v40  ;;  %v16068_v29 = vpack.c.bf16 %v16059_v40, %v16009_v5  ;;  %v11771_v9 = vld [vmem:[%s16465_s7 + $0x240] ss:$8 sps:$4 sm:$0xff]   ;;  %v11774_v39 = vld [vmem:[%s16465_s7 + $0x250] ss:$8 sps:$4 sm:$0xff]  }
 0x75f   : > { %9540 = vmatprep.subr.bf16.mxu1 %v11749_v1  ;;  %v16142_v1 = vld [vmem:[#allocation7 + $0x69] sm:$0xff] }
 0x760   : > { %v8309_v38 = vmax.f32 %v8291_v10, %v8293_v56  ;;  %v8294_v20 = vmax.f32 %v8262_v62, 0.0  ;;  %9505 = vmatprep.mubr.bf16.mxu1 %v16068_v29  ;;  %v16146_v0 = vpack.c.bf16 %v16135_v49, %v16142_v1  ;;  %v11779_v30 = vld [vmem:[%s16465_s7 + $0x264] ss:$8 sps:$4 sm:$0xff]   ;;  %v11777_v56 = vld [vmem:[%s16465_s7 + $0x260] ss:$8 sps:$4 sm:$0xff]  }
 0x761   : > { %v8436_v62 = vld [vmem:[#allocation7 + $0x99] sm:$0xff] }
 0x762   : > { %8325 = vst [vmem:[#allocation6 + $0x70] sm:$0xff] %v8309_v38  ;;  %v8310_v63 = vmax.f32 %v8292_v7, %v8294_v20  ;;  %9541 = vmatpush1.bf16.msra.mxu1 %v11747_v31  ;;  %v8486_v7 = vpack.c.bf16 %v8432_v4, %v8431_v24  ;;  %v11780_v38 = vld [vmem:[%s16465_s7 + $0x270] ss:$8 sps:$4 sm:$0xff]   ;;  %v11785_v20 = vld [vmem:[%s16465_s7 + $0x284] ss:$8 sps:$4 sm:$0xff]   ;;  %v8488_v54 = vpack.c.bf16 %v8436_v62, %v16135_v49 }
 0x763   : > { %9542 = vmatprep.subr.bf16.mxu1 %v11752_v12  ;;  %v11782_v12 = vld [vmem:[%s16465_s7 + $0x274] ss:$8 sps:$4 sm:$0xff]   ;;  %v11801_v15 = vld [vmem:[%s16465_s7 + $0x2e0] ss:$8 sps:$4 sm:$0xff]   ;;  %v11821_v4 = vld [vmem:[%s16465_s7 + $0x344] ss:$8 sps:$4 sm:$0xff]  }
 0x764   : > { %8326 = vst [vmem:[#allocation6 + $0x78] sm:$0xff] %v8310_v63  ;;  %v11783_v63 = vld [vmem:[%s16465_s7 + $0x280] ss:$8 sps:$4 sm:$0xff]   ;;  %v11806_v24 = vld [vmem:[%s16465_s7 + $0x2f4] ss:$8 sps:$4 sm:$0xff]  }
 0x765   : > { %v8405_v25 = vld [vmem:[#allocation7 + $0xaf] sm:$0xff]  ;;  %v11831_v49 = vld [vmem:[%s16465_s7 + $0x380] ss:$8 sps:$4 sm:$0xff]  }
 0x766   : > { %9543 = vmatpush1.bf16.msra.mxu1 %v11750_v47  ;;  %v16083_v58 = vpack.c.bf16 %v8405_v25, %v8404_v44  ;;  %v16159_v10 = vld [vmem:[#allocation7 + $0xb1] sm:$0xff]  ;;  %v11791_v44 = vld [vmem:[%s16465_s7 + $0x2a4] ss:$8 sps:$4 sm:$0xff]  }
 0x767   : > { %9544 = vmatprep.subr.bf16.mxu1 %v11755_v32  ;;  %v16165_v31 = vpack.c.bf16 %v16159_v10, %v8436_v62  ;;  %v11788_v47 = vld [vmem:[%s16465_s7 + $0x294] ss:$8 sps:$4 sm:$0xff]   ;;  %v11786_v32 = vld [vmem:[%s16465_s7 + $0x290] ss:$8 sps:$4 sm:$0xff]   ;;  %v11849_v62 = vld [vmem:[%s16465_s7 + $0x3e0] ss:$8 sps:$4 sm:$0xff]  }
 0x768   : > { %9506 = vmatmul.mubr.bf16.gmra.mrb[92].mxu1 %v16083_v58  ;;  %v11828_v5 = vld [vmem:[%s16465_s7 + $0x370] ss:$8 sps:$4 sm:$0xff]  }
 0x769   : > { %9548 = vmatprep.mubr.bf16.mxu1 %v8454_v42  ;;  %v11792_v42 = vld [vmem:[%s16465_s7 + $0x2b0] ss:$8 sps:$4 sm:$0xff]  }
 0x76a   : > { %9545 = vmatpush1.bf16.msra.mxu1 %v11753_v33  ;;  %v11794_v33 = vld [vmem:[%s16465_s7 + $0x2b4] ss:$8 sps:$4 sm:$0xff]  }
 0x76b   : > { %9546 = vmatprep.subr.bf16.mxu1 %v11758_v8  ;;  %v8341_v57 = vld [vmem:[#allocation6 + $0x70] ss:$2 sm:$0xff]  ;;  %v8357_v43 = vld [vmem:[#allocation6 + $0x71] ss:$2 sm:$0xff]  ;;  %v11797_v8 = vld [vmem:[%s16465_s7 + $0x2c4] ss:$8 sps:$4 sm:$0xff]  }
 0x76c   : > { %v16097_v21 = vmax.f32 %v8341_v57, %v8357_v43  ;;  %v11798_v57 = vld [vmem:[%s16465_s7 + $0x2d0] ss:$8 sps:$4 sm:$0xff]   ;;  %v11803_v43 = vld [vmem:[%s16465_s7 + $0x2e4] ss:$8 sps:$4 sm:$0xff]  }
 0x76e   : > { %9547 = vmatpush1.bf16.msra.mxu1 %v11756_v36  ;;  %8397 = vst [vmem:[#allocation7 + $0xc8] sm:$0xff] %v16097_v21  ;;  %v8473_v6 = vpack.c.bf16 %v16097_v21, %v16059_v40  ;;  %v11795_v36 = vld [vmem:[%s16465_s7 + $0x2c0] ss:$8 sps:$4 sm:$0xff]   ;;  %v11836_v40 = vld [vmem:[%s16465_s7 + $0x394] ss:$8 sps:$4 sm:$0xff]  }
 0x76f   : > { %9589 = vmatprep.subr.bf16.mxu1 %v11761_v28  ;;  %v11800_v28 = vld [vmem:[%s16465_s7 + $0x2d4] ss:$8 sps:$4 sm:$0xff]  }
 0x771   : > { %9549 = vmatmul.mubr.bf16.vlgmr.msra.gmra.mrb[80].mxu1 %v8438_v11  ;;  %v11809_v11 = vld [vmem:[%s16465_s7 + $0x304] ss:$8 sps:$4 sm:$0xff]  }
 0x772   : > { %9590 = vmatpush1.bf16.msra.mxu1 %v11759_v16  ;;  %9558 = vmatprep.mubr.bf16.mxu1 %v8455_v14  ;;  %v11804_v16 = vld [vmem:[%s16465_s7 + $0x2f0] ss:$8 sps:$4 sm:$0xff]   ;;  %v11812_v14 = vld [vmem:[%s16465_s7 + $0x314] ss:$8 sps:$4 sm:$0xff]  }
 0x773   : > { %9591 = vmatprep.subr.bf16.mxu1 %v11764_v52  ;;  %v11807_v52 = vld [vmem:[%s16465_s7 + $0x300] ss:$8 sps:$4 sm:$0xff]  }
 0x775   : > { %v16137_v13 = vld [vmem:[#allocation7 + $0xc7] sm:$0xff] }
 0x776   : > { %9592 = vmatpush1.bf16.msra.mxu1 %v11762_v3  ;;  %v8457_v48 = vpack.c.bf16 %v16137_v13, %v8405_v25  ;;  %v11789_v25 = vld [vmem:[%s16465_s7 + $0x2a0] ss:$8 sps:$4 sm:$0xff]   ;;  %v8487_v3 = vpack.c.bf16 %v16142_v1, %v16116_v59  ;;  %v11842_v1 = vld [vmem:[%s16465_s7 + $0x3b4] ss:$8 sps:$4 sm:$0xff]  }
 0x777   : > { %9593 = vmatprep.subr.bf16.mxu1 %v11767_v55  ;;  %v11810_v55 = vld [vmem:[%s16465_s7 + $0x310] ss:$8 sps:$4 sm:$0xff]   ;;  %v11813_v59 = vld [vmem:[%s16465_s7 + $0x320] ss:$8 sps:$4 sm:$0xff]  }
 0x779   : > { %9559 = vmatmul.mubr.bf16.gmra.mrb[84].mxu1 %v16122_v19 }
 0x77a   : > { %9594 = vmatpush1.bf16.msra.mxu1 %v11765_v2  ;;  %9568 = vmatprep.mubr.bf16.mxu1 %v8456_v18  ;;  %v11815_v2 = vld [vmem:[%s16465_s7 + $0x324] ss:$8 sps:$4 sm:$0xff]   ;;  %v11819_v18 = vld [vmem:[%s16465_s7 + $0x340] ss:$8 sps:$4 sm:$0xff]  }
 0x77b   : > { %9595 = vmatprep.subr.bf16.mxu1 %v11770_v35  ;;  %v16258_v35 = vld [vmem:[#allocation7 + $0xc9] sm:$0xff] }
 0x77c   : > { %v8489_v23 = vpack.c.bf16 %v16258_v35, %v16159_v10  ;;  %v11846_v10 = vld [vmem:[%s16465_s7 + $0x3d0] ss:$8 sps:$4 sm:$0xff]  }
 0x77e   : > { %9596 = vmatpush1.bf16.msra.mxu1 %v11768_v60  ;;  %v11827_v60 = vld [vmem:[%s16465_s7 + $0x364] ss:$8 sps:$4 sm:$0xff]  }
 0x77f   : > { %9597 = vmatprep.subr.bf16.mxu1 %v11773_v51  ;;  %v11825_v51 = vld [vmem:[%s16465_s7 + $0x360] ss:$8 sps:$4 sm:$0xff]  }
 0x781   : > { %9569 = vmatmul.mubr.bf16.gmra.mrb[88].mxu1 %v16146_v0 }
 0x782   : > { %9598 = vmatpush1.bf16.msra.mxu1 %v11771_v9  ;;  %9578 = vmatprep.mubr.bf16.mxu1 %v8457_v48  ;;  %v11837_v9 = vld [vmem:[%s16465_s7 + $0x3a0] ss:$8 sps:$4 sm:$0xff]   ;;  %v11845_v48 = vld [vmem:[%s16465_s7 + $0x3c4] ss:$8 sps:$4 sm:$0xff]  }
 0x783   : > { %9599 = vmatprep.subr.bf16.mxu1 %v11776_v53  ;;  %v11840_v53 = vld [vmem:[%s16465_s7 + $0x3b0] ss:$8 sps:$4 sm:$0xff]  }
 0x786   : > { %9600 = vmatpush1.bf16.msra.mxu1 %v11774_v39  ;;  %v11843_v39 = vld [vmem:[%s16465_s7 + $0x3c0] ss:$8 sps:$4 sm:$0xff]  }
 0x787   : > { %9601 = vmatprep.subr.bf16.mxu1 %v11779_v30  ;;  %v11848_v30 = vld [vmem:[%s16465_s7 + $0x3d4] ss:$8 sps:$4 sm:$0xff]  }
 0x789   : > { %9579 = vmatmul.mubr.bf16.gmra.mrb[92].mxu1 %v16165_v31 }
 0x78a   : > { %9602 = vmatpush1.bf16.msra.mxu1 %v11777_v56  ;;  %9621 = vmatprep.mubr.bf16.mxu1 %v8486_v7  ;;  %v11851_v56 = vld [vmem:[%s16465_s7 + $0x3e4] ss:$8 sps:$4 sm:$0xff]   ;;  %v11852_v7 = vld [vmem:[%s16465_s7 + $0x3f0] ss:$8 sps:$4 sm:$0xff]  }
 0x78b   : > { %9603 = vmatprep.subr.bf16.mxu1 %v11782_v12  ;;  %v11854_v12 = vld [vmem:[%s16465_s7 + $0x3f4] ss:$8 sps:$4 sm:$0xff]  }
 0x78e   : > { %9604 = vmatpush1.bf16.msra.mxu1 %v11780_v38  ;;  %v11857_v38 = vld [vmem:[%s16465_s7 + $0x404] ss:$8 sps:$4 sm:$0xff]  }
 0x78f   : > { %9605 = vmatprep.subr.bf16.mxu1 %v11785_v20  ;;  %v11855_v20 = vld [vmem:[%s16465_s7 + $0x400] ss:$8 sps:$4 sm:$0xff]  }
 0x792   : > { %9606 = vmatpush1.bf16.msra.mxu1 %v11783_v63  ;;  %v11860_v63 = vld [vmem:[%s16465_s7 + $0x414] ss:$8 sps:$4 sm:$0xff]  }
 0x793   : > { %9607 = vmatprep.subr.bf16.mxu1 %v11788_v47  ;;  %v11858_v47 = vld [vmem:[%s16465_s7 + $0x410] ss:$8 sps:$4 sm:$0xff]  }
 0x796   : > { %9608 = vmatpush1.bf16.msra.mxu1 %v11786_v32  ;;  %v11863_v32 = vld [vmem:[%s16465_s7 + $0x424] ss:$8 sps:$4 sm:$0xff]  }
 0x797   : > { %9609 = vmatprep.subr.bf16.mxu1 %v11791_v44  ;;  %v11861_v44 = vld [vmem:[%s16465_s7 + $0x420] ss:$8 sps:$4 sm:$0xff]  }
 0x79a   : > { %9610 = vmatpush1.bf16.msra.mxu1 %v11789_v25  ;;  %v11869_v25 = vld [vmem:[%s16465_s7 + $0x444] ss:$8 sps:$4 sm:$0xff]  }
 0x79b   : > { %9611 = vmatprep.subr.bf16.mxu1 %v11794_v33  ;;  %v11867_v33 = vld [vmem:[%s16465_s7 + $0x440] ss:$8 sps:$4 sm:$0xff]  }
 0x79e   : > { %9612 = vmatpush1.bf16.msra.mxu1 %v11792_v42  ;;  %v11870_v42 = vld [vmem:[%s16465_s7 + $0x450] ss:$8 sps:$4 sm:$0xff]  }
 0x79f   : > { %9613 = vmatprep.subr.bf16.mxu1 %v11797_v8  ;;  %v11875_v8 = vld [vmem:[%s16465_s7 + $0x464] ss:$8 sps:$4 sm:$0xff]  }
 0x7a2   : > { %9614 = vmatpush1.bf16.msra.mxu1 %v11795_v36  ;;  %v8502_v36 = vld [vmem:[#allocation7 + $0xdf] sm:$0xff] }
 0x7a3   : > { %9615 = vmatprep.subr.bf16.mxu1 %v11800_v28  ;;  %v11873_v28 = vld [vmem:[%s16465_s7 + $0x460] ss:$8 sps:$4 sm:$0xff]  }
 0x7a6   : > { %9616 = vmatpush1.bf16.msra.mxu1 %v11798_v57  ;;  %v11907_v57 = vmov 0  }
 0x7a7   : > { %9617 = vmatprep.subr.bf16.mxu1 %v11803_v43 }
 0x7aa   : > { %9618 = vmatpush1.bf16.msra.mxu1 %v11801_v15  ;;  %v9810_v15 = vlaneseq }
 0x7ab   : > { %9619 = vmatprep.subr.bf16.mxu1 %v11806_v24 }
 0x7ac   : > { %v16399_v24 = vshrl.u32 %v9810_v15, 7  ;;  %vm9928_vm13 = vcmp.lt.s32.totalorder %v9810_v15, 256 }
 0x7ae   : > { %9620 = vmatpush1.bf16.msra.mxu1 %v11804_v16  ;;  %v9812_v16 = vsub.s32 0, %v16399_v24 }
 0x7af   : > { %9662 = vmatprep.subr.bf16.mxu1 %v11809_v11 }
 0x7b1   : > { %9622 = vmatmul.mubr.bf16.vlgmr.msra.gmra.mrb[80].mxu1 %v8470_v22  ;;  %v11816_v22 = vld [vmem:[%s16465_s7 + $0x330] ss:$8 sps:$4 sm:$0xff]  }
 0x7b2   : > { %9631 = vmatprep.mubr.bf16.mxu1 %v8487_v3  ;;  %9663 = vmatpush1.bf16.msra.mxu1 %v11807_v52 }
 0x7b3   : > { %9664 = vmatprep.subr.bf16.mxu1 %v11812_v14 }
 0x7b6   : > { %9665 = vmatpush1.bf16.msra.mxu1 %v11810_v55 }
 0x7b7   : > { %9666 = vmatprep.subr.bf16.mxu1 %v11815_v2 }
 0x7b9   : > { %9632 = vmatmul.mubr.bf16.gmra.mrb[84].mxu1 %v8471_v46  ;;  %v11822_v46 = vld [vmem:[%s16465_s7 + $0x350] ss:$8 sps:$4 sm:$0xff]  }
 0x7ba   : > { %9641 = vmatprep.mubr.bf16.mxu1 %v8488_v54  ;;  %9667 = vmatpush1.bf16.msra.mxu1 %v11813_v59 }
 0x7bb   : > { %9668 = vmatprep.subr.bf16.mxu1 %v11818_v17 }
 0x7be   : > { %9669 = vmatpush1.bf16.msra.mxu1 %v11816_v22 }
 0x7bf   : > { %9670 = vmatprep.subr.bf16.mxu1 %v11821_v4 }
 0x7c1   : > { %9642 = vmatmul.mubr.bf16.gmra.mrb[88].mxu1 %v8472_v61  ;;  %v11833_v61 = vld [vmem:[%s16465_s7 + $0x384] ss:$8 sps:$4 sm:$0xff]  }
 0x7c2   : > { %9651 = vmatprep.mubr.bf16.mxu1 %v8489_v23  ;;  %9671 = vmatpush1.bf16.msra.mxu1 %v11819_v18 }
 0x7c3   : > { %9672 = vmatprep.subr.bf16.mxu1 %v11824_v34 }
 0x7c6   : > { %9673 = vmatpush1.bf16.msra.mxu1 %v11822_v46 }
 0x7c7   : > { %9674 = vmatprep.subr.bf16.mxu1 %v11827_v60 }
 0x7c9   : > { %9652 = vmatmul.mubr.bf16.gmra.mrb[92].mxu1 %v8473_v6  ;;  %v11839_v6 = vld [vmem:[%s16465_s7 + $0x3a4] ss:$8 sps:$4 sm:$0xff]  }
 0x7ca   : > { %9675 = vmatpush1.bf16.msra.mxu1 %v11825_v51  ;;  %9694 = vmatprep.mubr.bf16.mxu1 %v15928_v26  ;;  %v11834_v26 = vld [vmem:[%s16465_s7 + $0x390] ss:$8 sps:$4 sm:$0xff]  }
 0x7cb   : > { %9676 = vmatprep.subr.bf16.mxu1 %v11830_v45 }
 0x7ce   : > { %9677 = vmatpush1.bf16.msra.mxu1 %v11828_v5 }
 0x7cf   : > { %9678 = vmatprep.subr.bf16.mxu1 %v11833_v61 }
 0x7d2   : > { %9679 = vmatpush1.bf16.msra.mxu1 %v11831_v49 }
 0x7d3   : > { %9680 = vmatprep.subr.bf16.mxu1 %v11836_v40 }
 0x7d6   : > { %9681 = vmatpush1.bf16.msra.mxu1 %v11834_v26 }
 0x7d7   : > { %9682 = vmatprep.subr.bf16.mxu1 %v11839_v6 }
 0x7da   : > { %9683 = vmatpush1.bf16.msra.mxu1 %v11837_v9 }
 0x7db   : > { %9684 = vmatprep.subr.bf16.mxu1 %v11842_v1 }
 0x7de   : > { %9685 = vmatpush1.bf16.msra.mxu1 %v11840_v53 }
 0x7df   : > { %9686 = vmatprep.subr.bf16.mxu1 %v11845_v48 }
 0x7e2   : > { %9687 = vmatpush1.bf16.msra.mxu1 %v11843_v39 }
 0x7e3   : > { %9688 = vmatprep.subr.bf16.mxu1 %v11848_v30 }
 0x7e6   : > { %9689 = vmatpush1.bf16.msra.mxu1 %v11846_v10 }
 0x7e7   : > { %9690 = vmatprep.subr.bf16.mxu1 %v11851_v56 }
 0x7ea   : > { %9691 = vmatpush1.bf16.msra.mxu1 %v11849_v62 }
 0x7eb   : > { %9692 = vmatprep.subr.bf16.mxu1 %v11854_v12 }
 0x7ee   : > { %9693 = vmatpush1.bf16.msra.mxu1 %v11852_v7 }
 0x7ef   : > { %9735 = vmatprep.subr.bf16.mxu1 %v11857_v38 }
 0x7f1   : > { %9695 = vmatmul.mubr.bf16.vlgmr.msra.gmra.mrb[80].mxu1 %v15958_v37  ;;  %v11866_v37 = vld [vmem:[%s16465_s7 + $0x434] ss:$8 sps:$4 sm:$0xff]  }
 0x7f2   : > { %9704 = vmatprep.mubr.bf16.mxu1 %v15986_v50  ;;  %9736 = vmatpush1.bf16.msra.mxu1 %v11855_v20  ;;  %v11864_v50 = vld [vmem:[%s16465_s7 + $0x430] ss:$8 sps:$4 sm:$0xff]  }
 0x7f3   : > { %9737 = vmatprep.subr.bf16.mxu1 %v11860_v63 }
 0x7f6   : > { %9738 = vmatpush1.bf16.msra.mxu1 %v11858_v47 }
 0x7f7   : > { %9739 = vmatprep.subr.bf16.mxu1 %v11863_v32 }
 0x7f9   : > { %9705 = vmatmul.mubr.bf16.gmra.mrb[84].mxu1 %v16020_v41  ;;  %v11872_v41 = vld [vmem:[%s16465_s7 + $0x454] ss:$8 sps:$4 sm:$0xff]  }
 0x7fa   : > { %9714 = vmatprep.mubr.bf16.mxu1 %v16068_v29  ;;  %9740 = vmatpush1.bf16.msra.mxu1 %v11861_v44  ;;  %v8522_v29 = vpack.c.bf16 %v15868_v27, %v16097_v21  ;;  %v8506_v27 = vpack.c.bf16 %v8502_v36, %v16137_v13  ;;  %v11876_v21 = vld [vmem:[%s16465_s7 + $0x470] ss:$8 sps:$4 sm:$0xff]   ;;  %v8534_v13 = vld [vmem:[#allocation7 + $0xe1] sm:$0xff] }
 0x7fb   : > { %9741 = vmatprep.subr.bf16.mxu1 %v11866_v37  ;;  %v8538_v43 = vpack.c.bf16 %v8534_v13, %v16258_v35 }
 0x7fe   : > { %9742 = vmatpush1.bf16.msra.mxu1 %v11864_v50 }
 0x7ff   : > { %9743 = vmatprep.subr.bf16.mxu1 %v11869_v25 }
 0x801   : > { %9715 = vmatmul.mubr.bf16.gmra.mrb[88].mxu1 %v16083_v58  ;;  %v11878_v58 = vld [vmem:[%s16465_s7 + $0x474] ss:$8 sps:$4 sm:$0xff]  }
 0x802   : > { %9724 = vmatprep.mubr.bf16.mxu1 %v8522_v29  ;;  %9744 = vmatpush1.bf16.msra.mxu1 %v11867_v33 }
 0x803   : > { %9745 = vmatprep.subr.bf16.mxu1 %v11872_v41 }
 0x806   : > { %9746 = vmatpush1.bf16.msra.mxu1 %v11870_v42 }
 0x807   : > { %9747 = vmatprep.subr.bf16.mxu1 %v11875_v8 }
 0x809   : > { %9725 = vmatmul.mubr.bf16.gmra.mrb[92].mxu1 %v8506_v27 }
 0x80a   : > { %9748 = vmatpush1.bf16.msra.mxu1 %v11873_v28  ;;  %9767 = vmatprep.mubr.bf16.mxu1 %v11907_v57 }
 0x80b   : > { %9749 = vmatprep.subr.bf16.mxu1 %v11878_v58 }
 0x80e   : > { %9750 = vmatpush1.bf16.msra.mxu1 %v11876_v21 }
 0x811   : > { %9768 = vmatmul.mubr.bf16.vlgmr.msra.gmra.mrb[80].mxu1 %v16122_v19  ;;  %v9808_v19 = vld [vmem:[%s16466_s8] sm:$0x3] }
 0x812   : > { %9777 = vmatprep.mubr.bf16.mxu1 %v11907_v57  ;;  %v16409_v11 = vrot.slane %v9808_v19, %v9812_v16 }
 0x819   : > { %9778 = vmatmul.mubr.bf16.gmra.mrb[84].mxu1 %v16146_v0  ;;  %v9816_v0 = vsub.s32 1, %v16399_v24 }
 0x81a   : > { %9787 = vmatprep.mubr.bf16.mxu1 %v11907_v57 }
 0x81b   : > { %v16411_v52 = vrot.slane %v9808_v19, %v9816_v0 }
 0x821   : > { %9788 = vmatmul.mubr.bf16.gmra.mrb[88].mxu1 %v16165_v31  ;;  %v9836_v31 = vld [vmem:[%s16467_s9] sm:$0x3] }
 0x822   : > { %9797 = vmatprep.mubr.bf16.mxu1 %v11907_v57  ;;  %v16413_v14 = vrot.slane %v9836_v31, %v9812_v16  ;;  %v16415_v55 = vrot.slane %v9836_v31, %v9816_v0 }
 0x829   : > { %9798 = vmatmul.mubr.bf16.gmra.mrb[92].mxu1 %v8538_v43 }
 0x8e4   : > { %v9769_v3 = vpop.f32.mrb[80].mxu1 }
 0x8e5   : > { %v9820_v2 = vmul.f32 %v16409_v11, %v9769_v3  ;;  %v9771_v59 = vpop.f32.mrb[81].mxu1 }
 0x8e6   : > { %v9821_v17 = vmul.f32 %v16411_v52, %v9771_v59  ;;  %v9773_v54 = vpop.f32.mrb[82].mxu1 }
 0x8e7   : > { %v9848_v22 = vadd.f32 %v16413_v14, %v9820_v2  ;;  %v9822_v4 = vmul.f32 %v16409_v11, %v9773_v54  ;;  %v9775_v35 = vpop.f32.mrb[83].mxu1 }
 0x8e8   : > { %v9849_v18 = vadd.f32 %v16415_v55, %v9821_v17  ;;  %v9823_v34 = vmul.f32 %v16411_v52, %v9775_v35 }
 0x8e9   : > { %v9850_v23 = vadd.f32 %v16413_v14, %v9822_v4  ;;  %v9864_v60 = vmax.f32 %v9848_v22, 0.0 }
 0x8ea   : > { %v9851_v46 = vadd.f32 %v16415_v55, %v9823_v34  ;;  %v9865_v45 = vmax.f32 %v9849_v18, 0.0 }
 0x8eb   : > { %v9866_v51 = vmax.f32 %v9850_v23, 0.0 }
 0x8ec   : > { %v9867_v5 = vmax.f32 %v9851_v46, 0.0  ;;  %v9779_v61 = vpop.f32.mrb[84].mxu1 }
 0x8ed   : > { %v9880_v49 = vadd.f32 %v9866_v51, %v9864_v60  ;;  %v9824_v40 = vmul.f32 %v16409_v11, %v9779_v61  ;;  %v9781_v26 = vpop.f32.mrb[85].mxu1 }
 0x8ee   : > { %v9893_v6 = vadd.f32 %v9867_v5, %v9865_v45  ;;  %v9825_v9 = vmul.f32 %v16411_v52, %v9781_v26  ;;  %v9783_v1 = vpop.f32.mrb[86].mxu1 }
 0x8ef   : > { %v9852_v53 = vadd.f32 %v16413_v14, %v9824_v40  ;;  %v9826_v48 = vmul.f32 %v16409_v11, %v9783_v1  ;;  %v9785_v39 = vpop.f32.mrb[87].mxu1 }
 0x8f0   : > { %v9853_v30 = vadd.f32 %v16415_v55, %v9825_v9  ;;  %v9827_v10 = vmul.f32 %v16411_v52, %v9785_v39 }
 0x8f1   : > { %v9868_v56 = vmax.f32 %v9852_v53, 0.0  ;;  %v9854_v62 = vadd.f32 %v16413_v14, %v9826_v48 }
 0x8f2   : > { %v9869_v12 = vmax.f32 %v9853_v30, 0.0  ;;  %v9855_v7 = vadd.f32 %v16415_v55, %v9827_v10 }
 0x8f3   : > { %v9881_v38 = vadd.f32 %v9880_v49, %v9868_v56  ;;  %v9870_v20 = vmax.f32 %v9854_v62, 0.0 }
 0x8f4   : > { %v9894_v63 = vadd.f32 %v9893_v6, %v9869_v12  ;;  %v9871_v47 = vmax.f32 %v9855_v7, 0.0  ;;  %v9789_v32 = vpop.f32.mrb[88].mxu1 }
 0x8f5   : > { %v9882_v44 = vadd.f32 %v9881_v38, %v9870_v20  ;;  %v9828_v37 = vmul.f32 %v16409_v11, %v9789_v32  ;;  %v9791_v50 = vpop.f32.mrb[89].mxu1 }
 0x8f6   : > { %v9895_v25 = vadd.f32 %v9894_v63, %v9871_v47  ;;  %v9829_v33 = vmul.f32 %v16411_v52, %v9791_v50  ;;  %v9793_v41 = vpop.f32.mrb[90].mxu1 }
 0x8f7   : > { %v9856_v29 = vadd.f32 %v16413_v14, %v9828_v37  ;;  %v9830_v42 = vmul.f32 %v16409_v11, %v9793_v41  ;;  %v9795_v8 = vpop.f32.mrb[91].mxu1 }
 0x8f8   : > { %v9857_v36 = vadd.f32 %v16415_v55, %v9829_v33  ;;  %v9831_v28 = vmul.f32 %v16411_v52, %v9795_v8 }
 0x8f9   : > { %v9872_v27 = vmax.f32 %v9856_v29, 0.0  ;;  %v9858_v58 = vadd.f32 %v16413_v14, %v9830_v42 }
 0x8fa   : > { %v9873_v21 = vmax.f32 %v9857_v36, 0.0  ;;  %v9859_v57 = vadd.f32 %v16415_v55, %v9831_v28 }
 0x8fb   : > { %v9883_v13 = vadd.f32 %v9882_v44, %v9872_v27  ;;  %v9874_v43 = vmax.f32 %v9858_v58, 0.0 }
 0x8fc   : > { %v9896_v16 = vadd.f32 %v9895_v25, %v9873_v21  ;;  %v9875_v19 = vmax.f32 %v9859_v57, 0.0  ;;  %v9799_v0 = vpop.f32.mrb[92].mxu1 }
 0x8fd   : > { %v9884_v31 = vadd.f32 %v9883_v13, %v9874_v43  ;;  %v9832_v3 = vmul.f32 %v16409_v11, %v9799_v0  ;;  %v9801_v2 = vpop.f32.mrb[93].mxu1 }
 0x8fe   : > { %v9897_v59 = vadd.f32 %v9896_v16, %v9875_v19  ;;  %v9833_v17 = vmul.f32 %v16411_v52, %v9801_v2  ;;  %v9803_v54 = vpop.f32.mrb[94].mxu1 }
 0x8ff   : > { %v9860_v22 = vadd.f32 %v16413_v14, %v9832_v3  ;;  %v9834_v4 = vmul.f32 %v16409_v11, %v9803_v54  ;;  %v9805_v35 = vpop.f32.mrb[95].mxu1 }
 0x900   : > { %v9861_v18 = vadd.f32 %v16415_v55, %v9833_v17  ;;  %v9835_v34 = vmul.f32 %v16411_v52, %v9805_v35  ;;  %v11908_v52 = vmov 1966171168  }
 0x901   : > { %v9876_v23 = vmax.f32 %v9860_v22, 0.0  ;;  %v9862_v46 = vadd.f32 %v16413_v14, %v9834_v4  ;;  %v9912_v39 = vunpack.c.l.s4 %v11908_v52 }
 0x902   : > { %v9877_v60 = vmax.f32 %v9861_v18, 0.0  ;;  %v9863_v51 = vadd.f32 %v16415_v55, %v9835_v34 }
 0x903   : > { %v9885_v45 = vadd.f32 %v9884_v31, %v9876_v23  ;;  %v9878_v5 = vmax.f32 %v9862_v46, 0.0  ;;  %v9913_v55 = vunpack.c.0.s8 %v9912_v39 }
 0x904   : > { %v9898_v61 = vadd.f32 %v9897_v59, %v9877_v60  ;;  %v9879_v49 = vmax.f32 %v9863_v51, 0.0 }
 0x905   : > { %v9886_v40 = vadd.f32 %v9885_v45, %v9878_v5  ;;  %v9916_v20 = vsub.s32 %v9913_v55, %v16399_v24 }
 0x906   : > { %v9899_v26 = vadd.f32 %v9898_v61, %v9879_v49 }
 0x907   : > { %v9887_v6 = vrot.slane %v9886_v40, 4 }
 0x908   : > { %v9900_v9 = vrot.slane %v9899_v26, 4 }
 0x909   : > { %v9888_v11 = vadd.f32 %v9887_v6, %v9886_v40 }
 0x90a   : > { %v9901_v1 = vadd.f32 %v9900_v9, %v9899_v26 }
 0x90b   : > { %v9889_v53 = vrot.slane %v9888_v11, 2 }
 0x90c   : > { %v9902_v48 = vrot.slane %v9901_v1, 2 }
 0x90d   : > { %v9890_v30 = vadd.f32 %v9889_v53, %v9888_v11 }
 0x90e   : > { %v9903_v14 = vadd.f32 %v9902_v48, %v9901_v1 }
 0x90f   : > { %v9891_v10 = vrot.slane %v9890_v30, 1 }
 0x910   : > { %v9904_v56 = vrot.slane %v9903_v14, 1 }
 0x911   : > { %v9892_v62 = vadd.f32 %v9891_v10, %v9890_v30 }
 0x912   : > { %v9905_v12 = vadd.f32 %v9904_v56, %v9903_v14 }
 0x913   : > { %v9906_v7 = vmul.f32 0.015625, %v9892_v62 }
 0x914   : > { %v9907_v38 = vmul.f32 0.015625, %v9905_v12 }
 0x916   : > { %v9910_v63 = vcombine.low %v9906_v7, %v9907_v38 }
 0x918   : > { %v9917_v47 = vrot.slane %v9910_v63, %v9916_v20 }
 0x91a   : > { %v9924_v32 = vrot.slane %v9917_v47, %v9916_v20 }
 0x91c   : > { %9930 = vst.msk [vmem:[%s357_s19] sm:$0x3] %vm9928_vm13, %v9924_v32 }
 0x91d PF: > { %s20_s13 = sadd.s32 1, %s11896_s13  }
 0x91e   : > { %p17_p4 = scmp.ge.s32.totalorder %s20_s13, 4  }
 0x920   :  { %19 = sbr.rel (!%p17_p4) target bundleno = 1 (0x1), region = 176 }

</bundles_post_ra>
